<compile_context>
chip_gen: v5e
topology: v5e:2x2
jax: 0.10.0
libtpu: 0.0.40
codegen_flags: <defaults>
</compile_context>

<pallas_src>
import jax
import jax.numpy as jnp
from jax import lax
from jax.experimental import pallas as pl
from jax.experimental.pallas import tpu as pltpu


# ---------------------------------------------------------------------------
# Problem constants
# ---------------------------------------------------------------------------
C_IN, H, W = 6, 13, 13          # av observation (NCHW in torch)
K9 = 9 * C_IN                   # 54  im2col patch width
C_CONV = 32                     # conv channels per branch
CONV_OUT_PAD = 128              # lane-dense conv output (actor|critic|zeros)
S_REAL = H * W                  # 169 spatial positions
S_PAD = 176                     # padded to a multiple of 8 sublanes
HIDDEN = 256
N_SCALAR = 41
N_ACTIONS = 3
OUT_PAD = 128                   # lane-dense head output slab
FEAT_REAL = S_REAL * C_CONV     # 5408 real conv features per branch
FEAT_PAD = S_PAD * C_CONV       # 5632 (padded rows in fc1 weight are zero)


def _full_block(shape):
    zeros = (0,) * len(shape)
    return pl.BlockSpec(shape, lambda i: zeros)


# ---------------------------------------------------------------------------
# Kernel 1: merged actor+critic conv as a single im2col matmul + ReLU
# ---------------------------------------------------------------------------
def _conv_kernel(p_ref, w_ref, b_ref, o_ref):
    x = p_ref[...].astype(jnp.bfloat16)
    y = jnp.dot(x, w_ref[...], preferred_element_type=jnp.float32)
    y = y + b_ref[...]
    o_ref[...] = jnp.maximum(y, 0.0)


def conv_forward(patches, conv_w, conv_b):
    M, K = patches.shape
    _, N = conv_w.shape
    return pl.pallas_call(
        _conv_kernel,
        out_shape=jax.ShapeDtypeStruct((M, N), jnp.float32),
        grid=(1,),
        in_specs=[_full_block((M, K)),
                  _full_block((K, N)),
                  _full_block((1, N))],
        out_specs=_full_block((M, N)),
        compiler_params=pltpu.CompilerParams(
            dimension_semantics=("arbitrary",)),
    )(patches, conv_w, conv_b)


# ---------------------------------------------------------------------------
# Kernel 2: fused fc1 (both branches) + both heads + masked softmax,
#           lane-dense (B, 128) output slab.
# ---------------------------------------------------------------------------
def _fc_kernel(feat_a_ref, feat_c_ref, scal_ref,
               w1ac_ref, w1as_ref, b1a_ref,
               w1cc_ref, w1cs_ref, b1c_ref,
               w2a_ref, w2c_ref, b2_ref,
               o_ref):
    fa = feat_a_ref[...].astype(jnp.bfloat16)
    fc = feat_c_ref[...].astype(jnp.bfloat16)
    sc = scal_ref[...].astype(jnp.bfloat16)

    # fc1 actor: conv-feature part + scalar part (no concat materialized)
    h_a = jnp.dot(fa, w1ac_ref[...], preferred_element_type=jnp.float32)
    h_a = h_a + jnp.dot(sc, w1as_ref[...], preferred_element_type=jnp.float32)
    h_a = jnp.maximum(h_a + b1a_ref[...], 0.0)

    # fc1 critic
    h_c = jnp.dot(fc, w1cc_ref[...], preferred_element_type=jnp.float32)
    h_c = h_c + jnp.dot(sc, w1cs_ref[...], preferred_element_type=jnp.float32)
    h_c = jnp.maximum(h_c + b1c_ref[...], 0.0)

    # Both heads into one padded 128-wide slab:
    #   cols 0..2 -> actor logits, col 3 -> critic value, cols 4..127 -> 0
    raw = jnp.dot(h_a.astype(jnp.bfloat16), w2a_ref[...],
                  preferred_element_type=jnp.float32)
    raw = raw + jnp.dot(h_c.astype(jnp.bfloat16), w2c_ref[...],
                        preferred_element_type=jnp.float32)
    raw = raw + b2_ref[...]

    col = lax.broadcasted_iota(jnp.int32, raw.shape, 1)
    is_logit = col < N_ACTIONS
    masked = jnp.where(is_logit, raw, -jnp.inf)
    m = jnp.max(masked, axis=-1, keepdims=True)
    e = jnp.exp(masked - m)                      # masked lanes -> exp(-inf)=0
    s = jnp.sum(e, axis=-1, keepdims=True)
    probs = e / s                                # exact div: keeps row-sum ~1e-7
    o_ref[...] = jnp.where(is_logit, probs, raw).astype(o_ref.dtype)


def fc_forward(feat_a, feat_c, scal, p):
    B = feat_a.shape[0]
    args = (feat_a, feat_c, scal,
            p["w1a_conv"], p["w1a_scal"], p["b1a"],
            p["w1c_conv"], p["w1c_scal"], p["b1c"],
            p["w2a"], p["w2c"], p["b2"])
    return pl.pallas_call(
        _fc_kernel,
        out_shape=jax.ShapeDtypeStruct((B, OUT_PAD), jnp.float32),
        grid=(1,),
        in_specs=[_full_block(a.shape) for a in args],
        out_specs=_full_block((B, OUT_PAD)),
        compiler_params=pltpu.CompilerParams(
            dimension_semantics=("arbitrary",),
            vmem_limit_bytes=32 * 1024 * 1024),
    )(*args)


# ---------------------------------------------------------------------------
# Glue: im2col for the 3x3 SAME conv (pure reshuffling, runs in XLA)
# ---------------------------------------------------------------------------
def im2col_3x3_same_padded(x_nhwc):
    B, HH, WW, C = x_nhwc.shape
    xp = jnp.pad(x_nhwc, ((0, 0), (1, 1), (1, 1), (0, 0)))
    cols = [xp[:, di:di + HH, dj:dj + WW, :]
            for di in range(3) for dj in range(3)]
    patches = jnp.stack(cols, axis=3)                  # (B, H, W, 9, C)
    patches = patches.reshape(B, HH * WW, 9 * C)       # (B, 169, 54)
    patches = jnp.pad(patches, ((0, 0), (0, S_PAD - S_REAL), (0, 0)))
    return patches.reshape(B * S_PAD, 9 * C)           # (B*176, 54)


# ---------------------------------------------------------------------------
# Parameters (deterministic, synthetic; bf16 weights / f32 biases)
# ---------------------------------------------------------------------------
def _uniform(key, shape, fan_in):
    lim = 1.0 / float(fan_in) ** 0.5
    return jax.random.uniform(key, shape, jnp.float32, -lim, lim)


def init_params(seed=10):
    ks = jax.random.split(jax.random.PRNGKey(seed), 14)
    conv_fan = K9
    fc1_fan = FEAT_REAL + N_SCALAR          # 5449
    fc2_fan = HIDDEN

    # Merged conv weight/bias: actor cols 0..31, critic cols 32..63, pad->128.
    conv_w = jnp.zeros((K9, CONV_OUT_PAD), jnp.float32)
    conv_w = conv_w.at[:, :C_CONV].set(_uniform(ks[0], (K9, C_CONV), conv_fan))
    conv_w = conv_w.at[:, C_CONV:2 * C_CONV].set(
        _uniform(ks[1], (K9, C_CONV), conv_fan))
    conv_b = jnp.zeros((1, CONV_OUT_PAD), jnp.float32)
    conv_b = conv_b.at[:, :C_CONV].set(_uniform(ks[2], (1, C_CONV), conv_fan))
    conv_b = conv_b.at[:, C_CONV:2 * C_CONV].set(
        _uniform(ks[3], (1, C_CONV), conv_fan))

    def fc1_conv(key):
        w = _uniform(key, (FEAT_REAL, HIDDEN), fc1_fan)
        # zero rows for the 7 padded spatial positions (s = 169..175)
        return jnp.pad(w, ((0, FEAT_PAD - FEAT_REAL), (0, 0))).astype(jnp.bfloat16)

    # Actor head in cols 0..2, critic head in col 3 of the padded slab.
    w2a = jnp.zeros((HIDDEN, OUT_PAD), jnp.float32)
    w2a = w2a.at[:, :N_ACTIONS].set(_uniform(ks[10], (HIDDEN, N_ACTIONS), fc2_fan))
    w2c = jnp.zeros((HIDDEN, OUT_PAD), jnp.float32)
    w2c = w2c.at[:, N_ACTIONS:N_ACTIONS + 1].set(
        _uniform(ks[11], (HIDDEN, 1), fc2_fan))
    b2 = jnp.zeros((1, OUT_PAD), jnp.float32)
    b2 = b2.at[:, :N_ACTIONS].set(_uniform(ks[12], (1, N_ACTIONS), fc2_fan))
    b2 = b2.at[:, N_ACTIONS:N_ACTIONS + 1].set(_uniform(ks[13], (1, 1), fc2_fan))

    return {
        "conv_w": conv_w.astype(jnp.bfloat16),
        "conv_b": conv_b,                                   # f32
        "w1a_conv": fc1_conv(ks[4]),
        "w1a_scal": _uniform(ks[5], (N_SCALAR, HIDDEN), fc1_fan).astype(jnp.bfloat16),
        "b1a": _uniform(ks[6], (1, HIDDEN), fc1_fan),       # f32
        "w1c_conv": fc1_conv(ks[7]),
        "w1c_scal": _uniform(ks[8], (N_SCALAR, HIDDEN), fc1_fan).astype(jnp.bfloat16),
        "b1c": _uniform(ks[9], (1, HIDDEN), fc1_fan),       # f32
        "w2a": w2a.astype(jnp.bfloat16),
        "w2c": w2c.astype(jnp.bfloat16),
        "b2": b2,                                           # f32
    }


# ---------------------------------------------------------------------------
# ActorCritic.forward
# ---------------------------------------------------------------------------
def actor_critic_forward(av, scalar_obs, params):
    """av: (B, 6, 13, 13) float32 (NCHW); scalar_obs: (B, 1, 41) float32."""
    B = av.shape[0]
    x_nhwc = jnp.transpose(av, (0, 2, 3, 1))                 # NCHW -> NHWC
    patches = im2col_3x3_same_padded(x_nhwc)                 # (B*176, 54)

    conv = conv_forward(patches, params["conv_w"], params["conv_b"])
    conv3 = conv.reshape(B, S_PAD, CONV_OUT_PAD)
    feat_a = conv3[:, :, :C_CONV].reshape(B, FEAT_PAD)       # (B, 5632)
    feat_c = conv3[:, :, C_CONV:2 * C_CONV].reshape(B, FEAT_PAD)

    scal = scalar_obs.reshape(B, N_SCALAR).astype(jnp.float32)

    out = fc_forward(feat_a, feat_c, scal, params)           # (B, 128)
    policy = out[:, :N_ACTIONS]                              # (B, 3)
    value = out[:, N_ACTIONS:N_ACTIONS + 1]                  # (B, 1)
    return policy, value


if __name__ == "__main__":
    B = 2
    key = jax.random.PRNGKey(0)
    k_av, k_sc = jax.random.split(key)
    av = jax.random.normal(k_av, (B, C_IN, H, W), jnp.float32)
    scalar_obs = jax.random.normal(k_sc, (B, 1, N_SCALAR), jnp.float32)

    params = init_params(seed=10)

    fwd = jax.jit(actor_critic_forward)
    policy, value = fwd(av, scalar_obs, params)
    jax.block_until_ready((policy, value))

    assert policy.shape == (B, N_ACTIONS)
    assert value.shape == (B, 1)
    assert bool(jnp.all(policy >= 0.0))
    assert bool(jnp.all(jnp.abs(jnp.sum(policy, axis=-1) - 1.0) < 1e-4))

    print("KERNEL_OK")
</pallas_src>

<mosaic_0001>
module attributes {stable_mosaic.version = 11 : i64} {
  func.func @_conv_kernel(%arg0: i32, %arg1: memref<352x54xf32, #tpu.memory_space<vmem>>, %arg2: memref<54x128xbf16, #tpu.memory_space<vmem>>, %arg3: memref<1x128xf32, #tpu.memory_space<vmem>>, %arg4: memref<352x128xf32, #tpu.memory_space<vmem>>) attributes {dimension_semantics = [#tpu.dimension_semantics<arbitrary>], iteration_bounds = array<i64: 1>, scalar_prefetch = 0 : i64, scratch_operands = 0 : i64, tpu.core_type = #tpu.core_type<tc>, window_params = [{pipeline_mode = #tpu.pipeline_mode<synchronous>, transform_indices = @transform_0, window_bounds = array<i64: 352, 54>}, {pipeline_mode = #tpu.pipeline_mode<synchronous>, transform_indices = @transform_1, window_bounds = array<i64: 54, 128>}, {pipeline_mode = #tpu.pipeline_mode<synchronous>, transform_indices = @transform_2, window_bounds = array<i64: 1, 128>}, {pipeline_mode = #tpu.pipeline_mode<synchronous>, transform_indices = @transform_3, window_bounds = array<i64: 352, 128>}]} {
    %c0 = arith.constant 0 : index
    %c0_0 = arith.constant 0 : index
    %0 = vector.load %arg1[%c0, %c0_0] : memref<352x54xf32, #tpu.memory_space<vmem>>, vector<352x54xf32>
    %1 = arith.truncf %0 : vector<352x54xf32> to vector<352x54xbf16>
    %c0_1 = arith.constant 0 : index
    %c0_2 = arith.constant 0 : index
    %2 = vector.load %arg2[%c0_1, %c0_2] : memref<54x128xbf16, #tpu.memory_space<vmem>>, vector<54x128xbf16>
    %cst = arith.constant dense<0.000000e+00> : vector<352x128xf32>
    %3 = tpu.matmul %1, %2, %cst {dimension_numbers = #tpu.dot_dimension_numbers<[1], [0], [0], [1], [0, 0, 1, 1], [], []>} : vector<352x54xbf16>, vector<54x128xbf16>, vector<352x128xf32> -> vector<352x128xf32>
    %c0_3 = arith.constant 0 : index
    %c0_4 = arith.constant 0 : index
    %4 = vector.load %arg3[%c0_3, %c0_4] : memref<1x128xf32, #tpu.memory_space<vmem>>, vector<1x128xf32>
    %5 = vector.broadcast %4 : vector<1x128xf32> to vector<352x128xf32>
    %6 = arith.addf %3, %5 : vector<352x128xf32>
    %cst_5 = arith.constant 0.000000e+00 : f32
    %7 = vector.broadcast %cst_5 : f32 to vector<352x128xf32>
    %8 = arith.maximumf %6, %7 : vector<352x128xf32>
    %c0_6 = arith.constant 0 : index
    %c0_7 = arith.constant 0 : index
    %9 = vector.load %arg4[%c0_6, %c0_7] : memref<352x128xf32, #tpu.memory_space<vmem>>, vector<352x128xf32>
    tpu.vector_store %arg4[%c0_6, %c0_7], %8 {strides = array<i32>} : memref<352x128xf32, #tpu.memory_space<vmem>>, vector<352x128xf32>,
    return
  }
  func.func @transform_0(%arg0: i32) -> (i32, i32) {
    %c0_i32 = arith.constant 0 : i32
    %c0_i32_0 = arith.constant 0 : i32
    %c0_i32_1 = arith.constant 0 : i32
    return %c0_i32, %c0_i32_0 : i32, i32
  }
  func.func @transform_1(%arg0: i32) -> (i32, i32) {
    %c0_i32 = arith.constant 0 : i32
    %c0_i32_0 = arith.constant 0 : i32
    %c0_i32_1 = arith.constant 0 : i32
    return %c0_i32, %c0_i32_0 : i32, i32
  }
  func.func @transform_2(%arg0: i32) -> (i32, i32) {
    %c0_i32 = arith.constant 0 : i32
    %c0_i32_0 = arith.constant 0 : i32
    %c0_i32_1 = arith.constant 0 : i32
    return %c0_i32, %c0_i32_0 : i32, i32
  }
  func.func @transform_3(%arg0: i32) -> (i32, i32) {
    %c0_i32 = arith.constant 0 : i32
    %c0_i32_0 = arith.constant 0 : i32
    %c0_i32_1 = arith.constant 0 : i32
    return %c0_i32, %c0_i32_0 : i32, i32
  }
}

module attributes {stable_mosaic.version = 11 : i64} {
  func.func @_fc_kernel(%arg0: i32, %arg1: memref<2x5632xf32, #tpu.memory_space<vmem>>, %arg2: memref<2x5632xf32, #tpu.memory_space<vmem>>, %arg3: memref<2x41xf32, #tpu.memory_space<vmem>>, %arg4: memref<5632x256xbf16, #tpu.memory_space<vmem>>, %arg5: memref<41x256xbf16, #tpu.memory_space<vmem>>, %arg6: memref<1x256xf32, #tpu.memory_space<vmem>>, %arg7: memref<5632x256xbf16, #tpu.memory_space<vmem>>, %arg8: memref<41x256xbf16, #tpu.memory_space<vmem>>, %arg9: memref<1x256xf32, #tpu.memory_space<vmem>>, %arg10: memref<256x128xbf16, #tpu.memory_space<vmem>>, %arg11: memref<256x128xbf16, #tpu.memory_space<vmem>>, %arg12: memref<1x128xf32, #tpu.memory_space<vmem>>, %arg13: memref<2x128xf32, #tpu.memory_space<vmem>>) attributes {dimension_semantics = [#tpu.dimension_semantics<arbitrary>], iteration_bounds = array<i64: 1>, scalar_prefetch = 0 : i64, scratch_operands = 0 : i64, tpu.core_type = #tpu.core_type<tc>, window_params = [{pipeline_mode = #tpu.pipeline_mode<synchronous>, transform_indices = @transform_0, window_bounds = array<i64: 2, 5632>}, {pipeline_mode = #tpu.pipeline_mode<synchronous>, transform_indices = @transform_1, window_bounds = array<i64: 2, 5632>}, {pipeline_mode = #tpu.pipeline_mode<synchronous>, transform_indices = @transform_2, window_bounds = array<i64: 2, 41>}, {pipeline_mode = #tpu.pipeline_mode<synchronous>, transform_indices = @transform_3, window_bounds = array<i64: 5632, 256>}, {pipeline_mode = #tpu.pipeline_mode<synchronous>, transform_indices = @transform_4, window_bounds = array<i64: 41, 256>}, {pipeline_mode = #tpu.pipeline_mode<synchronous>, transform_indices = @transform_5, window_bounds = array<i64: 1, 256>}, {pipeline_mode = #tpu.pipeline_mode<synchronous>, transform_indices = @transform_6, window_bounds = array<i64: 5632, 256>}, {pipeline_mode = #tpu.pipeline_mode<synchronous>, transform_indices = @transform_7, window_bounds = array<i64: 41, 256>}, {pipeline_mode = #tpu.pipeline_mode<synchronous>, transform_indices = @transform_8, window_bounds = array<i64: 1, 256>}, {pipeline_mode = #tpu.pipeline_mode<synchronous>, transform_indices = @transform_9, window_bounds = array<i64: 256, 128>}, {pipeline_mode = #tpu.pipeline_mode<synchronous>, transform_indices = @transform_10, window_bounds = array<i64: 256, 128>}, {pipeline_mode = #tpu.pipeline_mode<synchronous>, transform_indices = @transform_11, window_bounds = array<i64: 1, 128>}, {pipeline_mode = #tpu.pipeline_mode<synchronous>, transform_indices = @transform_12, window_bounds = array<i64: 2, 128>}]} {
    %c0 = arith.constant 0 : index
    %c0_0 = arith.constant 0 : index
    %0 = vector.load %arg1[%c0, %c0_0] : memref<2x5632xf32, #tpu.memory_space<vmem>>, vector<2x5632xf32>
    %1 = arith.truncf %0 : vector<2x5632xf32> to vector<2x5632xbf16>
    %c0_1 = arith.constant 0 : index
    %c0_2 = arith.constant 0 : index
    %2 = vector.load %arg2[%c0_1, %c0_2] : memref<2x5632xf32, #tpu.memory_space<vmem>>, vector<2x5632xf32>
    %3 = arith.truncf %2 : vector<2x5632xf32> to vector<2x5632xbf16>
    %c0_3 = arith.constant 0 : index
    %c0_4 = arith.constant 0 : index
    %4 = vector.load %arg3[%c0_3, %c0_4] : memref<2x41xf32, #tpu.memory_space<vmem>>, vector<2x41xf32>
    %5 = arith.truncf %4 : vector<2x41xf32> to vector<2x41xbf16>
    %c0_5 = arith.constant 0 : index
    %c0_6 = arith.constant 0 : index
    %6 = vector.load %arg4[%c0_5, %c0_6] : memref<5632x256xbf16, #tpu.memory_space<vmem>>, vector<5632x256xbf16>
    %cst = arith.constant dense<0.000000e+00> : vector<2x256xf32>
    %7 = tpu.matmul %1, %6, %cst {dimension_numbers = #tpu.dot_dimension_numbers<[1], [0], [0], [1], [0, 0, 1, 1], [], []>} : vector<2x5632xbf16>, vector<5632x256xbf16>, vector<2x256xf32> -> vector<2x256xf32>
    %c0_7 = arith.constant 0 : index
    %c0_8 = arith.constant 0 : index
    %8 = vector.load %arg5[%c0_7, %c0_8] : memref<41x256xbf16, #tpu.memory_space<vmem>>, vector<41x256xbf16>
    %cst_9 = arith.constant dense<0.000000e+00> : vector<2x256xf32>
    %9 = tpu.matmul %5, %8, %cst_9 {dimension_numbers = #tpu.dot_dimension_numbers<[1], [0], [0], [1], [0, 0, 1, 1], [], []>} : vector<2x41xbf16>, vector<41x256xbf16>, vector<2x256xf32> -> vector<2x256xf32>
    %10 = arith.addf %7, %9 : vector<2x256xf32>
    %c0_10 = arith.constant 0 : index
    %c0_11 = arith.constant 0 : index
    %11 = vector.load %arg6[%c0_10, %c0_11] : memref<1x256xf32, #tpu.memory_space<vmem>>, vector<1x256xf32>
    %12 = vector.broadcast %11 : vector<1x256xf32> to vector<2x256xf32>
    %13 = arith.addf %10, %12 : vector<2x256xf32>
    %cst_12 = arith.constant 0.000000e+00 : f32
    %14 = vector.broadcast %cst_12 : f32 to vector<2x256xf32>
    %15 = arith.maximumf %13, %14 : vector<2x256xf32>
    %c0_13 = arith.constant 0 : index
    %c0_14 = arith.constant 0 : index
    %16 = vector.load %arg7[%c0_13, %c0_14] : memref<5632x256xbf16, #tpu.memory_space<vmem>>, vector<5632x256xbf16>
    %cst_15 = arith.constant dense<0.000000e+00> : vector<2x256xf32>
    %17 = tpu.matmul %3, %16, %cst_15 {dimension_numbers = #tpu.dot_dimension_numbers<[1], [0], [0], [1], [0, 0, 1, 1], [], []>} : vector<2x5632xbf16>, vector<5632x256xbf16>, vector<2x256xf32> -> vector<2x256xf32>
    %c0_16 = arith.constant 0 : index
    %c0_17 = arith.constant 0 : index
    %18 = vector.load %arg8[%c0_16, %c0_17] : memref<41x256xbf16, #tpu.memory_space<vmem>>, vector<41x256xbf16>
    %cst_18 = arith.constant dense<0.000000e+00> : vector<2x256xf32>
    %19 = tpu.matmul %5, %18, %cst_18 {dimension_numbers = #tpu.dot_dimension_numbers<[1], [0], [0], [1], [0, 0, 1, 1], [], []>} : vector<2x41xbf16>, vector<41x256xbf16>, vector<2x256xf32> -> vector<2x256xf32>
    %20 = arith.addf %17, %19 : vector<2x256xf32>
    %c0_19 = arith.constant 0 : index
    %c0_20 = arith.constant 0 : index
    %21 = vector.load %arg9[%c0_19, %c0_20] : memref<1x256xf32, #tpu.memory_space<vmem>>, vector<1x256xf32>
    %22 = vector.broadcast %21 : vector<1x256xf32> to vector<2x256xf32>
    %23 = arith.addf %20, %22 : vector<2x256xf32>
    %cst_21 = arith.constant 0.000000e+00 : f32
    %24 = vector.broadcast %cst_21 : f32 to vector<2x256xf32>
    %25 = arith.maximumf %23, %24 : vector<2x256xf32>
    %26 = arith.truncf %15 : vector<2x256xf32> to vector<2x256xbf16>
    %c0_22 = arith.constant 0 : index
    %c0_23 = arith.constant 0 : index
    %27 = vector.load %arg10[%c0_22, %c0_23] : memref<256x128xbf16, #tpu.memory_space<vmem>>, vector<256x128xbf16>
    %cst_24 = arith.constant dense<0.000000e+00> : vector<2x128xf32>
    %28 = tpu.matmul %26, %27, %cst_24 {dimension_numbers = #tpu.dot_dimension_numbers<[1], [0], [0], [1], [0, 0, 1, 1], [], []>} : vector<2x256xbf16>, vector<256x128xbf16>, vector<2x128xf32> -> vector<2x128xf32>
    %29 = arith.truncf %25 : vector<2x256xf32> to vector<2x256xbf16>
    %c0_25 = arith.constant 0 : index
    %c0_26 = arith.constant 0 : index
    %30 = vector.load %arg11[%c0_25, %c0_26] : memref<256x128xbf16, #tpu.memory_space<vmem>>, vector<256x128xbf16>
    %cst_27 = arith.constant dense<0.000000e+00> : vector<2x128xf32>
    %31 = tpu.matmul %29, %30, %cst_27 {dimension_numbers = #tpu.dot_dimension_numbers<[1], [0], [0], [1], [0, 0, 1, 1], [], []>} : vector<2x256xbf16>, vector<256x128xbf16>, vector<2x128xf32> -> vector<2x128xf32>
    %32 = arith.addf %28, %31 : vector<2x128xf32>
    %c0_28 = arith.constant 0 : index
    %c0_29 = arith.constant 0 : index
    %33 = vector.load %arg12[%c0_28, %c0_29] : memref<1x128xf32, #tpu.memory_space<vmem>>, vector<1x128xf32>
    %34 = vector.broadcast %33 : vector<1x128xf32> to vector<2x128xf32>
    %35 = arith.addf %32, %34 : vector<2x128xf32>
    %36 = tpu.iota {dimensions = array<i32: 1>} : vector<2x128xi32>
    %c3_i32 = arith.constant 3 : i32
    %37 = vector.broadcast %c3_i32 : i32 to vector<2x128xi32>
    %38 = arith.cmpi slt, %36, %37 : vector<2x128xi32>
    %cst_30 = arith.constant 0xFF800000 : f32
    %39 = vector.broadcast %cst_30 : f32 to vector<2x128xf32>
    %40 = arith.select %38, %35, %39 : vector<2x128xi1>, vector<2x128xf32>
    %cst_31 = arith.constant dense<0xFF800000> : vector<2xf32>
    %41 = vector.multi_reduction <maximumf>, %40, %cst_31 [1] : vector<2x128xf32> to vector<2xf32>
    %42 = vector.shape_cast %41 : vector<2xf32> to vector<2x1xf32>
    %43 = vector.broadcast %42 : vector<2x1xf32> to vector<2x128xf32>
    %44 = arith.subf %40, %43 : vector<2x128xf32>
    %45 = math.exp %44 : vector<2x128xf32>
    %cst_32 = arith.constant dense<0.000000e+00> : vector<2xf32>
    %46 = vector.multi_reduction <add>, %45, %cst_32 [1] : vector<2x128xf32> to vector<2xf32>
    %47 = vector.shape_cast %46 : vector<2xf32> to vector<2x1xf32>
    %48 = vector.broadcast %47 : vector<2x1xf32> to vector<2x128xf32>
    %49 = arith.divf %45, %48 : vector<2x128xf32>
    %50 = arith.select %38, %49, %35 : vector<2x128xi1>, vector<2x128xf32>
    %c0_33 = arith.constant 0 : index
    %c0_34 = arith.constant 0 : index
    %51 = vector.load %arg13[%c0_33, %c0_34] : memref<2x128xf32, #tpu.memory_space<vmem>>, vector<2x128xf32>
    tpu.vector_store %arg13[%c0_33, %c0_34], %50 {strides = array<i32>} : memref<2x128xf32, #tpu.memory_space<vmem>>, vector<2x128xf32>,
    return
  }
  func.func @transform_0(%arg0: i32) -> (i32, i32) {
    %c0_i32 = arith.constant 0 : i32
    %c0_i32_0 = arith.constant 0 : i32
    %c0_i32_1 = arith.constant 0 : i32
    return %c0_i32, %c0_i32_0 : i32, i32
  }
  func.func @transform_1(%arg0: i32) -> (i32, i32) {
    %c0_i32 = arith.constant 0 : i32
    %c0_i32_0 = arith.constant 0 : i32
    %c0_i32_1 = arith.constant 0 : i32
    return %c0_i32, %c0_i32_0 : i32, i32
  }
  func.func @transform_2(%arg0: i32) -> (i32, i32) {
    %c0_i32 = arith.constant 0 : i32
    %c0_i32_0 = arith.constant 0 : i32
    %c0_i32_1 = arith.constant 0 : i32
    return %c0_i32, %c0_i32_0 : i32, i32
  }
  func.func @transform_3(%arg0: i32) -> (i32, i32) {
    %c0_i32 = arith.constant 0 : i32
    %c0_i32_0 = arith.constant 0 : i32
    %c0_i32_1 = arith.constant 0 : i32
    return %c0_i32, %c0_i32_0 : i32, i32
  }
  func.func @transform_4(%arg0: i32) -> (i32, i32) {
    %c0_i32 = arith.constant 0 : i32
    %c0_i32_0 = arith.constant 0 : i32
    %c0_i32_1 = arith.constant 0 : i32
    return %c0_i32, %c0_i32_0 : i32, i32
  }
  func.func @transform_5(%arg0: i32) -> (i32, i32) {
    %c0_i32 = arith.constant 0 : i32
    %c0_i32_0 = arith.constant 0 : i32
    %c0_i32_1 = arith.constant 0 : i32
    return %c0_i32, %c0_i32_0 : i32, i32
  }
  func.func @transform_6(%arg0: i32) -> (i32, i32) {
    %c0_i32 = arith.constant 0 : i32
    %c0_i32_0 = arith.constant 0 : i32
    %c0_i32_1 = arith.constant 0 : i32
    return %c0_i32, %c0_i32_0 : i32, i32
  }
  func.func @transform_7(%arg0: i32) -> (i32, i32) {
    %c0_i32 = arith.constant 0 : i32
    %c0_i32_0 = arith.constant 0 : i32
    %c0_i32_1 = arith.constant 0 : i32
    return %c0_i32, %c0_i32_0 : i32, i32
  }
  func.func @transform_8(%arg0: i32) -> (i32, i32) {
    %c0_i32 = arith.constant 0 : i32
    %c0_i32_0 = arith.constant 0 : i32
    %c0_i32_1 = arith.constant 0 : i32
    return %c0_i32, %c0_i32_0 : i32, i32
  }
  func.func @transform_9(%arg0: i32) -> (i32, i32) {
    %c0_i32 = arith.constant 0 : i32
    %c0_i32_0 = arith.constant 0 : i32
    %c0_i32_1 = arith.constant 0 : i32
    return %c0_i32, %c0_i32_0 : i32, i32
  }
  func.func @transform_10(%arg0: i32) -> (i32, i32) {
    %c0_i32 = arith.constant 0 : i32
    %c0_i32_0 = arith.constant 0 : i32
    %c0_i32_1 = arith.constant 0 : i32
    return %c0_i32, %c0_i32_0 : i32, i32
  }
  func.func @transform_11(%arg0: i32) -> (i32, i32) {
    %c0_i32 = arith.constant 0 : i32
    %c0_i32_0 = arith.constant 0 : i32
    %c0_i32_1 = arith.constant 0 : i32
    return %c0_i32, %c0_i32_0 : i32, i32
  }
  func.func @transform_12(%arg0: i32) -> (i32, i32) {
    %c0_i32 = arith.constant 0 : i32
    %c0_i32_0 = arith.constant 0 : i32
    %c0_i32_1 = arith.constant 0 : i32
    return %c0_i32, %c0_i32_0 : i32, i32
  }
}

</mosaic_0001>

<bundles_post_ra>
// kernel: actor_critic_forward.2
= control target key start
LH: loop header
LB: loop body
LE: loop exit
PB: predicated region body
PF: predicated region fallthrough
CT: control target
= control target key end

     0   :  { %8 = vsyncpa [#allocation3], 0  ;;  %s487_s15 = smov [#allocation2]   ;;  %s855_s0 = inlined_call_operand.vmem [shape: f32[352,54], index: 0, kind: input, shape index: {}]   ;;  %s856_s1 = inlined_call_operand.vmem [shape: bf16[54,128], index: 1, kind: input, shape index: {}]   ;;  %s857_s2 = inlined_call_operand.hbm [shape: f32[1,128], index: 2, kind: input, shape index: {}]   ;;  %s858_s3 = inlined_call_operand.vmem [shape: f32[352,128], index: 3, kind: output, shape index: {}]  }
   0x1   :  { %s18_s14 = sshll.u32 %s857_s2, 4  ;;  %s20_s16 = sshll.u32 %s487_s15, 4  ;;  %s19_s14 = int_to_ptr.hbm [resolvable:$true] %s18_s14  ;;  %s21_s16 = int_to_ptr.vmem [resolvable:$true] %s20_s16 }
   0x2   :  { %23 = dma.hbm_to_vmem [thread:$0]  %s19_s14, 16, %s21_s16, [#allocation3]  }
   0x3   :  { %485 = dma.done.wait [#allocation3], 16  }
   0x4   :  { %486 = vsyncadd [#allocation3], 4294967280  ;;  %v101_v0 = vld [vmem:[%s856_s1 + $0x18] sm:$0x7]  ;;  %vm194_vm0 = vcmask 1042432   ;;  %v446_v4 = vld [vmem:[%s856_s1 + $0x10] sm:$0xff] }
   0x5   :  { %v119_v1 = vunpack.c.l.b16 %v101_v0  ;;  %v445_v5 = vld [vmem:[%s856_s1 + $0x8] sm:$0xff]  ;;  %v444_v6 = vld [vmem:[%s856_s1] sm:$0xff]  ;;  %v39_v7 = vld [vmem:[%s855_s0 + $0x50] sm:$0xff]  ;;  %vm127_vm1 = vcmask 441344  }
   0x6   :  { %v40_v8 = vld [vmem:[%s855_s0 + $0x58] sm:$0xff]  ;;  %v51_v9 = vld [vmem:[%s855_s0 + $0xb0] sm:$0xff]  ;;  %v29_v13 = vld [vmem:[%s855_s0] sm:$0xff] }
   0x7   :  { %v123_v2 = vpack.c.b16 %v119_v1, %v119_v1  ;;  %v52_v10 = vld [vmem:[%s855_s0 + $0xb8] sm:$0xff]  ;;  %v63_v11 = vld [vmem:[%s855_s0 + $0x110] sm:$0xff]  ;;  %v30_v14 = vld [vmem:[%s855_s0 + $0x8] sm:$0xff]  ;;  %v78_v15 = vpack.c.bf16 %v40_v8, %v39_v7 }
   0x8   :  { %v64_v12 = vld [vmem:[%s855_s0 + $0x118] sm:$0xff]  ;;  %v84_v16 = vpack.c.bf16 %v52_v10, %v51_v9  ;;  %v73_v18 = vpack.c.bf16 %v30_v14, %v29_v13  ;;  %v41_v19 = vld [vmem:[%s855_s0 + $0x60] sm:$0xff]  ;;  %v42_v20 = vld [vmem:[%s855_s0 + $0x68] sm:$0xff] }
   0x9   :  { %v196_v3 = vsel %vm194_vm0, %v123_v2, 0  ;;  %v90_v17 = vpack.c.bf16 %v64_v12, %v63_v11  ;;  %v53_v21 = vld [vmem:[%s855_s0 + $0xc0] sm:$0xff]  ;;  %v54_v22 = vld [vmem:[%s855_s0 + $0xc8] sm:$0xff]  ;;  %v31_v25 = vld [vmem:[%s855_s0 + $0x10] sm:$0xff]  ;;  %v79_v27 = vpack.c.bf16 %v42_v20, %v41_v19 }
   0xa   :  { %447 = vmatpush.bf16.msra.mxu1 %v196_v3  ;;  %448 = vmatpush.bf16.msra.mxu2 %v196_v3  ;;  %v65_v23 = vld [vmem:[%s855_s0 + $0x120] sm:$0xff]  ;;  %v66_v24 = vld [vmem:[%s855_s0 + $0x128] sm:$0xff]  ;;  %v32_v26 = vld [vmem:[%s855_s0 + $0x18] sm:$0xff]  ;;  %v85_v28 = vpack.c.bf16 %v54_v22, %v53_v21 }
   0xb   :  { %449 = vmatpush.bf16.msra.mxu3 %v196_v3  ;;  %202 = vmatpush.bf16.msra.mxu0 %v196_v3  ;;  %v91_v29 = vpack.c.bf16 %v66_v24, %v65_v23  ;;  %v74_v30 = vpack.c.bf16 %v32_v26, %v31_v25  ;;  %v43_v31 = vld [vmem:[%s855_s0 + $0x70] sm:$0xff]  ;;  %v44_v32 = vld [vmem:[%s855_s0 + $0x78] sm:$0xff]  ;;  %v33_v37 = vld [vmem:[%s855_s0 + $0x20] sm:$0xff] }
   0xc   :  { %v55_v33 = vld [vmem:[%s855_s0 + $0xd0] sm:$0xff]  ;;  %v56_v34 = vld [vmem:[%s855_s0 + $0xd8] sm:$0xff]  ;;  %v34_v38 = vld [vmem:[%s855_s0 + $0x28] sm:$0xff]  ;;  %v80_v39 = vpack.c.bf16 %v44_v32, %v43_v31 }
   0xd   :  { %v67_v35 = vld [vmem:[%s855_s0 + $0x130] sm:$0xff]  ;;  %v68_v36 = vld [vmem:[%s855_s0 + $0x138] sm:$0xff]  ;;  %v86_v40 = vpack.c.bf16 %v56_v34, %v55_v33  ;;  %v75_v42 = vpack.c.bf16 %v34_v38, %v33_v37  ;;  %v45_v43 = vld [vmem:[%s855_s0 + $0x80] sm:$0xff] }
   0xe   :  { %450 = vmatpush.bf16.msra.mxu1 %v446_v4  ;;  %451 = vmatpush.bf16.msra.mxu2 %v446_v4  ;;  %v92_v41 = vpack.c.bf16 %v68_v36, %v67_v35  ;;  %v46_v44 = vld [vmem:[%s855_s0 + $0x88] sm:$0xff]  ;;  %v57_v45 = vld [vmem:[%s855_s0 + $0xe0] sm:$0xff]  ;;  %v35_v49 = vld [vmem:[%s855_s0 + $0x30] sm:$0xff] }
   0xf   :  { %452 = vmatpush.bf16.msra.mxu3 %v446_v4  ;;  %203 = vmatpush.bf16.msra.mxu0 %v446_v4  ;;  %v58_v46 = vld [vmem:[%s855_s0 + $0xe8] sm:$0xff]  ;;  %v69_v47 = vld [vmem:[%s855_s0 + $0x140] sm:$0xff]  ;;  %v36_v50 = vld [vmem:[%s855_s0 + $0x38] sm:$0xff]  ;;  %v81_v51 = vpack.c.bf16 %v46_v44, %v45_v43 }
  0x10   :  { %v70_v48 = vld [vmem:[%s855_s0 + $0x148] sm:$0xff]  ;;  %v87_v52 = vpack.c.bf16 %v58_v46, %v57_v45  ;;  %v76_v54 = vpack.c.bf16 %v36_v50, %v35_v49  ;;  %v47_v55 = vld [vmem:[%s855_s0 + $0x90] sm:$0xff]  ;;  %v48_v56 = vld [vmem:[%s855_s0 + $0x98] sm:$0xff] }
  0x11   :  { %v93_v53 = vpack.c.bf16 %v70_v48, %v69_v47  ;;  %v59_v57 = vld [vmem:[%s855_s0 + $0xf0] sm:$0xff]  ;;  %v60_v58 = vld [vmem:[%s855_s0 + $0xf8] sm:$0xff]  ;;  %v37_v61 = vld [vmem:[%s855_s0 + $0x40] sm:$0xff]  ;;  %v82_v63 = vpack.c.bf16 %v48_v56, %v47_v55 }
  0x12   :  { %453 = vmatpush.bf16.msra.mxu1 %v445_v5  ;;  %454 = vmatpush.bf16.msra.mxu2 %v445_v5  ;;  %v71_v59 = vld [vmem:[%s855_s0 + $0x150] sm:$0xff]  ;;  %v72_v60 = vld [vmem:[%s855_s0 + $0x158] sm:$0xff]  ;;  %v38_v62 = vld [vmem:[%s855_s0 + $0x48] sm:$0xff]  ;;  %v88_v0 = vpack.c.bf16 %v60_v58, %v59_v57 }
  0x13   :  { %455 = vmatpush.bf16.msra.mxu3 %v445_v5  ;;  %204 = vmatpush.bf16.msra.mxu0 %v445_v5  ;;  %v94_v1 = vpack.c.bf16 %v72_v60, %v71_v59  ;;  %v77_v2 = vpack.c.bf16 %v38_v62, %v37_v61  ;;  %v49_v3 = vld [vmem:[%s855_s0 + $0xa0] sm:$0xff]  ;;  %v50_v4 = vld [vmem:[%s855_s0 + $0xa8] sm:$0xff] }
  0x14   :  { %v61_v5 = vld [vmem:[%s855_s0 + $0x100] sm:$0xff]  ;;  %v83_v7 = vpack.c.bf16 %v50_v4, %v49_v3 }
  0x15   :  { %v677_v9 = vld [vmem:[#allocation2] ss:$0 sm:$0xff] }
  0x16   :  { %456 = vmatpush.bf16.msra.mxu1 %v444_v6  ;;  %457 = vmatpush.bf16.msra.mxu2 %v444_v6 }
  0x17   :  { %458 = vmatpush.bf16.msra.mxu3 %v444_v6  ;;  %205 = vmatpush.bf16.msra.mxu0 %v444_v6  ;;  %v62_v6 = vld [vmem:[%s855_s0 + $0x108] sm:$0xff] }
  0x18   :  { %v89_v8 = vpack.c.bf16 %v62_v6, %v61_v5 }
  0x19   :  { %427 = vmatmul.msk.bf16.vlgmr.msra.gmra.mxu1 %vm127_vm1, %v78_v15  ;;  %433 = vmatmul.msk.bf16.vlgmr.msra.gmra.mxu2 %vm127_vm1, %v84_v16 }
  0x1a   :  { %439 = vmatmul.msk.bf16.vlgmr.msra.gmra.mxu3 %vm127_vm1, %v90_v17  ;;  %422 = vmatmul.msk.bf16.vlgmr.msra.gmra.mxu0 %vm127_vm1, %v73_v18 }
  0x29   :  { %428 = vmatmul.msk.bf16.gmra.mxu1 %vm127_vm1, %v79_v27  ;;  %434 = vmatmul.msk.bf16.gmra.mxu2 %vm127_vm1, %v85_v28 }
  0x2a   :  { %440 = vmatmul.msk.bf16.gmra.mxu3 %vm127_vm1, %v91_v29  ;;  %423 = vmatmul.msk.bf16.gmra.mxu0 %vm127_vm1, %v74_v30 }
  0x39   :  { %429 = vmatmul.msk.bf16.gmra.mxu1 %vm127_vm1, %v80_v39  ;;  %435 = vmatmul.msk.bf16.gmra.mxu2 %vm127_vm1, %v86_v40 }
  0x3a   :  { %441 = vmatmul.msk.bf16.gmra.mxu3 %vm127_vm1, %v92_v41  ;;  %424 = vmatmul.msk.bf16.gmra.mxu0 %vm127_vm1, %v75_v42 }
  0x49   :  { %430 = vmatmul.msk.bf16.gmra.mxu1 %vm127_vm1, %v81_v51  ;;  %436 = vmatmul.msk.bf16.gmra.mxu2 %vm127_vm1, %v87_v52 }
  0x4a   :  { %442 = vmatmul.msk.bf16.gmra.mxu3 %vm127_vm1, %v93_v53  ;;  %425 = vmatmul.msk.bf16.gmra.mxu0 %vm127_vm1, %v76_v54 }
  0x59   :  { %431 = vmatmul.msk.bf16.gmra.mxu1 %vm127_vm1, %v82_v63  ;;  %437 = vmatmul.msk.bf16.gmra.mxu2 %vm127_vm1, %v88_v0 }
  0x5a   :  { %443 = vmatmul.msk.bf16.gmra.mxu3 %vm127_vm1, %v94_v1  ;;  %426 = vmatmul.msk.bf16.gmra.mxu0 %vm127_vm1, %v77_v2 }
  0x69   :  { %432 = vmatmul.msk.bf16.gmra.mxu1 %vm127_vm1, %v83_v7  ;;  %438 = vmatmul.msk.bf16.gmra.mxu2 %vm127_vm1, %v89_v8 }
  0x96   :  { %v232_v10 = vpop.f32.mrf.mxu1 }
  0x97   :  { %v233_v11 = vadd.f32 %v677_v9, %v232_v10  ;;  %v207_v12 = vpop.f32.mrf.mxu0 }
  0x98   :  { %v208_v13 = vadd.f32 %v677_v9, %v207_v12 }
  0x99   :  { %v327_v14 = vmax.f32 %v233_v11, 0.0 }
  0x9a   :  { %v317_v15 = vmax.f32 %v208_v13, 0.0 }
  0x9b   :  { %371 = vst [vmem:[%s858_s3 + $0x50] sm:$0xff] %v327_v14 }
  0x9c   :  { %v262_v16 = vpop.f32.mrf.mxu2  ;;  %361 = vst [vmem:[%s858_s3] sm:$0xff] %v317_v15 }
  0x9d   :  { %v263_v17 = vadd.f32 %v677_v9, %v262_v16  ;;  %v292_v18 = vpop.f32.mrf.mxu3 }
  0x9e   :  { %v234_v19 = vpop.f32.mrf.mxu1  ;;  %v293_v20 = vadd.f32 %v677_v9, %v292_v18 }
  0x9f   :  { %v339_v21 = vmax.f32 %v263_v17, 0.0  ;;  %v235_v22 = vadd.f32 %v677_v9, %v234_v19  ;;  %v209_v23 = vpop.f32.mrf.mxu0 }
  0xa0   :  { %v351_v24 = vmax.f32 %v293_v20, 0.0  ;;  %v210_v25 = vadd.f32 %v677_v9, %v209_v23 }
  0xa1   :  { %383 = vst [vmem:[%s858_s3 + $0xb0] sm:$0xff] %v339_v21  ;;  %v328_v26 = vmax.f32 %v235_v22, 0.0 }
  0xa2   :  { %395 = vst [vmem:[%s858_s3 + $0x110] sm:$0xff] %v351_v24  ;;  %v318_v27 = vmax.f32 %v210_v25, 0.0 }
  0xa3   :  { %372 = vst [vmem:[%s858_s3 + $0x58] sm:$0xff] %v328_v26 }
  0xa4   :  { %v264_v28 = vpop.f32.mrf.mxu2  ;;  %362 = vst [vmem:[%s858_s3 + $0x8] sm:$0xff] %v318_v27 }
  0xa5   :  { %v265_v29 = vadd.f32 %v677_v9, %v264_v28  ;;  %v294_v30 = vpop.f32.mrf.mxu3 }
  0xa6   :  { %v237_v31 = vpop.f32.mrf.mxu1  ;;  %v295_v32 = vadd.f32 %v677_v9, %v294_v30 }
  0xa7   :  { %v340_v33 = vmax.f32 %v265_v29, 0.0  ;;  %v238_v34 = vadd.f32 %v677_v9, %v237_v31  ;;  %v212_v35 = vpop.f32.mrf.mxu0 }
  0xa8   :  { %v352_v36 = vmax.f32 %v295_v32, 0.0  ;;  %v213_v37 = vadd.f32 %v677_v9, %v212_v35 }
  0xa9   :  { %384 = vst [vmem:[%s858_s3 + $0xb8] sm:$0xff] %v340_v33  ;;  %v329_v38 = vmax.f32 %v238_v34, 0.0 }
  0xaa   :  { %396 = vst [vmem:[%s858_s3 + $0x118] sm:$0xff] %v352_v36  ;;  %v319_v39 = vmax.f32 %v213_v37, 0.0 }
  0xab   :  { %373 = vst [vmem:[%s858_s3 + $0x60] sm:$0xff] %v329_v38 }
  0xac   :  { %v267_v40 = vpop.f32.mrf.mxu2  ;;  %363 = vst [vmem:[%s858_s3 + $0x10] sm:$0xff] %v319_v39 }
  0xad   :  { %v268_v41 = vadd.f32 %v677_v9, %v267_v40  ;;  %v297_v42 = vpop.f32.mrf.mxu3 }
  0xae   :  { %v239_v43 = vpop.f32.mrf.mxu1  ;;  %v298_v44 = vadd.f32 %v677_v9, %v297_v42 }
  0xaf   :  { %v341_v45 = vmax.f32 %v268_v41, 0.0  ;;  %v240_v46 = vadd.f32 %v677_v9, %v239_v43  ;;  %v214_v47 = vpop.f32.mrf.mxu0 }
  0xb0   :  { %v353_v48 = vmax.f32 %v298_v44, 0.0  ;;  %v215_v49 = vadd.f32 %v677_v9, %v214_v47 }
  0xb1   :  { %385 = vst [vmem:[%s858_s3 + $0xc0] sm:$0xff] %v341_v45  ;;  %v330_v50 = vmax.f32 %v240_v46, 0.0 }
  0xb2   :  { %397 = vst [vmem:[%s858_s3 + $0x120] sm:$0xff] %v353_v48  ;;  %v320_v51 = vmax.f32 %v215_v49, 0.0 }
  0xb3   :  { %374 = vst [vmem:[%s858_s3 + $0x68] sm:$0xff] %v330_v50 }
  0xb4   :  { %v269_v52 = vpop.f32.mrf.mxu2  ;;  %364 = vst [vmem:[%s858_s3 + $0x18] sm:$0xff] %v320_v51 }
  0xb5   :  { %v270_v53 = vadd.f32 %v677_v9, %v269_v52  ;;  %v299_v54 = vpop.f32.mrf.mxu3 }
  0xb6   :  { %v242_v55 = vpop.f32.mrf.mxu1  ;;  %v300_v56 = vadd.f32 %v677_v9, %v299_v54 }
  0xb7   :  { %v342_v57 = vmax.f32 %v270_v53, 0.0  ;;  %v243_v58 = vadd.f32 %v677_v9, %v242_v55  ;;  %v217_v59 = vpop.f32.mrf.mxu0 }
  0xb8   :  { %v354_v60 = vmax.f32 %v300_v56, 0.0  ;;  %v218_v61 = vadd.f32 %v677_v9, %v217_v59 }
  0xb9   :  { %386 = vst [vmem:[%s858_s3 + $0xc8] sm:$0xff] %v342_v57  ;;  %v331_v62 = vmax.f32 %v243_v58, 0.0 }
  0xba   :  { %398 = vst [vmem:[%s858_s3 + $0x128] sm:$0xff] %v354_v60  ;;  %v321_v63 = vmax.f32 %v218_v61, 0.0 }
  0xbb   :  { %375 = vst [vmem:[%s858_s3 + $0x70] sm:$0xff] %v331_v62 }
  0xbc   :  { %v272_v0 = vpop.f32.mrf.mxu2  ;;  %365 = vst [vmem:[%s858_s3 + $0x20] sm:$0xff] %v321_v63 }
  0xbd   :  { %v273_v1 = vadd.f32 %v677_v9, %v272_v0  ;;  %v302_v2 = vpop.f32.mrf.mxu3 }
  0xbe   :  { %v244_v3 = vpop.f32.mrf.mxu1  ;;  %v303_v4 = vadd.f32 %v677_v9, %v302_v2 }
  0xbf   :  { %v343_v5 = vmax.f32 %v273_v1, 0.0  ;;  %v245_v6 = vadd.f32 %v677_v9, %v244_v3  ;;  %v219_v7 = vpop.f32.mrf.mxu0 }
  0xc0   :  { %v355_v8 = vmax.f32 %v303_v4, 0.0  ;;  %v220_v10 = vadd.f32 %v677_v9, %v219_v7 }
  0xc1   :  { %387 = vst [vmem:[%s858_s3 + $0xd0] sm:$0xff] %v343_v5  ;;  %v332_v11 = vmax.f32 %v245_v6, 0.0 }
  0xc2   :  { %399 = vst [vmem:[%s858_s3 + $0x130] sm:$0xff] %v355_v8  ;;  %v322_v12 = vmax.f32 %v220_v10, 0.0 }
  0xc3   :  { %376 = vst [vmem:[%s858_s3 + $0x78] sm:$0xff] %v332_v11 }
  0xc4   :  { %v274_v13 = vpop.f32.mrf.mxu2  ;;  %366 = vst [vmem:[%s858_s3 + $0x28] sm:$0xff] %v322_v12 }
  0xc5   :  { %v275_v14 = vadd.f32 %v677_v9, %v274_v13  ;;  %v304_v15 = vpop.f32.mrf.mxu3 }
  0xc6   :  { %v247_v16 = vpop.f32.mrf.mxu1  ;;  %v305_v17 = vadd.f32 %v677_v9, %v304_v15 }
  0xc7   :  { %v344_v18 = vmax.f32 %v275_v14, 0.0  ;;  %v248_v19 = vadd.f32 %v677_v9, %v247_v16  ;;  %v222_v20 = vpop.f32.mrf.mxu0 }
  0xc8   :  { %v356_v21 = vmax.f32 %v305_v17, 0.0  ;;  %v223_v22 = vadd.f32 %v677_v9, %v222_v20 }
  0xc9   :  { %388 = vst [vmem:[%s858_s3 + $0xd8] sm:$0xff] %v344_v18  ;;  %v333_v23 = vmax.f32 %v248_v19, 0.0 }
  0xca   :  { %400 = vst [vmem:[%s858_s3 + $0x138] sm:$0xff] %v356_v21  ;;  %v323_v24 = vmax.f32 %v223_v22, 0.0 }
  0xcb   :  { %377 = vst [vmem:[%s858_s3 + $0x80] sm:$0xff] %v333_v23 }
  0xcc   :  { %v277_v25 = vpop.f32.mrf.mxu2  ;;  %367 = vst [vmem:[%s858_s3 + $0x30] sm:$0xff] %v323_v24 }
  0xcd   :  { %v278_v26 = vadd.f32 %v677_v9, %v277_v25  ;;  %v307_v27 = vpop.f32.mrf.mxu3 }
  0xce   :  { %v249_v28 = vpop.f32.mrf.mxu1  ;;  %v308_v29 = vadd.f32 %v677_v9, %v307_v27 }
  0xcf   :  { %v345_v30 = vmax.f32 %v278_v26, 0.0  ;;  %v250_v31 = vadd.f32 %v677_v9, %v249_v28  ;;  %v224_v32 = vpop.f32.mrf.mxu0 }
  0xd0   :  { %v357_v33 = vmax.f32 %v308_v29, 0.0  ;;  %v225_v34 = vadd.f32 %v677_v9, %v224_v32 }
  0xd1   :  { %389 = vst [vmem:[%s858_s3 + $0xe0] sm:$0xff] %v345_v30  ;;  %v334_v35 = vmax.f32 %v250_v31, 0.0 }
  0xd2   :  { %401 = vst [vmem:[%s858_s3 + $0x140] sm:$0xff] %v357_v33  ;;  %v324_v36 = vmax.f32 %v225_v34, 0.0 }
  0xd3   :  { %378 = vst [vmem:[%s858_s3 + $0x88] sm:$0xff] %v334_v35 }
  0xd4   :  { %v279_v37 = vpop.f32.mrf.mxu2  ;;  %368 = vst [vmem:[%s858_s3 + $0x38] sm:$0xff] %v324_v36 }
  0xd5   :  { %v280_v38 = vadd.f32 %v677_v9, %v279_v37  ;;  %v309_v39 = vpop.f32.mrf.mxu3 }
  0xd6   :  { %v252_v40 = vpop.f32.mrf.mxu1  ;;  %v310_v41 = vadd.f32 %v677_v9, %v309_v39 }
  0xd7   :  { %v346_v42 = vmax.f32 %v280_v38, 0.0  ;;  %v253_v43 = vadd.f32 %v677_v9, %v252_v40  ;;  %v227_v44 = vpop.f32.mrf.mxu0 }
  0xd8   :  { %v358_v45 = vmax.f32 %v310_v41, 0.0  ;;  %v228_v46 = vadd.f32 %v677_v9, %v227_v44 }
  0xd9   :  { %390 = vst [vmem:[%s858_s3 + $0xe8] sm:$0xff] %v346_v42  ;;  %v335_v47 = vmax.f32 %v253_v43, 0.0 }
  0xda   :  { %402 = vst [vmem:[%s858_s3 + $0x148] sm:$0xff] %v358_v45  ;;  %v325_v48 = vmax.f32 %v228_v46, 0.0 }
  0xdb   :  { %379 = vst [vmem:[%s858_s3 + $0x90] sm:$0xff] %v335_v47 }
  0xdc   :  { %v282_v49 = vpop.f32.mrf.mxu2  ;;  %369 = vst [vmem:[%s858_s3 + $0x40] sm:$0xff] %v325_v48 }
  0xdd   :  { %v283_v50 = vadd.f32 %v677_v9, %v282_v49  ;;  %v312_v51 = vpop.f32.mrf.mxu3 }
  0xde   :  { %v254_v52 = vpop.f32.mrf.mxu1  ;;  %v313_v53 = vadd.f32 %v677_v9, %v312_v51 }
  0xdf   :  { %v347_v54 = vmax.f32 %v283_v50, 0.0  ;;  %v255_v55 = vadd.f32 %v677_v9, %v254_v52  ;;  %v229_v56 = vpop.f32.mrf.mxu0 }
  0xe0   :  { %v359_v57 = vmax.f32 %v313_v53, 0.0  ;;  %v230_v58 = vadd.f32 %v677_v9, %v229_v56 }
  0xe1   :  { %391 = vst [vmem:[%s858_s3 + $0xf0] sm:$0xff] %v347_v54  ;;  %v336_v59 = vmax.f32 %v255_v55, 0.0 }
  0xe2   :  { %403 = vst [vmem:[%s858_s3 + $0x150] sm:$0xff] %v359_v57  ;;  %v326_v60 = vmax.f32 %v230_v58, 0.0 }
  0xe3   :  { %380 = vst [vmem:[%s858_s3 + $0x98] sm:$0xff] %v336_v59 }
  0xe4   :  { %v284_v61 = vpop.f32.mrf.mxu2  ;;  %370 = vst [vmem:[%s858_s3 + $0x48] sm:$0xff] %v326_v60 }
  0xe5   :  { %v285_v62 = vadd.f32 %v677_v9, %v284_v61  ;;  %v314_v63 = vpop.f32.mrf.mxu3 }
  0xe6   :  { %v257_v0 = vpop.f32.mrf.mxu1  ;;  %v315_v1 = vadd.f32 %v677_v9, %v314_v63 }
  0xe7   :  { %v348_v2 = vmax.f32 %v285_v62, 0.0  ;;  %v258_v3 = vadd.f32 %v677_v9, %v257_v0 }
  0xe8   :  { %v360_v4 = vmax.f32 %v315_v1, 0.0 }
  0xe9   :  { %392 = vst [vmem:[%s858_s3 + $0xf8] sm:$0xff] %v348_v2  ;;  %v337_v5 = vmax.f32 %v258_v3, 0.0 }
  0xea   :  { %404 = vst [vmem:[%s858_s3 + $0x158] sm:$0xff] %v360_v4 }
  0xeb   :  { %381 = vst [vmem:[%s858_s3 + $0xa0] sm:$0xff] %v337_v5 }
  0xec   :  { %v287_v6 = vpop.f32.mrf.mxu2 }
  0xed   :  { %v288_v7 = vadd.f32 %v677_v9, %v287_v6 }
  0xee   :  { %v259_v8 = vpop.f32.mrf.mxu1 }
  0xef   :  { %v349_v10 = vmax.f32 %v288_v7, 0.0  ;;  %v260_v11 = vadd.f32 %v677_v9, %v259_v8 }
  0xf1   :  { %393 = vst [vmem:[%s858_s3 + $0x100] sm:$0xff] %v349_v10  ;;  %v338_v12 = vmax.f32 %v260_v11, 0.0 }
  0xf3   :  { %382 = vst [vmem:[%s858_s3 + $0xa8] sm:$0xff] %v338_v12 }
  0xf4   :  { %v289_v13 = vpop.f32.mrf.mxu2 }
  0xf5   :  { %v290_v14 = vadd.f32 %v677_v9, %v289_v13 }
  0xf7   :  { %v350_v15 = vmax.f32 %v290_v14, 0.0 }
  0xf9   :  { %394 = vst [vmem:[%s858_s3 + $0x108] sm:$0xff] %v350_v15 }
  0xfa   :  { %409 = vsyncpa [#allocation3], 1 }

// kernel: actor_critic_forward.3
= control target key start
LH: loop header
LB: loop body
LE: loop exit
PB: predicated region body
PF: predicated region fallthrough
CT: control target
= control target key end

     0   :  { %17 = vsyncpa [#allocation3], 0  ;;  %s28266_s0 = inlined_call_operand.vmem [shape: f32[2,5632], index: 0, kind: input, shape index: {}]   ;;  %s28267_s1 = inlined_call_operand.vmem [shape: f32[2,5632], index: 1, kind: input, shape index: {}]   ;;  %s28268_s2 = inlined_call_operand.vmem [shape: f32[2,41], index: 2, kind: input, shape index: {}]   ;;  %s28269_s3 = inlined_call_operand.vmem [shape: bf16[5632,256], index: 3, kind: input, shape index: {}]   ;;  %s28270_s4 = inlined_call_operand.vmem [shape: bf16[41,256], index: 4, kind: input, shape index: {}]   ;;  %s28271_s5 = inlined_call_operand.vmem [shape: f32[1,256], index: 5, kind: input, shape index: {}]   ;;  %s28272_s6 = inlined_call_operand.vmem [shape: bf16[5632,256], index: 6, kind: input, shape index: {}]   ;;  %s28273_s7 = inlined_call_operand.hbm [shape: bf16[41,256], index: 7, kind: input, shape index: {}]   ;;  %s28274_s8 = inlined_call_operand.hbm [shape: f32[1,256], index: 8, kind: input, shape index: {}]   ;;  %s28275_s9 = inlined_call_operand.vmem [shape: bf16[256,128], index: 9, kind: input, shape index: {}]   ;;  %s28276_s10 = inlined_call_operand.hbm [shape: bf16[256,128], index: 10, kind: input, shape index: {}]   ;;  %s28277_s11 = inlined_call_operand.hbm [shape: f32[1,128], index: 11, kind: input, shape index: {}]   ;;  %s28278_s12 = inlined_call_operand.vmem [shape: f32[2,128], index: 12, kind: output, shape index: {}]  }
   0x1   :  { %18 = vsyncpa [#allocation5], 0  ;;  %s52_s23 = sshll.u32 %s28274_s8, 4  ;;  %s53_s23 = int_to_ptr.hbm [resolvable:$true] %s52_s23 }
   0x2   :  { %19 = vsyncpa [#allocation8], 0  ;;  %s19066_s24 = smov [#allocation4]   ;;  %s38_s28 = sshll.u32 %s28273_s7, 4  ;;  %s39_s28 = int_to_ptr.hbm [resolvable:$true] %s38_s28 }
   0x3   :  { %s54_s25 = sshll.u32 %s19066_s24, 4  ;;  %s19067_s29 = smov [#allocation2]   ;;  %s55_s25 = int_to_ptr.vmem [resolvable:$true] %s54_s25 }
   0x4   :  { %57 = dma.hbm_to_vmem [thread:$0]  %s53_s23, 32, %s55_s25, [#allocation5]  }
   0x5   :  { %s40_s30 = sshll.u32 %s19067_s29, 4  ;;  %s19068_s13 = smov 128   ;;  %s41_s30 = int_to_ptr.vmem [resolvable:$true] %s40_s30 }
   0x6   :  { %s19069_s14 = smov 8   ;;  %s64_s8 = sshll.u32 %s28276_s10, 4  ;;  %s65_s8 = int_to_ptr.hbm [resolvable:$true] %s64_s8 }
   0x7   :  { %46 = dma.hbm_to_vmem [thread:$0]  %s39_s28, 768, %s41_s30, [#allocation3], %s19068_s13, %s19068_s13, %s19069_s14  }
   0x8   :  { %s19070_s17 = smov [#allocation6]   ;;  %s78_s7 = sshll.u32 %s28277_s11, 4  ;;  %s79_s7 = int_to_ptr.hbm [resolvable:$true] %s78_s7 }
   0x9   :  { %s66_s18 = sshll.u32 %s19070_s17, 4  ;;  %s19071_s21 = smov 64   ;;  %s67_s18 = int_to_ptr.vmem [resolvable:$true] %s66_s18 }
   0xa   :  { %s19072_s22 = smov 4   ;;  %s19073_s23 = smov [#allocation7]  }
   0xb   :  { %72 = dma.hbm_to_vmem [thread:$0]  %s65_s8, 2048, %s67_s18, [#allocation5], %s19071_s21, %s19071_s21, %s19072_s22  }
   0xc   :  { %s80_s24 = sshll.u32 %s19073_s23, 4  ;;  %s81_s24 = int_to_ptr.vmem [resolvable:$true] %s80_s24 }
   0xd   :  { %83 = dma.hbm_to_vmem [thread:$0]  %s79_s7, 16, %s81_s24, [#allocation8]  }
   0xe   :  { %19060 = dma.done.wait [#allocation3], 768  }
   0xf   :  { %19061 = vsyncadd [#allocation3], 4294966528 }
  0x10   :  { %19062 = dma.done.wait [#allocation5], 2080  }
  0x11   :  { %19063 = vsyncadd [#allocation5], 4294965216 }
  0x12   :  { %19064 = dma.done.wait [#allocation8], 16  }
  0x13   :  { %19065 = vsyncadd [#allocation8], 4294967280  ;;  %vm1177_vm0 = vcmask 1043456   ;;  %vm1178_vm1 = vcmask 1044480   ;;  %v19074_v0 = vmov 65535   ;;  %vm1173_vm2 = vcmask 334848  }
  0x14   :  { %v1179_v1 = vsel %vm1177_vm0, 4294967295, %v19074_v0  ;;  %v11770_v3 = vld [vmem:[%s28269_s3 + $0x70] sm:$0xf]  ;;  %v17513_v4 = vld [vmem:[%s28269_s3 + $0x74] sm:$0xf0]  ;;  %vm11652_vm4 = vcmask 1041408  }
  0x15   :  { %v19152_v2 = vsel %vm1178_vm1, %v1179_v1, 0  ;;  %v11834_v5 = vld [vmem:[%s28269_s3 + $0xf0] sm:$0xf]  ;;  %v11771_v6 = vor.u32 %v17513_v4, %v11770_v3  ;;  %v17529_v7 = vld [vmem:[%s28269_s3 + $0xf4] sm:$0xf0] }
  0x16   :  { %28293 = vst [vmem:[#allocation12_spill] sm:$0xff] %v19152_v2  ;;  %v11704_v8 = vld [vmem:[%s28270_s4 + $0x20] sm:$0xf]  ;;  %v18207_v9 = vld [vmem:[%s28270_s4 + $0x24] sm:$0x10]  ;;  %v11835_v10 = vor.u32 %v17529_v7, %v11834_v5 }
  0x17   :  { %v11705_v11 = vor.u32 %v18207_v9, %v11704_v8  ;;  %v18206_v12 = vld [vmem:[%s28270_s4 + $0x24] sm:$0xf]  ;;  %v11706_v13 = vld [vmem:[%s28270_s4 + $0x28] sm:$0x10]  ;;  %v11762_v14 = vld [vmem:[%s28269_s3 + $0x60] sm:$0xf]  ;;  %4733 = vmatpush.bf16.msra.mxu2 %v11771_v6 }
  0x18   :  { %v11709_v15 = vor.u32 %v18206_v12, %v11706_v13  ;;  %v17511_v16 = vld [vmem:[%s28269_s3 + $0x64] sm:$0xf0]  ;;  %v11826_v17 = vld [vmem:[%s28269_s3 + $0xe0] sm:$0xf]  ;;  %4746 = vmatpush.bf16.msra.mxu3 %v11835_v10  ;;  %v11696_v22 = vld [vmem:[%s28270_s4 + $0x10] sm:$0xf] }
  0x19   :  { %v17527_v18 = vld [vmem:[%s28269_s3 + $0xe4] sm:$0xf0]  ;;  %v1182_v19 = vand.u32 %v11705_v11, %v19152_v2  ;;  %v11763_v20 = vor.u32 %v17511_v16, %v11762_v14  ;;  %v18205_v23 = vld [vmem:[%s28270_s4 + $0x14] sm:$0xf0]  ;;  %v18204_v24 = vld [vmem:[%s28270_s4 + $0x14] sm:$0xf] }
  0x1a   :  { %v11827_v21 = vor.u32 %v17527_v18, %v11826_v17  ;;  %v1185_v25 = vand.u32 %v11709_v15, %v19152_v2  ;;  %v11698_v26 = vld [vmem:[%s28270_s4 + $0x18] sm:$0xf0]  ;;  %v11754_v27 = vld [vmem:[%s28269_s3 + $0x50] sm:$0xf]  ;;  %v17509_v28 = vld [vmem:[%s28269_s3 + $0x54] sm:$0xf0]  ;;  %v11697_v29 = vor.u32 %v18205_v23, %v11696_v22 }
  0x1b   :  { %1192 = vmatpush.bf16.msra.mxu0 %v1182_v19  ;;  %v11818_v30 = vld [vmem:[%s28269_s3 + $0xd0] sm:$0xf]  ;;  %v17525_v31 = vld [vmem:[%s28269_s3 + $0xd4] sm:$0xf0]  ;;  %v11688_v32 = vld [vmem:[%s28270_s4] sm:$0xf]  ;;  %4734 = vmatpush.bf16.msra.mxu2 %v11763_v20  ;;  %v11701_v33 = vor.u32 %v18204_v24, %v11698_v26  ;;  %v11755_v34 = vor.u32 %v17509_v28, %v11754_v27 }
  0x1c   :  { %1205 = vmatpush.bf16.msra.mxu1 %v1185_v25  ;;  %v18203_v35 = vld [vmem:[%s28270_s4 + $0x4] sm:$0xf0]  ;;  %v18202_v36 = vld [vmem:[%s28270_s4 + $0x4] sm:$0xf]  ;;  %v11690_v37 = vld [vmem:[%s28270_s4 + $0x8] sm:$0xf0]  ;;  %4747 = vmatpush.bf16.msra.mxu3 %v11827_v21  ;;  %v11819_v38 = vor.u32 %v17525_v31, %v11818_v30 }
  0x1d   :  { %v11898_v39 = vld [vmem:[%s28269_s3 + $0x170] sm:$0xf]  ;;  %v17545_v40 = vld [vmem:[%s28269_s3 + $0x174] sm:$0xf0]  ;;  %v11746_v43 = vld [vmem:[%s28269_s3 + $0x40] sm:$0xf]  ;;  %v11689_v45 = vor.u32 %v18203_v35, %v11688_v32  ;;  %v11693_v48 = vor.u32 %v18202_v36, %v11690_v37 }
  0x1e   :  { %v11962_v41 = vld [vmem:[%s28269_s3 + $0x1f0] sm:$0xf]  ;;  %v17561_v42 = vld [vmem:[%s28269_s3 + $0x1f4] sm:$0xf0]  ;;  %v17507_v44 = vld [vmem:[%s28269_s3 + $0x44] sm:$0xf0]  ;;  %v11899_v49 = vor.u32 %v17545_v40, %v11898_v39 }
  0x1f   :  { %1193 = vmatpush.bf16.msra.mxu0 %v11697_v29  ;;  %v11810_v46 = vld [vmem:[%s28269_s3 + $0xc0] sm:$0xf]  ;;  %v17523_v47 = vld [vmem:[%s28269_s3 + $0xc4] sm:$0xf0]  ;;  %4735 = vmatpush.bf16.msra.mxu2 %v11755_v34  ;;  %v11963_v50 = vor.u32 %v17561_v42, %v11962_v41  ;;  %v11747_v51 = vor.u32 %v17507_v44, %v11746_v43  ;;  %v11738_v57 = vld [vmem:[%s28269_s3 + $0x30] sm:$0xf] }
  0x20   :  { %1206 = vmatpush.bf16.msra.mxu1 %v11701_v33  ;;  %4748 = vmatpush.bf16.msra.mxu3 %v11819_v38  ;;  %v11890_v52 = vld [vmem:[%s28269_s3 + $0x160] sm:$0xf]  ;;  %v17543_v53 = vld [vmem:[%s28269_s3 + $0x164] sm:$0xf0]  ;;  %v11811_v55 = vor.u32 %v17523_v47, %v11810_v46  ;;  %v17505_v58 = vld [vmem:[%s28269_s3 + $0x34] sm:$0xf0] }
  0x21   :  { %v11954_v54 = vld [vmem:[%s28269_s3 + $0x1e0] sm:$0xf]  ;;  %v17559_v56 = vld [vmem:[%s28269_s3 + $0x1e4] sm:$0xf0]  ;;  %v11802_v59 = vld [vmem:[%s28269_s3 + $0xb0] sm:$0xf]  ;;  %v11891_v61 = vor.u32 %v17543_v53, %v11890_v52  ;;  %v11739_v63 = vor.u32 %v17505_v58, %v11738_v57 }
  0x22   :  { %v17521_v60 = vld [vmem:[%s28269_s3 + $0xb4] sm:$0xf0]  ;;  %v11955_v62 = vor.u32 %v17559_v56, %v11954_v54  ;;  %v11882_v0 = vld [vmem:[%s28269_s3 + $0x150] sm:$0xf]  ;;  %v11730_v6 = vld [vmem:[%s28269_s3 + $0x20] sm:$0xf] }
  0x23   :  { %1194 = vmatpush.bf16.msra.mxu0 %v11689_v45  ;;  %4736 = vmatpush.bf16.msra.mxu2 %v11747_v51  ;;  %v17541_v1 = vld [vmem:[%s28269_s3 + $0x154] sm:$0xf0]  ;;  %v11946_v3 = vld [vmem:[%s28269_s3 + $0x1d0] sm:$0xf]  ;;  %v11803_v4 = vor.u32 %v17521_v60, %v11802_v59  ;;  %v17503_v7 = vld [vmem:[%s28269_s3 + $0x24] sm:$0xf0] }
  0x24   :  { %1207 = vmatpush.bf16.msra.mxu1 %v11693_v48  ;;  %4749 = vmatpush.bf16.msra.mxu3 %v11811_v55  ;;  %v17557_v5 = vld [vmem:[%s28269_s3 + $0x1d4] sm:$0xf0]  ;;  %v11794_v8 = vld [vmem:[%s28269_s3 + $0xa0] sm:$0xf]  ;;  %v17519_v9 = vld [vmem:[%s28269_s3 + $0xa4] sm:$0xf0]  ;;  %v11883_v10 = vor.u32 %v17541_v1, %v11882_v0  ;;  %v11731_v13 = vor.u32 %v17503_v7, %v11730_v6 }
  0x25   :  { %v11874_v11 = vld [vmem:[%s28269_s3 + $0x140] sm:$0xf]  ;;  %v11947_v12 = vor.u32 %v17557_v5, %v11946_v3  ;;  %v17539_v14 = vld [vmem:[%s28269_s3 + $0x144] sm:$0xf0]  ;;  %v11795_v17 = vor.u32 %v17519_v9, %v11794_v8  ;;  %v11722_v19 = vld [vmem:[%s28269_s3 + $0x10] sm:$0xf] }
  0x26   :  { %v11938_v15 = vld [vmem:[%s28269_s3 + $0x1c0] sm:$0xf]  ;;  %v17555_v18 = vld [vmem:[%s28269_s3 + $0x1c4] sm:$0xf0]  ;;  %v17501_v20 = vld [vmem:[%s28269_s3 + $0x14] sm:$0xf0]  ;;  %v11875_v24 = vor.u32 %v17539_v14, %v11874_v11 }
  0x27   :  { %4759 = vmatpush.bf16.msrb.mxu0 %v11899_v49  ;;  %4737 = vmatpush.bf16.msra.mxu2 %v11739_v63  ;;  %v433_v16 = vld [vmem:[%s28268_s2] sm:$0x3]  ;;  %v11786_v22 = vld [vmem:[%s28269_s3 + $0x90] sm:$0xf]  ;;  %v17517_v23 = vld [vmem:[%s28269_s3 + $0x94] sm:$0xf0]  ;;  %v11939_v28 = vor.u32 %v17555_v18, %v11938_v15  ;;  %v11723_v29 = vor.u32 %v17501_v20, %v11722_v19 }
  0x28   :  { %4772 = vmatpush.bf16.msrb.mxu1 %v11963_v50  ;;  %4750 = vmatpush.bf16.msra.mxu3 %v11803_v4  ;;  %v19321_v21 = vpack.c.bf16 %v433_v16, %v433_v16  ;;  %v11866_v25 = vld [vmem:[%s28269_s3 + $0x130] sm:$0xf]  ;;  %v17537_v26 = vld [vmem:[%s28269_s3 + $0x134] sm:$0xf0]  ;;  %v101_v27 = vld [vmem:[%s28266_s0] sm:$0xff]  ;;  %v11787_v33 = vor.u32 %v17517_v23, %v11786_v22 }
  0x29   :  { %v11930_v30 = vld [vmem:[%s28269_s3 + $0x1b0] sm:$0xf]  ;;  %v17553_v31 = vld [vmem:[%s28269_s3 + $0x1b4] sm:$0xf0]  ;;  %v11714_v32 = vld [vmem:[%s28269_s3] sm:$0xf]  ;;  %v11867_v39 = vor.u32 %v17537_v26, %v11866_v25 }
  0x2a   :  { %28294 = vst [vmem:[#allocation13_spill] sm:$0xff] %v19321_v21  ;;  %11711 = vmatmul.msk.bf16.vlgmr.msra.gmra.mxu1 %vm1173_vm2, %v19321_v21  ;;  %11710 = vmatmul.msk.bf16.vlgmr.msra.gmra.mxu0 %vm1173_vm2, %v19321_v21  ;;  %v17499_v34 = vld [vmem:[%s28269_s3 + $0x4] sm:$0xf0]  ;;  %v11778_v35 = vld [vmem:[%s28269_s3 + $0x80] sm:$0xf]  ;;  %v11931_v42 = vor.u32 %v17553_v31, %v11930_v30 }
  0x2b   :  { %4760 = vmatpush.bf16.msrb.mxu0 %v11891_v61  ;;  %4738 = vmatpush.bf16.msra.mxu2 %v11731_v13  ;;  %v17515_v36 = vld [vmem:[%s28269_s3 + $0x84] sm:$0xf0]  ;;  %v12026_v37 = vld [vmem:[%s28269_s3 + $0x270] sm:$0xf]  ;;  %v17577_v38 = vld [vmem:[%s28269_s3 + $0x274] sm:$0xf0]  ;;  %v11715_v43 = vor.u32 %v17499_v34, %v11714_v32 }
  0x2c   :  { %4773 = vmatpush.bf16.msrb.mxu1 %v11955_v62  ;;  %4751 = vmatpush.bf16.msra.mxu3 %v11795_v17  ;;  %123 = vst [vmem:[#allocation1] ss:$4 sm:$0xff] %v101_v27  ;;  %v12090_v40 = vld [vmem:[%s28269_s3 + $0x2f0] sm:$0xf]  ;;  %v17593_v41 = vld [vmem:[%s28269_s3 + $0x2f4] sm:$0xf0]  ;;  %v11779_v46 = vor.u32 %v17515_v36, %v11778_v35  ;;  %v12027_v47 = vor.u32 %v17577_v38, %v12026_v37 }
  0x2d   :  { %v11858_v44 = vld [vmem:[%s28269_s3 + $0x120] sm:$0xf]  ;;  %v17535_v45 = vld [vmem:[%s28269_s3 + $0x124] sm:$0xf0]  ;;  %v12091_v50 = vor.u32 %v17593_v41, %v12090_v40  ;;  %v11850_v56 = vld [vmem:[%s28269_s3 + $0x110] sm:$0xf] }
  0x2e   :  { %v11922_v48 = vld [vmem:[%s28269_s3 + $0x1a0] sm:$0xf]  ;;  %v17551_v49 = vld [vmem:[%s28269_s3 + $0x1a4] sm:$0xf0]  ;;  %v11859_v53 = vor.u32 %v17535_v45, %v11858_v44  ;;  %v17533_v58 = vld [vmem:[%s28269_s3 + $0x114] sm:$0xf0] }
  0x2f   :  { %4761 = vmatpush.bf16.msrb.mxu0 %v11883_v10  ;;  %4739 = vmatpush.bf16.msra.mxu2 %v11723_v29  ;;  %v12018_v51 = vld [vmem:[%s28269_s3 + $0x260] sm:$0xf]  ;;  %v17575_v52 = vld [vmem:[%s28269_s3 + $0x264] sm:$0xf0]  ;;  %v11923_v57 = vor.u32 %v17551_v49, %v11922_v48  ;;  %v11914_v59 = vld [vmem:[%s28269_s3 + $0x190] sm:$0xf]  ;;  %v11851_v7 = vor.u32 %v17533_v58, %v11850_v56 }
  0x30   :  { %4774 = vmatpush.bf16.msrb.mxu1 %v11947_v12  ;;  %4752 = vmatpush.bf16.msra.mxu3 %v11787_v33  ;;  %v12082_v54 = vld [vmem:[%s28269_s3 + $0x2e0] sm:$0xf]  ;;  %v17591_v55 = vld [vmem:[%s28269_s3 + $0x2e4] sm:$0xf0]  ;;  %v17549_v60 = vld [vmem:[%s28269_s3 + $0x194] sm:$0xf0]  ;;  %v12019_v61 = vor.u32 %v17575_v52, %v12018_v51 }
  0x31   :  { %v12083_v0 = vor.u32 %v17591_v55, %v12082_v54  ;;  %v12010_v4 = vld [vmem:[%s28269_s3 + $0x250] sm:$0xf]  ;;  %v17573_v5 = vld [vmem:[%s28269_s3 + $0x254] sm:$0xf0]  ;;  %v11842_v9 = vld [vmem:[%s28269_s3 + $0x100] sm:$0xf]  ;;  %v11915_v11 = vor.u32 %v17549_v60, %v11914_v59 }
  0x32   :  { %v12074_v6 = vld [vmem:[%s28269_s3 + $0x2d0] sm:$0xf]  ;;  %v17589_v8 = vld [vmem:[%s28269_s3 + $0x2d4] sm:$0xf0]  ;;  %v17531_v10 = vld [vmem:[%s28269_s3 + $0x104] sm:$0xf0]  ;;  %v12011_v15 = vor.u32 %v17573_v5, %v12010_v4 }
  0x33   :  { %4762 = vmatpush.bf16.msrb.mxu0 %v11875_v24  ;;  %4740 = vmatpush.bf16.msra.mxu2 %v11715_v43  ;;  %v126_v62 = vld.sshfl [vmem:[#allocation1] sm:$0xff pattern:$0x73625140]  ;;  %v127_v63 = vld.sshfl [vmem:[#allocation1 + $0x8] sm:$0xff pattern:$0x73625140]  ;;  %v12075_v19 = vor.u32 %v17589_v8, %v12074_v6  ;;  %v11843_v24 = vor.u32 %v17531_v10, %v11842_v9 }
  0x34   :  { %4775 = vmatpush.bf16.msrb.mxu1 %v11939_v28  ;;  %4753 = vmatpush.bf16.msra.mxu3 %v11779_v46  ;;  %v19408_v1 = vpack.c.bf16 %v126_v62, %v126_v62  ;;  %v19410_v3 = vpack.c.bf16 %v127_v63, %v127_v63  ;;  %v11906_v12 = vld [vmem:[%s28269_s3 + $0x180] sm:$0xf]  ;;  %v17547_v13 = vld [vmem:[%s28269_s3 + $0x184] sm:$0xf0]  ;;  %v12154_v14 = vld [vmem:[%s28269_s3 + $0x370] sm:$0xf] }
  0x35   :  { %v17609_v16 = vld [vmem:[%s28269_s3 + $0x374] sm:$0xf0]  ;;  %v12218_v17 = vld [vmem:[%s28269_s3 + $0x3f0] sm:$0xf]  ;;  %v12002_v20 = vld [vmem:[%s28269_s3 + $0x240] sm:$0xf]  ;;  %v11907_v27 = vor.u32 %v17547_v13, %v11906_v12 }
  0x36   :  { %4741 = vmatmul.bf16.vlgmr.msra.gmra.mxu2 %v19408_v1  ;;  %v17625_v18 = vld [vmem:[%s28269_s3 + $0x3f4] sm:$0xf0]  ;;  %v17571_v22 = vld [vmem:[%s28269_s3 + $0x244] sm:$0xf0]  ;;  %v12066_v23 = vld [vmem:[%s28269_s3 + $0x2c0] sm:$0xf]  ;;  %v12155_v28 = vor.u32 %v17609_v16, %v12154_v14 }
  0x37   :  { %4763 = vmatpush.bf16.msrb.mxu0 %v11867_v39  ;;  %4785 = vmatpush.bf16.msrb.mxu2 %v12027_v47  ;;  %v17587_v25 = vld [vmem:[%s28269_s3 + $0x2c4] sm:$0xf0]  ;;  %v128_v26 = vld.sshfl [vmem:[#allocation1 + $0x10] sm:$0xff pattern:$0x73625140]  ;;  %v12219_v30 = vor.u32 %v17625_v18, %v12218_v17  ;;  %v12003_v31 = vor.u32 %v17571_v22, %v12002_v20 }
  0x38   :  { %4776 = vmatpush.bf16.msrb.mxu1 %v11931_v42  ;;  %4798 = vmatpush.bf16.msrb.mxu3 %v12091_v50  ;;  %v129_v29 = vld.sshfl [vmem:[#allocation1 + $0x18] sm:$0xff pattern:$0x73625140]  ;;  %v12146_v32 = vld [vmem:[%s28269_s3 + $0x360] sm:$0xf]  ;;  %v12067_v35 = vor.u32 %v17587_v25, %v12066_v23  ;;  %v19471_v36 = vpack.c.bf16 %v128_v26, %v128_v26  ;;  %v102_v44 = vld [vmem:[%s28266_s0 + $0x8] sm:$0xff] }
  0x39   :  { %4754 = vmatmul.bf16.vlgmr.msra.gmra.mxu3 %v19410_v3  ;;  %v17607_v33 = vld [vmem:[%s28269_s3 + $0x364] sm:$0xf0]  ;;  %v12210_v34 = vld [vmem:[%s28269_s3 + $0x3e0] sm:$0xf]  ;;  %v11994_v38 = vld [vmem:[%s28269_s3 + $0x230] sm:$0xf]  ;;  %v19488_v42 = vpack.c.bf16 %v129_v29, %v129_v29 }
  0x3a   :  { %v17623_v37 = vld [vmem:[%s28269_s3 + $0x3e4] sm:$0xf0]  ;;  %v17569_v39 = vld [vmem:[%s28269_s3 + $0x234] sm:$0xf0]  ;;  %v12058_v40 = vld [vmem:[%s28269_s3 + $0x2b0] sm:$0xf]  ;;  %v12147_v43 = vor.u32 %v17607_v33, %v12146_v32 }
  0x3b   :  { %4764 = vmatpush.bf16.msrb.mxu0 %v11859_v53  ;;  %4786 = vmatpush.bf16.msrb.mxu2 %v12019_v61  ;;  %v17585_v41 = vld [vmem:[%s28269_s3 + $0x2b4] sm:$0xf0]  ;;  %v12211_v45 = vor.u32 %v17623_v37, %v12210_v34  ;;  %v11995_v46 = vor.u32 %v17569_v39, %v11994_v38  ;;  %v12138_v47 = vld [vmem:[%s28269_s3 + $0x350] sm:$0xf]  ;;  %v11986_v52 = vld [vmem:[%s28269_s3 + $0x220] sm:$0xf] }
  0x3c   :  { %4777 = vmatpush.bf16.msrb.mxu1 %v11923_v57  ;;  %4799 = vmatpush.bf16.msrb.mxu3 %v12083_v0  ;;  %v17605_v48 = vld [vmem:[%s28269_s3 + $0x354] sm:$0xf0]  ;;  %v12202_v49 = vld [vmem:[%s28269_s3 + $0x3d0] sm:$0xf]  ;;  %v12059_v50 = vor.u32 %v17585_v41, %v12058_v40  ;;  %v17567_v53 = vld [vmem:[%s28269_s3 + $0x224] sm:$0xf0] }
  0x3d   :  { %v17621_v51 = vld [vmem:[%s28269_s3 + $0x3d4] sm:$0xf0]  ;;  %v12050_v54 = vld [vmem:[%s28269_s3 + $0x2a0] sm:$0xf]  ;;  %v17583_v55 = vld [vmem:[%s28269_s3 + $0x2a4] sm:$0xf0]  ;;  %v12139_v56 = vor.u32 %v17605_v48, %v12138_v47  ;;  %v11987_v58 = vor.u32 %v17567_v53, %v11986_v52 }
  0x3e   :  { %125 = vst [vmem:[#allocation1 + $0x20] ss:$4 sm:$0xff] %v102_v44  ;;  %v12203_v57 = vor.u32 %v17621_v51, %v12202_v49  ;;  %v12130_v59 = vld [vmem:[%s28269_s3 + $0x340] sm:$0xf]  ;;  %v17603_v60 = vld [vmem:[%s28269_s3 + $0x344] sm:$0xf0]  ;;  %v12051_v62 = vor.u32 %v17583_v55, %v12050_v54 }
  0x3f   :  { %4765 = vmatpush.bf16.msrb.mxu0 %v11851_v7  ;;  %4787 = vmatpush.bf16.msrb.mxu2 %v12011_v15  ;;  %v12194_v61 = vld [vmem:[%s28269_s3 + $0x3c0] sm:$0xf]  ;;  %v17619_v63 = vld [vmem:[%s28269_s3 + $0x3c4] sm:$0xf0]  ;;  %v11978_v0 = vld [vmem:[%s28269_s3 + $0x210] sm:$0xf]  ;;  %v12131_v8 = vor.u32 %v17603_v60, %v12130_v59 }
  0x40   :  { %4778 = vmatpush.bf16.msrb.mxu1 %v11915_v11  ;;  %4800 = vmatpush.bf16.msrb.mxu3 %v12075_v19  ;;  %v17565_v4 = vld [vmem:[%s28269_s3 + $0x214] sm:$0xf0]  ;;  %v12042_v5 = vld [vmem:[%s28269_s3 + $0x290] sm:$0xf]  ;;  %v12195_v12 = vor.u32 %v17619_v63, %v12194_v61  ;;  %v11970_v14 = vld [vmem:[%s28269_s3 + $0x200] sm:$0xf] }
  0x41   :  { %v17581_v6 = vld [vmem:[%s28269_s3 + $0x294] sm:$0xf0]  ;;  %v12122_v7 = vld [vmem:[%s28269_s3 + $0x330] sm:$0xf]  ;;  %v11979_v13 = vor.u32 %v17565_v4, %v11978_v0  ;;  %v17563_v15 = vld [vmem:[%s28269_s3 + $0x204] sm:$0xf0] }
  0x42   :  { %v17601_v9 = vld [vmem:[%s28269_s3 + $0x334] sm:$0xf0]  ;;  %v12186_v10 = vld [vmem:[%s28269_s3 + $0x3b0] sm:$0xf]  ;;  %v12034_v16 = vld [vmem:[%s28269_s3 + $0x280] sm:$0xf]  ;;  %v12043_v17 = vor.u32 %v17581_v6, %v12042_v5 }
  0x43   :  { %4766 = vmatpush.bf16.msrb.mxu0 %v11843_v24  ;;  %4788 = vmatpush.bf16.msrb.mxu2 %v12003_v31  ;;  %v17617_v11 = vld [vmem:[%s28269_s3 + $0x3b4] sm:$0xf0]  ;;  %v17579_v18 = vld [vmem:[%s28269_s3 + $0x284] sm:$0xf0]  ;;  %v12282_v19 = vld [vmem:[%s28269_s3 + $0x470] sm:$0xf]  ;;  %v12123_v25 = vor.u32 %v17601_v9, %v12122_v7 }
  0x44   :  { %4779 = vmatpush.bf16.msrb.mxu1 %v11907_v27  ;;  %4801 = vmatpush.bf16.msrb.mxu3 %v12067_v35  ;;  %v17641_v20 = vld [vmem:[%s28269_s3 + $0x474] sm:$0xf0]  ;;  %v12346_v22 = vld [vmem:[%s28269_s3 + $0x4f0] sm:$0xf]  ;;  %v12114_v24 = vld [vmem:[%s28269_s3 + $0x320] sm:$0xf]  ;;  %v12187_v29 = vor.u32 %v17617_v11, %v12186_v10  ;;  %v12035_v33 = vor.u32 %v17579_v18, %v12034_v16 }
  0x45   :  { %v17657_v23 = vld [vmem:[%s28269_s3 + $0x4f4] sm:$0xf0]  ;;  %v17599_v26 = vld [vmem:[%s28269_s3 + $0x324] sm:$0xf0]  ;;  %v12178_v27 = vld [vmem:[%s28269_s3 + $0x3a0] sm:$0xf]  ;;  %v12283_v34 = vor.u32 %v17641_v20, %v12282_v19 }
  0x46   :  { %4767 = vmatmul.bf16.vlgmr.msrb.gmra.mxu0 %v19471_v36  ;;  %v130_v31 = vld.sshfl [vmem:[#allocation1 + $0x20] sm:$0xff pattern:$0x73625140]  ;;  %v131_v35 = vld.sshfl [vmem:[#allocation1 + $0x28] sm:$0xff pattern:$0x73625140]  ;;  %v12347_v39 = vor.u32 %v17657_v23, %v12346_v22  ;;  %v12115_v44 = vor.u32 %v17599_v26, %v12114_v24 }
  0x47   :  { %4811 = vmatpush.bf16.msra.mxu0 %v12155_v28  ;;  %4780 = vmatmul.bf16.vlgmr.msrb.gmra.mxu1 %v19488_v42  ;;  %v17615_v28 = vld [vmem:[%s28269_s3 + $0x3a4] sm:$0xf0]  ;;  %v12274_v32 = vld [vmem:[%s28269_s3 + $0x460] sm:$0xf]  ;;  %v104_v38 = vld [vmem:[%s28266_s0 + $0x18] sm:$0xff]  ;;  %v19610_v48 = vpack.c.bf16 %v131_v35, %v131_v35 }
  0x48   :  { %4824 = vmatpush.bf16.msra.mxu1 %v12219_v30  ;;  %4789 = vmatpush.bf16.msrb.mxu2 %v11995_v46  ;;  %v11971_v30 = vor.u32 %v17563_v15, %v11970_v14  ;;  %v17639_v37 = vld [vmem:[%s28269_s3 + $0x464] sm:$0xf0]  ;;  %v132_v40 = vld.sshfl [vmem:[#allocation1 + $0x30] sm:$0xff pattern:$0x73625140]  ;;  %v12179_v47 = vor.u32 %v17615_v28, %v12178_v27 }
  0x49   :  { %4802 = vmatpush.bf16.msrb.mxu3 %v12059_v50  ;;  %v19600_v41 = vld.sshfl [vmem:[#allocation1 + $0x38] sm:$0xff pattern:$0x73625140]  ;;  %v17655_v46 = vld [vmem:[%s28269_s3 + $0x4e4] sm:$0xf0]  ;;  %v12275_v51 = vor.u32 %v17639_v37, %v12274_v32  ;;  %v103_v15 = vld [vmem:[%s28266_s0 + $0x10] sm:$0xff]  ;;  %v19689_v26 = vpack.c.bf16 %v132_v40, %v132_v40 }
  0x4a   :  { %135 = vst [vmem:[#allocation1 + $0x20] ss:$4 sm:$0xff] %v104_v38  ;;  %v12106_v49 = vld [vmem:[%s28269_s3 + $0x310] sm:$0xf]  ;;  %v17597_v50 = vld [vmem:[%s28269_s3 + $0x314] sm:$0xf0] }
  0x4b   :  { %4812 = vmatpush.bf16.msra.mxu0 %v12147_v43  ;;  %v19602_v43 = vpack.c.bf16 %v130_v31, %v130_v31  ;;  %v12170_v52 = vld [vmem:[%s28269_s3 + $0x390] sm:$0xf]  ;;  %v17613_v53 = vld [vmem:[%s28269_s3 + $0x394] sm:$0xf0]  ;;  %v12098_v60 = vld [vmem:[%s28269_s3 + $0x300] sm:$0xf] }
  0x4c   :  { %4825 = vmatpush.bf16.msra.mxu1 %v12211_v45  ;;  %4790 = vmatpush.bf16.msrb.mxu2 %v11987_v58  ;;  %v12338_v45 = vld [vmem:[%s28269_s3 + $0x4e0] sm:$0xf]  ;;  %v12266_v55 = vld [vmem:[%s28269_s3 + $0x450] sm:$0xf]  ;;  %v17653_v59 = vld [vmem:[%s28269_s3 + $0x4d4] sm:$0xf0]  ;;  %v12171_v61 = vor.u32 %v17613_v53, %v12170_v52 }
  0x4d   :  { %4803 = vmatpush.bf16.msrb.mxu3 %v12051_v62  ;;  %v12339_v54 = vor.u32 %v17655_v46, %v12338_v45  ;;  %v12330_v58 = vld [vmem:[%s28269_s3 + $0x4d0] sm:$0xf]  ;;  %v17595_v62 = vld [vmem:[%s28269_s3 + $0x304] sm:$0xf0]  ;;  %v12162_v63 = vld [vmem:[%s28269_s3 + $0x380] sm:$0xf] }
  0x4e   :  { %v17611_v0 = vld [vmem:[%s28269_s3 + $0x384] sm:$0xf0]  ;;  %v12410_v5 = vld [vmem:[%s28269_s3 + $0x570] sm:$0xf]  ;;  %v17673_v6 = vld [vmem:[%s28269_s3 + $0x574] sm:$0xf0] }
  0x4f   :  { %4813 = vmatpush.bf16.msra.mxu0 %v12139_v56  ;;  %v17637_v56 = vld [vmem:[%s28269_s3 + $0x454] sm:$0xf0]  ;;  %v12474_v7 = vld [vmem:[%s28269_s3 + $0x5f0] sm:$0xf]  ;;  %v12258_v10 = vld [vmem:[%s28269_s3 + $0x440] sm:$0xf]  ;;  %v12163_v16 = vor.u32 %v17611_v0, %v12162_v63 }
  0x50   :  { %4826 = vmatpush.bf16.msra.mxu1 %v12203_v57  ;;  %4791 = vmatpush.bf16.msrb.mxu2 %v11979_v13  ;;  %v12107_v57 = vor.u32 %v17597_v50, %v12106_v49  ;;  %v12267_v4 = vor.u32 %v17637_v56, %v12266_v55  ;;  %v17689_v9 = vld [vmem:[%s28269_s3 + $0x5f4] sm:$0xf0]  ;;  %v17635_v11 = vld [vmem:[%s28269_s3 + $0x444] sm:$0xf0]  ;;  %v12322_v13 = vld [vmem:[%s28269_s3 + $0x4c0] sm:$0xf] }
  0x51   :  { %4804 = vmatpush.bf16.msrb.mxu3 %v12043_v17  ;;  %v17651_v14 = vld [vmem:[%s28269_s3 + $0x4c4] sm:$0xf0]  ;;  %v12411_v17 = vor.u32 %v17673_v6, %v12410_v5  ;;  %v12402_v18 = vld [vmem:[%s28269_s3 + $0x560] sm:$0xf]  ;;  %v12475_v19 = vor.u32 %v17689_v9, %v12474_v7  ;;  %v12259_v20 = vor.u32 %v17635_v11, %v12258_v10  ;;  %v12250_v27 = vld [vmem:[%s28269_s3 + $0x430] sm:$0xf] }
  0x52   :  { %v17671_v22 = vld [vmem:[%s28269_s3 + $0x564] sm:$0xf0]  ;;  %v12466_v23 = vld [vmem:[%s28269_s3 + $0x5e0] sm:$0xf]  ;;  %v17633_v28 = vld [vmem:[%s28269_s3 + $0x434] sm:$0xf0] }
  0x53   :  { %4814 = vmatpush.bf16.msra.mxu0 %v12131_v8  ;;  %v12331_v8 = vor.u32 %v17653_v59, %v12330_v58  ;;  %v17687_v24 = vld [vmem:[%s28269_s3 + $0x5e4] sm:$0xf0]  ;;  %134 = vst [vmem:[#allocation1] ss:$4 sm:$0xff] %v103_v15  ;;  %v17649_v31 = vld [vmem:[%s28269_s3 + $0x4b4] sm:$0xf0]  ;;  %v12403_v32 = vor.u32 %v17671_v22, %v12402_v18 }
  0x54   :  { %4827 = vmatpush.bf16.msra.mxu1 %v12195_v12  ;;  %4792 = vmatpush.bf16.msrb.mxu2 %v11971_v30  ;;  %v12099_v12 = vor.u32 %v17595_v62, %v12098_v60  ;;  %v12314_v30 = vld [vmem:[%s28269_s3 + $0x4b0] sm:$0xf]  ;;  %v17669_v37 = vld [vmem:[%s28269_s3 + $0x554] sm:$0xf0]  ;;  %v12306_v45 = vld [vmem:[%s28269_s3 + $0x4a0] sm:$0xf] }
  0x55   :  { %4805 = vmatpush.bf16.msrb.mxu3 %v12035_v33  ;;  %v12467_v33 = vor.u32 %v17687_v24, %v12466_v23  ;;  %v12394_v35 = vld [vmem:[%s28269_s3 + $0x550] sm:$0xf]  ;;  %v17685_v40 = vld [vmem:[%s28269_s3 + $0x5d4] sm:$0xf0]  ;;  %v17647_v46 = vld [vmem:[%s28269_s3 + $0x4a4] sm:$0xf0] }
  0x56   :  { %v12458_v38 = vld [vmem:[%s28269_s3 + $0x5d0] sm:$0xf]  ;;  %v17667_v52 = vld [vmem:[%s28269_s3 + $0x544] sm:$0xf0]  ;;  %v12450_v53 = vld [vmem:[%s28269_s3 + $0x5c0] sm:$0xf] }
  0x57   :  { %4815 = vmatpush.bf16.msra.mxu0 %v12123_v25  ;;  %4793 = vmatmul.bf16.vlgmr.msrb.gmra.mxu2 %v19602_v43  ;;  %v12323_v25 = vor.u32 %v17651_v14, %v12322_v13  ;;  %v12459_v49 = vor.u32 %v17685_v40, %v12458_v38  ;;  %v17683_v55 = vld [vmem:[%s28269_s3 + $0x5c4] sm:$0xf0]  ;;  %v12234_v56 = vld [vmem:[%s28269_s3 + $0x410] sm:$0xf]  ;;  %v17645_v59 = vld [vmem:[%s28269_s3 + $0x494] sm:$0xf0] }
  0x58   :  { %4828 = vmatpush.bf16.msra.mxu1 %v12187_v29  ;;  %4837 = vmatpush.bf16.msra.mxu2 %v12283_v34  ;;  %v19699_v29 = vpack.c.bf16 %v19600_v41, %v19600_v41  ;;  %v12251_v34 = vor.u32 %v17633_v28, %v12250_v27  ;;  %v12242_v41 = vld [vmem:[%s28269_s3 + $0x420] sm:$0xf]  ;;  %v12298_v58 = vld [vmem:[%s28269_s3 + $0x490] sm:$0xf]  ;;  %v17665_v62 = vld [vmem:[%s28269_s3 + $0x534] sm:$0xf0]  ;;  %v12451_v63 = vor.u32 %v17683_v55, %v12450_v53 }
  0x59   :  { %4850 = vmatpush.bf16.msra.mxu3 %v12347_v39  ;;  %v12315_v39 = vor.u32 %v17649_v31, %v12314_v30  ;;  %v17681_v5 = vld [vmem:[%s28269_s3 + $0x5b4] sm:$0xf0]  ;;  %v12226_v6 = vld [vmem:[%s28269_s3 + $0x400] sm:$0xf]  ;;  %v12299_v7 = vor.u32 %v17645_v59, %v12298_v58  ;;  %v17643_v10 = vld [vmem:[%s28269_s3 + $0x484] sm:$0xf0] }
  0x5a   :  { %4806 = vmatmul.bf16.vlgmr.msrb.gmra.mxu3 %v19610_v48  ;;  %v12290_v9 = vld [vmem:[%s28269_s3 + $0x480] sm:$0xf]  ;;  %v12538_v11 = vld [vmem:[%s28269_s3 + $0x670] sm:$0xf]  ;;  %v17721_v15 = vld [vmem:[%s28269_s3 + $0x6f4] sm:$0xf0] }
  0x5b   :  { %4816 = vmatpush.bf16.msra.mxu0 %v12115_v44  ;;  %v17631_v44 = vld [vmem:[%s28269_s3 + $0x424] sm:$0xf0]  ;;  %v12602_v13 = vld [vmem:[%s28269_s3 + $0x6f0] sm:$0xf]  ;;  %v12434_v22 = vld [vmem:[%s28269_s3 + $0x5a0] sm:$0xf]  ;;  %v12291_v23 = vor.u32 %v17643_v10, %v12290_v9 }
  0x5c   :  { %4829 = vmatpush.bf16.msra.mxu1 %v12179_v47  ;;  %4838 = vmatpush.bf16.msra.mxu2 %v12275_v51  ;;  %v12395_v47 = vor.u32 %v17669_v37, %v12394_v35  ;;  %v12243_v50 = vor.u32 %v17631_v44, %v12242_v41  ;;  %v12386_v51 = vld [vmem:[%s28269_s3 + $0x540] sm:$0xf]  ;;  %v137_v27 = vld.sshfl [vmem:[#allocation1 + $0x8] sm:$0xff pattern:$0x73625140]  ;;  %v12603_v28 = vor.u32 %v17721_v15, %v12602_v13 }
  0x5d   :  { %4851 = vmatpush.bf16.msra.mxu3 %v12339_v54  ;;  %v12307_v54 = vor.u32 %v17647_v46, %v12306_v45  ;;  %v12387_v60 = vor.u32 %v17667_v52, %v12386_v51  ;;  %v12530_v30 = vld [vmem:[%s28269_s3 + $0x660] sm:$0xf]  ;;  %v17703_v31 = vld [vmem:[%s28269_s3 + $0x664] sm:$0xf0]  ;;  %v19819_v38 = vpack.c.bf16 %v137_v27, %v137_v27  ;;  %v17661_v40 = vld [vmem:[%s28269_s3 + $0x514] sm:$0xf0] }
  0x5e   :  { %v17719_v35 = vld [vmem:[%s28269_s3 + $0x6e4] sm:$0xf0]  ;;  %v12531_v41 = vor.u32 %v17703_v31, %v12530_v30  ;;  %v12426_v44 = vld [vmem:[%s28269_s3 + $0x590] sm:$0xf]  ;;  %v17677_v45 = vld [vmem:[%s28269_s3 + $0x594] sm:$0xf0] }
  0x5f   :  { %4817 = vmatpush.bf16.msra.mxu0 %v12107_v57  ;;  %v17629_v57 = vld [vmem:[%s28269_s3 + $0x414] sm:$0xf0]  ;;  %v12354_v53 = vld [vmem:[%s28269_s3 + $0x500] sm:$0xf]  ;;  %v12427_v55 = vor.u32 %v17677_v45, %v12426_v44  ;;  %v12666_v58 = vld [vmem:[%s28269_s3 + $0x770] sm:$0xf] }
  0x60   :  { %4830 = vmatpush.bf16.msra.mxu1 %v12171_v61  ;;  %4839 = vmatpush.bf16.msra.mxu2 %v12267_v4  ;;  %v12378_v61 = vld [vmem:[%s28269_s3 + $0x530] sm:$0xf]  ;;  %v12235_v0 = vor.u32 %v17629_v57, %v12234_v56  ;;  %v17717_v52 = vld [vmem:[%s28269_s3 + $0x6d4] sm:$0xf0]  ;;  %v12418_v56 = vld [vmem:[%s28269_s3 + $0x580] sm:$0xf] }
  0x61   :  { %4852 = vmatpush.bf16.msra.mxu3 %v12331_v8  ;;  %v12442_v4 = vld [vmem:[%s28269_s3 + $0x5b0] sm:$0xf]  ;;  %v17627_v8 = vld [vmem:[%s28269_s3 + $0x404] sm:$0xf0]  ;;  %v12379_v14 = vor.u32 %v17665_v62, %v12378_v61  ;;  %v17753_v62 = vld [vmem:[%s28269_s3 + $0x7f4] sm:$0xf0] }
  0x62   :  { %v12443_v18 = vor.u32 %v17681_v5, %v12442_v4  ;;  %v17675_v57 = vld [vmem:[%s28269_s3 + $0x584] sm:$0xf0]  ;;  %v12730_v61 = vld [vmem:[%s28269_s3 + $0x7f0] sm:$0xf]  ;;  %v12578_v5 = vld [vmem:[%s28269_s3 + $0x6c0] sm:$0xf] }
  0x63   :  { %4818 = vmatpush.bf16.msra.mxu0 %v12099_v12  ;;  %v17705_v12 = vld [vmem:[%s28269_s3 + $0x674] sm:$0xf0]  ;;  %v17699_v4 = vld [vmem:[%s28269_s3 + $0x644] sm:$0xf0]  ;;  %v12419_v9 = vor.u32 %v17675_v57, %v12418_v56  ;;  %v12650_v31 = vld [vmem:[%s28269_s3 + $0x750] sm:$0xf] }
  0x64   :  { %4831 = vmatpush.bf16.msra.mxu1 %v12163_v16  ;;  %4840 = vmatpush.bf16.msra.mxu2 %v12259_v20  ;;  %v12370_v16 = vld [vmem:[%s28269_s3 + $0x520] sm:$0xf]  ;;  %v12539_v24 = vor.u32 %v17705_v12, %v12538_v11  ;;  %v139_v11 = vld.sshfl [vmem:[#allocation1 + $0x18] sm:$0xff pattern:$0x73625140]  ;;  %v12731_v12 = vor.u32 %v17753_v62, %v12730_v61 }
  0x65   :  { %4853 = vmatpush.bf16.msra.mxu3 %v12323_v25  ;;  %v136_v20 = vld.sshfl [vmem:[#allocation1] sm:$0xff pattern:$0x73625140]  ;;  %v17679_v25 = vld [vmem:[%s28269_s3 + $0x5a4] sm:$0xf0] }
  0x66   :  { %4819 = vmatmul.bf16.vlgmr.msra.gmra.mxu0 %v19689_v26  ;;  %v12435_v37 = vor.u32 %v17679_v25, %v12434_v22  ;;  %v17735_v15 = vld [vmem:[%s28269_s3 + $0x764] sm:$0xf0]  ;;  %v17697_v22 = vld [vmem:[%s28269_s3 + $0x634] sm:$0xf0]  ;;  %v12554_v56 = vld [vmem:[%s28269_s3 + $0x690] sm:$0xf] }
  0x67   :  { %4863 = vmatpush.bf16.msrb.mxu0 %v12411_v17  ;;  %4832 = vmatmul.bf16.vlgmr.msra.gmra.mxu1 %v19699_v29  ;;  %v17663_v17 = vld [vmem:[%s28269_s3 + $0x524] sm:$0xf0]  ;;  %v17713_v25 = vld [vmem:[%s28269_s3 + $0x6b4] sm:$0xf0] }
  0x68   :  { %4876 = vmatpush.bf16.msrb.mxu1 %v12475_v19  ;;  %4841 = vmatpush.bf16.msra.mxu2 %v12251_v34  ;;  %v12227_v19 = vor.u32 %v17627_v8, %v12226_v6  ;;  %v12594_v34 = vld [vmem:[%s28269_s3 + $0x6e0] sm:$0xf]  ;;  %v138_v8 = vld.sshfl [vmem:[#allocation1 + $0x10] sm:$0xff pattern:$0x73625140] }
  0x69   :  { %4854 = vmatpush.bf16.msra.mxu3 %v12315_v39  ;;  %v12362_v39 = vld [vmem:[%s28269_s3 + $0x510] sm:$0xf]  ;;  %v12595_v46 = vor.u32 %v17719_v35, %v12594_v34  ;;  %v17711_v44 = vld [vmem:[%s28269_s3 + $0x6a4] sm:$0xf0]  ;;  %v17709_v57 = vld [vmem:[%s28269_s3 + $0x694] sm:$0xf0] }
  0x6a   :  { %v12363_v51 = vor.u32 %v17661_v40, %v12362_v39  ;;  %v12714_v34 = vld [vmem:[%s28269_s3 + $0x7d0] sm:$0xf]  ;;  %v12498_v39 = vld [vmem:[%s28269_s3 + $0x620] sm:$0xf]  ;;  %v17695_v40 = vld [vmem:[%s28269_s3 + $0x624] sm:$0xf0] }
  0x6b   :  { %4864 = vmatpush.bf16.msrb.mxu0 %v12403_v32  ;;  %v19811_v32 = vpack.c.bf16 %v136_v20, %v136_v20  ;;  %v12506_v20 = vld [vmem:[%s28269_s3 + $0x630] sm:$0xf]  ;;  %v18127_v21 = vld [vmem:[%s28269_s3 + $0x13a4] sm:$0xf0] }
  0x6c   :  { %4877 = vmatpush.bf16.msrb.mxu1 %v12467_v33  ;;  %4842 = vmatpush.bf16.msra.mxu2 %v12243_v50  ;;  %v12371_v33 = vor.u32 %v17663_v17, %v12370_v16  ;;  %v12586_v50 = vld [vmem:[%s28269_s3 + $0x6d0] sm:$0xf]  ;;  %v12722_v16 = vld [vmem:[%s28269_s3 + $0x7e0] sm:$0xf]  ;;  %v12507_v30 = vor.u32 %v17697_v22, %v12506_v20 }
  0x6d   :  { %4855 = vmatpush.bf16.msra.mxu3 %v12307_v54  ;;  %v17659_v54 = vld [vmem:[%s28269_s3 + $0x504] sm:$0xf0]  ;;  %v12690_v20 = vld [vmem:[%s28269_s3 + $0x7a0] sm:$0xf] }
  0x6e   :  { %v12355_v6 = vor.u32 %v17659_v54, %v12354_v53  ;;  %v17747_v53 = vld [vmem:[%s28269_s3 + $0x7c4] sm:$0xf0]  ;;  %v12490_v54 = vld [vmem:[%s28269_s3 + $0x610] sm:$0xf] }
  0x6f   :  { %4865 = vmatpush.bf16.msrb.mxu0 %v12395_v47  ;;  %v12522_v47 = vld [vmem:[%s28269_s3 + $0x650] sm:$0xf] }
  0x70   :  { %4878 = vmatpush.bf16.msrb.mxu1 %v12459_v49  ;;  %4843 = vmatpush.bf16.msra.mxu2 %v12235_v0  ;;  %v17701_v49 = vld [vmem:[%s28269_s3 + $0x654] sm:$0xf0]  ;;  %v12514_v0 = vld [vmem:[%s28269_s3 + $0x640] sm:$0xf] }
  0x71   :  { %4856 = vmatpush.bf16.msra.mxu3 %v12299_v7  ;;  %v12523_v59 = vor.u32 %v17701_v49, %v12522_v47  ;;  %v17715_v7 = vld [vmem:[%s28269_s3 + $0x6c4] sm:$0xf0]  ;;  %v12515_v13 = vor.u32 %v17699_v4, %v12514_v0  ;;  %v12499_v47 = vor.u32 %v17695_v40, %v12498_v39  ;;  %v12642_v49 = vld [vmem:[%s28269_s3 + $0x740] sm:$0xf]  ;;  %v17745_v0 = vld [vmem:[%s28269_s3 + $0x7b4] sm:$0xf0] }
  0x72   :  { %v12579_v17 = vor.u32 %v17715_v7, %v12578_v5  ;;  %v12482_v4 = vld [vmem:[%s28269_s3 + $0x600] sm:$0xf]  ;;  %v12555_v5 = vor.u32 %v17709_v57, %v12554_v56  ;;  %v17723_v57 = vld [vmem:[%s28269_s3 + $0x704] sm:$0xf0] }
  0x73   :  { %4866 = vmatpush.bf16.msrb.mxu0 %v12387_v60  ;;  %v17737_v60 = vld [vmem:[%s28269_s3 + $0x774] sm:$0xf0]  ;;  %v12546_v7 = vld [vmem:[%s28269_s3 + $0x680] sm:$0xf] }
  0x74   :  { %4879 = vmatpush.bf16.msrb.mxu1 %v12451_v63  ;;  %4844 = vmatpush.bf16.msra.mxu2 %v12227_v19  ;;  %v12587_v63 = vor.u32 %v17717_v52, %v12586_v50  ;;  %v12667_v10 = vor.u32 %v17737_v60, %v12666_v58  ;;  %v17751_v19 = vld [vmem:[%s28269_s3 + $0x7e4] sm:$0xf0]  ;;  %v17729_v60 = vld [vmem:[%s28269_s3 + $0x734] sm:$0xf0]  ;;  %v12610_v56 = vld [vmem:[%s28269_s3 + $0x700] sm:$0xf] }
  0x75   :  { %4857 = vmatpush.bf16.msra.mxu3 %v12291_v23  ;;  %v19903_v23 = vpack.c.bf16 %v139_v11, %v139_v11  ;;  %v17731_v50 = vld [vmem:[%s28269_s3 + $0x744] sm:$0xf0]  ;;  %v12858_v11 = vld [vmem:[%s28269_s3 + $0x8f0] sm:$0xf] }
  0x76   :  { %v12643_v58 = vor.u32 %v17731_v50, %v12642_v49  ;;  %v17741_v49 = vld [vmem:[%s28269_s3 + $0x794] sm:$0xf0] }
  0x77   :  { %4867 = vmatpush.bf16.msrb.mxu0 %v12379_v14  ;;  %4845 = vmatmul.bf16.vlgmr.msra.gmra.mxu2 %v19811_v32  ;;  %v12658_v14 = vld [vmem:[%s28269_s3 + $0x760] sm:$0xf] }
  0x78   :  { %4880 = vmatpush.bf16.msrb.mxu1 %v12443_v18  ;;  %4889 = vmatpush.bf16.msrb.mxu2 %v12539_v24  ;;  %v19892_v18 = vpack.c.bf16 %v138_v8, %v138_v8  ;;  %v12570_v24 = vld [vmem:[%s28269_s3 + $0x6b0] sm:$0xf]  ;;  %v12659_v27 = vor.u32 %v17735_v15, %v12658_v14  ;;  %v17707_v8 = vld [vmem:[%s28269_s3 + $0x684] sm:$0xf0] }
  0x79   :  { %4902 = vmatpush.bf16.msrb.mxu3 %v12603_v28  ;;  %v12723_v28 = vor.u32 %v17751_v19, %v12722_v16  ;;  %v12571_v35 = vor.u32 %v17713_v25, %v12570_v24  ;;  %v140_v14 = vld.sshfl [vmem:[#allocation1 + $0x20] sm:$0xff pattern:$0x73625140]  ;;  %v17727_v19 = vld [vmem:[%s28269_s3 + $0x724] sm:$0xf0]  ;;  %v12547_v22 = vor.u32 %v17707_v8, %v12546_v7 }
  0x7a   :  { %4858 = vmatmul.bf16.vlgmr.msra.gmra.mxu3 %v19819_v38  ;;  %v17743_v25 = vld [vmem:[%s28269_s3 + $0x7a4] sm:$0xf0]  ;;  %v12834_v8 = vld [vmem:[%s28269_s3 + $0x8c0] sm:$0xf] }
  0x7b   :  { %4868 = vmatpush.bf16.msrb.mxu0 %v12371_v33  ;;  %v17733_v33 = vld [vmem:[%s28269_s3 + $0x754] sm:$0xf0]  ;;  %v12691_v39 = vor.u32 %v17743_v25, %v12690_v20  ;;  %v17763_v7 = vld [vmem:[%s28269_s3 + $0x844] sm:$0xf0]  ;;  %v12978_v20 = vld [vmem:[%s28269_s3 + $0x9e0] sm:$0xf] }
  0x7c   :  { %4881 = vmatpush.bf16.msrb.mxu1 %v12435_v37  ;;  %4890 = vmatpush.bf16.msrb.mxu2 %v12531_v41  ;;  %v17749_v37 = vld [vmem:[%s28269_s3 + $0x7d4] sm:$0xf0]  ;;  %v12562_v41 = vld [vmem:[%s28269_s3 + $0x6a0] sm:$0xf]  ;;  %v12651_v45 = vor.u32 %v17733_v33, %v12650_v31  ;;  %v17767_v31 = vld [vmem:[%s28269_s3 + $0x864] sm:$0xf0]  ;;  %v20015_v33 = vpack.c.bf16 %v140_v14, %v140_v14 }
  0x7d   :  { %4903 = vmatpush.bf16.msrb.mxu3 %v12595_v46  ;;  %v12715_v46 = vor.u32 %v17749_v37, %v12714_v34  ;;  %v12563_v52 = vor.u32 %v17711_v44, %v12562_v41  ;;  %v17783_v37 = vld [vmem:[%s28269_s3 + $0x8e4] sm:$0xf0]  ;;  %v12618_v41 = vld [vmem:[%s28269_s3 + $0x710] sm:$0xf]  ;;  %v17725_v44 = vld [vmem:[%s28269_s3 + $0x714] sm:$0xf0] }
  0x7e   :  { %v143_v14 = vld.sshfl [vmem:[#allocation1 + $0x38] sm:$0xff pattern:$0x73625140]  ;;  %v17815_v25 = vld [vmem:[%s28269_s3 + $0x9e4] sm:$0xf0] }
  0x7f   :  { %4869 = vmatpush.bf16.msrb.mxu0 %v12363_v51  ;;  %v12706_v51 = vld [vmem:[%s28269_s3 + $0x7c0] sm:$0xf] }
  0x80   :  { %4882 = vmatpush.bf16.msrb.mxu1 %v12427_v55  ;;  %4891 = vmatpush.bf16.msrb.mxu2 %v12523_v59  ;;  %v17693_v55 = vld [vmem:[%s28269_s3 + $0x614] sm:$0xf0]  ;;  %v12634_v59 = vld [vmem:[%s28269_s3 + $0x730] sm:$0xf]  ;;  %v12707_v61 = vor.u32 %v17747_v53, %v12706_v51 }
  0x81   :  { %4904 = vmatpush.bf16.msrb.mxu3 %v12587_v63  ;;  %v12491_v62 = vor.u32 %v17693_v55, %v12490_v54  ;;  %v12698_v63 = vld [vmem:[%s28269_s3 + $0x7b0] sm:$0xf]  ;;  %v12619_v54 = vor.u32 %v17725_v44, %v12618_v41  ;;  %v17781_v55 = vld [vmem:[%s28269_s3 + $0x8d4] sm:$0xf0] }
  0x82   :  { %v12699_v15 = vor.u32 %v17745_v0, %v12698_v63  ;;  %v12778_v51 = vld [vmem:[%s28269_s3 + $0x850] sm:$0xf]  ;;  %v17801_v63 = vld [vmem:[%s28269_s3 + $0x974] sm:$0xf0] }
  0x83   :  { %4870 = vmatpush.bf16.msrb.mxu0 %v12355_v6  ;;  %v17691_v6 = vld [vmem:[%s28269_s3 + $0x604] sm:$0xf0]  ;;  %v12842_v53 = vld [vmem:[%s28269_s3 + $0x8d0] sm:$0xf]  ;;  %v17797_v44 = vld [vmem:[%s28269_s3 + $0x954] sm:$0xf0] }
  0x84   :  { %4883 = vmatpush.bf16.msrb.mxu1 %v12419_v9  ;;  %4892 = vmatpush.bf16.msrb.mxu2 %v12515_v13  ;;  %v12794_v9 = vld [vmem:[%s28269_s3 + $0x870] sm:$0xf]  ;;  %v17785_v13 = vld [vmem:[%s28269_s3 + $0x8f4] sm:$0xf0]  ;;  %v12483_v16 = vor.u32 %v17691_v6, %v12482_v4  ;;  %v12770_v6 = vld [vmem:[%s28269_s3 + $0x840] sm:$0xf] }
  0x85   :  { %4905 = vmatpush.bf16.msrb.mxu3 %v12579_v17  ;;  %v12626_v17 = vld [vmem:[%s28269_s3 + $0x720] sm:$0xf]  ;;  %v12986_v0 = vld [vmem:[%s28269_s3 + $0x9f0] sm:$0xf]  ;;  %v17817_v4 = vld [vmem:[%s28269_s3 + $0x9f4] sm:$0xf0] }
  0x86   :  { %4871 = vmatmul.bf16.vlgmr.msrb.gmra.mxu0 %v19892_v18  ;;  %v12627_v34 = vor.u32 %v17727_v19, %v12626_v17  ;;  %v12914_v17 = vld [vmem:[%s28269_s3 + $0x960] sm:$0xf]  ;;  %v17799_v19 = vld [vmem:[%s28269_s3 + $0x964] sm:$0xf0]  ;;  %v12906_v41 = vld [vmem:[%s28269_s3 + $0x950] sm:$0xf] }
  0x87   :  { %4915 = vmatpush.bf16.msra.mxu0 %v12667_v10  ;;  %4884 = vmatmul.bf16.vlgmr.msrb.gmra.mxu1 %v19903_v23  ;;  %v17769_v10 = vld [vmem:[%s28269_s3 + $0x874] sm:$0xf0] }
  0x88   :  { %4928 = vmatpush.bf16.msra.mxu1 %v12731_v12  ;;  %4893 = vmatpush.bf16.msrb.mxu2 %v12507_v30  ;;  %v12635_v12 = vor.u32 %v17729_v60, %v12634_v59  ;;  %v12795_v24 = vor.u32 %v17769_v10, %v12794_v9  ;;  %v12786_v30 = vld [vmem:[%s28269_s3 + $0x860] sm:$0xf]  ;;  %v17739_v60 = vld [vmem:[%s28269_s3 + $0x784] sm:$0xf0]  ;;  %v12611_v9 = vor.u32 %v17723_v57, %v12610_v56 }
  0x89   :  { %4906 = vmatpush.bf16.msrb.mxu3 %v12571_v35  ;;  %v12850_v35 = vld [vmem:[%s28269_s3 + $0x8e0] sm:$0xf]  ;;  %v17779_v10 = vld [vmem:[%s28269_s3 + $0x8c4] sm:$0xf0] }
  0x8a   :  { %v12851_v50 = vor.u32 %v17783_v37, %v12850_v35  ;;  %v12674_v59 = vld [vmem:[%s28269_s3 + $0x780] sm:$0xf]  ;;  %v12915_v35 = vor.u32 %v17799_v19, %v12914_v17  ;;  %v12979_v37 = vor.u32 %v17815_v25, %v12978_v20  ;;  %v17795_v57 = vld [vmem:[%s28269_s3 + $0x944] sm:$0xf0]  ;;  %v13050_v17 = vld [vmem:[%s28269_s3 + $0xa70] sm:$0xf] }
  0x8b   :  { %4916 = vmatpush.bf16.msra.mxu0 %v12659_v27  ;;  %v141_v27 = vld.sshfl [vmem:[#allocation1 + $0x28] sm:$0xff pattern:$0x73625140]  ;;  %v17833_v19 = vld [vmem:[%s28269_s3 + $0xa74] sm:$0xf0] }
  0x8c   :  { %4929 = vmatpush.bf16.msra.mxu1 %v12723_v28  ;;  %4894 = vmatpush.bf16.msrb.mxu2 %v12499_v47  ;;  %v12859_v28 = vor.u32 %v17785_v13, %v12858_v11  ;;  %v20023_v40 = vpack.c.bf16 %v141_v27, %v141_v27  ;;  %v12682_v47 = vld [vmem:[%s28269_s3 + $0x790] sm:$0xf]  ;;  %v17849_v25 = vld [vmem:[%s28269_s3 + $0xaf4] sm:$0xf0] }
  0x8d   :  { %4907 = vmatpush.bf16.msrb.mxu3 %v12563_v52  ;;  %v17765_v52 = vld [vmem:[%s28269_s3 + $0x854] sm:$0xf0]  ;;  %v142_v11 = vld.sshfl [vmem:[#allocation1 + $0x30] sm:$0xff pattern:$0x73625140] }
  0x8e   :  { %v12762_v27 = vld [vmem:[%s28269_s3 + $0x830] sm:$0xf] }
  0x8f   :  { %4917 = vmatpush.bf16.msra.mxu0 %v12651_v45  ;;  %v105_v45 = vld [vmem:[%s28266_s0 + $0x20] sm:$0xff]  ;;  %v13114_v20 = vld [vmem:[%s28269_s3 + $0xaf0] sm:$0xf] }
  0x90   :  { %4930 = vmatpush.bf16.msra.mxu1 %v12715_v46  ;;  %4895 = vmatpush.bf16.msrb.mxu2 %v12491_v62  ;;  %v12787_v46 = vor.u32 %v17767_v31, %v12786_v30  ;;  %144 = vst [vmem:[#allocation1] ss:$4 sm:$0xff] %v105_v45  ;;  %v12779_v62 = vor.u32 %v17765_v52, %v12778_v51  ;;  %v12826_v31 = vld [vmem:[%s28269_s3 + $0x8b0] sm:$0xf]  ;;  %v12818_v51 = vld [vmem:[%s28269_s3 + $0x8a0] sm:$0xf] }
  0x91   :  { %4908 = vmatpush.bf16.msrb.mxu3 %v12555_v5  ;;  %v12843_v5 = vor.u32 %v17781_v55, %v12842_v53  ;;  %v20110_v30 = vpack.c.bf16 %v143_v14, %v143_v14  ;;  %v12970_v45 = vld [vmem:[%s28269_s3 + $0x9d0] sm:$0xf]  ;;  %v17775_v52 = vld [vmem:[%s28269_s3 + $0x8a4] sm:$0xf0]  ;;  %v12907_v53 = vor.u32 %v17797_v44, %v12906_v41  ;;  %v13051_v41 = vor.u32 %v17833_v19, %v13050_v17  ;;  %v17881_v17 = vld [vmem:[%s28269_s3 + $0xbf4] sm:$0xf0] }
  0x92   :  { %v17807_v44 = vld [vmem:[%s28269_s3 + $0x9a4] sm:$0xf0] }
  0x93   :  { %4918 = vmatpush.bf16.msra.mxu0 %v12643_v58  ;;  %v12683_v58 = vor.u32 %v17741_v49, %v12682_v47  ;;  %v17813_v47 = vld [vmem:[%s28269_s3 + $0x9d4] sm:$0xf0]  ;;  %v12754_v49 = vld [vmem:[%s28269_s3 + $0x820] sm:$0xf] }
  0x94   :  { %4931 = vmatpush.bf16.msra.mxu1 %v12707_v61  ;;  %4896 = vmatpush.bf16.msrb.mxu2 %v12483_v16  ;;  %v12922_v61 = vld [vmem:[%s28269_s3 + $0x970] sm:$0xf]  ;;  %v12771_v16 = vor.u32 %v17763_v7, %v12770_v6  ;;  %v12971_v55 = vor.u32 %v17813_v47, %v12970_v45  ;;  %v17793_v6 = vld [vmem:[%s28269_s3 + $0x934] sm:$0xf0]  ;;  %v13042_v47 = vld [vmem:[%s28269_s3 + $0xa60] sm:$0xf] }
  0x95   :  { %4909 = vmatpush.bf16.msrb.mxu3 %v12547_v22  ;;  %v12923_v13 = vor.u32 %v17801_v63, %v12922_v61  ;;  %v12835_v22 = vor.u32 %v17779_v10, %v12834_v8  ;;  %v12746_v61 = vld [vmem:[%s28269_s3 + $0x810] sm:$0xf]  ;;  %v17809_v8 = vld [vmem:[%s28269_s3 + $0x9b4] sm:$0xf0] }
  0x96   :  { %v12810_v63 = vld [vmem:[%s28269_s3 + $0x890] sm:$0xf] }
  0x97   :  { %4919 = vmatpush.bf16.msra.mxu0 %v12635_v12  ;;  %4897 = vmatmul.bf16.vlgmr.msrb.gmra.mxu2 %v20015_v33  ;;  %v12675_v12 = vor.u32 %v17739_v60, %v12674_v59  ;;  %v17811_v59 = vld [vmem:[%s28269_s3 + $0x9c4] sm:$0xf0]  ;;  %v12819_v60 = vor.u32 %v17775_v52, %v12818_v51  ;;  %v12954_v7 = vld [vmem:[%s28269_s3 + $0x9b0] sm:$0xf]  ;;  %v13106_v52 = vld [vmem:[%s28269_s3 + $0xae0] sm:$0xf] }
  0x98   :  { %4932 = vmatpush.bf16.msra.mxu1 %v12699_v15  ;;  %4941 = vmatpush.bf16.msra.mxu2 %v12795_v24  ;;  %v12987_v15 = vor.u32 %v17817_v4, %v12986_v0  ;;  %v20099_v24 = vpack.c.bf16 %v142_v11, %v142_v11  ;;  %v17773_v0 = vld [vmem:[%s28269_s3 + $0x894] sm:$0xf0]  ;;  %v12890_v4 = vld [vmem:[%s28269_s3 + $0x930] sm:$0xf]  ;;  %v12738_v11 = vld [vmem:[%s28269_s3 + $0x800] sm:$0xf] }
  0x99   :  { %4954 = vmatpush.bf16.msra.mxu3 %v12859_v28  ;;  %v17761_v28 = vld [vmem:[%s28269_s3 + $0x834] sm:$0xf0]  ;;  %v12811_v14 = vor.u32 %v17773_v0, %v12810_v63  ;;  %v147_v45 = vld.sshfl [vmem:[#allocation1 + $0x8] sm:$0xff pattern:$0x73625140] }
  0x9a   :  { %4910 = vmatmul.bf16.vlgmr.msrb.gmra.mxu3 %v20023_v40  ;;  %v13034_v0 = vld [vmem:[%s28269_s3 + $0xa50] sm:$0xf] }
  0x9b   :  { %4920 = vmatpush.bf16.msra.mxu0 %v12627_v34  ;;  %v17777_v34 = vld [vmem:[%s28269_s3 + $0x8b4] sm:$0xf0] }
  0x9c   :  { %4933 = vmatpush.bf16.msra.mxu1 %v12691_v39  ;;  %4942 = vmatpush.bf16.msra.mxu2 %v12787_v46  ;;  %v12763_v39 = vor.u32 %v17761_v28, %v12762_v27  ;;  %v12827_v46 = vor.u32 %v17777_v34, %v12826_v31  ;;  %v12882_v27 = vld [vmem:[%s28269_s3 + $0x920] sm:$0xf]  ;;  %v17791_v28 = vld [vmem:[%s28269_s3 + $0x924] sm:$0xf0]  ;;  %v12955_v31 = vor.u32 %v17809_v8, %v12954_v7  ;;  %v17845_v7 = vld [vmem:[%s28269_s3 + $0xad4] sm:$0xf0] }
  0x9d   :  { %4955 = vmatpush.bf16.msra.mxu3 %v12851_v50  ;;  %v17759_v50 = vld [vmem:[%s28269_s3 + $0x824] sm:$0xf0]  ;;  %v12883_v51 = vor.u32 %v17791_v28, %v12882_v27  ;;  %v12866_v8 = vld [vmem:[%s28269_s3 + $0x900] sm:$0xf] }
  0x9e   :  { %v12755_v56 = vor.u32 %v17759_v50, %v12754_v49  ;;  %v17831_v49 = vld [vmem:[%s28269_s3 + $0xa64] sm:$0xf0] }
  0x9f   :  { %4921 = vmatpush.bf16.msra.mxu0 %v12619_v54  ;;  %v12898_v54 = vld [vmem:[%s28269_s3 + $0x940] sm:$0xf]  ;;  %v17843_v28 = vld [vmem:[%s28269_s3 + $0xac4] sm:$0xf0] }
  0xa0   :  { %4934 = vmatpush.bf16.msra.mxu1 %v12683_v58  ;;  %4943 = vmatpush.bf16.msra.mxu2 %v12779_v62  ;;  %v12962_v58 = vld [vmem:[%s28269_s3 + $0x9c0] sm:$0xf]  ;;  %v17757_v62 = vld [vmem:[%s28269_s3 + $0x814] sm:$0xf0] }
  0xa1   :  { %4956 = vmatpush.bf16.msra.mxu3 %v12843_v5  ;;  %v12899_v5 = vor.u32 %v17795_v57, %v12898_v54  ;;  %v12747_v10 = vor.u32 %v17757_v62, %v12746_v61  ;;  %v17789_v57 = vld [vmem:[%s28269_s3 + $0x914] sm:$0xf0] }
  0xa2   :  { %v17805_v61 = vld [vmem:[%s28269_s3 + $0x994] sm:$0xf0] }
  0xa3   :  { %4922 = vmatpush.bf16.msra.mxu0 %v12611_v9  ;;  %v12963_v9 = vor.u32 %v17811_v59, %v12962_v58  ;;  %v13043_v59 = vor.u32 %v17831_v49, %v13042_v47  ;;  %v13234_v47 = vld [vmem:[%s28269_s3 + $0xbe0] sm:$0xf] }
  0xa4   :  { %4935 = vmatpush.bf16.msra.mxu1 %v12675_v12  ;;  %4944 = vmatpush.bf16.msra.mxu2 %v12771_v16  ;;  %v17755_v12 = vld [vmem:[%s28269_s3 + $0x804] sm:$0xf0] }
  0xa5   :  { %4957 = vmatpush.bf16.msra.mxu3 %v12835_v22  ;;  %v17771_v16 = vld [vmem:[%s28269_s3 + $0x884] sm:$0xf0]  ;;  %v12891_v22 = vor.u32 %v17793_v6, %v12890_v4  ;;  %v12739_v34 = vor.u32 %v17755_v12, %v12738_v11  ;;  %v17829_v4 = vld [vmem:[%s28269_s3 + $0xa54] sm:$0xf0]  ;;  %v12930_v11 = vld [vmem:[%s28269_s3 + $0x980] sm:$0xf] }
  0xa6   :  { %4923 = vmatmul.bf16.vlgmr.msra.gmra.mxu0 %v20099_v24  ;;  %v17803_v12 = vld [vmem:[%s28269_s3 + $0x984] sm:$0xf0] }
  0xa7   :  { %4967 = vmatpush.bf16.msrb.mxu0 %v12923_v13  ;;  %4936 = vmatmul.bf16.vlgmr.msra.gmra.mxu1 %v20110_v30  ;;  %v106_v13 = vld [vmem:[%s28266_s0 + $0x28] sm:$0xff]  ;;  %v20241_v58 = vpop.f32.mrf.mxu1  ;;  %v20249_v63 = vpop.f32.mrf.mxu0 }
  0xa8   :  { %4980 = vmatpush.bf16.msrb.mxu1 %v12987_v15  ;;  %4945 = vmatpush.bf16.msra.mxu2 %v12763_v39  ;;  %v12802_v15 = vld [vmem:[%s28269_s3 + $0x880] sm:$0xf]  ;;  %145 = vst [vmem:[#allocation1 + $0x20] ss:$4 sm:$0xff] %v106_v13  ;;  %v13178_v13 = vld [vmem:[%s28269_s3 + $0xb70] sm:$0xf] }
  0xa9   :  { %4958 = vmatpush.bf16.msra.mxu3 %v12827_v46  ;;  %v12803_v39 = vor.u32 %v17771_v16, %v12802_v15  ;;  %v13115_v46 = vor.u32 %v17849_v25, %v13114_v20  ;;  %v17865_v15 = vld [vmem:[%s28269_s3 + $0xb74] sm:$0xf0]  ;;  %v13242_v16 = vld [vmem:[%s28269_s3 + $0xbf0] sm:$0xf]  ;;  %v13026_v20 = vld [vmem:[%s28269_s3 + $0xa40] sm:$0xf] }
  0xaa   :  { %v13090_v25 = vld [vmem:[%s28269_s3 + $0xac0] sm:$0xf] }
  0xab   :  { %4968 = vmatpush.bf16.msrb.mxu0 %v12915_v35  ;;  %v146_v35 = vld.sshfl [vmem:[#allocation1] sm:$0xff pattern:$0x73625140]  ;;  %v13091_v49 = vor.u32 %v17843_v28, %v13090_v25  ;;  %v13002_v25 = vld [vmem:[%s28269_s3 + $0xa10] sm:$0xf] }
  0xac   :  { %4981 = vmatpush.bf16.msrb.mxu1 %v12979_v37  ;;  %4946 = vmatpush.bf16.msra.mxu2 %v12755_v56  ;;  %v12946_v37 = vld [vmem:[%s28269_s3 + $0x9a0] sm:$0xf]  ;;  %v20225_v50 = vpack.c.bf16 %v146_v35, %v146_v35  ;;  %v12874_v56 = vld [vmem:[%s28269_s3 + $0x910] sm:$0xf]  ;;  %v13179_v35 = vor.u32 %v17865_v15, %v13178_v13 }
  0xad   :  { %4959 = vmatpush.bf16.msra.mxu3 %v12819_v60  ;;  %v12947_v54 = vor.u32 %v17807_v44, %v12946_v37  ;;  %v12938_v60 = vld [vmem:[%s28269_s3 + $0x990] sm:$0xf]  ;;  %v12875_v6 = vor.u32 %v17789_v57, %v12874_v56  ;;  %v149_v37 = vld.sshfl [vmem:[#allocation1 + $0x18] sm:$0xff pattern:$0x73625140] }
  0xae   :  { %v17825_v56 = vld [vmem:[%s28269_s3 + $0xa34] sm:$0xf0]  ;;  %v20321_v57 = vpack.c.bf16 %v149_v37, %v149_v37 }
  0xaf   :  { %4969 = vmatpush.bf16.msrb.mxu0 %v12907_v53  ;;  %v17847_v53 = vld [vmem:[%s28269_s3 + $0xae4] sm:$0xf0] }
  0xb0   :  { %4982 = vmatpush.bf16.msrb.mxu1 %v12971_v55  ;;  %4947 = vmatpush.bf16.msra.mxu2 %v12747_v10  ;;  %v20233_v55 = vpack.c.bf16 %v147_v45, %v147_v45  ;;  %v13107_v62 = vor.u32 %v17847_v53, %v13106_v52  ;;  %v12939_v10 = vor.u32 %v17805_v61, %v12938_v60  ;;  %v13170_v45 = vld [vmem:[%s28269_s3 + $0xb60] sm:$0xf]  ;;  %v17879_v52 = vld [vmem:[%s28269_s3 + $0xbe4] sm:$0xf0]  ;;  %v1198_v53 = vpop.f32.mrf.mxu0  ;;  %v17841_v60 = vld [vmem:[%s28269_s3 + $0xab4] sm:$0xf0] }
  0xb1   :  { %4960 = vmatpush.bf16.msra.mxu3 %v12811_v14  ;;  %v13035_v14 = vor.u32 %v17829_v4, %v13034_v0  ;;  %v13162_v4 = vld [vmem:[%s28269_s3 + $0xb50] sm:$0xf] }
  0xb2   :  { %v107_v53 = vld [vmem:[%s28266_s0 + $0x30] sm:$0xff] }
  0xb3   :  { %4970 = vmatpush.bf16.msrb.mxu0 %v12899_v5  ;;  %v13098_v5 = vld [vmem:[%s28269_s3 + $0xad0] sm:$0xf] }
  0xb4   :  { %4983 = vmatpush.bf16.msrb.mxu1 %v12963_v9  ;;  %4948 = vmatpush.bf16.msra.mxu2 %v12739_v34  ;;  %v17787_v9 = vld [vmem:[%s28269_s3 + $0x904] sm:$0xf0]  ;;  %v13099_v19 = vor.u32 %v17845_v7, %v13098_v5  ;;  %v12931_v34 = vor.u32 %v17803_v12, %v12930_v11  ;;  %v17861_v5 = vld [vmem:[%s28269_s3 + $0xb54] sm:$0xf0]  ;;  %v13074_v11 = vld [vmem:[%s28269_s3 + $0xaa0] sm:$0xf] }
  0xb5   :  { %4961 = vmatpush.bf16.msra.mxu3 %v12803_v39  ;;  %v12867_v27 = vor.u32 %v17787_v9, %v12866_v8  ;;  %v1211_v39 = vpop.f32.mrf.mxu1  ;;  %v17877_v8 = vld [vmem:[%s28269_s3 + $0xbd4] sm:$0xf0]  ;;  %v13010_v9 = vld [vmem:[%s28269_s3 + $0xa20] sm:$0xf]  ;;  %v17839_v12 = vld [vmem:[%s28269_s3 + $0xaa4] sm:$0xf0]  ;;  %v13163_v13 = vor.u32 %v17861_v5, %v13162_v4 }
  0xb6   :  { %v13370_v4 = vld [vmem:[%s28269_s3 + $0xcf0] sm:$0xf] }
  0xb7   :  { %4971 = vmatpush.bf16.msrb.mxu0 %v12891_v22  ;;  %4949 = vmatmul.bf16.vlgmr.msra.gmra.mxu2 %v20225_v50  ;;  %v17827_v22 = vld [vmem:[%s28269_s3 + $0xa44] sm:$0xf0] }
  0xb8   :  { %4984 = vmatpush.bf16.msrb.mxu1 %v12955_v31  ;;  %4993 = vmatpush.bf16.msrb.mxu2 %v13051_v41  ;;  %v148_v31 = vld.sshfl [vmem:[#allocation1 + $0x10] sm:$0xff pattern:$0x73625140]  ;;  %v13243_v41 = vor.u32 %v17881_v17, %v13242_v16  ;;  %v13027_v44 = vor.u32 %v17827_v22, %v13026_v20  ;;  %v13154_v16 = vld [vmem:[%s28269_s3 + $0xb40] sm:$0xf]  ;;  %v13075_v20 = vor.u32 %v17839_v12, %v13074_v11 }
  0xb9   :  { %5006 = vmatpush.bf16.msrb.mxu3 %v13115_v46  ;;  %v17863_v46 = vld [vmem:[%s28269_s3 + $0xb64] sm:$0xf0]  ;;  %v4742_v28 = vpop.f32.mrf.mxu2  ;;  %154 = vst [vmem:[#allocation1] ss:$4 sm:$0xff] %v107_v53  ;;  %v13290_v53 = vld [vmem:[%s28269_s3 + $0xc50] sm:$0xf] }
  0xba   :  { %4962 = vmatmul.bf16.vlgmr.msra.gmra.mxu3 %v20233_v55  ;;  %v13171_v61 = vor.u32 %v17863_v46, %v13170_v45  ;;  %v17859_v17 = vld [vmem:[%s28269_s3 + $0xb44] sm:$0xf0]  ;;  %v4743_v37 = vadd.f32 %v4742_v28, %v20249_v63  ;;  %v13210_v45 = vld [vmem:[%s28269_s3 + $0xbb0] sm:$0xf]  ;;  %v17873_v46 = vld [vmem:[%s28269_s3 + $0xbb4] sm:$0xf0] }
  0xbb   :  { %4972 = vmatpush.bf16.msrb.mxu0 %v12883_v51  ;;  %v20310_v51 = vpack.c.bf16 %v148_v31, %v148_v31  ;;  %v17875_v22 = vld [vmem:[%s28269_s3 + $0xbc4] sm:$0xf0]  ;;  %v13066_v31 = vld [vmem:[%s28269_s3 + $0xa90] sm:$0xf]  ;;  %v12994_v63 = vld [vmem:[%s28269_s3 + $0xa00] sm:$0xf]  ;;  %v13211_v11 = vor.u32 %v17873_v46, %v13210_v45 }
  0xbc   :  { %4985 = vmatpush.bf16.msrb.mxu1 %v12947_v54  ;;  %4994 = vmatpush.bf16.msrb.mxu2 %v13043_v59  ;;  %v13018_v54 = vld [vmem:[%s28269_s3 + $0xa30] sm:$0xf]  ;;  %v4755_v39 = vpop.f32.mrf.mxu3  ;;  %v17853_v46 = vld [vmem:[%s28269_s3 + $0xb14] sm:$0xf0] }
  0xbd   :  { %5007 = vmatpush.bf16.msrb.mxu3 %v13107_v62  ;;  %v13082_v59 = vld [vmem:[%s28269_s3 + $0xab0] sm:$0xf]  ;;  %v13235_v62 = vor.u32 %v17879_v52, %v13234_v47  ;;  %v13019_v0 = vor.u32 %v17825_v56, %v13018_v54  ;;  %v17819_v52 = vld [vmem:[%s28269_s3 + $0xa04] sm:$0xf0]  ;;  %v4756_v54 = vadd.f32 %v4755_v39, %v4743_v37 }
  0xbe   :  { %v13083_v7 = vor.u32 %v17841_v60, %v13082_v59  ;;  %v13058_v59 = vld [vmem:[%s28269_s3 + $0xa80] sm:$0xf]  ;;  %v17835_v60 = vld [vmem:[%s28269_s3 + $0xa84] sm:$0xf0]  ;;  %v12995_v12 = vor.u32 %v17819_v52, %v12994_v63  ;;  %v13130_v45 = vld [vmem:[%s28269_s3 + $0xb10] sm:$0xf] }
  0xbf   :  { %4973 = vmatpush.bf16.msrb.mxu0 %v12875_v6  ;;  %v13226_v6 = vld [vmem:[%s28269_s3 + $0xbd0] sm:$0xf]  ;;  %v17911_v37 = vld [vmem:[%s28269_s3 + $0xce4] sm:$0xf0]  ;;  %v17869_v63 = vld [vmem:[%s28269_s3 + $0xb94] sm:$0xf0] }
  0xc0   :  { %4986 = vmatpush.bf16.msrb.mxu1 %v12939_v10  ;;  %4995 = vmatpush.bf16.msrb.mxu2 %v13035_v14  ;;  %v17823_v10 = vld [vmem:[%s28269_s3 + $0xa24] sm:$0xf0]  ;;  %v13227_v14 = vor.u32 %v17877_v8, %v13226_v6  ;;  %v17913_v8 = vld [vmem:[%s28269_s3 + $0xcf4] sm:$0xf0] }
  0xc1   :  { %5008 = vmatpush.bf16.msrb.mxu3 %v13099_v19  ;;  %v13011_v15 = vor.u32 %v17823_v10, %v13010_v9  ;;  %v13218_v19 = vld [vmem:[%s28269_s3 + $0xbc0] sm:$0xf]  ;;  %v17855_v10 = vld [vmem:[%s28269_s3 + $0xb24] sm:$0xf0]  ;;  %v4744_v28 = vpop.f32.mrf.mxu2 }
  0xc2   :  { %v13219_v47 = vor.u32 %v17875_v22, %v13218_v19  ;;  %v13138_v9 = vld [vmem:[%s28269_s3 + $0xb20] sm:$0xf]  ;;  %v17871_v19 = vld [vmem:[%s28269_s3 + $0xba4] sm:$0xf0]  ;;  %v13371_v22 = vor.u32 %v17913_v8, %v13370_v4  ;;  %v13434_v8 = vld [vmem:[%s28269_s3 + $0xd70] sm:$0xf] }
  0xc3   :  { %4974 = vmatpush.bf16.msrb.mxu0 %v12867_v27  ;;  %v17821_v27 = vld [vmem:[%s28269_s3 + $0xa14] sm:$0xf0] }
  0xc4   :  { %4987 = vmatpush.bf16.msrb.mxu1 %v12931_v34  ;;  %4996 = vmatpush.bf16.msrb.mxu2 %v13027_v44  ;;  %v17837_v34 = vld [vmem:[%s28269_s3 + $0xa94] sm:$0xf0]  ;;  %v4781_v6 = vpop.f32.mrf.mxu1  ;;  %v4757_v39 = vpop.f32.mrf.mxu3 }
  0xc5   :  { %5009 = vmatpush.bf16.msrb.mxu3 %v13091_v49  ;;  %v17857_v44 = vld [vmem:[%s28269_s3 + $0xb34] sm:$0xf0]  ;;  %v13003_v49 = vor.u32 %v17821_v27, %v13002_v25  ;;  %v13067_v56 = vor.u32 %v17837_v34, %v13066_v31  ;;  %v13298_v25 = vld [vmem:[%s28269_s3 + $0xc60] sm:$0xf]  ;;  %v17895_v27 = vld [vmem:[%s28269_s3 + $0xc64] sm:$0xf0]  ;;  %v13139_v34 = vor.u32 %v17855_v10, %v13138_v9 }
  0xc6   :  { %4975 = vmatmul.bf16.vlgmr.msrb.gmra.mxu0 %v20310_v51  ;;  %v17929_v10 = vld [vmem:[%s28269_s3 + $0xd74] sm:$0xf0]  ;;  %v17927_v39 = vld [vmem:[%s28269_s3 + $0xd64] sm:$0xf0] }
  0xc7   :  { %5019 = vmatpush.bf16.msra.mxu0 %v13179_v35  ;;  %4988 = vmatmul.bf16.vlgmr.msrb.gmra.mxu1 %v20321_v57  ;;  %v13146_v35 = vld [vmem:[%s28269_s3 + $0xb30] sm:$0xf]  ;;  %v153_v28 = vld.sshfl [vmem:[#allocation1 + $0x38] sm:$0xff pattern:$0x73625140] }
  0xc8   :  { %5032 = vmatpush.bf16.msra.mxu1 %v13243_v41  ;;  %4997 = vmatpush.bf16.msrb.mxu2 %v13019_v0  ;;  %v13155_v41 = vor.u32 %v17859_v17, %v13154_v16  ;;  %v17897_v0 = vld [vmem:[%s28269_s3 + $0xc74] sm:$0xf0]  ;;  %v13059_v16 = vor.u32 %v17835_v60, %v13058_v59  ;;  %v13131_v60 = vor.u32 %v17853_v46, %v13130_v45 }
  0xc9   :  { %5010 = vmatpush.bf16.msrb.mxu3 %v13083_v7  ;;  %v13147_v7 = vor.u32 %v17857_v44, %v13146_v35  ;;  %v13362_v35 = vld [vmem:[%s28269_s3 + $0xce0] sm:$0xf] }
  0xca   :  { %v13363_v52 = vor.u32 %v17911_v37, %v13362_v35  ;;  %v13426_v37 = vld [vmem:[%s28269_s3 + $0xd60] sm:$0xf] }
  0xcb   :  { %5020 = vmatpush.bf16.msra.mxu0 %v13171_v61  ;;  %v4768_v61 = vpop.f32.mrf.mxu0 }
  0xcc   :  { %5033 = vmatpush.bf16.msra.mxu1 %v13235_v62  ;;  %4998 = vmatpush.bf16.msrb.mxu2 %v13011_v15  ;;  %v13306_v62 = vld [vmem:[%s28269_s3 + $0xc70] sm:$0xf]  ;;  %v4769_v5 = vadd.f32 %v4768_v61, %v4756_v54  ;;  %v17893_v54 = vld [vmem:[%s28269_s3 + $0xc54] sm:$0xf0]  ;;  %v4783_v4 = vpop.f32.mrf.mxu1 }
  0xcd   :  { %5011 = vmatpush.bf16.msrb.mxu3 %v13075_v20  ;;  %v13307_v17 = vor.u32 %v17897_v0, %v13306_v62  ;;  %v151_v20 = vld.sshfl [vmem:[#allocation1 + $0x28] sm:$0xff pattern:$0x73625140]  ;;  %v17909_v61 = vld [vmem:[%s28269_s3 + $0xcd4] sm:$0xf0]  ;;  %v13291_v9 = vor.u32 %v17893_v54, %v13290_v53 }
  0xce   :  { %v20428_v15 = vadd.f32 %v4781_v6, %v4769_v5  ;;  %v20447_v44 = vpack.c.bf16 %v151_v20, %v151_v20  ;;  %v13122_v62 = vld [vmem:[%s28269_s3 + $0xb00] sm:$0xf]  ;;  %v17851_v0 = vld [vmem:[%s28269_s3 + $0xb04] sm:$0xf0]  ;;  %v13338_v53 = vld [vmem:[%s28269_s3 + $0xcb0] sm:$0xf] }
  0xcf   :  { %5021 = vmatpush.bf16.msra.mxu0 %v13163_v13  ;;  %v150_v13 = vld.sshfl [vmem:[#allocation1 + $0x20] sm:$0xff pattern:$0x73625140]  ;;  %v17907_v20 = vld [vmem:[%s28269_s3 + $0xcc4] sm:$0xf0] }
  0xd0   :  { %5034 = vmatpush.bf16.msra.mxu1 %v13227_v14  ;;  %4999 = vmatpush.bf16.msrb.mxu2 %v13003_v49  ;;  %v13202_v14 = vld [vmem:[%s28269_s3 + $0xba0] sm:$0xf]  ;;  %v20439_v31 = vpack.c.bf16 %v150_v13, %v150_v13  ;;  %v13194_v49 = vld [vmem:[%s28269_s3 + $0xb90] sm:$0xf]  ;;  %v17905_v54 = vld [vmem:[%s28269_s3 + $0xcb4] sm:$0xf0] }
  0xd1   :  { %5012 = vmatpush.bf16.msrb.mxu3 %v13067_v56  ;;  %v13354_v56 = vld [vmem:[%s28269_s3 + $0xcd0] sm:$0xf]  ;;  %v13195_v5 = vor.u32 %v17869_v63, %v13194_v49  ;;  %v13186_v6 = vld [vmem:[%s28269_s3 + $0xb80] sm:$0xf]  ;;  %v17889_v63 = vld [vmem:[%s28269_s3 + $0xc34] sm:$0xf0]  ;;  %v13339_v4 = vor.u32 %v17905_v54, %v13338_v53 }
  0xd2   :  { %v13355_v13 = vor.u32 %v17909_v61, %v13354_v56  ;;  %v13274_v49 = vld [vmem:[%s28269_s3 + $0xc30] sm:$0xf]  ;;  %v13427_v56 = vor.u32 %v17927_v39, %v13426_v37  ;;  %v13250_v53 = vld [vmem:[%s28269_s3 + $0xc00] sm:$0xf]  ;;  %v17883_v54 = vld [vmem:[%s28269_s3 + $0xc04] sm:$0xf0] }
  0xd3   :  { %5022 = vmatpush.bf16.msra.mxu0 %v13155_v41  ;;  %v13203_v41 = vor.u32 %v17871_v19, %v13202_v14  ;;  %v4770_v59 = vpop.f32.mrf.mxu0  ;;  %v13282_v14 = vld [vmem:[%s28269_s3 + $0xc40] sm:$0xf]  ;;  %v13123_v19 = vor.u32 %v17851_v0, %v13122_v62  ;;  %v13418_v61 = vld [vmem:[%s28269_s3 + $0xd50] sm:$0xf]  ;;  %v17925_v62 = vld [vmem:[%s28269_s3 + $0xd54] sm:$0xf0] }
  0xd4   :  { %5035 = vmatpush.bf16.msra.mxu1 %v13219_v47  ;;  %5000 = vmatpush.bf16.msrb.mxu2 %v12995_v12  ;;  %v13299_v47 = vor.u32 %v17895_v27, %v13298_v25  ;;  %v17945_v12 = vld [vmem:[%s28269_s3 + $0xdf4] sm:$0xf0]  ;;  %v13435_v27 = vor.u32 %v17929_v10, %v13434_v8  ;;  %v13482_v0 = vld [vmem:[%s28269_s3 + $0xdd0] sm:$0xf]  ;;  %v13330_v8 = vld [vmem:[%s28269_s3 + $0xca0] sm:$0xf]  ;;  %v13419_v10 = vor.u32 %v17925_v62, %v13418_v61 }
  0xd5   :  { %5013 = vmatpush.bf16.msrb.mxu3 %v13059_v16  ;;  %v17891_v16 = vld [vmem:[%s28269_s3 + $0xc44] sm:$0xf0]  ;;  %v13402_v37 = vld [vmem:[%s28269_s3 + $0xd30] sm:$0xf] }
  0xd6   :  { %v13283_v35 = vor.u32 %v17891_v16, %v13282_v14  ;;  %v17923_v14 = vld [vmem:[%s28269_s3 + $0xd44] sm:$0xf0]  ;;  %v13474_v16 = vld [vmem:[%s28269_s3 + $0xdc0] sm:$0xf] }
  0xd7   :  { %5023 = vmatpush.bf16.msra.mxu0 %v13147_v7  ;;  %5001 = vmatmul.bf16.vlgmr.msrb.gmra.mxu2 %v20439_v31  ;;  %v17867_v7 = vld [vmem:[%s28269_s3 + $0xb84] sm:$0xf0] }
  0xd8   :  { %5036 = vmatpush.bf16.msra.mxu1 %v13211_v11  ;;  %5045 = vmatpush.bf16.msra.mxu2 %v13307_v17  ;;  %v13498_v11 = vld [vmem:[%s28269_s3 + $0xdf0] sm:$0xf]  ;;  %v13346_v17 = vld [vmem:[%s28269_s3 + $0xcc0] sm:$0xf]  ;;  %v13187_v25 = vor.u32 %v17867_v7, %v13186_v6  ;;  %v17887_v7 = vld [vmem:[%s28269_s3 + $0xc24] sm:$0xf0] }
  0xd9   :  { %5058 = vmatpush.bf16.msra.mxu3 %v13371_v22  ;;  %v152_v22 = vld.sshfl [vmem:[#allocation1 + $0x30] sm:$0xff pattern:$0x73625140]  ;;  %v13347_v45 = vor.u32 %v17907_v20, %v13346_v17  ;;  %v13266_v6 = vld [vmem:[%s28269_s3 + $0xc20] sm:$0xf] }
  0xda   :  { %5014 = vmatmul.bf16.vlgmr.msrb.gmra.mxu3 %v20447_v44  ;;  %v20520_v46 = vpack.c.bf16 %v152_v22, %v152_v22  ;;  %v4794_v17 = vpop.f32.mrf.mxu2  ;;  %v17939_v20 = vld [vmem:[%s28269_s3 + $0xdc4] sm:$0xf0]  ;;  %v13258_v22 = vld [vmem:[%s28269_s3 + $0xc10] sm:$0xf] }
  0xdb   :  { %5024 = vmatpush.bf16.msra.mxu0 %v13139_v34  ;;  %v13499_v34 = vor.u32 %v17945_v12, %v13498_v11  ;;  %v13267_v12 = vor.u32 %v17887_v7, %v13266_v6  ;;  %v17899_v61 = vld [vmem:[%s28269_s3 + $0xc84] sm:$0xf0] }
  0xdc   :  { %5037 = vmatpush.bf16.msra.mxu1 %v13203_v41  ;;  %5046 = vmatpush.bf16.msra.mxu2 %v13299_v47  ;;  %v13490_v41 = vld [vmem:[%s28269_s3 + $0xde0] sm:$0xf]  ;;  %v17943_v47 = vld [vmem:[%s28269_s3 + $0xde4] sm:$0xf0] }
  0xdd   :  { %5059 = vmatpush.bf16.msra.mxu3 %v13363_v52  ;;  %v20531_v52 = vpack.c.bf16 %v153_v28, %v153_v28  ;;  %v13491_v59 = vor.u32 %v17943_v47, %v13490_v41  ;;  %v4807_v28 = vpop.f32.mrf.mxu3  ;;  %v17921_v41 = vld [vmem:[%s28269_s3 + $0xd34] sm:$0xf0] }
  0xdf   :  { %5025 = vmatpush.bf16.msra.mxu0 %v13131_v60  ;;  %v13275_v60 = vor.u32 %v17889_v63, %v13274_v49  ;;  %v13475_v49 = vor.u32 %v17939_v20, %v13474_v16  ;;  %v13458_v16 = vld [vmem:[%s28269_s3 + $0xda0] sm:$0xf] }
  0xe0   :  { %5038 = vmatpush.bf16.msra.mxu1 %v13195_v5  ;;  %5047 = vmatpush.bf16.msra.mxu2 %v13291_v9  ;;  %v17941_v5 = vld [vmem:[%s28269_s3 + $0xdd4] sm:$0xf0]  ;;  %v17903_v9 = vld [vmem:[%s28269_s3 + $0xca4] sm:$0xf0] }
  0xe1   :  { %5060 = vmatpush.bf16.msra.mxu3 %v13355_v13  ;;  %v13483_v11 = vor.u32 %v17941_v5, %v13482_v0  ;;  %v13410_v13 = vld [vmem:[%s28269_s3 + $0xd40] sm:$0xf]  ;;  %v13562_v0 = vld [vmem:[%s28269_s3 + $0xe70] sm:$0xf] }
  0xe2   :  { %v13411_v39 = vor.u32 %v17923_v14, %v13410_v13  ;;  %v13626_v5 = vld [vmem:[%s28269_s3 + $0xef0] sm:$0xf]  ;;  %v13251_v13 = vor.u32 %v17883_v54, %v13250_v53  ;;  %v156_v14 = vld.sshfl [vmem:[#allocation1] sm:$0xff pattern:$0x73625140] }
  0xe3   :  { %5026 = vmatpush.bf16.msra.mxu0 %v13123_v19  ;;  %v13331_v19 = vor.u32 %v17903_v9, %v13330_v8  ;;  %v4820_v62 = vpop.f32.mrf.mxu0  ;;  %v13403_v8 = vor.u32 %v17921_v41, %v13402_v37  ;;  %v17977_v9 = vld [vmem:[%s28269_s3 + $0xef4] sm:$0xf0] }
  0xe4   :  { %5039 = vmatpush.bf16.msra.mxu1 %v13187_v25  ;;  %5048 = vmatpush.bf16.msra.mxu2 %v13283_v35  ;;  %v17885_v25 = vld [vmem:[%s28269_s3 + $0xc14] sm:$0xf0]  ;;  %v4833_v7 = vpop.f32.mrf.mxu1 }
  0xe5   :  { %5061 = vmatpush.bf16.msra.mxu3 %v13347_v45  ;;  %v17901_v35 = vld [vmem:[%s28269_s3 + $0xc94] sm:$0xf0]  ;;  %v13259_v63 = vor.u32 %v17885_v25, %v13258_v22  ;;  %v17935_v22 = vld [vmem:[%s28269_s3 + $0xda4] sm:$0xf0]  ;;  %v4809_v37 = vpop.f32.mrf.mxu3 }
  0xe6   :  { %5027 = vmatmul.bf16.vlgmr.msra.gmra.mxu0 %v20520_v46  ;;  %v17937_v45 = vld [vmem:[%s28269_s3 + $0xdb4] sm:$0xf0]  ;;  %v157_v25 = vld.sshfl [vmem:[#allocation1 + $0x8] sm:$0xff pattern:$0x73625140] }
  0xe7   :  { %5071 = vmatpush.bf16.msrb.mxu0 %v13435_v27  ;;  %5040 = vmatmul.bf16.vlgmr.msra.gmra.mxu1 %v20531_v52  ;;  %v4795_v27 = vadd.f32 %v4794_v17, %v20428_v15  ;;  %v13466_v15 = vld [vmem:[%s28269_s3 + $0xdb0] sm:$0xf]  ;;  %v17917_v53 = vld [vmem:[%s28269_s3 + $0xd14] sm:$0xf0] }
  0xe8   :  { %5084 = vmatpush.bf16.msrb.mxu1 %v13499_v34  ;;  %5049 = vmatpush.bf16.msra.mxu2 %v13275_v60  ;;  %v13322_v34 = vld [vmem:[%s28269_s3 + $0xc90] sm:$0xf]  ;;  %v13314_v60 = vld [vmem:[%s28269_s3 + $0xc80] sm:$0xf] }
  0xe9   :  { %5062 = vmatpush.bf16.msra.mxu3 %v13339_v4  ;;  %v4808_v47 = vadd.f32 %v4807_v28, %v4795_v27  ;;  %v17961_v4 = vld [vmem:[%s28269_s3 + $0xe74] sm:$0xf0]  ;;  %v4796_v27 = vpop.f32.mrf.mxu2  ;;  %v13627_v28 = vor.u32 %v17977_v9, %v13626_v5  ;;  %v158_v37 = vld.sshfl [vmem:[#allocation1 + $0x10] sm:$0xff pattern:$0x73625140] }
  0xea   :  { %v13563_v20 = vor.u32 %v17961_v4, %v13562_v0  ;;  %v13610_v0 = vld [vmem:[%s28269_s3 + $0xed0] sm:$0xf]  ;;  %v17955_v27 = vld [vmem:[%s28269_s3 + $0xe44] sm:$0xf0] }
  0xeb   :  { %5072 = vmatpush.bf16.msrb.mxu0 %v13427_v56  ;;  %v108_v56 = vld [vmem:[%s28266_s0 + $0x38] sm:$0xff]  ;;  %v4821_v6 = vadd.f32 %v4820_v62, %v4808_v47  ;;  %v13459_v47 = vor.u32 %v17935_v22, %v13458_v16  ;;  %v4822_v4 = vpop.f32.mrf.mxu0 }
  0xec   :  { %5085 = vmatpush.bf16.msrb.mxu1 %v13491_v59  ;;  %5050 = vmatpush.bf16.msra.mxu2 %v13267_v12  ;;  %v13323_v59 = vor.u32 %v17901_v35, %v13322_v34  ;;  %155 = vst [vmem:[#allocation1 + $0x20] ss:$4 sm:$0xff] %v108_v56  ;;  %v13467_v12 = vor.u32 %v17937_v45, %v13466_v15  ;;  %v13554_v34 = vld [vmem:[%s28269_s3 + $0xe60] sm:$0xf]  ;;  %v17959_v35 = vld [vmem:[%s28269_s3 + $0xe64] sm:$0xf0]  ;;  %v4835_v9 = vpop.f32.mrf.mxu1 }
  0xed   :  { %5063 = vmatpush.bf16.msra.mxu3 %v13331_v19  ;;  %v20638_v17 = vadd.f32 %v4833_v7, %v4821_v6  ;;  %v13315_v19 = vor.u32 %v17899_v61, %v13314_v60  ;;  %v13618_v15 = vld [vmem:[%s28269_s3 + $0xee0] sm:$0xf]  ;;  %v17975_v45 = vld [vmem:[%s28269_s3 + $0xee4] sm:$0xf0]  ;;  %v13555_v54 = vor.u32 %v17959_v35, %v13554_v34  ;;  %v13450_v56 = vld [vmem:[%s28269_s3 + $0xd90] sm:$0xf] }
  0xee   :  { %v13619_v60 = vor.u32 %v17975_v45, %v13618_v15  ;;  %v13546_v61 = vld [vmem:[%s28269_s3 + $0xe50] sm:$0xf]  ;;  %v17957_v62 = vld [vmem:[%s28269_s3 + $0xe54] sm:$0xf0]  ;;  %v13378_v7 = vld [vmem:[%s28269_s3 + $0xd00] sm:$0xf] }
  0xef   :  { %5073 = vmatpush.bf16.msrb.mxu0 %v13419_v10  ;;  %v13394_v10 = vld [vmem:[%s28269_s3 + $0xd20] sm:$0xf]  ;;  %v17973_v6 = vld [vmem:[%s28269_s3 + $0xed4] sm:$0xf0]  ;;  %v17971_v35 = vld [vmem:[%s28269_s3 + $0xec4] sm:$0xf0] }
  0xf0   :  { %5086 = vmatpush.bf16.msrb.mxu1 %v13483_v11  ;;  %v17919_v11 = vld [vmem:[%s28269_s3 + $0xd24] sm:$0xf0]  ;;  %5051 = vmatpush.bf16.msra.mxu2 %v13259_v63  ;;  %v13386_v63 = vld [vmem:[%s28269_s3 + $0xd10] sm:$0xf]  ;;  %v17993_v16 = vld [vmem:[%s28269_s3 + $0xf74] sm:$0xf0]  ;;  %v13611_v22 = vor.u32 %v17973_v6, %v13610_v0 }
  0xf1   :  { %5064 = vmatpush.bf16.msra.mxu3 %v13323_v59  ;;  %v13395_v41 = vor.u32 %v17919_v11, %v13394_v10  ;;  %v17933_v59 = vld [vmem:[%s28269_s3 + $0xd94] sm:$0xf0]  ;;  %v13387_v5 = vor.u32 %v17917_v53, %v13386_v63  ;;  %v13442_v11 = vld [vmem:[%s28269_s3 + $0xd80] sm:$0xf] }
  0xf2   :  { %v13451_v10 = vor.u32 %v17933_v59, %v13450_v56  ;;  %v159_v45 = vld.sshfl [vmem:[#allocation1 + $0x18] sm:$0xff pattern:$0x73625140]  ;;  %v13682_v53 = vld [vmem:[%s28269_s3 + $0xf60] sm:$0xf] }
  0xf3   :  { %5074 = vmatpush.bf16.msrb.mxu0 %v13411_v39  ;;  %v20649_v39 = vpack.c.bf16 %v156_v14, %v156_v14  ;;  %v13547_v14 = vor.u32 %v17957_v62, %v13546_v61  ;;  %v13746_v56 = vld [vmem:[%s28269_s3 + $0xfe0] sm:$0xf]  ;;  %v18007_v61 = vld [vmem:[%s28269_s3 + $0xfe4] sm:$0xf0]  ;;  %v13530_v62 = vld [vmem:[%s28269_s3 + $0xe30] sm:$0xf]  ;;  %v20741_v4 = vpack.c.bf16 %v159_v45, %v159_v45 }
  0xf4   :  { %5087 = vmatpush.bf16.msrb.mxu1 %v13475_v49  ;;  %5052 = vmatpush.bf16.msra.mxu2 %v13251_v13  ;;  %v20657_v49 = vpack.c.bf16 %v157_v25, %v157_v25  ;;  %v13690_v13 = vld [vmem:[%s28269_s3 + $0xf70] sm:$0xf]  ;;  %v13538_v25 = vld [vmem:[%s28269_s3 + $0xe40] sm:$0xf]  ;;  %v17953_v0 = vld [vmem:[%s28269_s3 + $0xe34] sm:$0xf0] }
  0xf5   :  { %5065 = vmatpush.bf16.msra.mxu3 %v13315_v19  ;;  %v13754_v19 = vld [vmem:[%s28269_s3 + $0xff0] sm:$0xf]  ;;  %v13691_v15 = vor.u32 %v17993_v16, %v13690_v13  ;;  %v13539_v63 = vor.u32 %v17955_v27, %v13538_v25  ;;  %v17969_v6 = vld [vmem:[%s28269_s3 + $0xeb4] sm:$0xf0]  ;;  %v13531_v9 = vor.u32 %v17953_v0, %v13530_v62  ;;  %v13522_v16 = vld [vmem:[%s28269_s3 + $0xe20] sm:$0xf] }
  0xf6   :  { %v18003_v45 = vld [vmem:[%s28269_s3 + $0xfc4] sm:$0xf0]  ;;  %v17985_v0 = vld [vmem:[%s28269_s3 + $0xf34] sm:$0xf0] }
  0xf7   :  { %5075 = vmatpush.bf16.msrb.mxu0 %v13403_v8  ;;  %5053 = vmatmul.bf16.vlgmr.msra.gmra.mxu2 %v20649_v39  ;;  %v17915_v8 = vld [vmem:[%s28269_s3 + $0xd04] sm:$0xf0] }
  0xf8   :  { %5088 = vmatpush.bf16.msrb.mxu1 %v13467_v12  ;;  %5097 = vmatpush.bf16.msrb.mxu2 %v13563_v20  ;;  %v17931_v12 = vld [vmem:[%s28269_s3 + $0xd84] sm:$0xf0]  ;;  %v18009_v20 = vld [vmem:[%s28269_s3 + $0xff4] sm:$0xf0]  ;;  %v13379_v34 = vor.u32 %v17915_v8, %v13378_v7  ;;  %v13747_v8 = vor.u32 %v18007_v61, %v13746_v56  ;;  %v13578_v56 = vld [vmem:[%s28269_s3 + $0xe90] sm:$0xf] }
  0xf9   :  { %5110 = vmatpush.bf16.msrb.mxu3 %v13627_v28  ;;  %v13602_v28 = vld [vmem:[%s28269_s3 + $0xec0] sm:$0xf]  ;;  %v13658_v61 = vld [vmem:[%s28269_s3 + $0xf30] sm:$0xf] }
  0xfa   :  { %5066 = vmatmul.bf16.vlgmr.msra.gmra.mxu3 %v20657_v49  ;;  %v13603_v59 = vor.u32 %v17971_v35, %v13602_v28  ;;  %v17987_v35 = vld [vmem:[%s28269_s3 + $0xf44] sm:$0xf0] }
  0xfb   :  { %5076 = vmatpush.bf16.msrb.mxu0 %v13395_v41  ;;  %v13443_v41 = vor.u32 %v17931_v12, %v13442_v11  ;;  %v17989_v11 = vld [vmem:[%s28269_s3 + $0xf54] sm:$0xf0]  ;;  %v13738_v12 = vld [vmem:[%s28269_s3 + $0xfd0] sm:$0xf] }
  0xfc   :  { %5089 = vmatpush.bf16.msrb.mxu1 %v13459_v47  ;;  %5098 = vmatpush.bf16.msrb.mxu2 %v13555_v54  ;;  %v13755_v47 = vor.u32 %v18009_v20, %v13754_v19  ;;  %v17991_v54 = vld [vmem:[%s28269_s3 + $0xf64] sm:$0xf0]  ;;  %v13586_v20 = vld [vmem:[%s28269_s3 + $0xea0] sm:$0xf] }
  0xfd   :  { %5111 = vmatpush.bf16.msrb.mxu3 %v13619_v60  ;;  %v20730_v60 = vpack.c.bf16 %v158_v37, %v158_v37  ;;  %v13683_v7 = vor.u32 %v17991_v54, %v13682_v53  ;;  %v17951_v19 = vld [vmem:[%s28269_s3 + $0xe24] sm:$0xf0]  ;;  %v13730_v37 = vld [vmem:[%s28269_s3 + $0xfc0] sm:$0xf]  ;;  %v4859_v54 = vpop.f32.mrf.mxu3 }
  0xfe   :  { %v13523_v28 = vor.u32 %v17951_v19, %v13522_v16  ;;  %v13818_v19 = vld [vmem:[%s28269_s3 + $0x1070] sm:$0xf] }
  0xff   :  { %5077 = vmatpush.bf16.msrb.mxu0 %v13387_v5  ;;  %v13594_v5 = vld [vmem:[%s28269_s3 + $0xeb0] sm:$0xf] }
 0x100   :  { %5090 = vmatpush.bf16.msrb.mxu1 %v13451_v10  ;;  %5099 = vmatpush.bf16.msrb.mxu2 %v13547_v14  ;;  %v13674_v10 = vld [vmem:[%s28269_s3 + $0xf50] sm:$0xf]  ;;  %v13595_v13 = vor.u32 %v17969_v6, %v13594_v5  ;;  %v18005_v14 = vld [vmem:[%s28269_s3 + $0xfd4] sm:$0xf0] }
 0x101   :  { %5112 = vmatpush.bf16.msrb.mxu3 %v13611_v22  ;;  %v17967_v22 = vld [vmem:[%s28269_s3 + $0xea4] sm:$0xf0]  ;;  %v13675_v25 = vor.u32 %v17989_v11, %v13674_v10  ;;  %v13739_v27 = vor.u32 %v18005_v14, %v13738_v12  ;;  %v18001_v5 = vld [vmem:[%s28269_s3 + $0xfb4] sm:$0xf0]  ;;  %v109_v11 = vld [vmem:[%s28266_s0 + $0x40] sm:$0xff] }
 0x102   :  { %v17947_v10 = vld [vmem:[%s28269_s3 + $0xe04] sm:$0xf0]  ;;  %164 = vst [vmem:[#allocation1] ss:$4 sm:$0xff] %v109_v11 }
 0x103   :  { %5078 = vmatpush.bf16.msrb.mxu0 %v13379_v34  ;;  %v13666_v34 = vld [vmem:[%s28269_s3 + $0xf40] sm:$0xf]  ;;  %v17963_v14 = vld [vmem:[%s28269_s3 + $0xe84] sm:$0xf0]  ;;  %v4872_v16 = vpop.f32.mrf.mxu0 }
 0x104   :  { %5091 = vmatpush.bf16.msrb.mxu1 %v13443_v41  ;;  %5100 = vmatpush.bf16.msrb.mxu2 %v13539_v63  ;;  %v4846_v41 = vpop.f32.mrf.mxu2  ;;  %v17949_v63 = vld [vmem:[%s28269_s3 + $0xe14] sm:$0xf0]  ;;  %v13667_v62 = vor.u32 %v17987_v35, %v13666_v34  ;;  %v13650_v35 = vld [vmem:[%s28269_s3 + $0xf20] sm:$0xf] }
 0x105   :  { %5113 = vmatpush.bf16.msrb.mxu3 %v13603_v59  ;;  %v4847_v53 = vadd.f32 %v4846_v41, %v20638_v17  ;;  %v17965_v59 = vld [vmem:[%s28269_s3 + $0xe94] sm:$0xf0]  ;;  %v13722_v17 = vld [vmem:[%s28269_s3 + $0xfb0] sm:$0xf] }
 0x106   :  { %5079 = vmatmul.bf16.vlgmr.msrb.gmra.mxu0 %v20730_v60  ;;  %v13579_v12 = vor.u32 %v17965_v59, %v13578_v56  ;;  %v18041_v34 = vld [vmem:[%s28269_s3 + $0x10f4] sm:$0xf0]  ;;  %v13723_v41 = vor.u32 %v18001_v5, %v13722_v17  ;;  %v17999_v56 = vld [vmem:[%s28269_s3 + $0xfa4] sm:$0xf0]  ;;  %v4861_v5 = vpop.f32.mrf.mxu3 }
 0x107   :  { %5123 = vmatpush.bf16.msra.mxu0 %v13691_v15  ;;  %5092 = vmatmul.bf16.vlgmr.msrb.gmra.mxu1 %v20741_v4  ;;  %v13587_v15 = vor.u32 %v17967_v22, %v13586_v20  ;;  %v4860_v6 = vadd.f32 %v4859_v54, %v4847_v53  ;;  %v18025_v20 = vld [vmem:[%s28269_s3 + $0x1074] sm:$0xf0]  ;;  %v13882_v22 = vld [vmem:[%s28269_s3 + $0x10f0] sm:$0xf]  ;;  %v18023_v17 = vld [vmem:[%s28269_s3 + $0x1064] sm:$0xf0] }
 0x108   :  { %5136 = vmatpush.bf16.msra.mxu1 %v13755_v47  ;;  %5101 = vmatpush.bf16.msrb.mxu2 %v13531_v9  ;;  %v13514_v47 = vld [vmem:[%s28269_s3 + $0xe10] sm:$0xf]  ;;  %v13506_v9 = vld [vmem:[%s28269_s3 + $0xe00] sm:$0xf]  ;;  %v13819_v54 = vor.u32 %v18025_v20, %v13818_v19  ;;  %v17997_v19 = vld [vmem:[%s28269_s3 + $0xf94] sm:$0xf0] }
 0x109   :  { %5114 = vmatpush.bf16.msrb.mxu3 %v13595_v13  ;;  %v13570_v13 = vld [vmem:[%s28269_s3 + $0xe80] sm:$0xf]  ;;  %v161_v59 = vld.sshfl [vmem:[#allocation1 + $0x28] sm:$0xff pattern:$0x73625140] }
 0x10a   :  { %v13571_v53 = vor.u32 %v17963_v14, %v13570_v13  ;;  %v20867_v11 = vpack.c.bf16 %v161_v59, %v161_v59  ;;  %v17981_v13 = vld [vmem:[%s28269_s3 + $0xf14] sm:$0xf0]  ;;  %v18019_v5 = vld [vmem:[%s28269_s3 + $0x1044] sm:$0xf0] }
 0x10b   :  { %5124 = vmatpush.bf16.msra.mxu0 %v13683_v7  ;;  %v13731_v7 = vor.u32 %v18003_v45, %v13730_v37  ;;  %v17983_v37 = vld [vmem:[%s28269_s3 + $0xf24] sm:$0xf0]  ;;  %v160_v45 = vld.sshfl [vmem:[#allocation1 + $0x20] sm:$0xff pattern:$0x73625140] }
 0x10c   :  { %5137 = vmatpush.bf16.msra.mxu1 %v13747_v8  ;;  %5102 = vmatpush.bf16.msrb.mxu2 %v13523_v28  ;;  %v13515_v8 = vor.u32 %v17949_v63, %v13514_v47  ;;  %v13659_v28 = vor.u32 %v17985_v0, %v13658_v61  ;;  %v13714_v47 = vld [vmem:[%s28269_s3 + $0xfa0] sm:$0xf]  ;;  %v4848_v61 = vpop.f32.mrf.mxu2  ;;  %v18057_v59 = vld [vmem:[%s28269_s3 + $0x1174] sm:$0xf0] }
 0x10d   :  { %5115 = vmatpush.bf16.msrb.mxu3 %v13587_v15  ;;  %v13507_v15 = vor.u32 %v17947_v10, %v13506_v9  ;;  %v13810_v0 = vld [vmem:[%s28269_s3 + $0x1060] sm:$0xf]  ;;  %v18039_v9 = vld [vmem:[%s28269_s3 + $0x10e4] sm:$0xf0]  ;;  %v13715_v10 = vor.u32 %v17999_v56, %v13714_v47  ;;  %v14010_v61 = vld [vmem:[%s28269_s3 + $0x11f0] sm:$0xf] }
 0x10e   :  { %v13811_v14 = vor.u32 %v18023_v17, %v13810_v0  ;;  %v13698_v47 = vld [vmem:[%s28269_s3 + $0xf80] sm:$0xf] }
 0x10f   :  { %5125 = vmatpush.bf16.msra.mxu0 %v13675_v25  ;;  %v4873_v25 = vadd.f32 %v4872_v16, %v4860_v6  ;;  %v20859_v6 = vpack.c.bf16 %v160_v45, %v160_v45  ;;  %v13706_v16 = vld [vmem:[%s28269_s3 + $0xf90] sm:$0xf]  ;;  %v13794_v17 = vld [vmem:[%s28269_s3 + $0x1040] sm:$0xf] }
 0x110   :  { %5138 = vmatpush.bf16.msra.mxu1 %v13739_v27  ;;  %v4885_v27 = vpop.f32.mrf.mxu1  ;;  %5103 = vmatpush.bf16.msrb.mxu2 %v13515_v8  ;;  %v13874_v8 = vld [vmem:[%s28269_s3 + $0x10e0] sm:$0xf]  ;;  %v13707_v45 = vor.u32 %v17997_v19, %v13706_v16  ;;  %v13795_v19 = vor.u32 %v18019_v5, %v13794_v17  ;;  %v18015_v5 = vld [vmem:[%s28269_s3 + $0x1024] sm:$0xf0] }
 0x111   :  { %v20848_v63 = vadd.f32 %v4885_v27, %v4873_v25  ;;  %5116 = vmatpush.bf16.msrb.mxu3 %v13579_v12  ;;  %v13642_v12 = vld [vmem:[%s28269_s3 + $0xf10] sm:$0xf]  ;;  %v13875_v20 = vor.u32 %v18039_v9, %v13874_v8  ;;  %v18021_v25 = vld [vmem:[%s28269_s3 + $0x1054] sm:$0xf0]  ;;  %v18035_v9 = vld [vmem:[%s28269_s3 + $0x10c4] sm:$0xf0] }
 0x112   :  { %v13866_v27 = vld [vmem:[%s28269_s3 + $0x10d0] sm:$0xf]  ;;  %v13778_v17 = vld [vmem:[%s28269_s3 + $0x1020] sm:$0xf] }
 0x113   :  { %5126 = vmatpush.bf16.msra.mxu0 %v13667_v62  ;;  %v13883_v62 = vor.u32 %v18041_v34, %v13882_v22  ;;  %v13802_v22 = vld [vmem:[%s28269_s3 + $0x1050] sm:$0xf]  ;;  %v13643_v34 = vor.u32 %v17981_v13, %v13642_v12 }
 0x114   :  { %5139 = vmatpush.bf16.msra.mxu1 %v13731_v7  ;;  %v13651_v7 = vor.u32 %v17983_v37, %v13650_v35  ;;  %5104 = vmatpush.bf16.msrb.mxu2 %v13507_v15  ;;  %v18037_v35 = vld [vmem:[%s28269_s3 + $0x10d4] sm:$0xf0]  ;;  %v13634_v37 = vld [vmem:[%s28269_s3 + $0xf00] sm:$0xf]  ;;  %v13803_v56 = vor.u32 %v18021_v25, %v13802_v22  ;;  %v18055_v22 = vld [vmem:[%s28269_s3 + $0x1164] sm:$0xf0] }
 0x115   :  { %5117 = vmatpush.bf16.msrb.mxu3 %v13571_v53  ;;  %v17995_v53 = vld [vmem:[%s28269_s3 + $0xf84] sm:$0xf0]  ;;  %v13867_v0 = vor.u32 %v18037_v35, %v13866_v27  ;;  %v14002_v25 = vld [vmem:[%s28269_s3 + $0x11e0] sm:$0xf]  ;;  %v13786_v35 = vld [vmem:[%s28269_s3 + $0x1030] sm:$0xf] }
 0x116   :  { %v13699_v12 = vor.u32 %v17995_v53, %v13698_v47 }
 0x117   :  { %5127 = vmatpush.bf16.msra.mxu0 %v13659_v28  ;;  %v4874_v28 = vpop.f32.mrf.mxu0  ;;  %5105 = vmatmul.bf16.vlgmr.msrb.gmra.mxu2 %v20859_v6 }
 0x118   :  { %5140 = vmatpush.bf16.msra.mxu1 %v13723_v41  ;;  %5149 = vmatpush.bf16.msra.mxu2 %v13819_v54  ;;  %v17979_v41 = vld [vmem:[%s28269_s3 + $0xf04] sm:$0xf0]  ;;  %v4887_v15 = vpop.f32.mrf.mxu1  ;;  %v13946_v54 = vld [vmem:[%s28269_s3 + $0x1170] sm:$0xf] }
 0x119   :  { %5162 = vmatpush.bf16.msra.mxu3 %v13883_v62  ;;  %v18073_v62 = vld [vmem:[%s28269_s3 + $0x11f4] sm:$0xf0]  ;;  %v13635_v8 = vor.u32 %v17979_v41, %v13634_v37  ;;  %v13947_v13 = vor.u32 %v18057_v59, %v13946_v54  ;;  %v13850_v15 = vld [vmem:[%s28269_s3 + $0x10b0] sm:$0xf] }
 0x11a   :  { %5118 = vmatmul.bf16.vlgmr.msrb.gmra.mxu3 %v20867_v11  ;;  %v14011_v16 = vor.u32 %v18073_v62, %v14010_v61  ;;  %v18017_v37 = vld [vmem:[%s28269_s3 + $0x1034] sm:$0xf0]  ;;  %v13994_v61 = vld [vmem:[%s28269_s3 + $0x11d0] sm:$0xf] }
 0x11b   :  { %5128 = vmatpush.bf16.msra.mxu0 %v13651_v7  ;;  %v13858_v7 = vld [vmem:[%s28269_s3 + $0x10c0] sm:$0xf]  ;;  %v13787_v54 = vor.u32 %v18017_v37, %v13786_v35  ;;  %v18053_v59 = vld [vmem:[%s28269_s3 + $0x1154] sm:$0xf0]  ;;  %v13834_v37 = vld [vmem:[%s28269_s3 + $0x1090] sm:$0xf] }
 0x11c   :  { %5141 = vmatpush.bf16.msra.mxu1 %v13715_v10  ;;  %5150 = vmatpush.bf16.msra.mxu2 %v13811_v14  ;;  %v162_v10 = vld.sshfl [vmem:[#allocation1 + $0x30] sm:$0xff pattern:$0x73625140]  ;;  %v163_v14 = vld.sshfl [vmem:[#allocation1 + $0x38] sm:$0xff pattern:$0x73625140]  ;;  %v13859_v27 = vor.u32 %v18035_v9, %v13858_v7 }
 0x11d   :  { %5163 = vmatpush.bf16.msra.mxu3 %v13875_v20  ;;  %v13938_v20 = vld [vmem:[%s28269_s3 + $0x1160] sm:$0xf]  ;;  %v20940_v28 = vpack.c.bf16 %v162_v10, %v162_v10  ;;  %v20951_v41 = vpack.c.bf16 %v163_v14, %v163_v14  ;;  %v18051_v14 = vld [vmem:[%s28269_s3 + $0x1144] sm:$0xf0]  ;;  %v4911_v35 = vpop.f32.mrf.mxu3 }
 0x11e   :  { %v13939_v47 = vor.u32 %v18055_v22, %v13938_v20  ;;  %v13842_v7 = vld [vmem:[%s28269_s3 + $0x10a0] sm:$0xf]  ;;  %v18067_v22 = vld [vmem:[%s28269_s3 + $0x11c4] sm:$0xf0] }
 0x11f   :  { %5129 = vmatpush.bf16.msra.mxu0 %v13643_v34  ;;  %v18071_v34 = vld [vmem:[%s28269_s3 + $0x11e4] sm:$0xf0] }
 0x120   :  { %5142 = vmatpush.bf16.msra.mxu1 %v13707_v45  ;;  %5151 = vmatpush.bf16.msra.mxu2 %v13803_v56  ;;  %v18033_v45 = vld [vmem:[%s28269_s3 + $0x10b4] sm:$0xf0]  ;;  %v14003_v53 = vor.u32 %v18071_v34, %v14002_v25  ;;  %v13930_v56 = vld [vmem:[%s28269_s3 + $0x1150] sm:$0xf] }
 0x121   :  { %5164 = vmatpush.bf16.msra.mxu3 %v13867_v0  ;;  %v13851_v62 = vor.u32 %v18033_v45, %v13850_v15  ;;  %v18069_v0 = vld [vmem:[%s28269_s3 + $0x11d4] sm:$0xf0]  ;;  %v13931_v9 = vor.u32 %v18053_v59, %v13930_v56  ;;  %v13770_v25 = vld [vmem:[%s28269_s3 + $0x1010] sm:$0xf] }
 0x122   :  { %v13995_v10 = vor.u32 %v18069_v0, %v13994_v61  ;;  %v18029_v15 = vld [vmem:[%s28269_s3 + $0x1094] sm:$0xf0]  ;;  %v13914_v45 = vld [vmem:[%s28269_s3 + $0x1130] sm:$0xf]  ;;  %v18011_v0 = vld [vmem:[%s28269_s3 + $0x1004] sm:$0xf0] }
 0x123   :  { %5130 = vmatpush.bf16.msra.mxu0 %v13635_v8  ;;  %v18031_v8 = vld [vmem:[%s28269_s3 + $0x10a4] sm:$0xf0] }
 0x124   :  { %5143 = vmatpush.bf16.msra.mxu1 %v13699_v12  ;;  %5152 = vmatpush.bf16.msra.mxu2 %v13795_v19  ;;  %v13779_v12 = vor.u32 %v18015_v5, %v13778_v17  ;;  %v4898_v19 = vpop.f32.mrf.mxu2  ;;  %v13843_v20 = vor.u32 %v18031_v8, %v13842_v7  ;;  %v110_v17 = vld [vmem:[%s28266_s0 + $0x48] sm:$0xff]  ;;  %v13835_v5 = vor.u32 %v18029_v15, %v13834_v37  ;;  %v13826_v7 = vld [vmem:[%s28269_s3 + $0x1080] sm:$0xf] }
 0x125   :  { %5165 = vmatpush.bf16.msra.mxu3 %v13859_v27  ;;  %v18013_v27 = vld [vmem:[%s28269_s3 + $0x1014] sm:$0xf0]  ;;  %v4899_v34 = vadd.f32 %v4898_v19, %v20848_v63  ;;  %v13978_v63 = vld [vmem:[%s28269_s3 + $0x11b0] sm:$0xf]  ;;  %v18027_v8 = vld [vmem:[%s28269_s3 + $0x1084] sm:$0xf0] }
 0x126   :  { %5131 = vmatmul.bf16.vlgmr.msra.gmra.mxu0 %v20940_v28  ;;  %v13771_v61 = vor.u32 %v18013_v27, %v13770_v25  ;;  %165 = vst [vmem:[#allocation1 + $0x20] ss:$4 sm:$0xff] %v110_v17  ;;  %v18047_v25 = vld [vmem:[%s28269_s3 + $0x1124] sm:$0xf0]  ;;  %v13970_v37 = vld [vmem:[%s28269_s3 + $0x11a0] sm:$0xf] }
 0x127   :  { %5175 = vmatpush.bf16.msrb.mxu0 %v13947_v13  ;;  %5144 = vmatmul.bf16.vlgmr.msra.gmra.mxu1 %v20951_v41  ;;  %v13922_v13 = vld [vmem:[%s28269_s3 + $0x1140] sm:$0xf]  ;;  %v4912_v56 = vadd.f32 %v4911_v35, %v4899_v34 }
 0x128   :  { %5188 = vmatpush.bf16.msrb.mxu1 %v14011_v16  ;;  %5153 = vmatpush.bf16.msra.mxu2 %v13787_v54  ;;  %v13986_v16 = vld [vmem:[%s28269_s3 + $0x11c0] sm:$0xf]  ;;  %v18065_v54 = vld [vmem:[%s28269_s3 + $0x11b4] sm:$0xf0] }
 0x129   :  { %5166 = vmatpush.bf16.msra.mxu3 %v13851_v62  ;;  %v13987_v59 = vor.u32 %v18067_v22, %v13986_v16  ;;  %v13762_v62 = vld [vmem:[%s28269_s3 + $0x1000] sm:$0xf]  ;;  %v4937_v16 = vpop.f32.mrf.mxu1  ;;  %v13979_v27 = vor.u32 %v18065_v54, %v13978_v63  ;;  %v18087_v54 = vld [vmem:[%s28269_s3 + $0x1264] sm:$0xf0] }
 0x12a   :  { %v13906_v22 = vld [vmem:[%s28269_s3 + $0x1120] sm:$0xf]  ;;  %v13763_v34 = vor.u32 %v18011_v0, %v13762_v62 }
 0x12b   :  { %5176 = vmatpush.bf16.msrb.mxu0 %v13939_v47  ;;  %v13923_v47 = vor.u32 %v18051_v14, %v13922_v13  ;;  %v14138_v13 = vld [vmem:[%s28269_s3 + $0x12f0] sm:$0xf]  ;;  %v166_v35 = vld.sshfl [vmem:[#allocation1] sm:$0xff pattern:$0x73625140]  ;;  %v13907_v0 = vor.u32 %v18047_v25, %v13906_v22 }
 0x12c   :  { %5189 = vmatpush.bf16.msrb.mxu1 %v14003_v53  ;;  %v18049_v53 = vld [vmem:[%s28269_s3 + $0x1134] sm:$0xf0]  ;;  %5154 = vmatpush.bf16.msra.mxu2 %v13779_v12  ;;  %v4900_v17 = vpop.f32.mrf.mxu2  ;;  %v14066_v63 = vld [vmem:[%s28269_s3 + $0x1260] sm:$0xf]  ;;  %v21069_v62 = vpack.c.bf16 %v166_v35, %v166_v35  ;;  %v14122_v25 = vld [vmem:[%s28269_s3 + $0x12d0] sm:$0xf] }
 0x12d   :  { %5167 = vmatpush.bf16.msra.mxu3 %v13843_v20  ;;  %v18089_v12 = vld [vmem:[%s28269_s3 + $0x1274] sm:$0xf0]  ;;  %v13915_v19 = vor.u32 %v18049_v53, %v13914_v45  ;;  %v13827_v45 = vor.u32 %v18027_v8, %v13826_v7  ;;  %v18063_v53 = vld [vmem:[%s28269_s3 + $0x11a4] sm:$0xf0] }
 0x12e   :  { %v18105_v20 = vld [vmem:[%s28269_s3 + $0x12f4] sm:$0xf0]  ;;  %v18103_v7 = vld [vmem:[%s28269_s3 + $0x12e4] sm:$0xf0]  ;;  %v13971_v8 = vor.u32 %v18063_v53, %v13970_v37  ;;  %v13890_v37 = vld [vmem:[%s28269_s3 + $0x1100] sm:$0xf] }
 0x12f   :  { %5177 = vmatpush.bf16.msrb.mxu0 %v13931_v9  ;;  %v4924_v9 = vpop.f32.mrf.mxu0  ;;  %v18085_v22 = vld [vmem:[%s28269_s3 + $0x1254] sm:$0xf0]  ;;  %v18059_v17 = vld [vmem:[%s28269_s3 + $0x1184] sm:$0xf0] }
 0x130   :  { %5190 = vmatpush.bf16.msrb.mxu1 %v13995_v10  ;;  %v14074_v10 = vld [vmem:[%s28269_s3 + $0x1270] sm:$0xf]  ;;  %v4925_v14 = vadd.f32 %v4924_v9, %v4912_v56  ;;  %5155 = vmatpush.bf16.msra.mxu2 %v13771_v61  ;;  %v167_v56 = vld.sshfl [vmem:[#allocation1 + $0x8] sm:$0xff pattern:$0x73625140]  ;;  %v4913_v61 = vpop.f32.mrf.mxu3 }
 0x131   :  { %5168 = vmatpush.bf16.msra.mxu3 %v13835_v5  ;;  %v14130_v5 = vld [vmem:[%s28269_s3 + $0x12e0] sm:$0xf]  ;;  %v21077_v9 = vpack.c.bf16 %v167_v56, %v167_v56  ;;  %v18101_v35 = vld [vmem:[%s28269_s3 + $0x12d4] sm:$0xf0]  ;;  %v14266_v61 = vld [vmem:[%s28269_s3 + $0x13f0] sm:$0xf] }
 0x132   :  { %v21058_v15 = vadd.f32 %v4937_v16, %v4925_v14  ;;  %v13962_v14 = vld [vmem:[%s28269_s3 + $0x1190] sm:$0xf]  ;;  %v18061_v16 = vld [vmem:[%s28269_s3 + $0x1194] sm:$0xf0]  ;;  %v13954_v56 = vld [vmem:[%s28269_s3 + $0x1180] sm:$0xf] }
 0x133   :  { %5178 = vmatpush.bf16.msrb.mxu0 %v13923_v47  ;;  %v14075_v47 = vor.u32 %v18089_v12, %v14074_v10  ;;  %v13898_v10 = vld [vmem:[%s28269_s3 + $0x1110] sm:$0xf]  ;;  %v18045_v12 = vld [vmem:[%s28269_s3 + $0x1114] sm:$0xf0]  ;;  %v13963_v53 = vor.u32 %v18061_v16, %v13962_v14  ;;  %v13955_v16 = vor.u32 %v18059_v17, %v13954_v56 }
 0x134   :  { %5191 = vmatpush.bf16.msrb.mxu1 %v13987_v59  ;;  %v14139_v59 = vor.u32 %v18105_v20, %v14138_v13  ;;  %5156 = vmatpush.bf16.msra.mxu2 %v13763_v34  ;;  %v14067_v13 = vor.u32 %v18087_v54, %v14066_v63  ;;  %v14058_v20 = vld [vmem:[%s28269_s3 + $0x1250] sm:$0xf]  ;;  %v13899_v34 = vor.u32 %v18045_v12, %v13898_v10  ;;  %v18121_v54 = vld [vmem:[%s28269_s3 + $0x1374] sm:$0xf0]  ;;  %v14114_v10 = vld [vmem:[%s28269_s3 + $0x12c0] sm:$0xf] }
 0x135   :  { %5169 = vmatpush.bf16.msra.mxu3 %v13827_v45  ;;  %v18043_v45 = vld [vmem:[%s28269_s3 + $0x1104] sm:$0xf0]  ;;  %v14059_v63 = vor.u32 %v18085_v22, %v14058_v20  ;;  %v168_v14 = vld.sshfl [vmem:[#allocation1 + $0x10] sm:$0xff pattern:$0x73625140] }
 0x136   :  { %v13891_v12 = vor.u32 %v18043_v45, %v13890_v37  ;;  %v169_v20 = vld.sshfl [vmem:[#allocation1 + $0x18] sm:$0xff pattern:$0x73625140]  ;;  %v21150_v45 = vpack.c.bf16 %v168_v14, %v168_v14  ;;  %v18079_v14 = vld [vmem:[%s28269_s3 + $0x1224] sm:$0xf0] }
 0x137   :  { %5179 = vmatpush.bf16.msrb.mxu0 %v13915_v19  ;;  %v14131_v19 = vor.u32 %v18103_v7, %v14130_v5  ;;  %5157 = vmatmul.bf16.vlgmr.msra.gmra.mxu2 %v21069_v62  ;;  %v14123_v5 = vor.u32 %v18101_v35, %v14122_v25  ;;  %v14050_v7 = vld [vmem:[%s28269_s3 + $0x1240] sm:$0xf]  ;;  %v18081_v56 = vld [vmem:[%s28269_s3 + $0x1234] sm:$0xf0]  ;;  %v21161_v17 = vpack.c.bf16 %v169_v20, %v169_v20 }
 0x138   :  { %5192 = vmatpush.bf16.msrb.mxu1 %v13979_v27  ;;  %5201 = vmatpush.bf16.msrb.mxu2 %v14075_v47  ;;  %v4926_v27 = vpop.f32.mrf.mxu0  ;;  %v4939_v47 = vpop.f32.mrf.mxu1  ;;  %v14258_v35 = vld [vmem:[%s28269_s3 + $0x13e0] sm:$0xf]  ;;  %v171_v2 = vld.sshfl [vmem:[#allocation1 + $0x28] sm:$0xff pattern:$0x73625140] }
 0x139   :  { %5214 = vmatpush.bf16.msrb.mxu3 %v14139_v59  ;;  %v14202_v59 = vld [vmem:[%s28269_s3 + $0x1370] sm:$0xf]  ;;  %v14194_v27 = vld [vmem:[%s28269_s3 + $0x1360] sm:$0xf]  ;;  %v18135_v47 = vld [vmem:[%s28269_s3 + $0x13e4] sm:$0xf0] }
 0x13a   :  { %5170 = vmatmul.bf16.vlgmr.msra.gmra.mxu3 %v21077_v9  ;;  %28295 = vst [vmem:[#allocation14_spill] sm:$0xff] %v21161_v17 }
 0x13b   :  { %5180 = vmatpush.bf16.msrb.mxu0 %v13907_v0  ;;  %v18137_v0 = vld [vmem:[%s28269_s3 + $0x13f4] sm:$0xf0] }
 0x13c   :  { %5193 = vmatpush.bf16.msrb.mxu1 %v13971_v8  ;;  %5202 = vmatpush.bf16.msrb.mxu2 %v14067_v13  ;;  %v18083_v8 = vld [vmem:[%s28269_s3 + $0x1244] sm:$0xf0]  ;;  %v14267_v22 = vor.u32 %v18137_v0, %v14266_v61  ;;  %v14259_v61 = vor.u32 %v18135_v47, %v14258_v35  ;;  %v14242_v35 = vld [vmem:[%s28269_s3 + $0x13c0] sm:$0xf] }
 0x13d   :  { %5215 = vmatpush.bf16.msrb.mxu3 %v14131_v19  ;;  %v18099_v13 = vld [vmem:[%s28269_s3 + $0x12c4] sm:$0xf0]  ;;  %v14203_v19 = vor.u32 %v18121_v54, %v14202_v59  ;;  %v14051_v25 = vor.u32 %v18083_v8, %v14050_v7  ;;  %v14106_v59 = vld [vmem:[%s28269_s3 + $0x12b0] sm:$0xf]  ;;  %v18117_v7 = vld [vmem:[%s28269_s3 + $0x1354] sm:$0xf0] }
 0x13e   :  { %v14115_v37 = vor.u32 %v18099_v13, %v14114_v10  ;;  %v14250_v8 = vld [vmem:[%s28269_s3 + $0x13d0] sm:$0xf]  ;;  %v14034_v13 = vld [vmem:[%s28269_s3 + $0x1220] sm:$0xf] }
 0x13f   :  { %5181 = vmatpush.bf16.msrb.mxu0 %v13899_v34  ;;  %v18119_v34 = vld [vmem:[%s28269_s3 + $0x1364] sm:$0xf0] }
 0x140   :  { %5194 = vmatpush.bf16.msrb.mxu1 %v13963_v53  ;;  %5203 = vmatpush.bf16.msrb.mxu2 %v14059_v63  ;;  %v14042_v53 = vld [vmem:[%s28269_s3 + $0x1230] sm:$0xf]  ;;  %v18097_v63 = vld [vmem:[%s28269_s3 + $0x12b4] sm:$0xf0]  ;;  %v14195_v54 = vor.u32 %v18119_v34, %v14194_v27  ;;  %v14178_v27 = vld [vmem:[%s28269_s3 + $0x1340] sm:$0xf] }
 0x141   :  { %5216 = vmatpush.bf16.msrb.mxu3 %v14123_v5  ;;  %v14043_v0 = vor.u32 %v18081_v56, %v14042_v53  ;;  %v14186_v5 = vld [vmem:[%s28269_s3 + $0x1350] sm:$0xf]  ;;  %v14107_v10 = vor.u32 %v18097_v63, %v14106_v59  ;;  %v18115_v34 = vld [vmem:[%s28269_s3 + $0x1344] sm:$0xf0]  ;;  %v18077_v59 = vld [vmem:[%s28269_s3 + $0x1214] sm:$0xf0] }
 0x142   :  { %v14187_v20 = vor.u32 %v18117_v7, %v14186_v5  ;;  %v18131_v53 = vld [vmem:[%s28269_s3 + $0x13c4] sm:$0xf0]  ;;  %v14026_v56 = vld [vmem:[%s28269_s3 + $0x1210] sm:$0xf]  ;;  %v14179_v7 = vor.u32 %v18115_v34, %v14178_v27 }
 0x143   :  { %5182 = vmatpush.bf16.msrb.mxu0 %v13891_v12  ;;  %v18133_v12 = vld [vmem:[%s28269_s3 + $0x13d4] sm:$0xf0]  ;;  %v14170_v5 = vld [vmem:[%s28269_s3 + $0x1330] sm:$0xf]  ;;  %v4976_v34 = vpop.f32.mrf.mxu0 }
 0x144   :  { %5195 = vmatpush.bf16.msrb.mxu1 %v13955_v16  ;;  %5204 = vmatpush.bf16.msrb.mxu2 %v14051_v25  ;;  %v14098_v16 = vld [vmem:[%s28269_s3 + $0x12a0] sm:$0xf]  ;;  %v14035_v25 = vor.u32 %v18079_v14, %v14034_v13  ;;  %v14243_v13 = vor.u32 %v18131_v53, %v14242_v35  ;;  %v14027_v14 = vor.u32 %v18077_v59, %v14026_v56  ;;  %v14330_v35 = vld [vmem:[%s28269_s3 + $0x1470] sm:$0xf]  ;;  %v4989_v56 = vpop.f32.mrf.mxu1 }
 0x145   :  { %5217 = vmatpush.bf16.msrb.mxu3 %v14115_v37  ;;  %v4950_v37 = vpop.f32.mrf.mxu2 }
 0x146   :  { %5183 = vmatmul.bf16.vlgmr.msrb.gmra.mxu0 %v21150_v45  ;;  %v4951_v63 = vadd.f32 %v4950_v37, %v21058_v15  ;;  %v14234_v15 = vld [vmem:[%s28269_s3 + $0x13b0] sm:$0xf]  ;;  %v18153_v37 = vld [vmem:[%s28269_s3 + $0x1474] sm:$0xf0] }
 0x147   :  { %5227 = vmatpush.bf16.msra.mxu0 %v14203_v19  ;;  %5196 = vmatmul.bf16.vlgmr.msrb.gmra.mxu1 %v21161_v17  ;;  %v18095_v19 = vld [vmem:[%s28269_s3 + $0x12a4] sm:$0xf0] }
 0x148   :  { %5240 = vmatpush.bf16.msra.mxu1 %v14267_v22  ;;  %5205 = vmatpush.bf16.msrb.mxu2 %v14043_v0  ;;  %v14251_v22 = vor.u32 %v18133_v12, %v14250_v8  ;;  %v14099_v47 = vor.u32 %v18095_v19, %v14098_v16  ;;  %v18093_v0 = vld [vmem:[%s28269_s3 + $0x1294] sm:$0xf0]  ;;  %v14018_v16 = vld [vmem:[%s28269_s3 + $0x1200] sm:$0xf]  ;;  %v18075_v19 = vld [vmem:[%s28269_s3 + $0x1204] sm:$0xf0] }
 0x149   :  { %5218 = vmatpush.bf16.msrb.mxu3 %v14107_v10  ;;  %v18113_v8 = vld [vmem:[%s28269_s3 + $0x1334] sm:$0xf0] }
 0x14a   :  { %v18129_v10 = vld [vmem:[%s28269_s3 + $0x13b4] sm:$0xf0]  ;;  %v14171_v59 = vor.u32 %v18113_v8, %v14170_v5  ;;  %v14226_v5 = vld [vmem:[%s28269_s3 + $0x13a0] sm:$0xf] }
 0x14b   :  { %5228 = vmatpush.bf16.msra.mxu0 %v14195_v54  ;;  %v4963_v54 = vpop.f32.mrf.mxu3 }
 0x14c   :  { %5241 = vmatpush.bf16.msra.mxu1 %v14259_v61  ;;  %v14090_v61 = vld [vmem:[%s28269_s3 + $0x1290] sm:$0xf]  ;;  %v4964_v12 = vadd.f32 %v4963_v54, %v4951_v63  ;;  %5206 = vmatpush.bf16.msrb.mxu2 %v14035_v25  ;;  %v18091_v25 = vld [vmem:[%s28269_s3 + $0x1284] sm:$0xf0]  ;;  %v18169_v63 = vld [vmem:[%s28269_s3 + $0x14f4] sm:$0xf0] }
 0x14d   :  { %5219 = vmatpush.bf16.msrb.mxu3 %v14099_v47  ;;  %v14091_v27 = vor.u32 %v18093_v0, %v14090_v61  ;;  %v14394_v47 = vld [vmem:[%s28269_s3 + $0x14f0] sm:$0xf]  ;;  %v14162_v54 = vld [vmem:[%s28269_s3 + $0x1320] sm:$0xf]  ;;  %v18111_v61 = vld [vmem:[%s28269_s3 + $0x1324] sm:$0xf0]  ;;  %v14235_v0 = vor.u32 %v18129_v10, %v14234_v15  ;;  %v4952_v17 = vpop.f32.mrf.mxu2 }
 0x14e   :  { %v4977_v53 = vadd.f32 %v4976_v34, %v4964_v12  ;;  %v170_v12 = vld.sshfl [vmem:[#allocation1 + $0x20] sm:$0xff pattern:$0x73625140]  ;;  %v14331_v34 = vor.u32 %v18153_v37, %v14330_v35  ;;  %v18151_v10 = vld [vmem:[%s28269_s3 + $0x1464] sm:$0xf0] }
 0x14f   :  { %5229 = vmatpush.bf16.msra.mxu0 %v14187_v20  ;;  %v111_v20 = vld [vmem:[%s28266_s0 + $0x50] sm:$0xff]  ;;  %v14322_v15 = vld [vmem:[%s28269_s3 + $0x1460] sm:$0xf]  ;;  %v18167_v17 = vld [vmem:[%s28269_s3 + $0x14e4] sm:$0xf0] }
 0x150   :  { %5242 = vmatpush.bf16.msra.mxu1 %v14251_v22  ;;  %v14082_v22 = vld [vmem:[%s28269_s3 + $0x1280] sm:$0xf]  ;;  %174 = vst [vmem:[#allocation1] ss:$4 sm:$0xff] %v111_v20  ;;  %5207 = vmatpush.bf16.msrb.mxu2 %v14027_v14  ;;  %v14019_v20 = vor.u32 %v18075_v19, %v14018_v16  ;;  %v21279_v16 = vpack.c.bf16 %v170_v12, %v170_v12  ;;  %v14154_v35 = vld [vmem:[%s28269_s3 + $0x1310] sm:$0xf] }
 0x151   :  { %5220 = vmatpush.bf16.msrb.mxu3 %v14091_v27  ;;  %v14083_v8 = vor.u32 %v18091_v25, %v14082_v22  ;;  %v14163_v19 = vor.u32 %v18111_v61, %v14162_v54  ;;  %v14386_v27 = vld [vmem:[%s28269_s3 + $0x14e0] sm:$0xf]  ;;  %v14227_v22 = vor.u32 %v18127_v21, %v14226_v5  ;;  %v21287_v25 = vpack.c.bf16 %v171_v2, %v171_v2  ;;  %v18109_v37 = vld [vmem:[%s28269_s3 + $0x1314] sm:$0xf0]  ;;  %v4978_v54 = vpop.f32.mrf.mxu0  ;;  %v18107_v12 = vld [vmem:[%s28269_s3 + $0x1304] sm:$0xf0]  ;;  %v4991_v5 = vpop.f32.mrf.mxu1 }
 0x152   :  { %28296 = vst [vmem:[#allocation15_spill] sm:$0xff] %v21279_v16  ;;  %v18125_v2 = vld [vmem:[%s28269_s3 + $0x1394] sm:$0xf0]  ;;  %v14387_v21 = vor.u32 %v18167_v17, %v14386_v27  ;;  %v14155_v61 = vor.u32 %v18109_v37, %v14154_v35  ;;  %v18147_v35 = vld [vmem:[%s28269_s3 + $0x1444] sm:$0xf0] }
 0x153   :  { %5230 = vmatpush.bf16.msra.mxu0 %v14179_v7  ;;  %v21268_v7 = vadd.f32 %v4989_v56, %v4977_v53  ;;  %v4965_v14 = vpop.f32.mrf.mxu3  ;;  %28297 = vst [vmem:[#allocation16_spill] sm:$0xff] %v21287_v25  ;;  %v14218_v53 = vld [vmem:[%s28269_s3 + $0x1390] sm:$0xf]  ;;  %v18201_v27 = vld [vmem:[%s28269_s3 + $0x15f4] sm:$0xf0] }
 0x154   :  { %5243 = vmatpush.bf16.msra.mxu1 %v14243_v13  ;;  %v14395_v13 = vor.u32 %v18169_v63, %v14394_v47  ;;  %5208 = vmatpush.bf16.msrb.mxu2 %v14019_v20  ;;  %v14323_v47 = vor.u32 %v18151_v10, %v14322_v15  ;;  %v14314_v56 = vld [vmem:[%s28269_s3 + $0x1450] sm:$0xf]  ;;  %v14146_v20 = vld [vmem:[%s28269_s3 + $0x1300] sm:$0xf]  ;;  %v18185_v14 = vld [vmem:[%s28269_s3 + $0x1574] sm:$0xf0] }
 0x155   :  { %5221 = vmatpush.bf16.msrb.mxu3 %v14083_v8  ;;  %v14378_v63 = vld [vmem:[%s28269_s3 + $0x14d0] sm:$0xf]  ;;  %v14219_v8 = vor.u32 %v18125_v2, %v14218_v53  ;;  %v14370_v37 = vld [vmem:[%s28269_s3 + $0x14c0] sm:$0xf]  ;;  %v18163_v53 = vld [vmem:[%s28269_s3 + $0x14c4] sm:$0xf0] }
 0x156   :  { %v14458_v15 = vld [vmem:[%s28269_s3 + $0x1570] sm:$0xf] }
 0x157   :  { %5231 = vmatpush.bf16.msra.mxu0 %v14171_v59  ;;  %v18149_v59 = vld [vmem:[%s28269_s3 + $0x1454] sm:$0xf0]  ;;  %5209 = vmatmul.bf16.vlgmr.msrb.gmra.mxu2 %v21279_v16  ;;  %v172_v2 = vld.sshfl [vmem:[#allocation1 + $0x30] sm:$0xff pattern:$0x73625140] }
 0x158   :  { %5244 = vmatpush.bf16.msra.mxu1 %v14235_v0  ;;  %5253 = vmatpush.bf16.msra.mxu2 %v14331_v34  ;;  %v18165_v0 = vld [vmem:[%s28269_s3 + $0x14d4] sm:$0xf0]  ;;  %v14210_v34 = vld [vmem:[%s28269_s3 + $0x1380] sm:$0xf]  ;;  %v14315_v10 = vor.u32 %v18149_v59, %v14314_v56  ;;  %v14459_v56 = vor.u32 %v18185_v14, %v14458_v15  ;;  %v21360_v5 = vpack.c.bf16 %v172_v2, %v172_v2 }
 0x159   :  { %5266 = vmatpush.bf16.msra.mxu3 %v14395_v13  ;;  %v18123_v13 = vld [vmem:[%s28269_s3 + $0x1384] sm:$0xf0]  ;;  %v14379_v17 = vor.u32 %v18165_v0, %v14378_v63  ;;  %v173_v59 = vld.sshfl [vmem:[#allocation1 + $0x38] sm:$0xff pattern:$0x73625140] }
 0x15a   :  { %5222 = vmatmul.bf16.vlgmr.msrb.gmra.mxu3 %v21287_v25  ;;  %v14450_v0 = vld [vmem:[%s28269_s3 + $0x1560] sm:$0xf]  ;;  %28298 = vst [vmem:[#allocation17_spill] sm:$0xff] %v21360_v5  ;;  %v21371_v15 = vpack.c.bf16 %v173_v59, %v173_v59  ;;  %v18161_v14 = vld [vmem:[%s28269_s3 + $0x14b4] sm:$0xf0] }
 0x15b   :  { %5232 = vmatpush.bf16.msra.mxu0 %v14163_v19  ;;  %v14522_v19 = vld [vmem:[%s28269_s3 + $0x15f0] sm:$0xf]  ;;  %v14290_v2 = vld [vmem:[%s28269_s3 + $0x1420] sm:$0xf]  ;;  %v18159_v59 = vld [vmem:[%s28269_s3 + $0x14a4] sm:$0xf0] }
 0x15c   :  { %5245 = vmatpush.bf16.msra.mxu1 %v14227_v22  ;;  %5254 = vmatpush.bf16.msra.mxu2 %v14323_v47  ;;  %v14306_v22 = vld [vmem:[%s28269_s3 + $0x1440] sm:$0xf]  ;;  %v14147_v47 = vor.u32 %v18107_v12, %v14146_v20  ;;  %v14523_v63 = vor.u32 %v18201_v27, %v14522_v19  ;;  %v14371_v12 = vor.u32 %v18163_v53, %v14370_v37  ;;  %v14506_v37 = vld [vmem:[%s28269_s3 + $0x15d0] sm:$0xf]  ;;  %v18197_v53 = vld [vmem:[%s28269_s3 + $0x15d4] sm:$0xf0] }
 0x15d   :  { %5267 = vmatpush.bf16.msra.mxu3 %v14387_v21  ;;  %v14211_v21 = vor.u32 %v18123_v13, %v14210_v34  ;;  %v14307_v54 = vor.u32 %v18147_v35, %v14306_v22  ;;  %v14514_v20 = vld [vmem:[%s28269_s3 + $0x15e0] sm:$0xf]  ;;  %v14298_v34 = vld [vmem:[%s28269_s3 + $0x1430] sm:$0xf]  ;;  %v18145_v13 = vld [vmem:[%s28269_s3 + $0x1434] sm:$0xf0] }
 0x15e   :  { %28299 = vst [vmem:[#allocation18_spill] sm:$0xff] %v21371_v15  ;;  %v14442_v22 = vld [vmem:[%s28269_s3 + $0x1550] sm:$0xf]  ;;  %v18181_v35 = vld [vmem:[%s28269_s3 + $0x1554] sm:$0xf0] }
 0x15f   :  { %5233 = vmatpush.bf16.msra.mxu0 %v14155_v61  ;;  %v18183_v61 = vld [vmem:[%s28269_s3 + $0x1564] sm:$0xf0] }
 0x160   :  { %5246 = vmatpush.bf16.msra.mxu1 %v14219_v8  ;;  %5255 = vmatpush.bf16.msra.mxu2 %v14315_v10  ;;  %v18199_v8 = vld [vmem:[%s28269_s3 + $0x15e4] sm:$0xf0]  ;;  %v14362_v10 = vld [vmem:[%s28269_s3 + $0x14b0] sm:$0xf]  ;;  %v14451_v19 = vor.u32 %v18183_v61, %v14450_v0  ;;  %v14434_v61 = vld [vmem:[%s28269_s3 + $0x1540] sm:$0xf] }
 0x161   :  { %5268 = vmatpush.bf16.msra.mxu3 %v14379_v17  ;;  %v14515_v27 = vor.u32 %v18199_v8, %v14514_v20  ;;  %v14299_v17 = vor.u32 %v18145_v13, %v14298_v34  ;;  %v18179_v20 = vld [vmem:[%s28269_s3 + $0x1544] sm:$0xf0]  ;;  %v5002_v8 = vpop.f32.mrf.mxu2 }
 0x162   :  { %v18195_v13 = vld [vmem:[%s28269_s3 + $0x15c4] sm:$0xf0] }
 0x163   :  { %5234 = vmatpush.bf16.msra.mxu0 %v14147_v47  ;;  %v14363_v47 = vor.u32 %v18161_v14, %v14362_v10  ;;  %v14282_v10 = vld [vmem:[%s28269_s3 + $0x1410] sm:$0xf]  ;;  %v18141_v14 = vld [vmem:[%s28269_s3 + $0x1414] sm:$0xf0] }
 0x164   :  { %5247 = vmatpush.bf16.msra.mxu1 %v14211_v21  ;;  %5256 = vmatpush.bf16.msra.mxu2 %v14307_v54  ;;  %v18143_v21 = vld [vmem:[%s28269_s3 + $0x1424] sm:$0xf0]  ;;  %v14507_v54 = vor.u32 %v18197_v53, %v14506_v37  ;;  %v14426_v37 = vld [vmem:[%s28269_s3 + $0x1530] sm:$0xf] }
 0x165   :  { %5269 = vmatpush.bf16.msra.mxu3 %v14371_v12  ;;  %v14291_v0 = vor.u32 %v18143_v21, %v14290_v2  ;;  %v14498_v12 = vld [vmem:[%s28269_s3 + $0x15c0] sm:$0xf]  ;;  %v14283_v2 = vor.u32 %v18141_v14, %v14282_v10  ;;  %v14490_v21 = vld [vmem:[%s28269_s3 + $0x15b0] sm:$0xf]  ;;  %v5041_v10 = vpop.f32.mrf.mxu1 }
 0x166   :  { %5235 = vmatmul.bf16.vlgmr.msra.gmra.mxu0 %v21360_v5  ;;  %v14499_v53 = vor.u32 %v18195_v13, %v14498_v12  ;;  %v17512_v12 = vld [vmem:[%s28269_s3 + $0x74] sm:$0xf]  ;;  %v18191_v5 = vld [vmem:[%s28269_s3 + $0x15a4] sm:$0xf0] }
 0x167   :  { %5279 = vmatpush.bf16.msrb.mxu0 %v14459_v56  ;;  %5248 = vmatmul.bf16.vlgmr.msra.gmra.mxu1 %v21371_v15  ;;  %v14354_v56 = vld [vmem:[%s28269_s3 + $0x14a0] sm:$0xf]  ;;  %v176_v25 = vld.sshfl [vmem:[#allocation1 + $0x8] sm:$0xff pattern:$0x73625140] }
 0x168   :  { %5292 = vmatpush.bf16.msrb.mxu1 %v14523_v63  ;;  %v14443_v63 = vor.u32 %v18181_v35, %v14442_v22  ;;  %5257 = vmatpush.bf16.msra.mxu2 %v14299_v17  ;;  %v14355_v34 = vor.u32 %v18159_v59, %v14354_v56  ;;  %v14346_v17 = vld [vmem:[%s28269_s3 + $0x1490] sm:$0xf]  ;;  %v18157_v22 = vld [vmem:[%s28269_s3 + $0x1494] sm:$0xf0]  ;;  %v14435_v35 = vor.u32 %v18179_v20, %v14434_v61  ;;  %v14274_v59 = vld [vmem:[%s28269_s3 + $0x1400] sm:$0xf]  ;;  %v5028_v20 = vpop.f32.mrf.mxu0 }
 0x169   :  { %5270 = vmatpush.bf16.msra.mxu3 %v14363_v47  ;;  %v18177_v47 = vld [vmem:[%s28269_s3 + $0x1534] sm:$0xf0]  ;;  %v18155_v61 = vld [vmem:[%s28269_s3 + $0x1484] sm:$0xf0]  ;;  %v5004_v16 = vpop.f32.mrf.mxu2 }
 0x16a   :  { %v18193_v56 = vld [vmem:[%s28269_s3 + $0x15b4] sm:$0xf0]  ;;  %v14427_v14 = vor.u32 %v18177_v47, %v14426_v37  ;;  %v11828_v16 = vld [vmem:[%s28269_s3 + $0xe8] sm:$0xf0] }
 0x16b   :  { %5280 = vmatpush.bf16.msrb.mxu0 %v14451_v19  ;;  %v5003_v19 = vadd.f32 %v5002_v8, %v21268_v7  ;;  %v11772_v8 = vld [vmem:[%s28269_s3 + $0x78] sm:$0xf0] }
 0x16c   :  { %5293 = vmatpush.bf16.msrb.mxu1 %v14515_v27  ;;  %v5015_v27 = vpop.f32.mrf.mxu3  ;;  %5258 = vmatpush.bf16.msra.mxu2 %v14291_v0  ;;  %v14338_v0 = vld [vmem:[%s28269_s3 + $0x1480] sm:$0xf] }
 0x16d   :  { %v5016_v7 = vadd.f32 %v5015_v27, %v5003_v19  ;;  %5271 = vmatpush.bf16.msra.mxu3 %v14355_v34  ;;  %v17528_v34 = vld [vmem:[%s28269_s3 + $0xf4] sm:$0xf]  ;;  %v11836_v19 = vld [vmem:[%s28269_s3 + $0xf8] sm:$0xf0]  ;;  %v14418_v27 = vld [vmem:[%s28269_s3 + $0x1520] sm:$0xf]  ;;  %v14339_v47 = vor.u32 %v18155_v61, %v14338_v0  ;;  %v21494_v61 = vpack.c.bf16 %v176_v25, %v176_v25 }
 0x16e   :  { %v18189_v25 = vld [vmem:[%s28269_s3 + $0x1594] sm:$0xf0] }
 0x16f   :  { %5281 = vmatpush.bf16.msrb.mxu0 %v14443_v63  ;;  %v14347_v63 = vor.u32 %v18157_v22, %v14346_v17  ;;  %v5029_v13 = vadd.f32 %v5028_v20, %v5016_v7  ;;  %v18175_v17 = vld [vmem:[%s28269_s3 + $0x1524] sm:$0xf0]  ;;  %v14491_v22 = vor.u32 %v18193_v56, %v14490_v21  ;;  %v175_v7 = vld.sshfl [vmem:[#allocation1] sm:$0xff pattern:$0x73625140]  ;;  %v11775_v20 = vor.u32 %v17512_v12, %v11772_v8 }
 0x170   :  { %5294 = vmatpush.bf16.msrb.mxu1 %v14507_v54  ;;  %v18139_v54 = vld [vmem:[%s28269_s3 + $0x1404] sm:$0xf0]  ;;  %5259 = vmatpush.bf16.msra.mxu2 %v14283_v2  ;;  %v17510_v2 = vld [vmem:[%s28269_s3 + $0x64] sm:$0xf]  ;;  %v11764_v21 = vld [vmem:[%s28269_s3 + $0x68] sm:$0xf0] }
 0x171   :  { %v14275_v15 = vor.u32 %v18139_v54, %v14274_v59  ;;  %v21475_v37 = vadd.f32 %v5041_v10, %v5029_v13  ;;  %5272 = vmatpush.bf16.msra.mxu3 %v14347_v63  ;;  %v21486_v59 = vpack.c.bf16 %v175_v7, %v175_v7  ;;  %v14419_v63 = vor.u32 %v18175_v17, %v14418_v27  ;;  %v17526_v54 = vld [vmem:[%s28269_s3 + $0xe4] sm:$0xf]  ;;  %v14410_v12 = vld [vmem:[%s28269_s3 + $0x1510] sm:$0xf]  ;;  %v18173_v8 = vld [vmem:[%s28269_s3 + $0x1514] sm:$0xf0] }
 0x172   :  { %v14474_v13 = vld [vmem:[%s28269_s3 + $0x1590] sm:$0xf]  ;;  %v11756_v10 = vld [vmem:[%s28269_s3 + $0x58] sm:$0xf0]  ;;  %v14411_v27 = vor.u32 %v18173_v8, %v14410_v12  ;;  %v18171_v7 = vld [vmem:[%s28269_s3 + $0x1504] sm:$0xf0] }
 0x173   :  { %5282 = vmatpush.bf16.msrb.mxu0 %v14435_v35  ;;  %v14482_v35 = vld [vmem:[%s28269_s3 + $0x15a0] sm:$0xf]  ;;  %v11820_v17 = vld [vmem:[%s28269_s3 + $0xd8] sm:$0xf0]  ;;  %v11748_v12 = vld [vmem:[%s28269_s3 + $0x48] sm:$0xf0] }
 0x174   :  { %5295 = vmatpush.bf16.msrb.mxu1 %v14499_v53  ;;  %v11839_v53 = vor.u32 %v17528_v34, %v11836_v19  ;;  %v5017_v56 = vpop.f32.mrf.mxu3  ;;  %5260 = vmatpush.bf16.msra.mxu2 %v14275_v15  ;;  %v14483_v0 = vor.u32 %v18191_v5, %v14482_v35  ;;  %v11767_v34 = vor.u32 %v17510_v2, %v11764_v21  ;;  %v17508_v15 = vld [vmem:[%s28269_s3 + $0x54] sm:$0xf]  ;;  %v5030_v19 = vpop.f32.mrf.mxu0  ;;  %v17522_v8 = vld [vmem:[%s28269_s3 + $0xc4] sm:$0xf] }
 0x175   :  { %5273 = vmatpush.bf16.msra.mxu3 %v14339_v47  ;;  %v11831_v5 = vor.u32 %v17526_v54, %v11828_v16  ;;  %v5043_v35 = vpop.f32.mrf.mxu1  ;;  %v14475_v47 = vor.u32 %v18189_v25, %v14474_v13  ;;  %v17544_v2 = vld [vmem:[%s28269_s3 + $0x174] sm:$0xf]  ;;  %v11759_v21 = vor.u32 %v17508_v15, %v11756_v10  ;;  %v11900_v56 = vld [vmem:[%s28269_s3 + $0x178] sm:$0xf0]  ;;  %v11812_v13 = vld [vmem:[%s28269_s3 + $0xc8] sm:$0xf0] }
 0x176   :  { %v11964_v54 = vld [vmem:[%s28269_s3 + $0x1f8] sm:$0xf0]  ;;  %v177_v25 = vld.sshfl [vmem:[#allocation1 + $0x10] sm:$0xff pattern:$0x73625140]  ;;  %v11903_v15 = vor.u32 %v17544_v2, %v11900_v56 }
 0x177   :  { %5283 = vmatpush.bf16.msrb.mxu0 %v14427_v14  ;;  %v17524_v14 = vld [vmem:[%s28269_s3 + $0xd4] sm:$0xf]  ;;  %5261 = vmatmul.bf16.vlgmr.msra.gmra.mxu2 %v21486_v59  ;;  %v178_v10 = vld.sshfl [vmem:[#allocation1 + $0x18] sm:$0xff pattern:$0x73625140]  ;;  %v21567_v35 = vpack.c.bf16 %v177_v25, %v177_v25 }
 0x178   :  { %5296 = vmatpush.bf16.msrb.mxu1 %v14491_v22  ;;  %5305 = vmatpush.bf16.msrb.mxu2 %v11775_v20  ;;  %v14402_v22 = vld [vmem:[%s28269_s3 + $0x1500] sm:$0xf]  ;;  %v11823_v16 = vor.u32 %v17524_v14, %v11820_v17  ;;  %v17542_v17 = vld [vmem:[%s28269_s3 + $0x164] sm:$0xf]  ;;  %v21578_v2 = vpack.c.bf16 %v178_v10, %v178_v10  ;;  %v11804_v56 = vld [vmem:[%s28269_s3 + $0xb8] sm:$0xf0] }
 0x179   :  { %5318 = vmatpush.bf16.msrb.mxu3 %v11839_v53  ;;  %v14466_v20 = vld [vmem:[%s28269_s3 + $0x1580] sm:$0xf]  ;;  %v18187_v53 = vld [vmem:[%s28269_s3 + $0x1584] sm:$0xf0]  ;;  %v17502_v25 = vld [vmem:[%s28269_s3 + $0x24] sm:$0xf] }
 0x17a   :  { %5274 = vmatmul.bf16.vlgmr.msra.gmra.mxu3 %v21494_v61  ;;  %v11796_v10 = vld [vmem:[%s28269_s3 + $0xa8] sm:$0xf0] }
 0x17b   :  { %5284 = vmatpush.bf16.msrb.mxu0 %v14419_v63  ;;  %v17560_v63 = vld [vmem:[%s28269_s3 + $0x1f4] sm:$0xf] }
 0x17c   :  { %5297 = vmatpush.bf16.msrb.mxu1 %v14483_v0  ;;  %5306 = vmatpush.bf16.msrb.mxu2 %v11767_v34  ;;  %v17506_v0 = vld [vmem:[%s28269_s3 + $0x44] sm:$0xf]  ;;  %v14403_v34 = vor.u32 %v18171_v7, %v14402_v22  ;;  %v11967_v14 = vor.u32 %v17560_v63, %v11964_v54  ;;  %v11815_v7 = vor.u32 %v17522_v8, %v11812_v13  ;;  %v17556_v8 = vld [vmem:[%s28269_s3 + $0x1d4] sm:$0xf]  ;;  %v11948_v13 = vld [vmem:[%s28269_s3 + $0x1d8] sm:$0xf0] }
 0x17d   :  { %5319 = vmatpush.bf16.msrb.mxu3 %v11831_v5  ;;  %v14467_v5 = vor.u32 %v18187_v53, %v14466_v20  ;;  %v11751_v19 = vor.u32 %v17506_v0, %v11748_v12  ;;  %v17558_v22 = vld [vmem:[%s28269_s3 + $0x1e4] sm:$0xf]  ;;  %v17504_v20 = vld [vmem:[%s28269_s3 + $0x34] sm:$0xf]  ;;  %v11740_v53 = vld [vmem:[%s28269_s3 + $0x38] sm:$0xf0] }
 0x17e   :  { %v17540_v0 = vld [vmem:[%s28269_s3 + $0x154] sm:$0xf]  ;;  %v11884_v12 = vld [vmem:[%s28269_s3 + $0x158] sm:$0xf0] }
 0x17f   :  { %5285 = vmatpush.bf16.msrb.mxu0 %v14411_v27  ;;  %v11892_v27 = vld [vmem:[%s28269_s3 + $0x168] sm:$0xf0] }
 0x180   :  { %5298 = vmatpush.bf16.msrb.mxu1 %v14475_v47  ;;  %5307 = vmatpush.bf16.msrb.mxu2 %v11759_v21  ;;  %v11956_v47 = vld [vmem:[%s28269_s3 + $0x1e8] sm:$0xf0]  ;;  %v17520_v21 = vld [vmem:[%s28269_s3 + $0xb4] sm:$0xf]  ;;  %v11895_v63 = vor.u32 %v17542_v17, %v11892_v27  ;;  %v17538_v27 = vld [vmem:[%s28269_s3 + $0x144] sm:$0xf] }
 0x181   :  { %5320 = vmatpush.bf16.msrb.mxu3 %v11823_v16  ;;  %v11959_v54 = vor.u32 %v17558_v22, %v11956_v47  ;;  %v11743_v16 = vor.u32 %v17504_v20, %v11740_v53  ;;  %v11876_v22 = vld [vmem:[%s28269_s3 + $0x148] sm:$0xf0]  ;;  %v5054_v47 = vpop.f32.mrf.mxu2 }
 0x182   :  { %v11940_v53 = vld [vmem:[%s28269_s3 + $0x1c8] sm:$0xf0] }
 0x183   :  { %5286 = vmatpush.bf16.msrb.mxu0 %v14403_v34  ;;  %v11807_v34 = vor.u32 %v17520_v21, %v11804_v56  ;;  %v17500_v21 = vld [vmem:[%s28269_s3 + $0x14] sm:$0xf]  ;;  %v11724_v56 = vld [vmem:[%s28269_s3 + $0x18] sm:$0xf0] }
 0x184   :  { %5299 = vmatpush.bf16.msrb.mxu1 %v14467_v5  ;;  %5308 = vmatpush.bf16.msrb.mxu2 %v11751_v19  ;;  %v11732_v5 = vld [vmem:[%s28269_s3 + $0x28] sm:$0xf0]  ;;  %v11951_v19 = vor.u32 %v17556_v8, %v11948_v13  ;;  %v17536_v8 = vld [vmem:[%s28269_s3 + $0x134] sm:$0xf] }
 0x185   :  { %5321 = vmatpush.bf16.msrb.mxu3 %v11815_v7  ;;  %v11735_v17 = vor.u32 %v17502_v25, %v11732_v5  ;;  %v17554_v7 = vld [vmem:[%s28269_s3 + $0x1c4] sm:$0xf]  ;;  %v11868_v25 = vld [vmem:[%s28269_s3 + $0x138] sm:$0xf0]  ;;  %v17552_v5 = vld [vmem:[%s28269_s3 + $0x1b4] sm:$0xf] }
 0x186   :  { %5287 = vmatmul.bf16.vlgmr.msrb.gmra.mxu0 %v21567_v35  ;;  %v11943_v13 = vor.u32 %v17554_v7, %v11940_v53  ;;  %v17576_v7 = vld [vmem:[%s28269_s3 + $0x274] sm:$0xf]  ;;  %v5093_v53 = vpop.f32.mrf.mxu1 }
 0x187   :  { %5331 = vmatpush.bf16.msra.mxu0 %v11903_v15  ;;  %5300 = vmatmul.bf16.vlgmr.msrb.gmra.mxu1 %v21578_v2  ;;  %v17518_v15 = vld [vmem:[%s28269_s3 + $0xa4] sm:$0xf] }
 0x188   :  { %5344 = vmatpush.bf16.msra.mxu1 %v11967_v14  ;;  %v11887_v14 = vor.u32 %v17540_v0, %v11884_v12  ;;  %5309 = vmatpush.bf16.msrb.mxu2 %v11743_v16  ;;  %v11799_v20 = vor.u32 %v17518_v15, %v11796_v10  ;;  %v17516_v16 = vld [vmem:[%s28269_s3 + $0x94] sm:$0xf]  ;;  %v11788_v0 = vld [vmem:[%s28269_s3 + $0x98] sm:$0xf0]  ;;  %v11879_v12 = vor.u32 %v17538_v27, %v11876_v22  ;;  %v5080_v27 = vpop.f32.mrf.mxu0  ;;  %v11780_v22 = vld [vmem:[%s28269_s3 + $0x88] sm:$0xf0] }
 0x189   :  { %5322 = vmatpush.bf16.msrb.mxu3 %v11807_v34  ;;  %v11932_v15 = vld [vmem:[%s28269_s3 + $0x1b8] sm:$0xf0]  ;;  %v11791_v10 = vor.u32 %v17516_v16, %v11788_v0  ;;  %v17534_v0 = vld [vmem:[%s28269_s3 + $0x124] sm:$0xf] }
 0x18b   :  { %5332 = vmatpush.bf16.msra.mxu0 %v11895_v63  ;;  %v5055_v63 = vadd.f32 %v5054_v47, %v21475_v37  ;;  %v11727_v37 = vor.u32 %v17500_v21, %v11724_v56  ;;  %v12028_v47 = vld [vmem:[%s28269_s3 + $0x278] sm:$0xf0]  ;;  %v11871_v21 = vor.u32 %v17536_v8, %v11868_v25  ;;  %v17592_v56 = vld [vmem:[%s28269_s3 + $0x2f4] sm:$0xf] }
 0x18c   :  { %5345 = vmatpush.bf16.msra.mxu1 %v11959_v54  ;;  %v5067_v54 = vpop.f32.mrf.mxu3  ;;  %5310 = vmatpush.bf16.msrb.mxu2 %v11735_v17  ;;  %v17514_v17 = vld [vmem:[%s28269_s3 + $0x84] sm:$0xf]  ;;  %v12031_v25 = vor.u32 %v17576_v7, %v12028_v47  ;;  %v17532_v47 = vld [vmem:[%s28269_s3 + $0x114] sm:$0xf] }
 0x18d   :  { %v5068_v34 = vadd.f32 %v5067_v54, %v5055_v63  ;;  %5323 = vmatpush.bf16.msrb.mxu3 %v11799_v20  ;;  %v12092_v63 = vld [vmem:[%s28269_s3 + $0x2f8] sm:$0xf0]  ;;  %v11935_v54 = vor.u32 %v17552_v5, %v11932_v15  ;;  %v5056_v5 = vpop.f32.mrf.mxu2 }
 0x18e   :  { %v12095_v15 = vor.u32 %v17592_v56, %v12092_v63  ;;  %v11916_v56 = vld [vmem:[%s28269_s3 + $0x198] sm:$0xf0] }
 0x18f   :  { %5333 = vmatpush.bf16.msra.mxu0 %v11887_v14  ;;  %v17498_v14 = vld [vmem:[%s28269_s3 + $0x4] sm:$0xf]  ;;  %v5081_v20 = vadd.f32 %v5080_v27, %v5068_v34  ;;  %v11783_v34 = vor.u32 %v17514_v17, %v11780_v22  ;;  %v12084_v22 = vld [vmem:[%s28269_s3 + $0x2e8] sm:$0xf0] }
 0x190   :  { %5346 = vmatpush.bf16.msra.mxu1 %v11951_v19  ;;  %v11716_v19 = vld [vmem:[%s28269_s3 + $0x8] sm:$0xf0]  ;;  %5311 = vmatpush.bf16.msrb.mxu2 %v11727_v37  ;;  %v17590_v27 = vld [vmem:[%s28269_s3 + $0x2e4] sm:$0xf] }
 0x191   :  { %v11719_v16 = vor.u32 %v17498_v14, %v11716_v19  ;;  %v21679_v8 = vadd.f32 %v5093_v53, %v5081_v20  ;;  %5324 = vmatpush.bf16.msrb.mxu3 %v11791_v10  ;;  %v11924_v37 = vld [vmem:[%s28269_s3 + $0x1a8] sm:$0xf0]  ;;  %v17574_v14 = vld [vmem:[%s28269_s3 + $0x264] sm:$0xf]  ;;  %v11852_v20 = vld [vmem:[%s28269_s3 + $0x118] sm:$0xf0]  ;;  %v12087_v63 = vor.u32 %v17590_v27, %v12084_v22 }
 0x192   :  { %v12020_v10 = vld [vmem:[%s28269_s3 + $0x268] sm:$0xf0]  ;;  %v12220_v22 = vld [vmem:[%s28269_s3 + $0x3f8] sm:$0xf0] }
 0x193   :  { %5334 = vmatpush.bf16.msra.mxu0 %v11879_v12  ;;  %v11860_v12 = vld [vmem:[%s28269_s3 + $0x128] sm:$0xf0]  ;;  %v12023_v53 = vor.u32 %v17574_v14, %v12020_v10 }
 0x194   :  { %5347 = vmatpush.bf16.msra.mxu1 %v11943_v13  ;;  %v17550_v13 = vld [vmem:[%s28269_s3 + $0x1a4] sm:$0xf]  ;;  %v5069_v19 = vpop.f32.mrf.mxu3  ;;  %v11863_v17 = vor.u32 %v17534_v0, %v11860_v12  ;;  %5312 = vmatpush.bf16.msrb.mxu2 %v11719_v16  ;;  %v12012_v16 = vld [vmem:[%s28269_s3 + $0x258] sm:$0xf0]  ;;  %v5082_v0 = vpop.f32.mrf.mxu0  ;;  %v11855_v12 = vor.u32 %v17532_v47, %v11852_v20  ;;  %v11908_v14 = vld [vmem:[%s28269_s3 + $0x188] sm:$0xf0] }
 0x195   :  { %v11927_v7 = vor.u32 %v17550_v13, %v11924_v37  ;;  %5325 = vmatpush.bf16.msrb.mxu3 %v11783_v34  ;;  %v17588_v34 = vld [vmem:[%s28269_s3 + $0x2d4] sm:$0xf]  ;;  %v17530_v13 = vld [vmem:[%s28269_s3 + $0x104] sm:$0xf]  ;;  %v5095_v37 = vpop.f32.mrf.mxu1  ;;  %v12004_v47 = vld [vmem:[%s28269_s3 + $0x248] sm:$0xf0] }
 0x196   :  { %v17608_v19 = vld [vmem:[%s28269_s3 + $0x374] sm:$0xf]  ;;  %v17606_v0 = vld [vmem:[%s28269_s3 + $0x364] sm:$0xf] }
 0x197   :  { %5335 = vmatpush.bf16.msra.mxu0 %v11871_v21  ;;  %v17548_v21 = vld [vmem:[%s28269_s3 + $0x194] sm:$0xf]  ;;  %5313 = vmatmul.bf16.vlgmr.msrb.gmra.mxu2 %v19408_v1  ;;  %v11844_v1 = vld [vmem:[%s28269_s3 + $0x108] sm:$0xf0] }
 0x198   :  { %5348 = vmatpush.bf16.msra.mxu1 %v11935_v54  ;;  %5357 = vmatpush.bf16.msra.mxu2 %v12031_v25  ;;  %v17572_v54 = vld [vmem:[%s28269_s3 + $0x254] sm:$0xf]  ;;  %v12076_v25 = vld [vmem:[%s28269_s3 + $0x2d8] sm:$0xf0]  ;;  %v11919_v5 = vor.u32 %v17548_v21, %v11916_v56  ;;  %v11847_v20 = vor.u32 %v17530_v13, %v11844_v1  ;;  %v12068_v21 = vld [vmem:[%s28269_s3 + $0x2c8] sm:$0xf0] }
 0x199   :  { %5370 = vmatpush.bf16.msra.mxu3 %v12095_v15  ;;  %v17546_v15 = vld [vmem:[%s28269_s3 + $0x184] sm:$0xf]  ;;  %v12015_v10 = vor.u32 %v17572_v54, %v12012_v16  ;;  %v12079_v27 = vor.u32 %v17588_v34, %v12076_v25  ;;  %v12212_v13 = vld [vmem:[%s28269_s3 + $0x3e8] sm:$0xf0]  ;;  %v17568_v37 = vld [vmem:[%s28269_s3 + $0x234] sm:$0xf] }
 0x19a   :  { %5326 = vmatmul.bf16.vlgmr.msrb.gmra.mxu3 %v19410_v3  ;;  %v12156_v3 = vld [vmem:[%s28269_s3 + $0x378] sm:$0xf0]  ;;  %v11911_v56 = vor.u32 %v17546_v15, %v11908_v14  ;;  %v17622_v34 = vld [vmem:[%s28269_s3 + $0x3e4] sm:$0xf]  ;;  %v17584_v1 = vld [vmem:[%s28269_s3 + $0x2b4] sm:$0xf] }
 0x19b   :  { %5336 = vmatpush.bf16.msra.mxu0 %v11863_v17  ;;  %v17624_v17 = vld [vmem:[%s28269_s3 + $0x3f4] sm:$0xf]  ;;  %v12060_v15 = vld [vmem:[%s28269_s3 + $0x2b8] sm:$0xf0] }
 0x19c   :  { %5349 = vmatpush.bf16.msra.mxu1 %v11927_v7  ;;  %5358 = vmatpush.bf16.msra.mxu2 %v12023_v53  ;;  %v17570_v7 = vld [vmem:[%s28269_s3 + $0x244] sm:$0xf]  ;;  %v12223_v54 = vor.u32 %v17624_v17, %v12220_v22  ;;  %v12140_v17 = vld [vmem:[%s28269_s3 + $0x358] sm:$0xf0]  ;;  %v12063_v22 = vor.u32 %v17584_v1, %v12060_v15  ;;  %v17580_v1 = vld [vmem:[%s28269_s3 + $0x294] sm:$0xf] }
 0x19d   :  { %5371 = vmatpush.bf16.msra.mxu3 %v12087_v63  ;;  %v17586_v53 = vld [vmem:[%s28269_s3 + $0x2c4] sm:$0xf]  ;;  %v12159_v63 = vor.u32 %v17608_v19, %v12156_v3  ;;  %v12007_v16 = vor.u32 %v17570_v7, %v12004_v47  ;;  %v17604_v3 = vld [vmem:[%s28269_s3 + $0x354] sm:$0xf]  ;;  %v12204_v7 = vld [vmem:[%s28269_s3 + $0x3d8] sm:$0xf0] }
 0x19e   :  { %v12071_v25 = vor.u32 %v17586_v53, %v12068_v21  ;;  %v17566_v47 = vld [vmem:[%s28269_s3 + $0x224] sm:$0xf]  ;;  %v12143_v21 = vor.u32 %v17604_v3, %v12140_v17  ;;  %v12044_v15 = vld [vmem:[%s28269_s3 + $0x298] sm:$0xf0] }
 0x19f   :  { %5337 = vmatpush.bf16.msra.mxu0 %v11855_v12  ;;  %v12148_v12 = vld [vmem:[%s28269_s3 + $0x368] sm:$0xf0]  ;;  %v17582_v53 = vld [vmem:[%s28269_s3 + $0x2a4] sm:$0xf]  ;;  %v12124_v17 = vld [vmem:[%s28269_s3 + $0x338] sm:$0xf0] }
 0x1a0   :  { %5350 = vmatpush.bf16.msra.mxu1 %v11919_v5  ;;  %5359 = vmatpush.bf16.msra.mxu2 %v12015_v10  ;;  %v11996_v5 = vld [vmem:[%s28269_s3 + $0x238] sm:$0xf0]  ;;  %v12151_v14 = vor.u32 %v17606_v0, %v12148_v12  ;;  %v12215_v10 = vor.u32 %v17622_v34, %v12212_v13  ;;  %v5106_v0 = vpop.f32.mrf.mxu2  ;;  %v12196_v34 = vld [vmem:[%s28269_s3 + $0x3c8] sm:$0xf0] }
 0x1a1   :  { %5372 = vmatpush.bf16.msra.mxu3 %v12079_v27  ;;  %v11999_v19 = vor.u32 %v17568_v37, %v11996_v5  ;;  %v17620_v27 = vld [vmem:[%s28269_s3 + $0x3d4] sm:$0xf]  ;;  %v11980_v13 = vld [vmem:[%s28269_s3 + $0x218] sm:$0xf0]  ;;  %v5107_v37 = vadd.f32 %v5106_v0, %v21679_v8  ;;  %v5119_v5 = vpop.f32.mrf.mxu3 }
 0x1a2   :  { %v17656_v0 = vld [vmem:[%s28269_s3 + $0x4f4] sm:$0xf] }
 0x1a3   :  { %5338 = vmatpush.bf16.msra.mxu0 %v11847_v20  ;;  %v11988_v20 = vld [vmem:[%s28269_s3 + $0x228] sm:$0xf0] }
 0x1a4   :  { %5351 = vmatpush.bf16.msra.mxu1 %v11911_v56  ;;  %5360 = vmatpush.bf16.msra.mxu2 %v12007_v16  ;;  %v12207_v56 = vor.u32 %v17620_v27, %v12204_v7  ;;  %v17618_v16 = vld [vmem:[%s28269_s3 + $0x3c4] sm:$0xf]  ;;  %v17616_v27 = vld [vmem:[%s28269_s3 + $0x3b4] sm:$0xf]  ;;  %v12047_v7 = vor.u32 %v17580_v1, %v12044_v15 }
 0x1a5   :  { %5373 = vmatpush.bf16.msra.mxu3 %v12071_v25  ;;  %v17564_v25 = vld [vmem:[%s28269_s3 + $0x214] sm:$0xf]  ;;  %v12199_v3 = vor.u32 %v17618_v16, %v12196_v34 }
 0x1a6   :  { %5339 = vmatmul.bf16.vlgmr.msra.gmra.mxu0 %v19471_v36  ;;  %v12052_v36 = vld [vmem:[%s28269_s3 + $0x2a8] sm:$0xf0]  ;;  %v11983_v8 = vor.u32 %v17564_v25, %v11980_v13  ;;  %v17598_v13 = vld [vmem:[%s28269_s3 + $0x324] sm:$0xf] }
 0x1a7   :  { %5383 = vmatpush.bf16.msrb.mxu0 %v12159_v63  ;;  %5352 = vmatmul.bf16.vlgmr.msra.gmra.mxu1 %v19488_v42  ;;  %v11991_v63 = vor.u32 %v17566_v47, %v11988_v20  ;;  %v12132_v42 = vld [vmem:[%s28269_s3 + $0x348] sm:$0xf0]  ;;  %v12055_v12 = vor.u32 %v17582_v53, %v12052_v36  ;;  %v17562_v47 = vld [vmem:[%s28269_s3 + $0x204] sm:$0xf]  ;;  %v5132_v36 = vpop.f32.mrf.mxu0 }
 0x1a8   :  { %5396 = vmatpush.bf16.msrb.mxu1 %v12223_v54  ;;  %5361 = vmatpush.bf16.msra.mxu2 %v11999_v19  ;;  %v17602_v54 = vld [vmem:[%s28269_s3 + $0x344] sm:$0xf]  ;;  %v5120_v19 = vadd.f32 %v5119_v5, %v5107_v37  ;;  %v11972_v20 = vld [vmem:[%s28269_s3 + $0x208] sm:$0xf0] }
 0x1a9   :  { %5374 = vmatpush.bf16.msra.mxu3 %v12063_v22  ;;  %v12188_v22 = vld [vmem:[%s28269_s3 + $0x3b8] sm:$0xf0]  ;;  %v17578_v53 = vld [vmem:[%s28269_s3 + $0x284] sm:$0xf]  ;;  %v11975_v25 = vor.u32 %v17562_v47, %v11972_v20  ;;  %v12116_v37 = vld [vmem:[%s28269_s3 + $0x328] sm:$0xf0] }
 0x1aa   :  { %v12191_v34 = vor.u32 %v17616_v27, %v12188_v22  ;;  %v5121_v27 = vpop.f32.mrf.mxu3  ;;  %v12119_v22 = vor.u32 %v17598_v13, %v12116_v37  ;;  %v12340_v47 = vld [vmem:[%s28269_s3 + $0x4e8] sm:$0xf0]  ;;  %v17594_v13 = vld [vmem:[%s28269_s3 + $0x304] sm:$0xf] }
 0x1ab   :  { %5384 = vmatpush.bf16.msrb.mxu0 %v12151_v14  ;;  %v12135_v14 = vor.u32 %v17602_v54, %v12132_v42  ;;  %v5133_v54 = vadd.f32 %v5132_v36, %v5120_v19  ;;  %v5145_v42 = vpop.f32.mrf.mxu1  ;;  %v5108_v19 = vpop.f32.mrf.mxu2  ;;  %v12108_v36 = vld [vmem:[%s28269_s3 + $0x318] sm:$0xf0]  ;;  %v17634_v27 = vld [vmem:[%s28269_s3 + $0x444] sm:$0xf] }
 0x1ac   :  { %5397 = vmatpush.bf16.msrb.mxu1 %v12215_v10  ;;  %v17600_v10 = vld [vmem:[%s28269_s3 + $0x334] sm:$0xf]  ;;  %5362 = vmatpush.bf16.msra.mxu2 %v11991_v63  ;;  %v12284_v63 = vld [vmem:[%s28269_s3 + $0x478] sm:$0xf0] }
 0x1ad   :  { %5375 = vmatpush.bf16.msra.mxu3 %v12055_v12  ;;  %v12127_v16 = vor.u32 %v17600_v10, %v12124_v17  ;;  %v12348_v12 = vld [vmem:[%s28269_s3 + $0x4f8] sm:$0xf0]  ;;  %v21878_v5 = vadd.f32 %v5145_v42, %v5133_v54  ;;  %v12180_v10 = vld [vmem:[%s28269_s3 + $0x3a8] sm:$0xf0]  ;;  %v17636_v42 = vld [vmem:[%s28269_s3 + $0x454] sm:$0xf] }
 0x1ae   :  { %v12276_v17 = vld [vmem:[%s28269_s3 + $0x468] sm:$0xf0]  ;;  %v17672_v19 = vld [vmem:[%s28269_s3 + $0x574] sm:$0xf] }
 0x1af   :  { %5385 = vmatpush.bf16.msrb.mxu0 %v12143_v21  ;;  %v12036_v21 = vld [vmem:[%s28269_s3 + $0x288] sm:$0xf0] }
 0x1b0   :  { %5398 = vmatpush.bf16.msrb.mxu1 %v12207_v56  ;;  %v17640_v56 = vld [vmem:[%s28269_s3 + $0x474] sm:$0xf]  ;;  %5363 = vmatpush.bf16.msra.mxu2 %v11983_v8  ;;  %v12039_v1 = vor.u32 %v17578_v53, %v12036_v21  ;;  %v17638_v8 = vld [vmem:[%s28269_s3 + $0x464] sm:$0xf] }
 0x1b1   :  { %5376 = vmatpush.bf16.msra.mxu3 %v12047_v7  ;;  %v12287_v15 = vor.u32 %v17640_v56, %v12284_v63  ;;  %v17654_v7 = vld [vmem:[%s28269_s3 + $0x4e4] sm:$0xf]  ;;  %v17596_v53 = vld [vmem:[%s28269_s3 + $0x314] sm:$0xf]  ;;  %v12279_v21 = vor.u32 %v17638_v8, %v12276_v17  ;;  %v12172_v63 = vld [vmem:[%s28269_s3 + $0x398] sm:$0xf0] }
 0x1b2   :  { %v17612_v56 = vld [vmem:[%s28269_s3 + $0x394] sm:$0xf]  ;;  %v12343_v54 = vor.u32 %v17654_v7, %v12340_v47  ;;  %v12476_v17 = vld [vmem:[%s28269_s3 + $0x5f8] sm:$0xf0]  ;;  %v17650_v47 = vld [vmem:[%s28269_s3 + $0x4c4] sm:$0xf] }
 0x1b3   :  { %5386 = vmatpush.bf16.msrb.mxu0 %v12135_v14  ;;  %v17614_v14 = vld [vmem:[%s28269_s3 + $0x3a4] sm:$0xf]  ;;  %v5147_v37 = vpop.f32.mrf.mxu1 }
 0x1b4   :  { %5399 = vmatpush.bf16.msrb.mxu1 %v12199_v3  ;;  %v12351_v3 = vor.u32 %v17656_v0, %v12348_v12  ;;  %5364 = vmatpush.bf16.msra.mxu2 %v11975_v25  ;;  %v12183_v20 = vor.u32 %v17614_v14, %v12180_v10  ;;  %v5134_v0 = vpop.f32.mrf.mxu0  ;;  %v12111_v12 = vor.u32 %v17596_v53, %v12108_v36  ;;  %v12332_v25 = vld [vmem:[%s28269_s3 + $0x4d8] sm:$0xf0]  ;;  %v12164_v14 = vld [vmem:[%s28269_s3 + $0x388] sm:$0xf0] }
 0x1b5   :  { %5377 = vmatpush.bf16.msra.mxu3 %v12039_v1  ;;  %v12175_v1 = vor.u32 %v17612_v56, %v12172_v63  ;;  %v17670_v63 = vld [vmem:[%s28269_s3 + $0x564] sm:$0xf]  ;;  %v12468_v0 = vld [vmem:[%s28269_s3 + $0x5e8] sm:$0xf0] }
 0x1b7   :  { %5387 = vmatpush.bf16.msrb.mxu0 %v12127_v16  ;;  %v12268_v16 = vld [vmem:[%s28269_s3 + $0x458] sm:$0xf0]  ;;  %5365 = vmatmul.bf16.vlgmr.msra.gmra.mxu2 %v19602_v43  ;;  %v12100_v43 = vld [vmem:[%s28269_s3 + $0x308] sm:$0xf0] }
 0x1b8   :  { %5400 = vmatpush.bf16.msrb.mxu1 %v12191_v34  ;;  %5409 = vmatpush.bf16.msrb.mxu2 %v12287_v15  ;;  %v17652_v34 = vld [vmem:[%s28269_s3 + $0x4d4] sm:$0xf]  ;;  %v17610_v15 = vld [vmem:[%s28269_s3 + $0x384] sm:$0xf]  ;;  %v12271_v10 = vor.u32 %v17636_v42, %v12268_v16  ;;  %v12103_v7 = vor.u32 %v17594_v13, %v12100_v43  ;;  %v12316_v13 = vld [vmem:[%s28269_s3 + $0x4b8] sm:$0xf0] }
 0x1b9   :  { %5422 = vmatpush.bf16.msrb.mxu3 %v12351_v3  ;;  %v17688_v3 = vld [vmem:[%s28269_s3 + $0x5f4] sm:$0xf]  ;;  %v12335_v8 = vor.u32 %v17652_v34, %v12332_v25  ;;  %v12167_v53 = vor.u32 %v17610_v15, %v12164_v14  ;;  %v17686_v42 = vld [vmem:[%s28269_s3 + $0x5e4] sm:$0xf]  ;;  %v12252_v34 = vld [vmem:[%s28269_s3 + $0x438] sm:$0xf0] }
 0x1ba   :  { %5378 = vmatmul.bf16.vlgmr.msra.gmra.mxu3 %v19610_v48  ;;  %v12412_v48 = vld [vmem:[%s28269_s3 + $0x578] sm:$0xf0]  ;;  %v17648_v25 = vld [vmem:[%s28269_s3 + $0x4b4] sm:$0xf] }
 0x1bb   :  { %5388 = vmatpush.bf16.msrb.mxu0 %v12119_v22  ;;  %v12260_v22 = vld [vmem:[%s28269_s3 + $0x448] sm:$0xf0]  ;;  %v12415_v36 = vor.u32 %v17672_v19, %v12412_v48  ;;  %v17668_v15 = vld [vmem:[%s28269_s3 + $0x554] sm:$0xf]  ;;  %v12396_v14 = vld [vmem:[%s28269_s3 + $0x558] sm:$0xf0]  ;;  %v12319_v19 = vor.u32 %v17648_v25, %v12316_v13 }
 0x1bc   :  { %5401 = vmatpush.bf16.msrb.mxu1 %v12183_v20  ;;  %5410 = vmatpush.bf16.msrb.mxu2 %v12279_v21  ;;  %v12324_v20 = vld [vmem:[%s28269_s3 + $0x4c8] sm:$0xf0]  ;;  %v12479_v21 = vor.u32 %v17688_v3, %v12476_v17  ;;  %v12263_v56 = vor.u32 %v17634_v27, %v12260_v22  ;;  %v12460_v48 = vld [vmem:[%s28269_s3 + $0x5d8] sm:$0xf0]  ;;  %v17630_v3 = vld [vmem:[%s28269_s3 + $0x424] sm:$0xf]  ;;  %v12399_v27 = vor.u32 %v17668_v15, %v12396_v14 }
 0x1bd   :  { %5423 = vmatpush.bf16.msrb.mxu3 %v12343_v54  ;;  %v12404_v54 = vld [vmem:[%s28269_s3 + $0x568] sm:$0xf0]  ;;  %v12327_v16 = vor.u32 %v17650_v47, %v12324_v20  ;;  %v17646_v17 = vld [vmem:[%s28269_s3 + $0x4a4] sm:$0xf] }
 0x1be   :  { %v12407_v37 = vor.u32 %v17670_v63, %v12404_v54  ;;  %v17666_v47 = vld [vmem:[%s28269_s3 + $0x544] sm:$0xf]  ;;  %v12236_v63 = vld [vmem:[%s28269_s3 + $0x418] sm:$0xf0] }
 0x1bf   :  { %5389 = vmatpush.bf16.msrb.mxu0 %v12111_v12  ;;  %v17632_v12 = vld [vmem:[%s28269_s3 + $0x434] sm:$0xf]  ;;  %v17682_v20 = vld [vmem:[%s28269_s3 + $0x5c4] sm:$0xf] }
 0x1c0   :  { %5402 = vmatpush.bf16.msrb.mxu1 %v12175_v1  ;;  %5411 = vmatpush.bf16.msrb.mxu2 %v12271_v10  ;;  %v12471_v1 = vor.u32 %v17686_v42, %v12468_v0  ;;  %v12255_v43 = vor.u32 %v17632_v12, %v12252_v34  ;;  %v17684_v10 = vld [vmem:[%s28269_s3 + $0x5d4] sm:$0xf]  ;;  %v5171_v42 = vpop.f32.mrf.mxu3  ;;  %v12300_v0 = vld [vmem:[%s28269_s3 + $0x498] sm:$0xf0]  ;;  %v17626_v14 = vld [vmem:[%s28269_s3 + $0x404] sm:$0xf] }
 0x1c1   :  { %5424 = vmatpush.bf16.msrb.mxu3 %v12335_v8  ;;  %v12244_v8 = vld [vmem:[%s28269_s3 + $0x428] sm:$0xf0]  ;;  %v12463_v22 = vor.u32 %v17684_v10, %v12460_v48  ;;  %v17664_v34 = vld [vmem:[%s28269_s3 + $0x534] sm:$0xf] }
 0x1c2   :  { %v12228_v10 = vld [vmem:[%s28269_s3 + $0x408] sm:$0xf0] }
 0x1c3   :  { %5390 = vmatpush.bf16.msrb.mxu0 %v12103_v7  ;;  %v12247_v7 = vor.u32 %v17630_v3, %v12244_v8  ;;  %v5184_v48 = vpop.f32.mrf.mxu0  ;;  %v12292_v3 = vld [vmem:[%s28269_s3 + $0x488] sm:$0xf0]  ;;  %v17704_v8 = vld [vmem:[%s28269_s3 + $0x674] sm:$0xf] }
 0x1c4   :  { %5403 = vmatpush.bf16.msrb.mxu1 %v12167_v53  ;;  %5412 = vmatpush.bf16.msrb.mxu2 %v12263_v56  ;;  %v5158_v53 = vpop.f32.mrf.mxu2  ;;  %v17628_v56 = vld [vmem:[%s28269_s3 + $0x414] sm:$0xf] }
 0x1c5   :  { %5425 = vmatpush.bf16.msrb.mxu3 %v12327_v16  ;;  %v5159_v54 = vadd.f32 %v5158_v53, %v21878_v5  ;;  %v17644_v16 = vld [vmem:[%s28269_s3 + $0x494] sm:$0xf]  ;;  %v12239_v5 = vor.u32 %v17628_v56, %v12236_v63  ;;  %v17662_v53 = vld [vmem:[%s28269_s3 + $0x524] sm:$0xf] }
 0x1c6   :  { %5391 = vmatmul.bf16.vlgmr.msrb.gmra.mxu0 %v19689_v26  ;;  %v12308_v26 = vld [vmem:[%s28269_s3 + $0x4a8] sm:$0xf0]  ;;  %v12303_v15 = vor.u32 %v17644_v16, %v12300_v0 }
 0x1c7   :  { %5435 = vmatpush.bf16.msra.mxu0 %v12415_v36  ;;  %5404 = vmatmul.bf16.vlgmr.msrb.gmra.mxu1 %v19699_v29  ;;  %v12388_v29 = vld [vmem:[%s28269_s3 + $0x548] sm:$0xf0]  ;;  %v12311_v36 = vor.u32 %v17646_v17, %v12308_v26  ;;  %v5172_v25 = vadd.f32 %v5171_v42, %v5159_v54  ;;  %v12540_v17 = vld [vmem:[%s28269_s3 + $0x678] sm:$0xf0]  ;;  %v17678_v54 = vld [vmem:[%s28269_s3 + $0x5a4] sm:$0xf] }
 0x1c8   :  { %5448 = vmatpush.bf16.msra.mxu1 %v12479_v21  ;;  %5413 = vmatpush.bf16.msrb.mxu2 %v12255_v43  ;;  %v12452_v21 = vld [vmem:[%s28269_s3 + $0x5c8] sm:$0xf0]  ;;  %v12391_v12 = vor.u32 %v17666_v47, %v12388_v29  ;;  %v12444_v43 = vld [vmem:[%s28269_s3 + $0x5b8] sm:$0xf0]  ;;  %v12543_v63 = vor.u32 %v17704_v8, %v12540_v17 }
 0x1c9   :  { %5426 = vmatpush.bf16.msrb.mxu3 %v12319_v19  ;;  %v12455_v13 = vor.u32 %v17682_v20, %v12452_v21  ;;  %v17642_v19 = vld [vmem:[%s28269_s3 + $0x484] sm:$0xf]  ;;  %v5185_v26 = vadd.f32 %v5184_v48, %v5172_v25  ;;  %v12604_v47 = vld [vmem:[%s28269_s3 + $0x6f8] sm:$0xf0]  ;;  %v12231_v20 = vor.u32 %v17626_v14, %v12228_v10  ;;  %v12436_v42 = vld [vmem:[%s28269_s3 + $0x5a8] sm:$0xf0]  ;;  %v5173_v25 = vpop.f32.mrf.mxu3 }
 0x1ca   :  { %v12295_v56 = vor.u32 %v17642_v19, %v12292_v3  ;;  %v17676_v10 = vld [vmem:[%s28269_s3 + $0x594] sm:$0xf]  ;;  %v12428_v19 = vld [vmem:[%s28269_s3 + $0x598] sm:$0xf0]  ;;  %v12580_v25 = vld [vmem:[%s28269_s3 + $0x6c8] sm:$0xf0] }
 0x1cb   :  { %5436 = vmatpush.bf16.msra.mxu0 %v12407_v37  ;;  %v12380_v37 = vld [vmem:[%s28269_s3 + $0x538] sm:$0xf0]  ;;  %v17700_v3 = vld [vmem:[%s28269_s3 + $0x654] sm:$0xf]  ;;  %v5186_v17 = vpop.f32.mrf.mxu0 }
 0x1cc   :  { %5449 = vmatpush.bf16.msra.mxu1 %v12471_v1  ;;  %5414 = vmatpush.bf16.msrb.mxu2 %v12247_v7  ;;  %v17680_v1 = vld [vmem:[%s28269_s3 + $0x5b4] sm:$0xf]  ;;  %v5160_v16 = vpop.f32.mrf.mxu2  ;;  %v12524_v8 = vld [vmem:[%s28269_s3 + $0x658] sm:$0xf0] }
 0x1cd   :  { %5427 = vmatpush.bf16.msrb.mxu3 %v12311_v36  ;;  %v17720_v7 = vld [vmem:[%s28269_s3 + $0x6f4] sm:$0xf]  ;;  %v12447_v29 = vor.u32 %v17680_v1, %v12444_v43  ;;  %v12372_v36 = vld [vmem:[%s28269_s3 + $0x528] sm:$0xf0]  ;;  %v12439_v1 = vor.u32 %v17678_v54, %v12436_v42  ;;  %v12732_v42 = vld [vmem:[%s28269_s3 + $0x7f8] sm:$0xf0] }
 0x1ce   :  { %v12607_v0 = vor.u32 %v17720_v7, %v12604_v47  ;;  %v17660_v43 = vld [vmem:[%s28269_s3 + $0x514] sm:$0xf]  ;;  %v17658_v7 = vld [vmem:[%s28269_s3 + $0x504] sm:$0xf]  ;;  %v12572_v17 = vld [vmem:[%s28269_s3 + $0x6b8] sm:$0xf0] }
 0x1cf   :  { %5437 = vmatpush.bf16.msra.mxu0 %v12399_v27  ;;  %v5197_v27 = vpop.f32.mrf.mxu1  ;;  %v17698_v16 = vld [vmem:[%s28269_s3 + $0x644] sm:$0xf] }
 0x1d0   :  { %5450 = vmatpush.bf16.msra.mxu1 %v12463_v22  ;;  %v12383_v22 = vor.u32 %v17664_v34, %v12380_v37  ;;  %5415 = vmatpush.bf16.msrb.mxu2 %v12239_v5  ;;  %v22077_v21 = vadd.f32 %v5197_v27, %v5185_v26  ;;  %v12532_v34 = vld [vmem:[%s28269_s3 + $0x668] sm:$0xf0]  ;;  %v17718_v5 = vld [vmem:[%s28269_s3 + $0x6e4] sm:$0xf]  ;;  %v17716_v27 = vld [vmem:[%s28269_s3 + $0x6d4] sm:$0xf] }
 0x1d1   :  { %5428 = vmatpush.bf16.msrb.mxu3 %v12303_v15  ;;  %v12596_v37 = vld [vmem:[%s28269_s3 + $0x6e8] sm:$0xf0]  ;;  %v12364_v15 = vld [vmem:[%s28269_s3 + $0x518] sm:$0xf0] }
 0x1d2   :  { %v12599_v48 = vor.u32 %v17718_v5, %v12596_v37  ;;  %v12367_v26 = vor.u32 %v17660_v43, %v12364_v15  ;;  %v17734_v43 = vld [vmem:[%s28269_s3 + $0x764] sm:$0xf]  ;;  %v12660_v15 = vld [vmem:[%s28269_s3 + $0x768] sm:$0xf0] }
 0x1d3   :  { %5438 = vmatpush.bf16.msra.mxu0 %v12391_v12  ;;  %v17702_v12 = vld [vmem:[%s28269_s3 + $0x664] sm:$0xf] }
 0x1d4   :  { %5451 = vmatpush.bf16.msra.mxu1 %v12455_v13  ;;  %v12375_v13 = vor.u32 %v17662_v53, %v12372_v36  ;;  %5416 = vmatpush.bf16.msrb.mxu2 %v12231_v20  ;;  %v12535_v14 = vor.u32 %v17702_v12, %v12532_v34  ;;  %v17674_v20 = vld [vmem:[%s28269_s3 + $0x584] sm:$0xf]  ;;  %v12420_v53 = vld [vmem:[%s28269_s3 + $0x588] sm:$0xf0]  ;;  %v12527_v36 = vor.u32 %v17700_v3, %v12524_v8  ;;  %v12508_v3 = vld [vmem:[%s28269_s3 + $0x638] sm:$0xf0] }
 0x1d5   :  { %5429 = vmatpush.bf16.msrb.mxu3 %v12295_v56  ;;  %v17736_v56 = vld [vmem:[%s28269_s3 + $0x774] sm:$0xf]  ;;  %v17714_v34 = vld [vmem:[%s28269_s3 + $0x6c4] sm:$0xf] }
 0x1d6   :  { %v17712_v8 = vld [vmem:[%s28269_s3 + $0x6b4] sm:$0xf] }
 0x1d7   :  { %5439 = vmatpush.bf16.msra.mxu0 %v12383_v22  ;;  %5417 = vmatmul.bf16.vlgmr.msrb.gmra.mxu2 %v19811_v32  ;;  %v12588_v22 = vld [vmem:[%s28269_s3 + $0x6d8] sm:$0xf0]  ;;  %v5199_v47 = vpop.f32.mrf.mxu1  ;;  %v12356_v32 = vld [vmem:[%s28269_s3 + $0x508] sm:$0xf0] }
 0x1d8   :  { %5452 = vmatpush.bf16.msra.mxu1 %v12447_v29  ;;  %5461 = vmatpush.bf16.msra.mxu2 %v12543_v63  ;;  %v12431_v29 = vor.u32 %v17676_v10, %v12428_v19  ;;  %v17752_v63 = vld [vmem:[%s28269_s3 + $0x7f4] sm:$0xf]  ;;  %v12591_v54 = vor.u32 %v17716_v27, %v12588_v22  ;;  %v12359_v12 = vor.u32 %v17658_v7, %v12356_v32  ;;  %v12724_v19 = vld [vmem:[%s28269_s3 + $0x7e8] sm:$0xf0]  ;;  %v12652_v47 = vld [vmem:[%s28269_s3 + $0x758] sm:$0xf0] }
 0x1d9   :  { %5474 = vmatpush.bf16.msra.mxu3 %v12607_v0  ;;  %v12516_v0 = vld [vmem:[%s28269_s3 + $0x648] sm:$0xf0]  ;;  %v12735_v37 = vor.u32 %v17752_v63, %v12732_v42  ;;  %v12583_v10 = vor.u32 %v17714_v34, %v12580_v25  ;;  %v17732_v7 = vld [vmem:[%s28269_s3 + $0x754] sm:$0xf]  ;;  %v12575_v32 = vor.u32 %v17712_v8, %v12572_v17  ;;  %v17730_v42 = vld [vmem:[%s28269_s3 + $0x744] sm:$0xf] }
 0x1da   :  { %5430 = vmatmul.bf16.vlgmr.msrb.gmra.mxu3 %v19819_v38  ;;  %v12668_v38 = vld [vmem:[%s28269_s3 + $0x778] sm:$0xf0]  ;;  %v12708_v34 = vld [vmem:[%s28269_s3 + $0x7c8] sm:$0xf0]  ;;  %v17692_v25 = vld [vmem:[%s28269_s3 + $0x614] sm:$0xf] }
 0x1db   :  { %5440 = vmatpush.bf16.msra.mxu0 %v12375_v13  ;;  %v12423_v13 = vor.u32 %v17674_v20, %v12420_v53  ;;  %v12671_v5 = vor.u32 %v17736_v56, %v12668_v38  ;;  %v12716_v20 = vld [vmem:[%s28269_s3 + $0x7d8] sm:$0xf0]  ;;  %v17694_v53 = vld [vmem:[%s28269_s3 + $0x624] sm:$0xf]  ;;  %v12655_v38 = vor.u32 %v17732_v7, %v12652_v47  ;;  %v12548_v47 = vld [vmem:[%s28269_s3 + $0x688] sm:$0xf0] }
 0x1dc   :  { %5453 = vmatpush.bf16.msra.mxu1 %v12439_v1  ;;  %5462 = vmatpush.bf16.msra.mxu2 %v12535_v14  ;;  %v12519_v1 = vor.u32 %v17698_v16, %v12516_v0  ;;  %v17750_v14 = vld [vmem:[%s28269_s3 + $0x7e4] sm:$0xf]  ;;  %v5210_v0 = vpop.f32.mrf.mxu2  ;;  %v12700_v8 = vld [vmem:[%s28269_s3 + $0x7b8] sm:$0xf0] }
 0x1dd   :  { %5475 = vmatpush.bf16.msra.mxu3 %v12599_v48  ;;  %v17696_v48 = vld [vmem:[%s28269_s3 + $0x634] sm:$0xf]  ;;  %v12727_v27 = vor.u32 %v17750_v14, %v12724_v19  ;;  %v17710_v56 = vld [vmem:[%s28269_s3 + $0x6a4] sm:$0xf] }
 0x1de   :  { %v12511_v22 = vor.u32 %v17696_v48, %v12508_v3  ;;  %v17746_v16 = vld [vmem:[%s28269_s3 + $0x7c4] sm:$0xf]  ;;  %v17728_v14 = vld [vmem:[%s28269_s3 + $0x734] sm:$0xf]  ;;  %v12636_v48 = vld [vmem:[%s28269_s3 + $0x738] sm:$0xf0] }
 0x1df   :  { %5441 = vmatpush.bf16.msra.mxu0 %v12367_v26  ;;  %v12663_v26 = vor.u32 %v17734_v43, %v12660_v15  ;;  %v12556_v43 = vld [vmem:[%s28269_s3 + $0x698] sm:$0xf0]  ;;  %v12711_v19 = vor.u32 %v17746_v16, %v12708_v34  ;;  %v17744_v3 = vld [vmem:[%s28269_s3 + $0x7b4] sm:$0xf]  ;;  %v12692_v34 = vld [vmem:[%s28269_s3 + $0x7a8] sm:$0xf0] }
 0x1e0   :  { %5454 = vmatpush.bf16.msra.mxu1 %v12431_v29  ;;  %5463 = vmatpush.bf16.msra.mxu2 %v12527_v36  ;;  %v17748_v29 = vld [vmem:[%s28269_s3 + $0x7d4] sm:$0xf]  ;;  %v12500_v36 = vld [vmem:[%s28269_s3 + $0x628] sm:$0xf0] }
 0x1e1   :  { %5476 = vmatpush.bf16.msra.mxu3 %v12591_v54  ;;  %v12719_v63 = vor.u32 %v17748_v29, %v12716_v20  ;;  %v12503_v54 = vor.u32 %v17694_v53, %v12500_v36  ;;  %v17768_v29 = vld [vmem:[%s28269_s3 + $0x874] sm:$0xf]  ;;  %v12639_v36 = vor.u32 %v17728_v14, %v12636_v48  ;;  %v12852_v14 = vld [vmem:[%s28269_s3 + $0x8e8] sm:$0xf0] }
 0x1e3   :  { %5442 = vmatpush.bf16.msra.mxu0 %v12359_v12  ;;  %v5236_v7 = vpop.f32.mrf.mxu0 }
 0x1e4   :  { %5455 = vmatpush.bf16.msra.mxu1 %v12423_v13  ;;  %5464 = vmatpush.bf16.msra.mxu2 %v12519_v1  ;;  %v12492_v13 = vld [vmem:[%s28269_s3 + $0x618] sm:$0xf0]  ;;  %v17708_v1 = vld [vmem:[%s28269_s3 + $0x694] sm:$0xf]  ;;  %v5249_v53 = vpop.f32.mrf.mxu1 }
 0x1e5   :  { %5477 = vmatpush.bf16.msra.mxu3 %v12583_v10  ;;  %v12559_v17 = vor.u32 %v17708_v1, %v12556_v43 }
 0x1e6   :  { %5443 = vmatmul.bf16.vlgmr.msra.gmra.mxu0 %v19892_v18  ;;  %v12564_v18 = vld [vmem:[%s28269_s3 + $0x6a8] sm:$0xf0] }
 0x1e7   :  { %5487 = vmatpush.bf16.msrb.mxu0 %v12671_v5  ;;  %5456 = vmatmul.bf16.vlgmr.msra.gmra.mxu1 %v19903_v23  ;;  %v12644_v23 = vld [vmem:[%s28269_s3 + $0x748] sm:$0xf0]  ;;  %v12567_v12 = vor.u32 %v17710_v56, %v12564_v18  ;;  %v5211_v5 = vadd.f32 %v5210_v0, %v22077_v21  ;;  %v12495_v21 = vor.u32 %v17692_v25, %v12492_v13  ;;  %v17784_v56 = vld [vmem:[%s28269_s3 + $0x8f4] sm:$0xf]  ;;  %v12860_v18 = vld [vmem:[%s28269_s3 + $0x8f8] sm:$0xf0]  ;;  %v5212_v25 = vpop.f32.mrf.mxu2 }
 0x1e8   :  { %5500 = vmatpush.bf16.msrb.mxu1 %v12735_v37  ;;  %5465 = vmatpush.bf16.msra.mxu2 %v12511_v22  ;;  %v5223_v37 = vpop.f32.mrf.mxu3  ;;  %v12647_v15 = vor.u32 %v17730_v42, %v12644_v23  ;;  %v17706_v22 = vld [vmem:[%s28269_s3 + $0x684] sm:$0xf]  ;;  %v12628_v42 = vld [vmem:[%s28269_s3 + $0x728] sm:$0xf0]  ;;  %v12863_v13 = vor.u32 %v17784_v56, %v12860_v18 }
 0x1e9   :  { %5478 = vmatpush.bf16.msra.mxu3 %v12575_v32  ;;  %v5224_v10 = vadd.f32 %v5223_v37, %v5211_v5  ;;  %v12796_v32 = vld [vmem:[%s28269_s3 + $0x878] sm:$0xf0]  ;;  %v12551_v16 = vor.u32 %v17706_v22, %v12548_v47  ;;  %v17766_v5 = vld [vmem:[%s28269_s3 + $0x864] sm:$0xf]  ;;  %v12788_v37 = vld [vmem:[%s28269_s3 + $0x868] sm:$0xf0] }
 0x1ea   :  { %v12799_v0 = vor.u32 %v17768_v29, %v12796_v32  ;;  %v12791_v48 = vor.u32 %v17766_v5, %v12788_v37  ;;  %v17780_v47 = vld [vmem:[%s28269_s3 + $0x8d4] sm:$0xf]  ;;  %v12844_v29 = vld [vmem:[%s28269_s3 + $0x8d8] sm:$0xf0]  ;;  %v17722_v32 = vld [vmem:[%s28269_s3 + $0x704] sm:$0xf] }
 0x1eb   :  { %5488 = vmatpush.bf16.msrb.mxu0 %v12663_v26  ;;  %v17690_v26 = vld [vmem:[%s28269_s3 + $0x604] sm:$0xf]  ;;  %v5237_v20 = vadd.f32 %v5236_v7, %v5224_v10  ;;  %v5238_v22 = vpop.f32.mrf.mxu0  ;;  %v12676_v56 = vld [vmem:[%s28269_s3 + $0x788] sm:$0xf0] }
 0x1ec   :  { %5501 = vmatpush.bf16.msrb.mxu1 %v12727_v27  ;;  %5466 = vmatpush.bf16.msra.mxu2 %v12503_v54  ;;  %v12484_v27 = vld [vmem:[%s28269_s3 + $0x608] sm:$0xf0]  ;;  %v17726_v54 = vld [vmem:[%s28269_s3 + $0x724] sm:$0xf]  ;;  %v17796_v22 = vld [vmem:[%s28269_s3 + $0x954] sm:$0xf] }
 0x1ed   :  { %5479 = vmatpush.bf16.msra.mxu3 %v12567_v12  ;;  %v22276_v23 = vadd.f32 %v5249_v53, %v5237_v20  ;;  %v17742_v12 = vld [vmem:[%s28269_s3 + $0x7a4] sm:$0xf]  ;;  %v12631_v43 = vor.u32 %v17726_v54, %v12628_v42  ;;  %v5251_v20 = vpop.f32.mrf.mxu1  ;;  %v12847_v54 = vor.u32 %v17780_v47, %v12844_v29  ;;  %v12988_v42 = vld [vmem:[%s28269_s3 + $0x9f8] sm:$0xf0]  ;;  %v12836_v25 = vld [vmem:[%s28269_s3 + $0x8c8] sm:$0xf0] }
 0x1ee   :  { %v12695_v10 = vor.u32 %v17742_v12, %v12692_v34  ;;  %v17778_v34 = vld [vmem:[%s28269_s3 + $0x8c4] sm:$0xf]  ;;  %v17812_v47 = vld [vmem:[%s28269_s3 + $0x9d4] sm:$0xf] }
 0x1ef   :  { %5489 = vmatpush.bf16.msrb.mxu0 %v12655_v38  ;;  %v12703_v38 = vor.u32 %v17744_v3, %v12700_v8  ;;  %v17740_v3 = vld [vmem:[%s28269_s3 + $0x794] sm:$0xf]  ;;  %v12684_v8 = vld [vmem:[%s28269_s3 + $0x798] sm:$0xf0]  ;;  %v17758_v20 = vld [vmem:[%s28269_s3 + $0x824] sm:$0xf] }
 0x1f0   :  { %5502 = vmatpush.bf16.msrb.mxu1 %v12719_v63  ;;  %5467 = vmatpush.bf16.msra.mxu2 %v12495_v21  ;;  %v12487_v63 = vor.u32 %v17690_v26, %v12484_v27  ;;  %v5225_v1 = vpop.f32.mrf.mxu3  ;;  %v12620_v21 = vld [vmem:[%s28269_s3 + $0x718] sm:$0xf0]  ;;  %v17764_v26 = vld [vmem:[%s28269_s3 + $0x854] sm:$0xf]  ;;  %v12687_v53 = vor.u32 %v17740_v3, %v12684_v8 }
 0x1f1   :  { %5480 = vmatpush.bf16.msra.mxu3 %v12559_v17  ;;  %v12780_v27 = vld [vmem:[%s28269_s3 + $0x858] sm:$0xf0]  ;;  %v17776_v3 = vld [vmem:[%s28269_s3 + $0x8b4] sm:$0xf] }
 0x1f2   :  { %v12783_v18 = vor.u32 %v17764_v26, %v12780_v27  ;;  %v12828_v8 = vld [vmem:[%s28269_s3 + $0x8b8] sm:$0xf0] }
 0x1f3   :  { %5490 = vmatpush.bf16.msrb.mxu0 %v12647_v15  ;;  %v17782_v15 = vld [vmem:[%s28269_s3 + $0x8e4] sm:$0xf]  ;;  %v12831_v29 = vor.u32 %v17776_v3, %v12828_v8 }
 0x1f4   :  { %5503 = vmatpush.bf16.msrb.mxu1 %v12711_v19  ;;  %5468 = vmatpush.bf16.msra.mxu2 %v12487_v63  ;;  %v17724_v19 = vld [vmem:[%s28269_s3 + $0x714] sm:$0xf]  ;;  %v12855_v17 = vor.u32 %v17782_v15, %v12852_v14  ;;  %v12916_v15 = vld [vmem:[%s28269_s3 + $0x968] sm:$0xf0]  ;;  %v17814_v14 = vld [vmem:[%s28269_s3 + $0x9e4] sm:$0xf] }
 0x1f5   :  { %5481 = vmatpush.bf16.msra.mxu3 %v12551_v16  ;;  %v12623_v7 = vor.u32 %v17724_v19, %v12620_v21  ;;  %v17816_v63 = vld [vmem:[%s28269_s3 + $0x9f4] sm:$0xf]  ;;  %v17762_v16 = vld [vmem:[%s28269_s3 + $0x844] sm:$0xf]  ;;  %v12980_v19 = vld [vmem:[%s28269_s3 + $0x9e8] sm:$0xf0] }
 0x1f6   :  { %v12991_v37 = vor.u32 %v17816_v63, %v12988_v42  ;;  %v17760_v21 = vld [vmem:[%s28269_s3 + $0x834] sm:$0xf]  ;;  %v12983_v26 = vor.u32 %v17814_v14, %v12980_v19  ;;  %v12964_v42 = vld [vmem:[%s28269_s3 + $0x9c8] sm:$0xf0]  ;;  %v17770_v3 = vld [vmem:[%s28269_s3 + $0x884] sm:$0xf] }
 0x1f7   :  { %5491 = vmatpush.bf16.msrb.mxu0 %v12639_v36  ;;  %5469 = vmatmul.bf16.vlgmr.msra.gmra.mxu2 %v20015_v33  ;;  %v12612_v33 = vld [vmem:[%s28269_s3 + $0x708] sm:$0xf0]  ;;  %v17738_v36 = vld [vmem:[%s28269_s3 + $0x784] sm:$0xf]  ;;  %v17808_v14 = vld [vmem:[%s28269_s3 + $0x9b4] sm:$0xf] }
 0x1f8   :  { %5504 = vmatpush.bf16.msrb.mxu1 %v12703_v38  ;;  %5513 = vmatpush.bf16.msrb.mxu2 %v12799_v0  ;;  %v17800_v38 = vld [vmem:[%s28269_s3 + $0x974] sm:$0xf]  ;;  %v12772_v0 = vld [vmem:[%s28269_s3 + $0x848] sm:$0xf0]  ;;  %v12615_v12 = vor.u32 %v17722_v32, %v12612_v33  ;;  %v12972_v32 = vld [vmem:[%s28269_s3 + $0x9d8] sm:$0xf0] }
 0x1f9   :  { %5526 = vmatpush.bf16.msrb.mxu3 %v12863_v13  ;;  %v12679_v13 = vor.u32 %v17738_v36, %v12676_v56  ;;  %v12775_v1 = vor.u32 %v17762_v16, %v12772_v0  ;;  %v17774_v33 = vld [vmem:[%s28269_s3 + $0x8a4] sm:$0xf]  ;;  %v12975_v56 = vor.u32 %v17812_v47, %v12972_v32  ;;  %v17756_v16 = vld [vmem:[%s28269_s3 + $0x814] sm:$0xf]  ;;  %v12748_v0 = vld [vmem:[%s28269_s3 + $0x818] sm:$0xf0] }
 0x1fa   :  { %5482 = vmatmul.bf16.vlgmr.msra.gmra.mxu3 %v20023_v40  ;;  %v12924_v40 = vld [vmem:[%s28269_s3 + $0x978] sm:$0xf0]  ;;  %v5262_v63 = vpop.f32.mrf.mxu2 }
 0x1fb   :  { %5492 = vmatpush.bf16.msrb.mxu0 %v12631_v43  ;;  %v12927_v5 = vor.u32 %v17800_v38, %v12924_v40  ;;  %v17798_v43 = vld [vmem:[%s28269_s3 + $0x964] sm:$0xf]  ;;  %v13116_v32 = vld [vmem:[%s28269_s3 + $0xaf8] sm:$0xf0] }
 0x1fc   :  { %5505 = vmatpush.bf16.msrb.mxu1 %v12695_v10  ;;  %5514 = vmatpush.bf16.msrb.mxu2 %v12791_v48  ;;  %v12839_v10 = vor.u32 %v17778_v34, %v12836_v25  ;;  %v12764_v48 = vld [vmem:[%s28269_s3 + $0x838] sm:$0xf0]  ;;  %v17794_v38 = vld [vmem:[%s28269_s3 + $0x944] sm:$0xf]  ;;  %v17772_v25 = vld [vmem:[%s28269_s3 + $0x894] sm:$0xf] }
 0x1fd   :  { %5527 = vmatpush.bf16.msrb.mxu3 %v12855_v17  ;;  %v12919_v17 = vor.u32 %v17798_v43, %v12916_v15  ;;  %v12767_v27 = vor.u32 %v17760_v21, %v12764_v48  ;;  %v17810_v40 = vld [vmem:[%s28269_s3 + $0x9c4] sm:$0xf]  ;;  %v5275_v34 = vpop.f32.mrf.mxu3  ;;  %v12892_v15 = vld [vmem:[%s28269_s3 + $0x938] sm:$0xf0]  ;;  %v12740_v48 = vld [vmem:[%s28269_s3 + $0x808] sm:$0xf0] }
 0x1fe   :  { %v12967_v43 = vor.u32 %v17810_v40, %v12964_v42  ;;  %v17754_v21 = vld [vmem:[%s28269_s3 + $0x804] sm:$0xf]  ;;  %v13044_v42 = vld [vmem:[%s28269_s3 + $0xa68] sm:$0xf0] }
 0x1ff   :  { %5493 = vmatpush.bf16.msrb.mxu0 %v12623_v7  ;;  %v12908_v7 = vld [vmem:[%s28269_s3 + $0x958] sm:$0xf0] }
 0x200   :  { %5506 = vmatpush.bf16.msrb.mxu1 %v12687_v53  ;;  %5515 = vmatpush.bf16.msrb.mxu2 %v12783_v18  ;;  %v12756_v53 = vld [vmem:[%s28269_s3 + $0x828] sm:$0xf0]  ;;  %v12911_v36 = vor.u32 %v17796_v22, %v12908_v7 }
 0x201   :  { %5528 = vmatpush.bf16.msrb.mxu3 %v12847_v54  ;;  %v12759_v18 = vor.u32 %v17758_v20, %v12756_v53  ;;  %v12743_v53 = vor.u32 %v17754_v21, %v12740_v48  ;;  %v17844_v21 = vld [vmem:[%s28269_s3 + $0xad4] sm:$0xf]  ;;  %v13100_v48 = vld [vmem:[%s28269_s3 + $0xad8] sm:$0xf0] }
 0x202   :  { %v5264_v40 = vpop.f32.mrf.mxu2 }
 0x203   :  { %5494 = vmatpush.bf16.msrb.mxu0 %v12615_v12  ;;  %v5263_v12 = vadd.f32 %v5262_v63, %v22276_v23  ;;  %v12751_v23 = vor.u32 %v17756_v16, %v12748_v0  ;;  %v5288_v8 = vpop.f32.mrf.mxu0 }
 0x204   :  { %5507 = vmatpush.bf16.msrb.mxu1 %v12679_v13  ;;  %5516 = vmatpush.bf16.msrb.mxu2 %v12775_v1  ;;  %v12812_v13 = vld [vmem:[%s28269_s3 + $0x898] sm:$0xf0]  ;;  %v5301_v7 = vpop.f32.mrf.mxu1 }
 0x205   :  { %5529 = vmatpush.bf16.msrb.mxu3 %v12839_v10  ;;  %v5276_v1 = vadd.f32 %v5275_v34, %v5263_v12  ;;  %v12956_v10 = vld [vmem:[%s28269_s3 + $0x9b8] sm:$0xf0]  ;;  %v12815_v19 = vor.u32 %v17772_v25, %v12812_v13  ;;  %v5277_v16 = vpop.f32.mrf.mxu3  ;;  %v17846_v12 = vld [vmem:[%s28269_s3 + $0xae4] sm:$0xf]  ;;  %v13108_v34 = vld [vmem:[%s28269_s3 + $0xae8] sm:$0xf0] }
 0x206   :  { %5495 = vmatmul.bf16.vlgmr.msrb.gmra.mxu0 %v20099_v24  ;;  %v12820_v24 = vld [vmem:[%s28269_s3 + $0x8a8] sm:$0xf0]  ;;  %v12959_v20 = vor.u32 %v17808_v14, %v12956_v10  ;;  %v17788_v13 = vld [vmem:[%s28269_s3 + $0x914] sm:$0xf]  ;;  %v13036_v14 = vld [vmem:[%s28269_s3 + $0xa58] sm:$0xf0] }
 0x207   :  { %5539 = vmatpush.bf16.msra.mxu0 %v12927_v5  ;;  %5508 = vmatmul.bf16.vlgmr.msrb.gmra.mxu1 %v20110_v30  ;;  %v12900_v30 = vld [vmem:[%s28269_s3 + $0x948] sm:$0xf0]  ;;  %v12823_v54 = vor.u32 %v17774_v33, %v12820_v24  ;;  %v5289_v22 = vadd.f32 %v5288_v8, %v5276_v1  ;;  %v17790_v33 = vld [vmem:[%s28269_s3 + $0x924] sm:$0xf]  ;;  %v17804_v1 = vld [vmem:[%s28269_s3 + $0x994] sm:$0xf] }
 0x208   :  { %5552 = vmatpush.bf16.msra.mxu1 %v12991_v37  ;;  %5517 = vmatpush.bf16.msrb.mxu2 %v12767_v27  ;;  %v12903_v5 = vor.u32 %v17794_v38, %v12900_v30  ;;  %v17792_v37 = vld [vmem:[%s28269_s3 + $0x934] sm:$0xf]  ;;  %v13052_v27 = vld [vmem:[%s28269_s3 + $0xa78] sm:$0xf0]  ;;  %v12884_v24 = vld [vmem:[%s28269_s3 + $0x928] sm:$0xf0] }
 0x209   :  { %5530 = vmatpush.bf16.msrb.mxu3 %v12831_v29  ;;  %v12895_v47 = vor.u32 %v17792_v37, %v12892_v15  ;;  %v17848_v29 = vld [vmem:[%s28269_s3 + $0xaf4] sm:$0xf]  ;;  %v17806_v38 = vld [vmem:[%s28269_s3 + $0x9a4] sm:$0xf]  ;;  %v12948_v30 = vld [vmem:[%s28269_s3 + $0x9a8] sm:$0xf0]  ;;  %v12887_v0 = vor.u32 %v17790_v33, %v12884_v24 }
 0x20a   :  { %v13119_v63 = vor.u32 %v17848_v29, %v13116_v32  ;;  %v12951_v25 = vor.u32 %v17806_v38, %v12948_v30  ;;  %v17828_v15 = vld [vmem:[%s28269_s3 + $0xa54] sm:$0xf]  ;;  %v13103_v29 = vor.u32 %v17844_v21, %v13100_v48  ;;  %v13244_v32 = vld [vmem:[%s28269_s3 + $0xbf8] sm:$0xf0]  ;;  %v17842_v24 = vld [vmem:[%s28269_s3 + $0xac4] sm:$0xf] }
 0x20b   :  { %5540 = vmatpush.bf16.msra.mxu0 %v12919_v17  ;;  %v12804_v17 = vld [vmem:[%s28269_s3 + $0x888] sm:$0xf0]  ;;  %v5290_v10 = vpop.f32.mrf.mxu0  ;;  %v17838_v48 = vld [vmem:[%s28269_s3 + $0xaa4] sm:$0xf] }
 0x20c   :  { %5553 = vmatpush.bf16.msra.mxu1 %v12983_v26  ;;  %5518 = vmatpush.bf16.msrb.mxu2 %v12759_v18  ;;  %v17832_v26 = vld [vmem:[%s28269_s3 + $0xa74] sm:$0xf]  ;;  %v5303_v8 = vpop.f32.mrf.mxu1  ;;  %v13228_v10 = vld [vmem:[%s28269_s3 + $0xbd8] sm:$0xf0]  ;;  %v13012_v21 = vld [vmem:[%s28269_s3 + $0xa28] sm:$0xf0] }
 0x20d   :  { %5531 = vmatpush.bf16.msrb.mxu3 %v12823_v54  ;;  %v13055_v18 = vor.u32 %v17832_v26, %v13052_v27  ;;  %v17830_v54 = vld [vmem:[%s28269_s3 + $0xa64] sm:$0xf]  ;;  %v12932_v27 = vld [vmem:[%s28269_s3 + $0x988] sm:$0xf0] }
 0x20e   :  { %v13047_v37 = vor.u32 %v17830_v54, %v13044_v42  ;;  %v17802_v26 = vld [vmem:[%s28269_s3 + $0x984] sm:$0xf]  ;;  %v13172_v54 = vld [vmem:[%s28269_s3 + $0xb68] sm:$0xf0] }
 0x20f   :  { %5541 = vmatpush.bf16.msra.mxu0 %v12911_v36  ;;  %v22475_v36 = vadd.f32 %v5301_v7, %v5289_v22  ;;  %v13039_v22 = vor.u32 %v17828_v15, %v13036_v14  ;;  %v17864_v7 = vld [vmem:[%s28269_s3 + $0xb74] sm:$0xf]  ;;  %v17878_v42 = vld [vmem:[%s28269_s3 + $0xbe4] sm:$0xf] }
 0x210   :  { %5554 = vmatpush.bf16.msra.mxu1 %v12975_v56  ;;  %5519 = vmatpush.bf16.msrb.mxu2 %v12751_v23  ;;  %v12807_v56 = vor.u32 %v17770_v3, %v12804_v17  ;;  %v13111_v23 = vor.u32 %v17846_v12, %v13108_v34  ;;  %v17786_v3 = vld [vmem:[%s28269_s3 + $0x904] sm:$0xf]  ;;  %v17824_v12 = vld [vmem:[%s28269_s3 + $0xa34] sm:$0xf]  ;;  %v13020_v34 = vld [vmem:[%s28269_s3 + $0xa38] sm:$0xf0] }
 0x211   :  { %28300 = vst [vmem:[#allocation19_spill] sm:$0xff] %v22475_v36  ;;  %5532 = vmatpush.bf16.msrb.mxu3 %v12815_v19  ;;  %v17876_v15 = vld [vmem:[%s28269_s3 + $0xbd4] sm:$0xf] }
 0x212   :  { %v13231_v8 = vor.u32 %v17876_v15, %v13228_v10  ;;  %v13140_v10 = vld [vmem:[%s28269_s3 + $0xb28] sm:$0xf0] }
 0x213   :  { %5542 = vmatpush.bf16.msra.mxu0 %v12903_v5  ;;  %v12876_v5 = vld [vmem:[%s28269_s3 + $0x918] sm:$0xf0] }
 0x214   :  { %5555 = vmatpush.bf16.msra.mxu1 %v12967_v43  ;;  %5520 = vmatpush.bf16.msrb.mxu2 %v12743_v53  ;;  %v12940_v43 = vld [vmem:[%s28269_s3 + $0x998] sm:$0xf0]  ;;  %v12879_v19 = vor.u32 %v17788_v13, %v12876_v5  ;;  %v13028_v53 = vld [vmem:[%s28269_s3 + $0xa48] sm:$0xf0] }
 0x215   :  { %5533 = vmatpush.bf16.msrb.mxu3 %v12807_v56  ;;  %v12943_v17 = vor.u32 %v17804_v1, %v12940_v43  ;;  %v13092_v56 = vld [vmem:[%s28269_s3 + $0xac8] sm:$0xf0]  ;;  %v13084_v13 = vld [vmem:[%s28269_s3 + $0xab8] sm:$0xf0]  ;;  %v13023_v1 = vor.u32 %v17824_v12, %v13020_v34  ;;  %v17860_v43 = vld [vmem:[%s28269_s3 + $0xb54] sm:$0xf] }
 0x216   :  { %v13095_v16 = vor.u32 %v17842_v24, %v13092_v56  ;;  %v17856_v24 = vld [vmem:[%s28269_s3 + $0xb34] sm:$0xf]  ;;  %v13060_v12 = vld [vmem:[%s28269_s3 + $0xa88] sm:$0xf0] }
 0x217   :  { %5543 = vmatpush.bf16.msra.mxu0 %v12895_v47  ;;  %5521 = vmatmul.bf16.vlgmr.msrb.gmra.mxu2 %v20225_v50  ;;  %v12868_v50 = vld [vmem:[%s28269_s3 + $0x908] sm:$0xf0]  ;;  %v17880_v47 = vld [vmem:[%s28269_s3 + $0xbf4] sm:$0xf] }
 0x218   :  { %5556 = vmatpush.bf16.msra.mxu1 %v12959_v20  ;;  %5565 = vmatpush.bf16.msra.mxu2 %v13055_v18  ;;  %v17826_v20 = vld [vmem:[%s28269_s3 + $0xa44] sm:$0xf]  ;;  %v12871_v33 = vor.u32 %v17786_v3, %v12868_v50  ;;  %v12935_v18 = vor.u32 %v17802_v26, %v12932_v27  ;;  %v13247_v30 = vor.u32 %v17880_v47, %v13244_v32  ;;  %v13004_v47 = vld [vmem:[%s28269_s3 + $0xa18] sm:$0xf0]  ;;  %v17896_v34 = vld [vmem:[%s28269_s3 + $0xc74] sm:$0xf] }
 0x219   :  { %5578 = vmatpush.bf16.msra.mxu3 %v13119_v63  ;;  %v13031_v40 = vor.u32 %v17826_v20, %v13028_v53  ;;  %v17862_v63 = vld [vmem:[%s28269_s3 + $0xb64] sm:$0xf]  ;;  %v17836_v20 = vld [vmem:[%s28269_s3 + $0xa94] sm:$0xf]  ;;  %v13068_v53 = vld [vmem:[%s28269_s3 + $0xa98] sm:$0xf0] }
 0x21a   :  { %5534 = vmatmul.bf16.vlgmr.msrb.gmra.mxu3 %v20233_v55  ;;  %v13180_v55 = vld [vmem:[%s28269_s3 + $0xb78] sm:$0xf0]  ;;  %v13175_v5 = vor.u32 %v17862_v63, %v13172_v54  ;;  %v17858_v50 = vld [vmem:[%s28269_s3 + $0xb44] sm:$0xf]  ;;  %v5314_v27 = vpop.f32.mrf.mxu2  ;;  %v13071_v63 = vor.u32 %v17836_v20, %v13068_v53  ;;  %v17868_v20 = vld [vmem:[%s28269_s3 + $0xb94] sm:$0xf] }
 0x21b   :  { %5544 = vmatpush.bf16.msra.mxu0 %v12887_v0  ;;  %v13183_v38 = vor.u32 %v17864_v7, %v13180_v55  ;;  %v13236_v0 = vld [vmem:[%s28269_s3 + $0xbe8] sm:$0xf0]  ;;  %v17874_v26 = vld [vmem:[%s28269_s3 + $0xbc4] sm:$0xf]  ;;  %v17820_v55 = vld [vmem:[%s28269_s3 + $0xa14] sm:$0xf] }
 0x21c   :  { %5557 = vmatpush.bf16.msra.mxu1 %v12951_v25  ;;  %5566 = vmatpush.bf16.msra.mxu2 %v13047_v37  ;;  %v17840_v25 = vld [vmem:[%s28269_s3 + $0xab4] sm:$0xf]  ;;  %v13239_v37 = vor.u32 %v17878_v42, %v13236_v0  ;;  %v13220_v7 = vld [vmem:[%s28269_s3 + $0xbc8] sm:$0xf0]  ;;  %v17818_v54 = vld [vmem:[%s28269_s3 + $0xa04] sm:$0xf] }
 0x21d   :  { %5579 = vmatpush.bf16.msra.mxu3 %v13111_v23  ;;  %v13164_v23 = vld [vmem:[%s28269_s3 + $0xb58] sm:$0xf0]  ;;  %v13087_v14 = vor.u32 %v17840_v25, %v13084_v13  ;;  %v5327_v32 = vpop.f32.mrf.mxu3  ;;  %v12996_v42 = vld [vmem:[%s28269_s3 + $0xa08] sm:$0xf0] }
 0x21e   :  { %v13167_v3 = vor.u32 %v17860_v43, %v13164_v23  ;;  %v13308_v25 = vld [vmem:[%s28269_s3 + $0xc78] sm:$0xf0]  ;;  %v12999_v15 = vor.u32 %v17818_v54, %v12996_v42  ;;  %v17866_v42 = vld [vmem:[%s28269_s3 + $0xb84] sm:$0xf] }
 0x21f   :  { %5545 = vmatpush.bf16.msra.mxu0 %v12879_v19  ;;  %v17822_v19 = vld [vmem:[%s28269_s3 + $0xa24] sm:$0xf]  ;;  %v13372_v43 = vld [vmem:[%s28269_s3 + $0xcf8] sm:$0xf0] }
 0x220   :  { %5558 = vmatpush.bf16.msra.mxu1 %v12943_v17  ;;  %5567 = vmatpush.bf16.msra.mxu2 %v13039_v22  ;;  %v13015_v17 = vor.u32 %v17822_v19, %v13012_v21  ;;  %v13196_v53 = vld [vmem:[%s28269_s3 + $0xb98] sm:$0xf0] }
 0x221   :  { %5580 = vmatpush.bf16.msra.mxu3 %v13103_v29  ;;  %v5315_v29 = vadd.f32 %v5314_v27, %v20241_v58  ;;  %v13007_v58 = vor.u32 %v17820_v55, %v13004_v47  ;;  %v17852_v47 = vld [vmem:[%s28269_s3 + $0xb14] sm:$0xf]  ;;  %v13199_v54 = vor.u32 %v17868_v20, %v13196_v53  ;;  %v13484_v53 = vld [vmem:[%s28269_s3 + $0xdd8] sm:$0xf0] }
 0x223   :  { %5546 = vmatpush.bf16.msra.mxu0 %v12871_v33  ;;  %v5328_v56 = vadd.f32 %v5327_v32, %v5315_v29  ;;  %v5340_v0 = vpop.f32.mrf.mxu0  ;;  %v13132_v29 = vld [vmem:[%s28269_s3 + $0xb18] sm:$0xf0] }
 0x224   :  { %5559 = vmatpush.bf16.msra.mxu1 %v12935_v18  ;;  %5568 = vmatpush.bf16.msra.mxu2 %v13031_v40  ;;  %v13223_v18 = vor.u32 %v17874_v26, %v13220_v7  ;;  %v13212_v40 = vld [vmem:[%s28269_s3 + $0xbb8] sm:$0xf0]  ;;  %v13364_v7 = vld [vmem:[%s28269_s3 + $0xce8] sm:$0xf0] }
 0x225   :  { %5581 = vmatpush.bf16.msra.mxu3 %v13095_v16  ;;  %v17834_v16 = vld [vmem:[%s28269_s3 + $0xa84] sm:$0xf]  ;;  %v5341_v13 = vadd.f32 %v5340_v0, %v5328_v56  ;;  %v5329_v26 = vpop.f32.mrf.mxu3  ;;  %v13292_v56 = vld [vmem:[%s28269_s3 + $0xc58] sm:$0xf0] }
 0x226   :  { %5547 = vmatmul.bf16.vlgmr.msra.gmra.mxu0 %v20310_v51  ;;  %v13076_v51 = vld [vmem:[%s28269_s3 + $0xaa8] sm:$0xf0]  ;;  %v13063_v21 = vor.u32 %v17834_v16, %v13060_v12  ;;  %v17928_v12 = vld [vmem:[%s28269_s3 + $0xd74] sm:$0xf] }
 0x227   :  { %5591 = vmatpush.bf16.msrb.mxu0 %v13183_v38  ;;  %5560 = vmatmul.bf16.vlgmr.msra.gmra.mxu1 %v20321_v57  ;;  %v13156_v57 = vld [vmem:[%s28269_s3 + $0xb48] sm:$0xf0]  ;;  %v13079_v22 = vor.u32 %v17838_v48, %v13076_v51  ;;  %v13148_v38 = vld [vmem:[%s28269_s3 + $0xb38] sm:$0xf0]  ;;  %v13311_v48 = vor.u32 %v17896_v34, %v13308_v25  ;;  %v17870_v51 = vld [vmem:[%s28269_s3 + $0xba4] sm:$0xf] }
 0x228   :  { %5604 = vmatpush.bf16.msrb.mxu1 %v13247_v30  ;;  %5569 = vmatpush.bf16.msra.mxu2 %v13023_v1  ;;  %v13159_v33 = vor.u32 %v17858_v50, %v13156_v57  ;;  %v17872_v30 = vld [vmem:[%s28269_s3 + $0xbb4] sm:$0xf]  ;;  %v17894_v50 = vld [vmem:[%s28269_s3 + $0xc64] sm:$0xf]  ;;  %v13300_v57 = vld [vmem:[%s28269_s3 + $0xc68] sm:$0xf0] }
 0x229   :  { %5582 = vmatpush.bf16.msra.mxu3 %v13087_v14  ;;  %v17912_v1 = vld [vmem:[%s28269_s3 + $0xcf4] sm:$0xf]  ;;  %v13215_v23 = vor.u32 %v17872_v30, %v13212_v40  ;;  %v17854_v14 = vld [vmem:[%s28269_s3 + $0xb24] sm:$0xf]  ;;  %v13303_v32 = vor.u32 %v17894_v50, %v13300_v57  ;;  %v13356_v30 = vld [vmem:[%s28269_s3 + $0xcd8] sm:$0xf0] }
 0x22a   :  { %v13143_v27 = vor.u32 %v17854_v14, %v13140_v10  ;;  %v17850_v40 = vld [vmem:[%s28269_s3 + $0xb04] sm:$0xf]  ;;  %v13188_v16 = vld [vmem:[%s28269_s3 + $0xb88] sm:$0xf0]  ;;  %v17944_v34 = vld [vmem:[%s28269_s3 + $0xdf4] sm:$0xf] }
 0x22b   :  { %5592 = vmatpush.bf16.msrb.mxu0 %v13175_v5  ;;  %v5353_v5 = vpop.f32.mrf.mxu1  ;;  %v17888_v50 = vld [vmem:[%s28269_s3 + $0xc34] sm:$0xf]  ;;  %v13276_v57 = vld [vmem:[%s28269_s3 + $0xc38] sm:$0xf0] }
 0x22c   :  { %5605 = vmatpush.bf16.msrb.mxu1 %v13239_v37  ;;  %5570 = vmatpush.bf16.msra.mxu2 %v13015_v17  ;;  %v13151_v37 = vor.u32 %v17856_v24, %v13148_v38  ;;  %v22674_v19 = vadd.f32 %v5353_v5, %v5341_v13  ;;  %v13375_v17 = vor.u32 %v17912_v1, %v13372_v43  ;;  %v17892_v24 = vld [vmem:[%s28269_s3 + $0xc54] sm:$0xf]  ;;  %v13500_v13 = vld [vmem:[%s28269_s3 + $0xdf8] sm:$0xf0]  ;;  %v17890_v5 = vld [vmem:[%s28269_s3 + $0xc44] sm:$0xf] }
 0x22d   :  { %5583 = vmatpush.bf16.msra.mxu3 %v13079_v22  ;;  %v17910_v22 = vld [vmem:[%s28269_s3 + $0xce4] sm:$0xf]  ;;  %v17908_v38 = vld [vmem:[%s28269_s3 + $0xcd4] sm:$0xf]  ;;  %v13295_v0 = vor.u32 %v17892_v24, %v13292_v56  ;;  %v13503_v10 = vor.u32 %v17944_v34, %v13500_v13  ;;  %v13268_v24 = vld [vmem:[%s28269_s3 + $0xc28] sm:$0xf0] }
 0x22e   :  { %v13359_v25 = vor.u32 %v17908_v38, %v13356_v30  ;;  %v17906_v43 = vld [vmem:[%s28269_s3 + $0xcc4] sm:$0xf]  ;;  %v17904_v26 = vld [vmem:[%s28269_s3 + $0xcb4] sm:$0xf]  ;;  %v13324_v34 = vld [vmem:[%s28269_s3 + $0xc98] sm:$0xf0] }
 0x22f   :  { %5593 = vmatpush.bf16.msrb.mxu0 %v13167_v3  ;;  %v13204_v3 = vld [vmem:[%s28269_s3 + $0xba8] sm:$0xf0]  ;;  %v17902_v56 = vld [vmem:[%s28269_s3 + $0xca4] sm:$0xf]  ;;  %v17920_v13 = vld [vmem:[%s28269_s3 + $0xd34] sm:$0xf] }
 0x230   :  { %5606 = vmatpush.bf16.msrb.mxu1 %v13231_v8  ;;  %5571 = vmatpush.bf16.msra.mxu2 %v13007_v58  ;;  %v5316_v8 = vpop.f32.mrf.mxu2  ;;  %v13207_v55 = vor.u32 %v17870_v51, %v13204_v3  ;;  %v13135_v58 = vor.u32 %v17852_v47, %v13132_v29  ;;  %v13428_v51 = vld [vmem:[%s28269_s3 + $0xd68] sm:$0xf0]  ;;  %v17942_v3 = vld [vmem:[%s28269_s3 + $0xde4] sm:$0xf]  ;;  %v17924_v47 = vld [vmem:[%s28269_s3 + $0xd54] sm:$0xf] }
 0x231   :  { %5584 = vmatpush.bf16.msra.mxu3 %v13071_v63  ;;  %v13420_v29 = vld [vmem:[%s28269_s3 + $0xd58] sm:$0xf0]  ;;  %v17922_v30 = vld [vmem:[%s28269_s3 + $0xd44] sm:$0xf] }
 0x233   :  { %5594 = vmatpush.bf16.msrb.mxu0 %v13159_v33  ;;  %v13367_v33 = vor.u32 %v17910_v22, %v13364_v7  ;;  %v5355_v63 = vpop.f32.mrf.mxu1 }
 0x234   :  { %5607 = vmatpush.bf16.msrb.mxu1 %v13223_v18  ;;  %5572 = vmatpush.bf16.msra.mxu2 %v12999_v15  ;;  %v5342_v18 = vpop.f32.mrf.mxu0  ;;  %v13191_v15 = vor.u32 %v17866_v42, %v13188_v16  ;;  %v17884_v42 = vld [vmem:[%s28269_s3 + $0xc14] sm:$0xf]  ;;  %v13260_v16 = vld [vmem:[%s28269_s3 + $0xc18] sm:$0xf0] }
 0x235   :  { %5585 = vmatpush.bf16.msra.mxu3 %v13063_v21  ;;  %v13423_v18 = vor.u32 %v17924_v47, %v13420_v29  ;;  %v13396_v47 = vld [vmem:[%s28269_s3 + $0xd28] sm:$0xf0] }
 0x237   :  { %5595 = vmatpush.bf16.msrb.mxu0 %v13151_v37  ;;  %5573 = vmatmul.bf16.vlgmr.msra.gmra.mxu2 %v20439_v31  ;;  %v13124_v31 = vld [vmem:[%s28269_s3 + $0xb08] sm:$0xf0] }
 0x238   :  { %5608 = vmatpush.bf16.msrb.mxu1 %v13215_v23  ;;  %5617 = vmatpush.bf16.msrb.mxu2 %v13311_v48  ;;  %v13284_v37 = vld [vmem:[%s28269_s3 + $0xc48] sm:$0xf0]  ;;  %v13127_v1 = vor.u32 %v17850_v40, %v13124_v31  ;;  %v17926_v48 = vld [vmem:[%s28269_s3 + $0xd64] sm:$0xf] }
 0x239   :  { %5630 = vmatpush.bf16.msrb.mxu3 %v13375_v17  ;;  %v13348_v23 = vld [vmem:[%s28269_s3 + $0xcc8] sm:$0xf0]  ;;  %v13287_v21 = vor.u32 %v17890_v5, %v13284_v37  ;;  %v13431_v22 = vor.u32 %v17926_v48, %v13428_v51  ;;  %v17938_v40 = vld [vmem:[%s28269_s3 + $0xdc4] sm:$0xf] }
 0x23a   :  { %5586 = vmatmul.bf16.vlgmr.msra.gmra.mxu3 %v20447_v44  ;;  %v13436_v44 = vld [vmem:[%s28269_s3 + $0xd78] sm:$0xf0]  ;;  %v13351_v8 = vor.u32 %v17906_v43, %v13348_v23  ;;  %v13492_v17 = vld [vmem:[%s28269_s3 + $0xde8] sm:$0xf0]  ;;  %v5366_v63 = vpop.f32.mrf.mxu2  ;;  %v17936_v43 = vld [vmem:[%s28269_s3 + $0xdb4] sm:$0xf] }
 0x23b   :  { %5596 = vmatpush.bf16.msrb.mxu0 %v13143_v27  ;;  %v13439_v14 = vor.u32 %v17928_v12, %v13436_v44  ;;  %v13340_v27 = vld [vmem:[%s28269_s3 + $0xcb8] sm:$0xf0]  ;;  %v13495_v7 = vor.u32 %v17942_v3, %v13492_v17  ;;  %v13476_v31 = vld [vmem:[%s28269_s3 + $0xdc8] sm:$0xf0]  ;;  %v17900_v44 = vld [vmem:[%s28269_s3 + $0xc94] sm:$0xf] }
 0x23c   :  { %5609 = vmatpush.bf16.msrb.mxu1 %v13207_v55  ;;  %5618 = vmatpush.bf16.msrb.mxu2 %v13303_v32  ;;  %v13279_v55 = vor.u32 %v17888_v50, %v13276_v57  ;;  %v17940_v32 = vld [vmem:[%s28269_s3 + $0xdd4] sm:$0xf]  ;;  %v13343_v20 = vor.u32 %v17904_v26, %v13340_v27  ;;  %v13479_v37 = vor.u32 %v17938_v40, %v13476_v31  ;;  %v13468_v23 = vld [vmem:[%s28269_s3 + $0xdb8] sm:$0xf0]  ;;  %v13316_v51 = vld [vmem:[%s28269_s3 + $0xc88] sm:$0xf0] }
 0x23d   :  { %5631 = vmatpush.bf16.msrb.mxu3 %v13367_v33  ;;  %v17886_v33 = vld [vmem:[%s28269_s3 + $0xc24] sm:$0xf]  ;;  %v5379_v12 = vpop.f32.mrf.mxu3  ;;  %v17960_v3 = vld [vmem:[%s28269_s3 + $0xe74] sm:$0xf]  ;;  %v13628_v27 = vld [vmem:[%s28269_s3 + $0xef8] sm:$0xf0] }
 0x23e   :  { %v13271_v38 = vor.u32 %v17886_v33, %v13268_v24  ;;  %v17976_v26 = vld [vmem:[%s28269_s3 + $0xef4] sm:$0xf]  ;;  %v13460_v33 = vld [vmem:[%s28269_s3 + $0xda8] sm:$0xf0] }
 0x23f   :  { %5597 = vmatpush.bf16.msrb.mxu0 %v13135_v58  ;;  %v13487_v58 = vor.u32 %v17940_v32, %v13484_v53  ;;  %v17934_v53 = vld [vmem:[%s28269_s3 + $0xda4] sm:$0xf] }
 0x240   :  { %5610 = vmatpush.bf16.msrb.mxu1 %v13199_v54  ;;  %5619 = vmatpush.bf16.msrb.mxu2 %v13295_v0  ;;  %v5367_v0 = vadd.f32 %v5366_v63, %v22674_v19  ;;  %v13263_v19 = vor.u32 %v17884_v42, %v13260_v16  ;;  %v13463_v40 = vor.u32 %v17934_v53, %v13460_v33  ;;  %v17916_v63 = vld [vmem:[%s28269_s3 + $0xd14] sm:$0xf]  ;;  %v13452_v16 = vld [vmem:[%s28269_s3 + $0xd98] sm:$0xf0] }
 0x241   :  { %5632 = vmatpush.bf16.msrb.mxu3 %v13359_v25  ;;  %v17932_v42 = vld [vmem:[%s28269_s3 + $0xd94] sm:$0xf]  ;;  %v13532_v33 = vld [vmem:[%s28269_s3 + $0xe38] sm:$0xf0] }
 0x242   :  { %v5380_v5 = vadd.f32 %v5379_v12, %v5367_v0  ;;  %v5368_v24 = vpop.f32.mrf.mxu2  ;;  %v17956_v12 = vld [vmem:[%s28269_s3 + $0xe54] sm:$0xf] }
 0x243   :  { %5598 = vmatpush.bf16.msrb.mxu0 %v13127_v1  ;;  %v13404_v1 = vld [vmem:[%s28269_s3 + $0xd38] sm:$0xf0]  ;;  %v5392_v48 = vpop.f32.mrf.mxu0  ;;  %v17952_v53 = vld [vmem:[%s28269_s3 + $0xe34] sm:$0xf] }
 0x244   :  { %5611 = vmatpush.bf16.msrb.mxu1 %v13191_v15  ;;  %5620 = vmatpush.bf16.msrb.mxu2 %v13287_v21  ;;  %v13327_v15 = vor.u32 %v17900_v44, %v13324_v34  ;;  %v17898_v21 = vld [vmem:[%s28269_s3 + $0xc84] sm:$0xf]  ;;  %v5393_v17 = vadd.f32 %v5392_v48, %v5380_v5  ;;  %v5405_v50 = vpop.f32.mrf.mxu1  ;;  %v13407_v57 = vor.u32 %v17920_v13, %v13404_v1  ;;  %v13548_v44 = vld [vmem:[%s28269_s3 + $0xe58] sm:$0xf0]  ;;  %v17972_v13 = vld [vmem:[%s28269_s3 + $0xed4] sm:$0xf] }
 0x245   :  { %5633 = vmatpush.bf16.msrb.mxu3 %v13351_v8  ;;  %v13564_v8 = vld [vmem:[%s28269_s3 + $0xe78] sm:$0xf0]  ;;  %v13319_v32 = vor.u32 %v17898_v21, %v13316_v51  ;;  %v13455_v1 = vor.u32 %v17932_v42, %v13452_v16  ;;  %v17954_v51 = vld [vmem:[%s28269_s3 + $0xe44] sm:$0xf]  ;;  %v17968_v24 = vld [vmem:[%s28269_s3 + $0xeb4] sm:$0xf] }
 0x246   :  { %5599 = vmatmul.bf16.vlgmr.msrb.gmra.mxu0 %v20520_v46  ;;  %v13332_v46 = vld [vmem:[%s28269_s3 + $0xca8] sm:$0xf0]  ;;  %v22873_v29 = vadd.f32 %v5405_v50, %v5393_v17  ;;  %v13612_v5 = vld [vmem:[%s28269_s3 + $0xed8] sm:$0xf0]  ;;  %v17970_v17 = vld [vmem:[%s28269_s3 + $0xec4] sm:$0xf] }
 0x247   :  { %5643 = vmatpush.bf16.msra.mxu0 %v13439_v14  ;;  %5612 = vmatmul.bf16.vlgmr.msrb.gmra.mxu1 %v20531_v52  ;;  %v13412_v52 = vld [vmem:[%s28269_s3 + $0xd48] sm:$0xf0]  ;;  %v13335_v54 = vor.u32 %v17902_v56, %v13332_v46  ;;  %v17882_v14 = vld [vmem:[%s28269_s3 + $0xc04] sm:$0xf]  ;;  %v13631_v56 = vor.u32 %v17976_v26, %v13628_v27  ;;  %v13615_v21 = vor.u32 %v17972_v13, %v13612_v5  ;;  %v13756_v48 = vld [vmem:[%s28269_s3 + $0xff8] sm:$0xf0] }
 0x248   :  { %5656 = vmatpush.bf16.msra.mxu1 %v13503_v10  ;;  %5621 = vmatpush.bf16.msrb.mxu2 %v13279_v55  ;;  %v13415_v25 = vor.u32 %v17922_v30, %v13412_v52  ;;  %v13252_v10 = vld [vmem:[%s28269_s3 + $0xc08] sm:$0xf0]  ;;  %v17918_v55 = vld [vmem:[%s28269_s3 + $0xd24] sm:$0xf] }
 0x249   :  { %5634 = vmatpush.bf16.msrb.mxu3 %v13343_v20  ;;  %v13567_v20 = vor.u32 %v17960_v3, %v13564_v8  ;;  %v17958_v46 = vld [vmem:[%s28269_s3 + $0xe64] sm:$0xf]  ;;  %v13620_v52 = vld [vmem:[%s28269_s3 + $0xee8] sm:$0xf0] }
 0x24a   :  { %v17974_v30 = vld [vmem:[%s28269_s3 + $0xee4] sm:$0xf]  ;;  %v13540_v3 = vld [vmem:[%s28269_s3 + $0xe48] sm:$0xf0] }
 0x24b   :  { %5644 = vmatpush.bf16.msra.mxu0 %v13431_v22  ;;  %v13471_v22 = vor.u32 %v17936_v43, %v13468_v23  ;;  %v13623_v0 = vor.u32 %v17974_v30, %v13620_v52  ;;  %v5394_v34 = vpop.f32.mrf.mxu0  ;;  %v17930_v43 = vld [vmem:[%s28269_s3 + $0xd84] sm:$0xf]  ;;  %v13444_v23 = vld [vmem:[%s28269_s3 + $0xd88] sm:$0xf0]  ;;  %v13676_v30 = vld [vmem:[%s28269_s3 + $0xf58] sm:$0xf0] }
 0x24c   :  { %5657 = vmatpush.bf16.msra.mxu1 %v13495_v7  ;;  %5622 = vmatpush.bf16.msrb.mxu2 %v13271_v38  ;;  %v13255_v7 = vor.u32 %v17882_v14, %v13252_v10  ;;  %v13399_v38 = vor.u32 %v17918_v55, %v13396_v47  ;;  %v17992_v14 = vld [vmem:[%s28269_s3 + $0xf74] sm:$0xf]  ;;  %v13604_v50 = vld [vmem:[%s28269_s3 + $0xec8] sm:$0xf0]  ;;  %v18006_v47 = vld [vmem:[%s28269_s3 + $0xfe4] sm:$0xf] }
 0x24d   :  { %5635 = vmatpush.bf16.msrb.mxu3 %v13335_v54  ;;  %v13388_v54 = vld [vmem:[%s28269_s3 + $0xd18] sm:$0xf0]  ;;  %v18008_v10 = vld [vmem:[%s28269_s3 + $0xff4] sm:$0xf]  ;;  %v13684_v55 = vld [vmem:[%s28269_s3 + $0xf68] sm:$0xf0] }
 0x24e   :  { %v13759_v27 = vor.u32 %v18008_v10, %v13756_v48  ;;  %v18004_v52 = vld [vmem:[%s28269_s3 + $0xfd4] sm:$0xf]  ;;  %v17966_v42 = vld [vmem:[%s28269_s3 + $0xea4] sm:$0xf]  ;;  %v13732_v5 = vld [vmem:[%s28269_s3 + $0xfc8] sm:$0xf0] }
 0x24f   :  { %5645 = vmatpush.bf16.msra.mxu0 %v13423_v18  ;;  %v13556_v18 = vld [vmem:[%s28269_s3 + $0xe68] sm:$0xf0]  ;;  %v18002_v34 = vld [vmem:[%s28269_s3 + $0xfc4] sm:$0xf]  ;;  %v18000_v48 = vld [vmem:[%s28269_s3 + $0xfb4] sm:$0xf] }
 0x250   :  { %5658 = vmatpush.bf16.msra.mxu1 %v13487_v58  ;;  %5623 = vmatpush.bf16.msrb.mxu2 %v13263_v19  ;;  %v5381_v58 = vpop.f32.mrf.mxu3  ;;  %v13559_v31 = vor.u32 %v17958_v46, %v13556_v18  ;;  %v5407_v19 = vpop.f32.mrf.mxu1  ;;  %v13735_v10 = vor.u32 %v18002_v34, %v13732_v5  ;;  %v17996_v34 = vld [vmem:[%s28269_s3 + $0xf94] sm:$0xf] }
 0x251   :  { %5636 = vmatpush.bf16.msrb.mxu3 %v13327_v15  ;;  %v13551_v15 = vor.u32 %v17956_v12, %v13548_v44  ;;  %v13535_v58 = vor.u32 %v17952_v53, %v13532_v33  ;;  %v17986_v44 = vld [vmem:[%s28269_s3 + $0xf44] sm:$0xf]  ;;  %v13516_v19 = vld [vmem:[%s28269_s3 + $0xe18] sm:$0xf0]  ;;  %v18020_v5 = vld [vmem:[%s28269_s3 + $0x1054] sm:$0xf] }
 0x253   :  { %5646 = vmatpush.bf16.msra.mxu0 %v13415_v25  ;;  %v13391_v25 = vor.u32 %v17916_v63, %v13388_v54  ;;  %v13740_v63 = vld [vmem:[%s28269_s3 + $0xfd8] sm:$0xf0]  ;;  %v17950_v54 = vld [vmem:[%s28269_s3 + $0xe24] sm:$0xf] }
 0x254   :  { %5659 = vmatpush.bf16.msra.mxu1 %v13479_v37  ;;  %5624 = vmatpush.bf16.msrb.mxu2 %v13255_v7  ;;  %v17914_v37 = vld [vmem:[%s28269_s3 + $0xd04] sm:$0xf] }
 0x255   :  { %5637 = vmatpush.bf16.msrb.mxu3 %v13319_v32  ;;  %v17990_v7 = vld [vmem:[%s28269_s3 + $0xf64] sm:$0xf]  ;;  %v13607_v32 = vor.u32 %v17970_v17, %v13604_v50  ;;  %v13508_v17 = vld [vmem:[%s28269_s3 + $0xe08] sm:$0xf0] }
 0x256   :  { %v13687_v46 = vor.u32 %v17990_v7, %v13684_v55  ;;  %v17962_v50 = vld [vmem:[%s28269_s3 + $0xe84] sm:$0xf] }
 0x257   :  { %5647 = vmatpush.bf16.msra.mxu0 %v13407_v57  ;;  %5625 = vmatmul.bf16.vlgmr.msrb.gmra.mxu2 %v20649_v39  ;;  %v13380_v39 = vld [vmem:[%s28269_s3 + $0xd08] sm:$0xf0]  ;;  %v13447_v57 = vor.u32 %v17930_v43, %v13444_v23  ;;  %v17964_v43 = vld [vmem:[%s28269_s3 + $0xe94] sm:$0xf]  ;;  %v13580_v23 = vld [vmem:[%s28269_s3 + $0xe98] sm:$0xf0] }
 0x258   :  { %5660 = vmatpush.bf16.msra.mxu1 %v13471_v22  ;;  %5669 = vmatpush.bf16.msra.mxu2 %v13567_v20  ;;  %v13383_v8 = vor.u32 %v17914_v37, %v13380_v39  ;;  %v13543_v22 = vor.u32 %v17954_v51, %v13540_v3  ;;  %v13748_v20 = vld [vmem:[%s28269_s3 + $0xfe8] sm:$0xf0]  ;;  %v17948_v37 = vld [vmem:[%s28269_s3 + $0xe14] sm:$0xf]  ;;  %v13724_v51 = vld [vmem:[%s28269_s3 + $0xfb8] sm:$0xf0]  ;;  %v13583_v3 = vor.u32 %v17964_v43, %v13580_v23 }
 0x259   :  { %5682 = vmatpush.bf16.msra.mxu3 %v13631_v56  ;;  %v13596_v56 = vld [vmem:[%s28269_s3 + $0xeb8] sm:$0xf0]  ;;  %v13751_v18 = vor.u32 %v18006_v47, %v13748_v20  ;;  %v13727_v53 = vor.u32 %v18000_v48, %v13724_v51  ;;  %v17978_v23 = vld [vmem:[%s28269_s3 + $0xf04] sm:$0xf]  ;;  %v18072_v48 = vld [vmem:[%s28269_s3 + $0x11f4] sm:$0xf] }
 0x25a   :  { %5638 = vmatmul.bf16.vlgmr.msrb.gmra.mxu3 %v20657_v49  ;;  %v13692_v49 = vld [vmem:[%s28269_s3 + $0xf78] sm:$0xf0] }
 0x25b   :  { %5648 = vmatpush.bf16.msra.mxu0 %v13399_v38  ;;  %v13695_v26 = vor.u32 %v17992_v14, %v13692_v49  ;;  %v17988_v38 = vld [vmem:[%s28269_s3 + $0xf54] sm:$0xf]  ;;  %v13884_v20 = vld [vmem:[%s28269_s3 + $0x10f8] sm:$0xf0] }
 0x25c   :  { %5661 = vmatpush.bf16.msra.mxu1 %v13463_v40  ;;  %5670 = vmatpush.bf16.msra.mxu2 %v13559_v31  ;;  %v13599_v40 = vor.u32 %v17968_v24, %v13596_v56  ;;  %v13524_v31 = vld [vmem:[%s28269_s3 + $0xe28] sm:$0xf0]  ;;  %v13679_v16 = vor.u32 %v17988_v38, %v13676_v30  ;;  %v17984_v14 = vld [vmem:[%s28269_s3 + $0xf34] sm:$0xf]  ;;  %v17982_v24 = vld [vmem:[%s28269_s3 + $0xf24] sm:$0xf] }
 0x25d   :  { %5683 = vmatpush.bf16.msra.mxu3 %v13623_v0  ;;  %v13743_v0 = vor.u32 %v18004_v52, %v13740_v63  ;;  %v13527_v12 = vor.u32 %v17950_v54, %v13524_v31  ;;  %v5431_v39 = vpop.f32.mrf.mxu3  ;;  %v13652_v56 = vld [vmem:[%s28269_s3 + $0xf28] sm:$0xf0]  ;;  %v17998_v38 = vld [vmem:[%s28269_s3 + $0xfa4] sm:$0xf]  ;;  %v13868_v43 = vld [vmem:[%s28269_s3 + $0x10d8] sm:$0xf0] }
 0x25e   :  { %v13716_v30 = vld [vmem:[%s28269_s3 + $0xfa8] sm:$0xf0]  ;;  %v18022_v63 = vld [vmem:[%s28269_s3 + $0x1064] sm:$0xf] }
 0x25f   :  { %5649 = vmatpush.bf16.msra.mxu0 %v13391_v25  ;;  %v5418_v25 = vpop.f32.mrf.mxu2  ;;  %v13812_v54 = vld [vmem:[%s28269_s3 + $0x1068] sm:$0xf0] }
 0x260   :  { %5662 = vmatpush.bf16.msra.mxu1 %v13455_v1  ;;  %5671 = vmatpush.bf16.msra.mxu2 %v13551_v15  ;;  %v5419_v1 = vadd.f32 %v5418_v25, %v22873_v29  ;;  %v13519_v29 = vor.u32 %v17948_v37, %v13516_v19  ;;  %v13708_v25 = vld [vmem:[%s28269_s3 + $0xf98] sm:$0xf0] }
 0x261   :  { %5684 = vmatpush.bf16.msra.mxu3 %v13615_v21  ;;  %v13660_v21 = vld [vmem:[%s28269_s3 + $0xf38] sm:$0xf0] }
 0x262   :  { %v5432_v49 = vadd.f32 %v5431_v39, %v5419_v1  ;;  %v13663_v47 = vor.u32 %v17984_v14, %v13660_v21  ;;  %v13804_v37 = vld [vmem:[%s28269_s3 + $0x1058] sm:$0xf0]  ;;  %v18036_v39 = vld [vmem:[%s28269_s3 + $0x10d4] sm:$0xf]  ;;  %v13711_v14 = vor.u32 %v17996_v34, %v13708_v25  ;;  %v18050_v34 = vld [vmem:[%s28269_s3 + $0x1144] sm:$0xf] }
 0x263   :  { %5650 = vmatpush.bf16.msra.mxu0 %v13383_v8  ;;  %v17946_v8 = vld [vmem:[%s28269_s3 + $0xe04] sm:$0xf]  ;;  %v18056_v21 = vld [vmem:[%s28269_s3 + $0x1174] sm:$0xf]  ;;  %v13871_v51 = vor.u32 %v18036_v39, %v13868_v43 }
 0x264   :  { %5663 = vmatpush.bf16.msra.mxu1 %v13447_v57  ;;  %5672 = vmatpush.bf16.msra.mxu2 %v13543_v22  ;;  %v5444_v57 = vpop.f32.mrf.mxu0  ;;  %v13820_v22 = vld [vmem:[%s28269_s3 + $0x1078] sm:$0xf0]  ;;  %v5457_v55 = vpop.f32.mrf.mxu1  ;;  %v13511_v33 = vor.u32 %v17946_v8, %v13508_v17  ;;  %v18018_v8 = vld [vmem:[%s28269_s3 + $0x1044] sm:$0xf]  ;;  %v13796_v17 = vld [vmem:[%s28269_s3 + $0x1048] sm:$0xf0] }
 0x265   :  { %5685 = vmatpush.bf16.msra.mxu3 %v13607_v32  ;;  %v5445_v7 = vadd.f32 %v5444_v57, %v5432_v49  ;;  %v18040_v32 = vld [vmem:[%s28269_s3 + $0x10f4] sm:$0xf]  ;;  %v5433_v31 = vpop.f32.mrf.mxu3  ;;  %v17994_v49 = vld [vmem:[%s28269_s3 + $0xf84] sm:$0xf] }
 0x266   :  { %5651 = vmatmul.bf16.vlgmr.msra.gmra.mxu0 %v20730_v60  ;;  %v13588_v60 = vld [vmem:[%s28269_s3 + $0xea8] sm:$0xf0]  ;;  %v18034_v57 = vld [vmem:[%s28269_s3 + $0x10c4] sm:$0xf] }
 0x267   :  { %5695 = vmatpush.bf16.msrb.mxu0 %v13695_v26  ;;  %5664 = vmatmul.bf16.vlgmr.msra.gmra.mxu1 %v20741_v4  ;;  %v13668_v4 = vld [vmem:[%s28269_s3 + $0xf48] sm:$0xf0]  ;;  %v13591_v13 = vor.u32 %v17966_v42, %v13588_v60  ;;  %v5420_v52 = vpop.f32.mrf.mxu2  ;;  %v13655_v42 = vor.u32 %v17982_v24, %v13652_v56  ;;  %v18038_v60 = vld [vmem:[%s28269_s3 + $0x10e4] sm:$0xf]  ;;  %v18016_v24 = vld [vmem:[%s28269_s3 + $0x1034] sm:$0xf] }
 0x268   :  { %5708 = vmatpush.bf16.msrb.mxu1 %v13759_v27  ;;  %5673 = vmatpush.bf16.msra.mxu2 %v13535_v58  ;;  %v13671_v15 = vor.u32 %v17986_v44, %v13668_v4  ;;  %v13572_v26 = vld [vmem:[%s28269_s3 + $0xe88] sm:$0xf0]  ;;  %v18024_v27 = vld [vmem:[%s28269_s3 + $0x1074] sm:$0xf]  ;;  %v13644_v44 = vld [vmem:[%s28269_s3 + $0xf18] sm:$0xf0]  ;;  %v13815_v4 = vor.u32 %v18022_v63, %v13812_v54 }
 0x269   :  { %5686 = vmatpush.bf16.msra.mxu3 %v13599_v40  ;;  %v13823_v58 = vor.u32 %v18024_v27, %v13820_v22  ;;  %v13887_v40 = vor.u32 %v18040_v32, %v13884_v20  ;;  %v13940_v32 = vld [vmem:[%s28269_s3 + $0x1168] sm:$0xf0]  ;;  %v18070_v20 = vld [vmem:[%s28269_s3 + $0x11e4] sm:$0xf]  ;;  %v13788_v56 = vld [vmem:[%s28269_s3 + $0x1038] sm:$0xf0] }
 0x26a   :  { %v13791_v52 = vor.u32 %v18016_v24, %v13788_v56  ;;  %v13932_v63 = vld [vmem:[%s28269_s3 + $0x1158] sm:$0xf0]  ;;  %v18068_v54 = vld [vmem:[%s28269_s3 + $0x11d4] sm:$0xf]  ;;  %v18066_v25 = vld [vmem:[%s28269_s3 + $0x11c4] sm:$0xf] }
 0x26b   :  { %5696 = vmatpush.bf16.msrb.mxu0 %v13687_v46  ;;  %v23072_v46 = vadd.f32 %v5457_v55, %v5445_v7  ;;  %v13799_v55 = vor.u32 %v18018_v8, %v13796_v17  ;;  %v18026_v8 = vld [vmem:[%s28269_s3 + $0x1084] sm:$0xf] }
 0x26c   :  { %5709 = vmatpush.bf16.msrb.mxu1 %v13751_v18  ;;  %5674 = vmatpush.bf16.msra.mxu2 %v13527_v12  ;;  %v13575_v18 = vor.u32 %v17962_v50, %v13572_v26  ;;  %v17980_v12 = vld [vmem:[%s28269_s3 + $0xf14] sm:$0xf]  ;;  %v5446_v19 = vpop.f32.mrf.mxu0  ;;  %v13860_v26 = vld [vmem:[%s28269_s3 + $0x10c8] sm:$0xf0] }
 0x26d   :  { %5687 = vmatpush.bf16.msra.mxu3 %v13591_v13  ;;  %v13647_v1 = vor.u32 %v17980_v12, %v13644_v44  ;;  %v18012_v19 = vld [vmem:[%s28269_s3 + $0x1014] sm:$0xf] }
 0x26f   :  { %5697 = vmatpush.bf16.msrb.mxu0 %v13679_v16  ;;  %v13876_v16 = vld [vmem:[%s28269_s3 + $0x10e8] sm:$0xf0] }
 0x270   :  { %5710 = vmatpush.bf16.msrb.mxu1 %v13743_v0  ;;  %5675 = vmatpush.bf16.msra.mxu2 %v13519_v29  ;;  %v13719_v0 = vor.u32 %v17998_v38, %v13716_v30  ;;  %v13879_v13 = vor.u32 %v18038_v60, %v13876_v16  ;;  %v13807_v29 = vor.u32 %v18020_v5, %v13804_v37  ;;  %v18014_v60 = vld [vmem:[%s28269_s3 + $0x1024] sm:$0xf]  ;;  %v13780_v16 = vld [vmem:[%s28269_s3 + $0x1028] sm:$0xf0] }
 0x271   :  { %5688 = vmatpush.bf16.msra.mxu3 %v13583_v3  ;;  %v14012_v3 = vld [vmem:[%s28269_s3 + $0x11f8] sm:$0xf0]  ;;  %v13988_v37 = vld [vmem:[%s28269_s3 + $0x11c8] sm:$0xf0] }
 0x272   :  { %v14015_v7 = vor.u32 %v18072_v48, %v14012_v3  ;;  %v13764_v3 = vld [vmem:[%s28269_s3 + $0x1008] sm:$0xf0] }
 0x273   :  { %5698 = vmatpush.bf16.msrb.mxu0 %v13671_v15  ;;  %v5459_v15 = vpop.f32.mrf.mxu1 }
 0x274   :  { %5711 = vmatpush.bf16.msrb.mxu1 %v13735_v10  ;;  %5676 = vmatpush.bf16.msra.mxu2 %v13511_v33  ;;  %v13700_v10 = vld [vmem:[%s28269_s3 + $0xf88] sm:$0xf0]  ;;  %v13836_v15 = vld [vmem:[%s28269_s3 + $0x1098] sm:$0xf0] }
 0x275   :  { %5689 = vmatpush.bf16.msra.mxu3 %v13575_v18  ;;  %v13703_v27 = vor.u32 %v17994_v49, %v13700_v10  ;;  %v14004_v33 = vld [vmem:[%s28269_s3 + $0x11e8] sm:$0xf0]  ;;  %v18032_v18 = vld [vmem:[%s28269_s3 + $0x10b4] sm:$0xf]  ;;  %v13991_v10 = vor.u32 %v18066_v25, %v13988_v37  ;;  %v14060_v25 = vld [vmem:[%s28269_s3 + $0x1258] sm:$0xf0] }
 0x276   :  { %v14007_v30 = vor.u32 %v18070_v20, %v14004_v33  ;;  %v13908_v33 = vld [vmem:[%s28269_s3 + $0x1128] sm:$0xf0]  ;;  %v18100_v37 = vld [vmem:[%s28269_s3 + $0x12d4] sm:$0xf] }
 0x277   :  { %5699 = vmatpush.bf16.msrb.mxu0 %v13663_v47  ;;  %5677 = vmatmul.bf16.vlgmr.msra.gmra.mxu2 %v20859_v6  ;;  %v13636_v6 = vld [vmem:[%s28269_s3 + $0xf08] sm:$0xf0]  ;;  %v18054_v47 = vld [vmem:[%s28269_s3 + $0x1164] sm:$0xf] }
 0x278   :  { %5712 = vmatpush.bf16.msrb.mxu1 %v13727_v53  ;;  %5721 = vmatpush.bf16.msrb.mxu2 %v13823_v58  ;;  %v13639_v50 = vor.u32 %v17978_v23, %v13636_v6  ;;  %v13863_v53 = vor.u32 %v18034_v57, %v13860_v26  ;;  %v13852_v58 = vld [vmem:[%s28269_s3 + $0x10b8] sm:$0xf0]  ;;  %v13943_v38 = vor.u32 %v18054_v47, %v13940_v32  ;;  %v18028_v23 = vld [vmem:[%s28269_s3 + $0x1094] sm:$0xf] }
 0x279   :  { %5734 = vmatpush.bf16.msrb.mxu3 %v13887_v40  ;;  %v18052_v40 = vld [vmem:[%s28269_s3 + $0x1154] sm:$0xf]  ;;  %v13855_v31 = vor.u32 %v18032_v18, %v13852_v58  ;;  %v13839_v48 = vor.u32 %v18028_v23, %v13836_v15  ;;  %v14076_v26 = vld [vmem:[%s28269_s3 + $0x1278] sm:$0xf0]  ;;  %v18062_v58 = vld [vmem:[%s28269_s3 + $0x11a4] sm:$0xf] }
 0x27a   :  { %5690 = vmatmul.bf16.vlgmr.msra.gmra.mxu3 %v20867_v11  ;;  %v13948_v11 = vld [vmem:[%s28269_s3 + $0x1178] sm:$0xf0]  ;;  %v13935_v12 = vor.u32 %v18052_v40, %v13932_v63  ;;  %v18048_v6 = vld [vmem:[%s28269_s3 + $0x1134] sm:$0xf]  ;;  %v18086_v40 = vld [vmem:[%s28269_s3 + $0x1264] sm:$0xf] }
 0x27b   :  { %5700 = vmatpush.bf16.msrb.mxu0 %v13655_v42  ;;  %v13951_v22 = vor.u32 %v18056_v21, %v13948_v11  ;;  %v13996_v42 = vld [vmem:[%s28269_s3 + $0x11d8] sm:$0xf0]  ;;  %v18064_v21 = vld [vmem:[%s28269_s3 + $0x11b4] sm:$0xf]  ;;  %v14068_v63 = vld [vmem:[%s28269_s3 + $0x1268] sm:$0xf0] }
 0x27c   :  { %5713 = vmatpush.bf16.msrb.mxu1 %v13719_v0  ;;  %5722 = vmatpush.bf16.msrb.mxu2 %v13815_v4  ;;  %v18030_v0 = vld [vmem:[%s28269_s3 + $0x10a4] sm:$0xf]  ;;  %v13999_v44 = vor.u32 %v18068_v54, %v13996_v42  ;;  %v13783_v4 = vor.u32 %v18014_v60, %v13780_v16  ;;  %v13980_v11 = vld [vmem:[%s28269_s3 + $0x11b8] sm:$0xf0]  ;;  %v18088_v57 = vld [vmem:[%s28269_s3 + $0x1274] sm:$0xf] }
 0x27d   :  { %5735 = vmatpush.bf16.msrb.mxu3 %v13879_v13  ;;  %v5470_v13 = vpop.f32.mrf.mxu2  ;;  %v5483_v43 = vpop.f32.mrf.mxu3  ;;  %v14140_v47 = vld [vmem:[%s28269_s3 + $0x12f8] sm:$0xf0]  ;;  %v13983_v32 = vor.u32 %v18064_v21, %v13980_v11  ;;  %v14079_v18 = vor.u32 %v18088_v57, %v14076_v26  ;;  %v18102_v42 = vld [vmem:[%s28269_s3 + $0x12e4] sm:$0xf]  ;;  %v14132_v60 = vld [vmem:[%s28269_s3 + $0x12e8] sm:$0xf0] }
 0x27e   :  { %v5471_v39 = vadd.f32 %v5470_v13, %v23072_v46  ;;  %v18058_v23 = vld [vmem:[%s28269_s3 + $0x1184] sm:$0xf]  ;;  %v13956_v15 = vld [vmem:[%s28269_s3 + $0x1188] sm:$0xf0] }
 0x27f   :  { %5701 = vmatpush.bf16.msrb.mxu0 %v13647_v1  ;;  %v13772_v1 = vld [vmem:[%s28269_s3 + $0x1018] sm:$0xf0]  ;;  %v14052_v21 = vld [vmem:[%s28269_s3 + $0x1248] sm:$0xf0]  ;;  %v18118_v57 = vld [vmem:[%s28269_s3 + $0x1364] sm:$0xf] }
 0x280   :  { %5714 = vmatpush.bf16.msrb.mxu1 %v13711_v14  ;;  %5723 = vmatpush.bf16.msrb.mxu2 %v13807_v29  ;;  %v5484_v49 = vadd.f32 %v5483_v43, %v5471_v39  ;;  %v13775_v46 = vor.u32 %v18012_v19, %v13772_v1  ;;  %v13916_v29 = vld [vmem:[%s28269_s3 + $0x1138] sm:$0xf0]  ;;  %v18042_v1 = vld [vmem:[%s28269_s3 + $0x1104] sm:$0xf]  ;;  %v14196_v26 = vld [vmem:[%s28269_s3 + $0x1368] sm:$0xf0] }
 0x281   :  { %5736 = vmatpush.bf16.msrb.mxu3 %v13871_v51  ;;  %v18010_v51 = vld [vmem:[%s28269_s3 + $0x1004] sm:$0xf]  ;;  %v14124_v19 = vld [vmem:[%s28269_s3 + $0x12d8] sm:$0xf0] }
 0x282   :  { %v13767_v20 = vor.u32 %v18010_v51, %v13764_v3  ;;  %v14116_v51 = vld [vmem:[%s28269_s3 + $0x12c8] sm:$0xf0]  ;;  %v13959_v3 = vor.u32 %v18058_v23, %v13956_v15  ;;  %v14172_v23 = vld [vmem:[%s28269_s3 + $0x1338] sm:$0xf0]  ;;  %v18128_v15 = vld [vmem:[%s28269_s3 + $0x13b4] sm:$0xf] }
 0x283   :  { %5702 = vmatpush.bf16.msrb.mxu0 %v13639_v50  ;;  %v5496_v17 = vpop.f32.mrf.mxu0  ;;  %v13828_v50 = vld [vmem:[%s28269_s3 + $0x1088] sm:$0xf0] }
 0x284   :  { %5715 = vmatpush.bf16.msrb.mxu1 %v13703_v27  ;;  %5724 = vmatpush.bf16.msrb.mxu2 %v13799_v55  ;;  %v5497_v27 = vadd.f32 %v5496_v17, %v5484_v49  ;;  %v18104_v55 = vld [vmem:[%s28269_s3 + $0x12f4] sm:$0xf]  ;;  %v13831_v56 = vor.u32 %v18026_v8, %v13828_v50 }
 0x285   :  { %5737 = vmatpush.bf16.msrb.mxu3 %v13863_v53  ;;  %v18046_v53 = vld [vmem:[%s28269_s3 + $0x1124] sm:$0xf]  ;;  %v5485_v54 = vpop.f32.mrf.mxu3  ;;  %v18136_v49 = vld [vmem:[%s28269_s3 + $0x13f4] sm:$0xf] }
 0x286   :  { %5703 = vmatmul.bf16.vlgmr.msrb.gmra.mxu0 %v20940_v28  ;;  %v13844_v28 = vld [vmem:[%s28269_s3 + $0x10a8] sm:$0xf0] }
 0x287   :  { %5747 = vmatpush.bf16.msra.mxu0 %v13951_v22  ;;  %5716 = vmatmul.bf16.vlgmr.msrb.gmra.mxu1 %v20951_v41  ;;  %v13924_v41 = vld [vmem:[%s28269_s3 + $0x1148] sm:$0xf0]  ;;  %v13847_v5 = vor.u32 %v18030_v0, %v13844_v28  ;;  %v5509_v22 = vpop.f32.mrf.mxu1  ;;  %v18044_v0 = vld [vmem:[%s28269_s3 + $0x1114] sm:$0xf]  ;;  %v13900_v28 = vld [vmem:[%s28269_s3 + $0x1118] sm:$0xf0] }
 0x288   :  { %5760 = vmatpush.bf16.msra.mxu1 %v14015_v7  ;;  %5725 = vmatpush.bf16.msrb.mxu2 %v13791_v52  ;;  %v13927_v14 = vor.u32 %v18050_v34, %v13924_v41  ;;  %v13919_v7 = vor.u32 %v18048_v6, %v13916_v29  ;;  %v23271_v24 = vadd.f32 %v5509_v22, %v5497_v27  ;;  %v18084_v41 = vld [vmem:[%s28269_s3 + $0x1254] sm:$0xf]  ;;  %v18082_v29 = vld [vmem:[%s28269_s3 + $0x1244] sm:$0xf]  ;;  %v28301_v54 = vld [vmem:[#allocation14_spill] sm:$0xff] }
 0x289   :  { %5738 = vmatpush.bf16.msrb.mxu3 %v13855_v31  ;;  %v14143_v52 = vor.u32 %v18104_v55, %v14140_v47  ;;  %v13911_v31 = vor.u32 %v18046_v53, %v13908_v33  ;;  %v14135_v34 = vor.u32 %v18102_v42, %v14132_v60  ;;  %v18120_v6 = vld [vmem:[%s28269_s3 + $0x1374] sm:$0xf]  ;;  %v14055_v50 = vor.u32 %v18082_v29, %v14052_v21  ;;  %v18134_v27 = vld [vmem:[%s28269_s3 + $0x13e4] sm:$0xf]  ;;  %v14044_v47 = vld [vmem:[%s28269_s3 + $0x1238] sm:$0xf0] }
 0x28a   :  { %v18080_v55 = vld [vmem:[%s28269_s3 + $0x1234] sm:$0xf]  ;;  %v14199_v53 = vor.u32 %v18118_v57, %v14196_v26  ;;  %v14084_v29 = vld [vmem:[%s28269_s3 + $0x1288] sm:$0xf0]  ;;  %v18110_v26 = vld [vmem:[%s28269_s3 + $0x1324] sm:$0xf] }
 0x28b   :  { %5748 = vmatpush.bf16.msra.mxu0 %v13943_v38  ;;  %v13972_v38 = vld [vmem:[%s28269_s3 + $0x11a8] sm:$0xf0]  ;;  %v5498_v13 = vpop.f32.mrf.mxu0  ;;  %v18152_v21 = vld [vmem:[%s28269_s3 + $0x1474] sm:$0xf] }
 0x28c   :  { %5761 = vmatpush.bf16.msra.mxu1 %v14007_v30  ;;  %5726 = vmatpush.bf16.msrb.mxu2 %v13783_v4  ;;  %v5472_v30 = vpop.f32.mrf.mxu2  ;;  %v13975_v16 = vor.u32 %v18062_v58, %v13972_v38  ;;  %v13964_v4 = vld [vmem:[%s28269_s3 + $0x1198] sm:$0xf0]  ;;  %v18132_v38 = vld [vmem:[%s28269_s3 + $0x13d4] sm:$0xf] }
 0x28d   :  { %5739 = vmatpush.bf16.msrb.mxu3 %v13847_v5  ;;  %v13903_v5 = vor.u32 %v18044_v0, %v13900_v28  ;;  %v14188_v58 = vld [vmem:[%s28269_s3 + $0x1358] sm:$0xf0]  ;;  %v18114_v0 = vld [vmem:[%s28269_s3 + $0x1344] sm:$0xf]  ;;  %v14180_v28 = vld [vmem:[%s28269_s3 + $0x1348] sm:$0xf0] }
 0x28f   :  { %5749 = vmatpush.bf16.msra.mxu0 %v13935_v12  ;;  %v14071_v12 = vor.u32 %v18086_v40, %v14068_v63  ;;  %v5511_v39 = vpop.f32.mrf.mxu1  ;;  %v18078_v40 = vld [vmem:[%s28269_s3 + $0x1224] sm:$0xf]  ;;  %v14036_v63 = vld [vmem:[%s28269_s3 + $0x1228] sm:$0xf0] }
 0x290   :  { %5762 = vmatpush.bf16.msra.mxu1 %v13999_v44  ;;  %5727 = vmatpush.bf16.msrb.mxu2 %v13775_v46  ;;  %v18060_v44 = vld [vmem:[%s28269_s3 + $0x1194] sm:$0xf]  ;;  %v14268_v46 = vld [vmem:[%s28269_s3 + $0x13f8] sm:$0xf0] }
 0x291   :  { %5740 = vmatpush.bf16.msrb.mxu3 %v13839_v48  ;;  %v13967_v43 = vor.u32 %v18060_v44, %v13964_v4  ;;  %v18098_v48 = vld [vmem:[%s28269_s3 + $0x12c4] sm:$0xf]  ;;  %v14271_v17 = vor.u32 %v18136_v49, %v14268_v46  ;;  %v18112_v39 = vld [vmem:[%s28269_s3 + $0x1334] sm:$0xf]  ;;  %v14020_v49 = vld [vmem:[%s28269_s3 + $0x1208] sm:$0xf0] }
 0x292   :  { %v14119_v22 = vor.u32 %v18098_v48, %v14116_v51 }
 0x293   :  { %5750 = vmatpush.bf16.msra.mxu0 %v13927_v14  ;;  %v14063_v14 = vor.u32 %v18084_v41, %v14060_v25  ;;  %v18076_v41 = vld [vmem:[%s28269_s3 + $0x1214] sm:$0xf]  ;;  %v14028_v25 = vld [vmem:[%s28269_s3 + $0x1218] sm:$0xf0] }
 0x294   :  { %5763 = vmatpush.bf16.msra.mxu1 %v13991_v10  ;;  %5728 = vmatpush.bf16.msrb.mxu2 %v13767_v20  ;;  %v14127_v10 = vor.u32 %v18100_v37, %v14124_v19  ;;  %v14108_v20 = vld [vmem:[%s28269_s3 + $0x12b8] sm:$0xf0]  ;;  %v18092_v37 = vld [vmem:[%s28269_s3 + $0x1294] sm:$0xf] }
 0x295   :  { %5741 = vmatpush.bf16.msrb.mxu3 %v13831_v56  ;;  %v14047_v56 = vor.u32 %v18080_v55, %v14044_v47  ;;  %v14092_v19 = vld [vmem:[%s28269_s3 + $0x1298] sm:$0xf0]  ;;  %v18126_v47 = vld [vmem:[%s28269_s3 + $0x13a4] sm:$0xf] }
 0x297   :  { %5751 = vmatpush.bf16.msra.mxu0 %v13919_v7  ;;  %5729 = vmatmul.bf16.vlgmr.msrb.gmra.mxu2 %v21069_v62  ;;  %v13892_v62 = vld [vmem:[%s28269_s3 + $0x1108] sm:$0xf0] }
 0x298   :  { %5764 = vmatpush.bf16.msra.mxu1 %v13983_v32  ;;  %5773 = vmatpush.bf16.msra.mxu2 %v14079_v18  ;;  %v13895_v11 = vor.u32 %v18042_v1, %v13892_v62  ;;  %v14260_v7 = vld [vmem:[%s28269_s3 + $0x13e8] sm:$0xf0]  ;;  %v18096_v32 = vld [vmem:[%s28269_s3 + $0x12b4] sm:$0xf]  ;;  %v14183_v1 = vor.u32 %v18114_v0, %v14180_v28 }
 0x299   :  { %5786 = vmatpush.bf16.msra.mxu3 %v14143_v52  ;;  %v14263_v33 = vor.u32 %v18134_v27, %v14260_v7  ;;  %v18116_v18 = vld [vmem:[%s28269_s3 + $0x1354] sm:$0xf]  ;;  %v14111_v30 = vor.u32 %v18096_v32, %v14108_v20  ;;  %v14252_v52 = vld [vmem:[%s28269_s3 + $0x13d8] sm:$0xf0]  ;;  %v14164_v27 = vld [vmem:[%s28269_s3 + $0x1328] sm:$0xf0] }
 0x29a   :  { %5742 = vmatmul.bf16.vlgmr.msrb.gmra.mxu3 %v21077_v9  ;;  %v14204_v9 = vld [vmem:[%s28269_s3 + $0x1378] sm:$0xf0]  ;;  %v14191_v42 = vor.u32 %v18116_v18, %v14188_v58  ;;  %v14255_v60 = vor.u32 %v18132_v38, %v14252_v52  ;;  %v5522_v44 = vpop.f32.mrf.mxu2  ;;  %v14228_v32 = vld [vmem:[%s28269_s3 + $0x13a8] sm:$0xf0]  ;;  %v14167_v58 = vor.u32 %v18110_v26, %v14164_v27  ;;  %v18166_v38 = vld [vmem:[%s28269_s3 + $0x14e4] sm:$0xf] }
 0x29b   :  { %5752 = vmatpush.bf16.msra.mxu0 %v13911_v31  ;;  %v14207_v8 = vor.u32 %v18120_v6, %v14204_v9  ;;  %v18094_v31 = vld [vmem:[%s28269_s3 + $0x12a4] sm:$0xf]  ;;  %v5523_v13 = vadd.f32 %v5522_v44, %v23271_v24  ;;  %v14031_v24 = vor.u32 %v18076_v41, %v14028_v25  ;;  %v14095_v6 = vor.u32 %v18092_v37, %v14092_v19  ;;  %v28302_v28 = vld [vmem:[#allocation15_spill] sm:$0xff]  ;;  %v28303_v25 = vld [vmem:[#allocation16_spill] sm:$0xff] }
 0x29c   :  { %5765 = vmatpush.bf16.msra.mxu1 %v13975_v16  ;;  %5774 = vmatpush.bf16.msra.mxu2 %v14071_v12  ;;  %v14039_v16 = vor.u32 %v18078_v40, %v14036_v63  ;;  %v18130_v12 = vld [vmem:[%s28269_s3 + $0x13c4] sm:$0xf]  ;;  %v14231_v52 = vor.u32 %v18126_v47, %v14228_v32  ;;  %v18108_v40 = vld [vmem:[%s28269_s3 + $0x1314] sm:$0xf]  ;;  %v14156_v63 = vld [vmem:[%s28269_s3 + $0x1318] sm:$0xf0] }
 0x29d   :  { %5787 = vmatpush.bf16.msra.mxu3 %v14135_v34  ;;  %v14244_v34 = vld [vmem:[%s28269_s3 + $0x13c8] sm:$0xf0]  ;;  %v18074_v9 = vld [vmem:[%s28269_s3 + $0x1204] sm:$0xf]  ;;  %v18164_v44 = vld [vmem:[%s28269_s3 + $0x14d4] sm:$0xf] }
 0x29e   :  { %v14247_v62 = vor.u32 %v18130_v12, %v14244_v34  ;;  %v14023_v57 = vor.u32 %v18074_v9, %v14020_v49  ;;  %v14159_v12 = vor.u32 %v18108_v40, %v14156_v63  ;;  %v18106_v34 = vld [vmem:[%s28269_s3 + $0x1304] sm:$0xf]  ;;  %v14212_v19 = vld [vmem:[%s28269_s3 + $0x1388] sm:$0xf0]  ;;  %v14364_v26 = vld [vmem:[%s28269_s3 + $0x14b8] sm:$0xf0] }
 0x29f   :  { %5753 = vmatpush.bf16.msra.mxu0 %v13903_v5  ;;  %v5535_v5 = vpop.f32.mrf.mxu3  ;;  %v18122_v37 = vld [vmem:[%s28269_s3 + $0x1384] sm:$0xf]  ;;  %v14372_v49 = vld [vmem:[%s28269_s3 + $0x14c8] sm:$0xf0]  ;;  %v18180_v47 = vld [vmem:[%s28269_s3 + $0x1554] sm:$0xf] }
 0x2a0   :  { %5766 = vmatpush.bf16.msra.mxu1 %v13967_v43  ;;  %5775 = vmatpush.bf16.msra.mxu2 %v14063_v14  ;;  %v5536_v43 = vadd.f32 %v5535_v5, %v5523_v13  ;;  %v14236_v14 = vld [vmem:[%s28269_s3 + $0x13b8] sm:$0xf0]  ;;  %v14148_v5 = vld [vmem:[%s28269_s3 + $0x1308] sm:$0xf0]  ;;  %v18162_v9 = vld [vmem:[%s28269_s3 + $0x14c4] sm:$0xf] }
 0x2a1   :  { %5788 = vmatpush.bf16.msra.mxu3 %v14127_v10  ;;  %v18090_v10 = vld [vmem:[%s28269_s3 + $0x1284] sm:$0xf]  ;;  %v14444_v32 = vld [vmem:[%s28269_s3 + $0x1558] sm:$0xf0] }
 0x2a2   :  { %v14087_v7 = vor.u32 %v18090_v10, %v14084_v29  ;;  %v5524_v20 = vpop.f32.mrf.mxu2  ;;  %v14215_v10 = vor.u32 %v18122_v37, %v14212_v19  ;;  %v14447_v40 = vor.u32 %v18180_v47, %v14444_v32  ;;  %v18178_v63 = vld [vmem:[%s28269_s3 + $0x1544] sm:$0xf]  ;;  %v18916_v37 = vld [vmem:[#allocation2 + $0x24] sm:$0xf]  ;;  %v14548_v19 = vld [vmem:[#allocation2 + $0x28] sm:$0x10] }
 0x2a3   :  { %5754 = vmatpush.bf16.msra.mxu0 %v13895_v11  ;;  %v5548_v46 = vpop.f32.mrf.mxu0  ;;  %v14332_v11 = vld [vmem:[%s28269_s3 + $0x1478] sm:$0xf0]  ;;  %v18196_v20 = vld [vmem:[%s28269_s3 + $0x15d4] sm:$0xf] }
 0x2a4   :  { %5767 = vmatpush.bf16.msra.mxu1 %v13959_v3  ;;  %5776 = vmatpush.bf16.msra.mxu2 %v14055_v50  ;;  %v5549_v48 = vadd.f32 %v5548_v46, %v5536_v43  ;;  %v5561_v51 = vpop.f32.mrf.mxu1  ;;  %v14175_v3 = vor.u32 %v18112_v39, %v14172_v23  ;;  %v14239_v50 = vor.u32 %v18128_v15, %v14236_v14  ;;  %v18184_v39 = vld [vmem:[%s28269_s3 + $0x1574] sm:$0xf]  ;;  %v14460_v43 = vld [vmem:[%s28269_s3 + $0x1578] sm:$0xf0]  ;;  %v18146_v15 = vld [vmem:[%s28269_s3 + $0x1444] sm:$0xf] }
 0x2a5   :  { %5789 = vmatpush.bf16.msra.mxu3 %v14119_v22  ;;  %v14335_v55 = vor.u32 %v18152_v21, %v14332_v11  ;;  %v14524_v23 = vld [vmem:[%s28269_s3 + $0x15f8] sm:$0xf0]  ;;  %v14308_v14 = vld [vmem:[%s28269_s3 + $0x1448] sm:$0xf0]  ;;  %v14463_v46 = vor.u32 %v18184_v39, %v14460_v43  ;;  %v18182_v11 = vld [vmem:[%s28269_s3 + $0x1564] sm:$0xf] }
 0x2a6   :  { %5755 = vmatmul.bf16.vlgmr.msra.gmra.mxu0 %v21150_v45  ;;  %v14100_v45 = vld [vmem:[%s28269_s3 + $0x12a8] sm:$0xf0]  ;;  %v23470_v22 = vadd.f32 %v5561_v51, %v5549_v48  ;;  %v14311_v21 = vor.u32 %v18146_v15, %v14308_v14  ;;  %v18198_v51 = vld [vmem:[%s28269_s3 + $0x15e4] sm:$0xf]  ;;  %v14492_v15 = vld [vmem:[%s28269_s3 + $0x15b8] sm:$0xf0] }
 0x2a7   :  { %5799 = vmatpush.bf16.msrb.mxu0 %v14207_v8  ;;  %5768 = vmatmul.bf16.vlgmr.msra.gmra.mxu1 %v28301_v54  ;;  %v14103_v4 = vor.u32 %v18094_v31, %v14100_v45  ;;  %v18168_v8 = vld [vmem:[%s28269_s3 + $0x14f4] sm:$0xf]  ;;  %v5537_v18 = vpop.f32.mrf.mxu3  ;;  %v14220_v45 = vld [vmem:[%s28269_s3 + $0x1398] sm:$0xf0]  ;;  %v14452_v48 = vld [vmem:[%s28269_s3 + $0x1568] sm:$0xf0] }
 0x2a8   :  { %5812 = vmatpush.bf16.msrb.mxu1 %v14271_v17  ;;  %5777 = vmatpush.bf16.msra.mxu2 %v14047_v56  ;;  %v14396_v17 = vld [vmem:[%s28269_s3 + $0x14f8] sm:$0xf0]  ;;  %v14324_v56 = vld [vmem:[%s28269_s3 + $0x1468] sm:$0xf0]  ;;  %v18124_v31 = vld [vmem:[%s28269_s3 + $0x1394] sm:$0xf]  ;;  %v14455_v27 = vor.u32 %v18182_v11, %v14452_v48 }
 0x2a9   :  { %5790 = vmatpush.bf16.msra.mxu3 %v14111_v30  ;;  %v14388_v30 = vld [vmem:[%s28269_s3 + $0x14e8] sm:$0xf0]  ;;  %v14223_v13 = vor.u32 %v18124_v31, %v14220_v45  ;;  %v18142_v18 = vld [vmem:[%s28269_s3 + $0x1424] sm:$0xf] }
 0x2aa   :  { %v14436_v45 = vld [vmem:[%s28269_s3 + $0x1548] sm:$0xf0]  ;;  %v18138_v14 = vld [vmem:[%s28269_s3 + $0x1404] sm:$0xf] }
 0x2ab   :  { %5800 = vmatpush.bf16.msrb.mxu0 %v14199_v53  ;;  %v14399_v53 = vor.u32 %v18168_v8, %v14396_v17  ;;  %v5550_v0 = vpop.f32.mrf.mxu0  ;;  %v14516_v8 = vld [vmem:[%s28269_s3 + $0x15e8] sm:$0xf0]  ;;  %v18144_v17 = vld [vmem:[%s28269_s3 + $0x1434] sm:$0xf] }
 0x2ac   :  { %5813 = vmatpush.bf16.msrb.mxu1 %v14263_v33  ;;  %5778 = vmatpush.bf16.msra.mxu2 %v14039_v16  ;;  %v18150_v33 = vld [vmem:[%s28269_s3 + $0x1464] sm:$0xf]  ;;  %v14316_v16 = vld [vmem:[%s28269_s3 + $0x1458] sm:$0xf0]  ;;  %v5563_v41 = vpop.f32.mrf.mxu1 }
 0x2ad   :  { %5791 = vmatpush.bf16.msra.mxu3 %v14103_v4  ;;  %v14327_v54 = vor.u32 %v18150_v33, %v14324_v56  ;;  %v14380_v4 = vld [vmem:[%s28269_s3 + $0x14d8] sm:$0xf0] }
 0x2ae   :  { %v14508_v56 = vld [vmem:[%s28269_s3 + $0x15d8] sm:$0xf0] }
 0x2af   :  { %5801 = vmatpush.bf16.msrb.mxu0 %v14191_v42  ;;  %v14391_v42 = vor.u32 %v18166_v38, %v14388_v30  ;;  %v28305_v38 = vld [vmem:[#allocation18_spill] sm:$0xff]  ;;  %v18158_v30 = vld [vmem:[%s28269_s3 + $0x14a4] sm:$0xf]  ;;  %v14348_v41 = vld [vmem:[%s28269_s3 + $0x1498] sm:$0xf0] }
 0x2b0   :  { %5814 = vmatpush.bf16.msrb.mxu1 %v14255_v60  ;;  %5779 = vmatpush.bf16.msra.mxu2 %v14031_v24  ;;  %v18148_v60 = vld [vmem:[%s28269_s3 + $0x1454] sm:$0xf]  ;;  %v14383_v24 = vor.u32 %v18164_v44, %v14380_v4 }
 0x2b1   :  { %5792 = vmatpush.bf16.msra.mxu3 %v14095_v6  ;;  %v14151_v6 = vor.u32 %v18106_v34, %v14148_v5  ;;  %v18156_v44 = vld [vmem:[%s28269_s3 + $0x1494] sm:$0xf]  ;;  %v14439_v5 = vor.u32 %v18178_v63, %v14436_v45  ;;  %v14476_v63 = vld [vmem:[%s28269_s3 + $0x1598] sm:$0xf0]  ;;  %v18913_v45 = vld [vmem:[#allocation2 + $0x4] sm:$0xf0] }
 0x2b3   :  { %5802 = vmatpush.bf16.msrb.mxu0 %v14183_v1  ;;  %v14319_v1 = vor.u32 %v18148_v60, %v14316_v16  ;;  %v14500_v60 = vld [vmem:[%s28269_s3 + $0x15c8] sm:$0xf0] }
 0x2b4   :  { %5815 = vmatpush.bf16.msrb.mxu1 %v14247_v62  ;;  %5780 = vmatpush.bf16.msra.mxu2 %v14023_v57  ;;  %v18200_v62 = vld [vmem:[%s28269_s3 + $0x15f4] sm:$0xf] }
 0x2b5   :  { %5793 = vmatpush.bf16.msra.mxu3 %v14087_v7  ;;  %v14527_v29 = vor.u32 %v18200_v62, %v14524_v23  ;;  %v18160_v57 = vld [vmem:[%s28269_s3 + $0x14b4] sm:$0xf]  ;;  %v14519_v7 = vor.u32 %v18198_v51, %v14516_v8  ;;  %v14428_v62 = vld [vmem:[%s28269_s3 + $0x1538] sm:$0xf0]  ;;  %v14351_v23 = vor.u32 %v18156_v44, %v14348_v41  ;;  %v18174_v8 = vld [vmem:[%s28269_s3 + $0x1524] sm:$0xf] }
 0x2b6   :  { %v14367_v33 = vor.u32 %v18160_v57, %v14364_v26  ;;  %v28306_v26 = vld [vmem:[#allocation12_spill] sm:$0xff]  ;;  %v18271_v41 = vld [vmem:[%s28272_s6 + $0x1f4] sm:$0xf0] }
 0x2b7   :  { %5803 = vmatpush.bf16.msrb.mxu0 %v14175_v3  ;;  %5781 = vmatmul.bf16.vlgmr.msra.gmra.mxu2 %v28302_v28  ;;  %v14375_v3 = vor.u32 %v18162_v9, %v14372_v49  ;;  %v18140_v28 = vld [vmem:[%s28269_s3 + $0x1414] sm:$0xf] }
 0x2b8   :  { %5816 = vmatpush.bf16.msrb.mxu1 %v14239_v50  ;;  %5825 = vmatpush.bf16.msrb.mxu2 %v14335_v55  ;;  %v14300_v50 = vld [vmem:[%s28269_s3 + $0x1438] sm:$0xf0] }
 0x2b9   :  { %5838 = vmatpush.bf16.msrb.mxu3 %v14399_v53  ;;  %v14303_v55 = vor.u32 %v18144_v17, %v14300_v50  ;;  %v28304_v53 = vld [vmem:[#allocation17_spill] sm:$0xff]  ;;  %v14420_v17 = vld [vmem:[%s28269_s3 + $0x1528] sm:$0xf0] }
 0x2ba   :  { %5794 = vmatmul.bf16.vlgmr.msra.gmra.mxu3 %v28303_v25  ;;  %v5574_v16 = vpop.f32.mrf.mxu2  ;;  %v14546_v25 = vld [vmem:[#allocation2 + $0x20] sm:$0xf] }
 0x2bb   :  { %5804 = vmatpush.bf16.msrb.mxu0 %v14167_v58  ;;  %v14292_v58 = vld [vmem:[%s28269_s3 + $0x1428] sm:$0xf0]  ;;  %v5575_v4 = vadd.f32 %v5574_v16, %v23470_v22  ;;  %v18176_v22 = vld [vmem:[%s28269_s3 + $0x1534] sm:$0xf] }
 0x2bc   :  { %5817 = vmatpush.bf16.msrb.mxu1 %v14231_v52  ;;  %5826 = vmatpush.bf16.msrb.mxu2 %v14327_v54  ;;  %v14356_v52 = vld [vmem:[%s28269_s3 + $0x14a8] sm:$0xf0]  ;;  %v14511_v54 = vor.u32 %v18196_v20, %v14508_v56  ;;  %v14295_v31 = vor.u32 %v18142_v18, %v14292_v58  ;;  %v14431_v48 = vor.u32 %v18176_v22, %v14428_v62  ;;  %v14538_v20 = vld [vmem:[#allocation2 + $0x10] sm:$0xf]  ;;  %v14540_v58 = vld [vmem:[#allocation2 + $0x18] sm:$0xf0] }
 0x2bd   :  { %5839 = vmatpush.bf16.msrb.mxu3 %v14391_v42  ;;  %v18194_v42 = vld [vmem:[%s28269_s3 + $0x15c4] sm:$0xf]  ;;  %v14359_v0 = vor.u32 %v18158_v30, %v14356_v52  ;;  %v5587_v34 = vpop.f32.mrf.mxu3  ;;  %v14423_v18 = vor.u32 %v18174_v8, %v14420_v17  ;;  %v14412_v30 = vld [vmem:[%s28269_s3 + $0x1518] sm:$0xf0]  ;;  %v14676_v62 = vld [vmem:[%s28272_s6 + $0xf0] sm:$0xf] }
 0x2be   :  { %v14503_v39 = vor.u32 %v18194_v42, %v14500_v60  ;;  %v18912_v42 = vld [vmem:[#allocation2 + $0x4] sm:$0xf]  ;;  %v267_v60 = vld [vmem:[%s28267_s1] sm:$0xff]  ;;  %v14724_v17 = vld [vmem:[%s28272_s6 + $0x150] sm:$0xf] }
 0x2bf   :  { %5805 = vmatpush.bf16.msrb.mxu0 %v14159_v12  ;;  %v14284_v12 = vld [vmem:[%s28269_s3 + $0x1418] sm:$0xf0]  ;;  %289 = vst [vmem:[#allocation1] ss:$4 sm:$0xff] %v267_v60 }
 0x2c0   :  { %5818 = vmatpush.bf16.msrb.mxu1 %v14223_v13  ;;  %5827 = vmatpush.bf16.msrb.mxu2 %v14319_v1  ;;  %v18917_v13 = vld [vmem:[#allocation2 + $0x24] sm:$0x10]  ;;  %v5588_v1 = vadd.f32 %v5587_v34, %v5575_v4  ;;  %v14287_v43 = vor.u32 %v18140_v28, %v14284_v12  ;;  %v18255_v12 = vld [vmem:[%s28272_s6 + $0x174] sm:$0xf0] }
 0x2c1   :  { %5840 = vmatpush.bf16.msrb.mxu3 %v14383_v24  ;;  %v18192_v24 = vld [vmem:[%s28269_s3 + $0x15b4] sm:$0xf]  ;;  %v14547_v9 = vor.u32 %v18917_v13, %v14546_v25  ;;  %v14740_v28 = vld [vmem:[%s28272_s6 + $0x170] sm:$0xf] }
 0x2c2   :  { %v14495_v51 = vor.u32 %v18192_v24, %v14492_v15  ;;  %v5576_v47 = vpop.f32.mrf.mxu2  ;;  %v14804_v34 = vld [vmem:[%s28272_s6 + $0x1f0] sm:$0xf]  ;;  %v14741_v22 = vor.u32 %v18255_v12, %v14740_v28  ;;  %v18239_v24 = vld [vmem:[%s28272_s6 + $0xf4] sm:$0xf0]  ;;  %v28307_v12 = vld [vmem:[#allocation13_spill] sm:$0xff] }
 0x2c3   :  { %5806 = vmatpush.bf16.msrb.mxu0 %v14151_v6  ;;  %v14276_v6 = vld [vmem:[%s28269_s3 + $0x1408] sm:$0xf0]  ;;  %v5600_v49 = vpop.f32.mrf.mxu0  ;;  %v14596_v47 = vld [vmem:[%s28272_s6 + $0x50] sm:$0xf]  ;;  %v18247_v28 = vld [vmem:[%s28272_s6 + $0x134] sm:$0xf0] }
 0x2c4   :  { %5819 = vmatpush.bf16.msrb.mxu1 %v14215_v10  ;;  %5828 = vmatpush.bf16.msrb.mxu2 %v14311_v21  ;;  %v18154_v10 = vld [vmem:[%s28269_s3 + $0x1484] sm:$0xf]  ;;  %v5601_v21 = vadd.f32 %v5600_v49, %v5588_v1  ;;  %v5613_v11 = vpop.f32.mrf.mxu1  ;;  %v14468_v1 = vld [vmem:[%s28269_s3 + $0x1588] sm:$0xf0] }
 0x2c5   :  { %5841 = vmatpush.bf16.msrb.mxu3 %v14375_v3  ;;  %v14279_v3 = vor.u32 %v18138_v14, %v14276_v6  ;;  %v5589_v56 = vpop.f32.mrf.mxu3  ;;  %v14732_v14 = vld [vmem:[%s28272_s6 + $0x160] sm:$0xf]  ;;  %v18253_v6 = vld [vmem:[%s28272_s6 + $0x164] sm:$0xf0] }
 0x2c6   :  { %5807 = vmatmul.bf16.vlgmr.msrb.gmra.mxu0 %v28304_v53  ;;  %v23657_v50 = vadd.f32 %v5613_v11, %v5601_v21  ;;  %v18915_v53 = vld [vmem:[#allocation2 + $0x14] sm:$0xf0]  ;;  %v18221_v11 = vld [vmem:[%s28272_s6 + $0x64] sm:$0xf0] }
 0x2c7   :  { %5851 = vmatpush.bf16.msra.mxu0 %v14463_v46  ;;  %5820 = vmatmul.bf16.vlgmr.msrb.gmra.mxu1 %v28305_v38  ;;  %v14340_v46 = vld [vmem:[%s28269_s3 + $0x1488] sm:$0xf0]  ;;  %v18172_v38 = vld [vmem:[%s28269_s3 + $0x1514] sm:$0xf]  ;;  %v14604_v21 = vld [vmem:[%s28272_s6 + $0x60] sm:$0xf] }
 0x2c8   :  { %5864 = vmatpush.bf16.msra.mxu1 %v14527_v29  ;;  %5829 = vmatpush.bf16.msrb.mxu2 %v14303_v55  ;;  %v14551_v29 = vor.u32 %v18916_v37, %v14548_v19  ;;  %v14343_v57 = vor.u32 %v18154_v10, %v14340_v46  ;;  %v14484_v55 = vld [vmem:[%s28269_s3 + $0x15a8] sm:$0xf0]  ;;  %v14415_v4 = vor.u32 %v18172_v38, %v14412_v30  ;;  %v18186_v37 = vld [vmem:[%s28269_s3 + $0x1584] sm:$0xf]  ;;  %v14796_v10 = vld [vmem:[%s28272_s6 + $0x1e0] sm:$0xf] }
 0x2c9   :  { %5842 = vmatpush.bf16.msrb.mxu3 %v14367_v33  ;;  %v18914_v33 = vld [vmem:[#allocation2 + $0x14] sm:$0xf]  ;;  %v18269_v46 = vld [vmem:[%s28272_s6 + $0x1e4] sm:$0xf0]  ;;  %v14780_v38 = vld [vmem:[%s28272_s6 + $0x1c0] sm:$0xf] }
 0x2ca   :  { %v6629_v32 = vand.u32 %v14551_v29, %v28306_v26  ;;  %v14543_v16 = vor.u32 %v18914_v33, %v14540_v58  ;;  %v14677_v29 = vor.u32 %v18239_v24, %v14676_v62  ;;  %v14797_v8 = vor.u32 %v18269_v46, %v14796_v10  ;;  %v18235_v33 = vld [vmem:[%s28272_s6 + $0xd4] sm:$0xf0]  ;;  %v18265_v30 = vld [vmem:[%s28272_s6 + $0x1c4] sm:$0xf0]  ;;  %v14764_v24 = vld [vmem:[%s28272_s6 + $0x1a0] sm:$0xf] }
 0x2cb   :  { %5852 = vmatpush.bf16.msra.mxu0 %v14455_v27  ;;  %v6626_v27 = vand.u32 %v14547_v9, %v28306_v26  ;;  %v5602_v44 = vpop.f32.mrf.mxu0  ;;  %v14471_v9 = vor.u32 %v18186_v37, %v14468_v1  ;;  %v14605_v26 = vor.u32 %v18221_v11, %v14604_v21  ;;  %v18231_v37 = vld [vmem:[%s28272_s6 + $0xb4] sm:$0xf0]  ;;  %v18229_v46 = vld [vmem:[%s28272_s6 + $0xa4] sm:$0xf0] }
 0x2cc   :  { %5865 = vmatpush.bf16.msra.mxu1 %v14519_v7  ;;  %5830 = vmatpush.bf16.msrb.mxu2 %v14295_v31  ;;  %v18190_v7 = vld [vmem:[%s28269_s3 + $0x15a4] sm:$0xf]  ;;  %v14539_v31 = vor.u32 %v18915_v53, %v14538_v20  ;;  %v5615_v25 = vpop.f32.mrf.mxu1  ;;  %v14660_v53 = vld [vmem:[%s28272_s6 + $0xd0] sm:$0xf]  ;;  %v18243_v21 = vld [vmem:[%s28272_s6 + $0x114] sm:$0xf0] }
 0x2cd   :  { %5843 = vmatpush.bf16.msrb.mxu3 %v14359_v0  ;;  %v14487_v52 = vor.u32 %v18190_v7, %v14484_v55  ;;  %v14532_v0 = vld [vmem:[#allocation2 + $0x8] sm:$0xf0]  ;;  %v18267_v7 = vld [vmem:[%s28272_s6 + $0x1d4] sm:$0xf0]  ;;  %v14580_v25 = vld [vmem:[%s28272_s6 + $0x30] sm:$0xf] }
 0x2cf   :  { %5853 = vmatpush.bf16.msra.mxu0 %v14447_v40  ;;  %v18188_v40 = vld [vmem:[%s28269_s3 + $0x1594] sm:$0xf] }
 0x2d0   :  { %5866 = vmatpush.bf16.msra.mxu1 %v14511_v54  ;;  %5831 = vmatpush.bf16.msrb.mxu2 %v14287_v43  ;;  %v14530_v54 = vld [vmem:[#allocation2] sm:$0xf]  ;;  %v14479_v13 = vor.u32 %v18188_v40, %v14476_v63  ;;  %v14535_v43 = vor.u32 %v18912_v42, %v14532_v0  ;;  %v14708_v0 = vld [vmem:[%s28272_s6 + $0x130] sm:$0xf] }
 0x2d1   :  { %5844 = vmatpush.bf16.msrb.mxu3 %v14351_v23  ;;  %v14531_v19 = vor.u32 %v18913_v45, %v14530_v54  ;;  %v14805_v23 = vor.u32 %v18271_v41, %v14804_v34  ;;  %v18217_v40 = vld [vmem:[%s28272_s6 + $0x44] sm:$0xf0] }
 0x2d2   :  { %v18233_v45 = vld [vmem:[%s28272_s6 + $0xc4] sm:$0xf0] }
 0x2d3   :  { %5854 = vmatpush.bf16.msra.mxu0 %v14439_v5  ;;  %v14404_v5 = vld [vmem:[%s28269_s3 + $0x1508] sm:$0xf0] }
 0x2d4   :  { %5867 = vmatpush.bf16.msra.mxu1 %v14503_v39  ;;  %5832 = vmatpush.bf16.msrb.mxu2 %v14279_v3  ;;  %v18223_v39 = vld [vmem:[%s28272_s6 + $0x74] sm:$0xf0]  ;;  %v18237_v3 = vld [vmem:[%s28272_s6 + $0xe4] sm:$0xf0] }
 0x2d5   :  { %5845 = vmatpush.bf16.msrb.mxu3 %v14343_v57  ;;  %v18251_v57 = vld [vmem:[%s28272_s6 + $0x154] sm:$0xf0] }
 0x2d6   :  { %v14725_v20 = vor.u32 %v18251_v57, %v14724_v17 }
 0x2d7   :  { %5855 = vmatpush.bf16.msra.mxu0 %v14431_v48  ;;  %5833 = vmatmul.bf16.vlgmr.msrb.gmra.mxu2 %v21486_v59  ;;  %v18170_v59 = vld [vmem:[%s28269_s3 + $0x1504] sm:$0xf]  ;;  %v14733_v48 = vor.u32 %v18253_v6, %v14732_v14  ;;  %v14572_v14 = vld [vmem:[%s28272_s6 + $0x20] sm:$0xf]  ;;  %v18213_v6 = vld [vmem:[%s28272_s6 + $0x24] sm:$0xf0] }
 0x2d8   :  { %5868 = vmatpush.bf16.msra.mxu1 %v14495_v51  ;;  %6636 = vmatpush.bf16.msra.mxu2 %v6626_v27  ;;  %v14407_v15 = vor.u32 %v18170_v59, %v14404_v5  ;;  %v14668_v51 = vld [vmem:[%s28272_s6 + $0xe0] sm:$0xf]  ;;  %v14788_v27 = vld [vmem:[%s28272_s6 + $0x1d0] sm:$0xf]  ;;  %v14709_v59 = vor.u32 %v18247_v28, %v14708_v0  ;;  %v14573_v57 = vor.u32 %v18213_v6, %v14572_v14  ;;  %v18301_v6 = vld [vmem:[%s28272_s6 + $0x2e4] sm:$0xf0] }
 0x2d9   :  { %6649 = vmatpush.bf16.msra.mxu3 %v6629_v32  ;;  %v14669_v55 = vor.u32 %v18237_v3, %v14668_v51  ;;  %v18219_v32 = vld [vmem:[%s28272_s6 + $0x54] sm:$0xf0]  ;;  %v14789_v56 = vor.u32 %v18267_v7, %v14788_v27  ;;  %v14644_v5 = vld [vmem:[%s28272_s6 + $0xb0] sm:$0xf]  ;;  %v268_v7 = vld [vmem:[%s28267_s1 + $0x8] sm:$0xff] }
 0x2da   :  { %5846 = vmatmul.bf16.vlgmr.msrb.gmra.mxu3 %v21494_v61  ;;  %v14612_v61 = vld [vmem:[%s28272_s6 + $0x70] sm:$0xf]  ;;  %v14597_v58 = vor.u32 %v18219_v32, %v14596_v47  ;;  %v5626_v63 = vpop.f32.mrf.mxu2  ;;  %v18259_v3 = vld [vmem:[%s28272_s6 + $0x194] sm:$0xf0]  ;;  %v14684_v32 = vld [vmem:[%s28272_s6 + $0x100] sm:$0xf] }
 0x2db   :  { %5856 = vmatpush.bf16.msra.mxu0 %v14423_v18  ;;  %v14613_v49 = vor.u32 %v18223_v39, %v14612_v61  ;;  %v14716_v18 = vld [vmem:[%s28272_s6 + $0x140] sm:$0xf]  ;;  %v5627_v42 = vadd.f32 %v5626_v63, %v23657_v50  ;;  %v14772_v50 = vld [vmem:[%s28272_s6 + $0x1b0] sm:$0xf]  ;;  %v18245_v39 = vld [vmem:[%s28272_s6 + $0x124] sm:$0xf0] }
 0x2dc   :  { %5869 = vmatpush.bf16.msra.mxu1 %v14487_v52  ;;  %6637 = vmatpush.bf16.msra.mxu2 %v14539_v31  ;;  %v14588_v52 = vld [vmem:[%s28272_s6 + $0x40] sm:$0xf]  ;;  %v14756_v51 = vld [vmem:[%s28272_s6 + $0x190] sm:$0xf]  ;;  %v18227_v47 = vld [vmem:[%s28272_s6 + $0x94] sm:$0xf0] }
 0x2dd   :  { %6650 = vmatpush.bf16.msra.mxu3 %v14543_v16  ;;  %v14652_v31 = vld [vmem:[%s28272_s6 + $0xc0] sm:$0xf]  ;;  %v5639_v60 = vpop.f32.mrf.mxu3  ;;  %v14781_v16 = vor.u32 %v18265_v30, %v14780_v38  ;;  %v14589_v44 = vor.u32 %v18217_v40, %v14588_v52  ;;  %v14628_v27 = vld [vmem:[%s28272_s6 + $0x90] sm:$0xf]  ;;  %291 = vst [vmem:[#allocation1 + $0x20] ss:$4 sm:$0xff] %v268_v7 }
 0x2de   :  { %v5640_v34 = vadd.f32 %v5639_v60, %v5627_v42  ;;  %v14653_v41 = vor.u32 %v18233_v45, %v14652_v31  ;;  %v14700_v61 = vld [vmem:[%s28272_s6 + $0x120] sm:$0xf]  ;;  %v15060_v38 = vld [vmem:[%s28272_s6 + $0x3f0] sm:$0xf]  ;;  %v18335_v30 = vld [vmem:[%s28272_s6 + $0x3f4] sm:$0xf0]  ;;  %v14629_v42 = vor.u32 %v18227_v47, %v14628_v27 }
 0x2df   :  { %5857 = vmatpush.bf16.msra.mxu0 %v14415_v4  ;;  %v18263_v4 = vld [vmem:[%s28272_s6 + $0x1b4] sm:$0xf0]  ;;  %v14701_v10 = vor.u32 %v18245_v39, %v14700_v61  ;;  %v18209_v63 = vld [vmem:[%s28272_s6 + $0x4] sm:$0xf0]  ;;  %v14868_v60 = vld [vmem:[%s28272_s6 + $0x270] sm:$0xf] }
 0x2e0   :  { %5870 = vmatpush.bf16.msra.mxu1 %v14479_v13  ;;  %6638 = vmatpush.bf16.msra.mxu2 %v14531_v19  ;;  %v18215_v13 = vld [vmem:[%s28272_s6 + $0x34] sm:$0xf0]  ;;  %v14773_v1 = vor.u32 %v18263_v4, %v14772_v50  ;;  %v18225_v31 = vld [vmem:[%s28272_s6 + $0x84] sm:$0xf0]  ;;  %v14932_v0 = vld [vmem:[%s28272_s6 + $0x2f0] sm:$0xf] }
 0x2e1   :  { %6651 = vmatpush.bf16.msra.mxu3 %v14535_v43  ;;  %v14581_v62 = vor.u32 %v18215_v13, %v14580_v25  ;;  %v18317_v50 = vld [vmem:[%s28272_s6 + $0x364] sm:$0xf0]  ;;  %v15052_v25 = vld [vmem:[%s28272_s6 + $0x3e0] sm:$0xf]  ;;  %v15061_v13 = vor.u32 %v18335_v30, %v15060_v38  ;;  %v18299_v27 = vld [vmem:[%s28272_s6 + $0x2d4] sm:$0xf0] }
 0x2e2   :  { %v5628_v11 = vpop.f32.mrf.mxu2  ;;  %v295_v61 = vld.sshfl [vmem:[#allocation1 + $0x18] sm:$0xff pattern:$0x73625140]  ;;  %v293_v39 = vld.sshfl [vmem:[#allocation1 + $0x8] sm:$0xff pattern:$0x73625140] }
 0x2e3   :  { %5858 = vmatpush.bf16.msra.mxu0 %v14407_v15  ;;  %v5652_v19 = vpop.f32.mrf.mxu0  ;;  %v14645_v15 = vor.u32 %v18231_v37, %v14644_v5  ;;  %v18333_v5 = vld [vmem:[%s28272_s6 + $0x3e4] sm:$0xf0]  ;;  %v292_v37 = vld.sshfl [vmem:[#allocation1] sm:$0xff pattern:$0x73625140] }
 0x2e4   :  { %10203 = vmatpush.bf16.msrb.mxu2 %v14741_v22  ;;  %5871 = vmatpush.bf16.msra.mxu1 %v14471_v9  ;;  %v5653_v43 = vadd.f32 %v5652_v19, %v5640_v34  ;;  %v5665_v22 = vpop.f32.mrf.mxu1  ;;  %v14636_v9 = vld [vmem:[%s28272_s6 + $0xa0] sm:$0xf]  ;;  %v18313_v47 = vld [vmem:[%s28272_s6 + $0x344] sm:$0xf0] }
 0x2e5   :  { %10216 = vmatpush.bf16.msrb.mxu3 %v14805_v23  ;;  %v18261_v23 = vld [vmem:[%s28272_s6 + $0x1a4] sm:$0xf0]  ;;  %v5641_v17 = vpop.f32.mrf.mxu3  ;;  %v14924_v14 = vld [vmem:[%s28272_s6 + $0x2e0] sm:$0xf] }
 0x2e6   :  { %5859 = vmatmul.bf16.vlgmr.msra.gmra.mxu0 %v21567_v35  ;;  %v18249_v35 = vld [vmem:[%s28272_s6 + $0x144] sm:$0xf0]  ;;  %v18283_v17 = vld [vmem:[%s28272_s6 + $0x254] sm:$0xf0]  ;;  %v14908_v38 = vld [vmem:[%s28272_s6 + $0x2c0] sm:$0xf] }
 0x2e7   :  { %10177 = vmatpush.bf16.msrb.mxu0 %v14613_v49  ;;  %5872 = vmatmul.bf16.vlgmr.msra.gmra.mxu1 %v21578_v2  ;;  %v14661_v2 = vor.u32 %v18235_v33, %v14660_v53  ;;  %v14717_v54 = vor.u32 %v18249_v35, %v14716_v18  ;;  %v23844_v49 = vadd.f32 %v5665_v22, %v5653_v43  ;;  %v14748_v33 = vld [vmem:[%s28272_s6 + $0x180] sm:$0xf]  ;;  %v14996_v18 = vld [vmem:[%s28272_s6 + $0x370] sm:$0xf]  ;;  %v18319_v35 = vld [vmem:[%s28272_s6 + $0x374] sm:$0xf0] }
 0x2e8   :  { %10190 = vmatpush.bf16.msrb.mxu1 %v14677_v29  ;;  %10204 = vmatpush.bf16.msrb.mxu2 %v14733_v48  ;;  %v14692_v29 = vld [vmem:[%s28272_s6 + $0x110] sm:$0xf]  ;;  %v14765_v48 = vor.u32 %v18261_v23, %v14764_v24  ;;  %v14997_v34 = vor.u32 %v18319_v35, %v14996_v18  ;;  %v18285_v24 = vld [vmem:[%s28272_s6 + $0x264] sm:$0xf0] }
 0x2e9   :  { %10217 = vmatpush.bf16.msrb.mxu3 %v14797_v8  ;;  %14552 = vmatmul.msk.bf16.vlgmr.msra.gmra.mxu2 %vm1173_vm2, %v28307_v12  ;;  %v14564_v8 = vld [vmem:[%s28272_s6 + $0x10] sm:$0xf]  ;;  %v14693_v53 = vor.u32 %v18243_v21, %v14692_v29  ;;  %v18315_v29 = vld [vmem:[%s28272_s6 + $0x354] sm:$0xf0]  ;;  %v23960_v21 = vpack.c.bf16 %v295_v61, %v295_v61  ;;  %v18281_v18 = vld [vmem:[%s28272_s6 + $0x244] sm:$0xf0] }
 0x2ea   :  { %14553 = vmatmul.msk.bf16.vlgmr.msra.gmra.mxu3 %vm1173_vm2, %v28307_v12  ;;  %v18303_v12 = vld [vmem:[%s28272_s6 + $0x2f4] sm:$0xf0]  ;;  %v18297_v30 = vld [vmem:[%s28272_s6 + $0x2c4] sm:$0xf0] }
 0x2eb   :  { %10178 = vmatpush.bf16.msrb.mxu0 %v14605_v26  ;;  %v18211_v26 = vld [vmem:[%s28272_s6 + $0x14] sm:$0xf0]  ;;  %v5654_v52 = vpop.f32.mrf.mxu0  ;;  %v14933_v43 = vor.u32 %v18303_v12, %v14932_v0  ;;  %v14900_v12 = vld [vmem:[%s28272_s6 + $0x2b0] sm:$0xf]  ;;  %v18277_v61 = vld [vmem:[%s28272_s6 + $0x224] sm:$0xf0] }
 0x2ec   :  { %10191 = vmatpush.bf16.msrb.mxu1 %v14669_v55  ;;  %10205 = vmatpush.bf16.msrb.mxu2 %v14725_v20  ;;  %v14637_v55 = vor.u32 %v18229_v46, %v14636_v9  ;;  %v18241_v20 = vld [vmem:[%s28272_s6 + $0x104] sm:$0xf0]  ;;  %v14565_v40 = vor.u32 %v18211_v26, %v14564_v8  ;;  %v5667_v45 = vpop.f32.mrf.mxu1  ;;  %v15053_v9 = vor.u32 %v18333_v5, %v15052_v25  ;;  %v14980_v46 = vld [vmem:[%s28272_s6 + $0x350] sm:$0xf]  ;;  %v18279_v0 = vld [vmem:[%s28272_s6 + $0x234] sm:$0xf0] }
 0x2ed   :  { %10218 = vmatpush.bf16.msrb.mxu3 %v14789_v56  ;;  %v18257_v56 = vld [vmem:[%s28272_s6 + $0x184] sm:$0xf0]  ;;  %v14685_v28 = vor.u32 %v18241_v20, %v14684_v32  ;;  %v14852_v8 = vld [vmem:[%s28272_s6 + $0x250] sm:$0xf]  ;;  %v15036_v20 = vld [vmem:[%s28272_s6 + $0x3c0] sm:$0xf] }
 0x2ee   :  { %v14749_v4 = vor.u32 %v18257_v56, %v14748_v33  ;;  %v14916_v26 = vld [vmem:[%s28272_s6 + $0x2d0] sm:$0xf]  ;;  %v14853_v32 = vor.u32 %v18283_v17, %v14852_v8  ;;  %v14844_v56 = vld [vmem:[%s28272_s6 + $0x240] sm:$0xf] }
 0x2ef   :  { %10179 = vmatpush.bf16.msrb.mxu0 %v14597_v58  ;;  %v14757_v58 = vor.u32 %v18259_v3, %v14756_v51  ;;  %v18331_v51 = vld [vmem:[%s28272_s6 + $0x3d4] sm:$0xf0]  ;;  %v14925_v3 = vor.u32 %v18301_v6, %v14924_v14  ;;  %v14917_v33 = vor.u32 %v18299_v27, %v14916_v26  ;;  %v15028_v45 = vld [vmem:[%s28272_s6 + $0x3b0] sm:$0xf]  ;;  %v15020_v5 = vld [vmem:[%s28272_s6 + $0x3a0] sm:$0xf] }
 0x2f0   :  { %10192 = vmatpush.bf16.msrb.mxu1 %v14661_v2  ;;  %10206 = vmatpush.bf16.msrb.mxu2 %v14717_v54  ;;  %v14556_v2 = vld [vmem:[%s28272_s6] sm:$0xf]  ;;  %v18307_v14 = vld [vmem:[%s28272_s6 + $0x314] sm:$0xf0]  ;;  %v14884_v8 = vld [vmem:[%s28272_s6 + $0x290] sm:$0xf] }
 0x2f1   :  { %10219 = vmatpush.bf16.msrb.mxu3 %v14781_v16  ;;  %v14620_v54 = vld [vmem:[%s28272_s6 + $0x80] sm:$0xf]  ;;  %v18287_v16 = vld [vmem:[%s28272_s6 + $0x274] sm:$0xf0]  ;;  %v269_v17 = vld [vmem:[%s28267_s1 + $0x10] sm:$0xff] }
 0x2f2   :  { %v14621_v19 = vor.u32 %v18225_v31, %v14620_v54  ;;  %v18311_v54 = vld [vmem:[%s28272_s6 + $0x334] sm:$0xf0]  ;;  %v14845_v31 = vor.u32 %v18281_v18, %v14844_v56  ;;  %v14940_v27 = vld [vmem:[%s28272_s6 + $0x300] sm:$0xf]  ;;  %v15316_v56 = vld [vmem:[%s28272_s6 + $0x5f0] sm:$0xf] }
 0x2f3   :  { %10180 = vmatpush.bf16.msrb.mxu0 %v14589_v44  ;;  %v14988_v44 = vld [vmem:[%s28272_s6 + $0x360] sm:$0xf]  ;;  %v18291_v26 = vld [vmem:[%s28272_s6 + $0x294] sm:$0xf0] }
 0x2f4   :  { %10193 = vmatpush.bf16.msrb.mxu1 %v14653_v41  ;;  %10207 = vmatpush.bf16.msrb.mxu2 %v14709_v59  ;;  %v294_v41 = vld.sshfl [vmem:[#allocation1 + $0x10] sm:$0xff pattern:$0x73625140]  ;;  %v14557_v59 = vor.u32 %v18209_v63, %v14556_v2  ;;  %v14989_v23 = vor.u32 %v18317_v50, %v14988_v44  ;;  %v18295_v44 = vld [vmem:[%s28272_s6 + $0x2b4] sm:$0xf0] }
 0x2f5   :  { %10220 = vmatpush.bf16.msrb.mxu3 %v14773_v1  ;;  %v14869_v1 = vor.u32 %v18287_v16, %v14868_v60  ;;  %v23936_v22 = vpack.c.bf16 %v294_v41, %v294_v41  ;;  %v14964_v63 = vld [vmem:[%s28272_s6 + $0x330] sm:$0xf]  ;;  %v14909_v60 = vor.u32 %v18297_v30, %v14908_v38  ;;  %v18309_v41 = vld [vmem:[%s28272_s6 + $0x324] sm:$0xf0]  ;;  %300 = vst [vmem:[#allocation1] ss:$4 sm:$0xff] %v269_v17 }
 0x2f6   :  { %v14836_v16 = vld [vmem:[%s28272_s6 + $0x230] sm:$0xf]  ;;  %v18399_v18 = vld [vmem:[%s28272_s6 + $0x5f4] sm:$0xf0]  ;;  %v14812_v38 = vld [vmem:[%s28272_s6 + $0x200] sm:$0xf] }
 0x2f7   :  { %10181 = vmatpush.bf16.msrb.mxu0 %v14581_v62  ;;  %v14860_v62 = vld [vmem:[%s28272_s6 + $0x260] sm:$0xf]  ;;  %v18273_v30 = vld [vmem:[%s28272_s6 + $0x204] sm:$0xf0]  ;;  %v18347_v17 = vld [vmem:[%s28272_s6 + $0x454] sm:$0xf0] }
 0x2f8   :  { %10194 = vmatpush.bf16.msrb.mxu1 %v14645_v15  ;;  %10208 = vmatpush.bf16.msrb.mxu2 %v14701_v10  ;;  %v23944_v15 = vpack.c.bf16 %v292_v37, %v292_v37  ;;  %v23952_v10 = vpack.c.bf16 %v293_v39, %v293_v39  ;;  %v14861_v11 = vor.u32 %v18285_v24, %v14860_v62  ;;  %v18325_v37 = vld [vmem:[%s28272_s6 + $0x3a4] sm:$0xf0]  ;;  %v14892_v39 = vld [vmem:[%s28272_s6 + $0x2a0] sm:$0xf] }
 0x2f9   :  { %10221 = vmatpush.bf16.msrb.mxu3 %v14765_v48  ;;  %v15044_v48 = vld [vmem:[%s28272_s6 + $0x3d0] sm:$0xf]  ;;  %v18293_v24 = vld [vmem:[%s28272_s6 + $0x2a4] sm:$0xf0] }
 0x2fa   :  { %v15045_v7 = vor.u32 %v18331_v51, %v15044_v48  ;;  %v5678_v35 = vpop.f32.mrf.mxu2 }
 0x2fb   :  { %10182 = vmatpush.bf16.msrb.mxu0 %v14573_v57  ;;  %v14981_v57 = vor.u32 %v18315_v29, %v14980_v46  ;;  %v5679_v2 = vadd.f32 %v5678_v35, %v23844_v49  ;;  %v18327_v49 = vld [vmem:[%s28272_s6 + $0x3b4] sm:$0xf0]  ;;  %v15012_v46 = vld [vmem:[%s28272_s6 + $0x390] sm:$0xf] }
 0x2fc   :  { %10195 = vmatpush.bf16.msrb.mxu1 %v14637_v55  ;;  %10209 = vmatpush.bf16.msrb.mxu2 %v14693_v53  ;;  %v14972_v55 = vld [vmem:[%s28272_s6 + $0x340] sm:$0xf]  ;;  %v18329_v53 = vld [vmem:[%s28272_s6 + $0x3c4] sm:$0xf0]  ;;  %v18323_v29 = vld [vmem:[%s28272_s6 + $0x394] sm:$0xf0] }
 0x2fd   :  { %10222 = vmatpush.bf16.msrb.mxu3 %v14757_v58  ;;  %v14973_v58 = vor.u32 %v18313_v47, %v14972_v55  ;;  %v5691_v52 = vpop.f32.mrf.mxu3  ;;  %v15004_v47 = vld [vmem:[%s28272_s6 + $0x380] sm:$0xf] }
 0x2ff   :  { %10183 = vmatpush.bf16.msrb.mxu0 %v14565_v40  ;;  %v15037_v40 = vor.u32 %v18329_v53, %v15036_v20  ;;  %v15252_v20 = vld [vmem:[%s28272_s6 + $0x570] sm:$0xf]  ;;  %v15013_v53 = vor.u32 %v18323_v29, %v15012_v46  ;;  %v18379_v29 = vld [vmem:[%s28272_s6 + $0x554] sm:$0xf0] }
 0x300   :  { %10196 = vmatpush.bf16.msrb.mxu1 %v14629_v42  ;;  %10210 = vmatpush.bf16.msrb.mxu2 %v14685_v28  ;;  %v5692_v42 = vadd.f32 %v5691_v52, %v5679_v2  ;;  %v14965_v28 = vor.u32 %v18311_v54, %v14964_v63  ;;  %v14876_v2 = vld [vmem:[%s28272_s6 + $0x280] sm:$0xf]  ;;  %v18289_v63 = vld [vmem:[%s28272_s6 + $0x284] sm:$0xf0] }
 0x301   :  { %10223 = vmatpush.bf16.msrb.mxu3 %v14749_v4  ;;  %v15029_v4 = vor.u32 %v18327_v49, %v15028_v45  ;;  %v298_v54 = vld.sshfl [vmem:[#allocation1 + $0x30] sm:$0xff pattern:$0x73625140]  ;;  %v18351_v49 = vld [vmem:[%s28272_s6 + $0x474] sm:$0xf0] }
 0x302   :  { %v5680_v6 = vpop.f32.mrf.mxu2  ;;  %v15124_v45 = vld [vmem:[%s28272_s6 + $0x470] sm:$0xf] }
 0x303   :  { %10184 = vmatpush.bf16.msrb.mxu0 %v14557_v59  ;;  %10211 = vmatmul.bf16.vlgmr.msrb.gmra.mxu2 %v23936_v22  ;;  %v5704_v50 = vpop.f32.mrf.mxu0  ;;  %v14837_v59 = vor.u32 %v18279_v0, %v14836_v16  ;;  %v18367_v0 = vld [vmem:[%s28272_s6 + $0x4f4] sm:$0xf0] }
 0x304   :  { %10255 = vmatpush.bf16.msra.mxu2 %v14997_v34  ;;  %10197 = vmatpush.bf16.msrb.mxu1 %v14621_v19  ;;  %v14956_v34 = vld [vmem:[%s28272_s6 + $0x320] sm:$0xf]  ;;  %v5705_v25 = vadd.f32 %v5704_v50, %v5692_v42  ;;  %v14901_v19 = vor.u32 %v18295_v44, %v14900_v12  ;;  %v15188_v42 = vld [vmem:[%s28272_s6 + $0x4f0] sm:$0xf]  ;;  %v15317_v12 = vor.u32 %v18399_v18, %v15316_v56 }
 0x305   :  { %10268 = vmatpush.bf16.msra.mxu3 %v15061_v13  ;;  %v5717_v13 = vpop.f32.mrf.mxu1  ;;  %v14957_v62 = vor.u32 %v18309_v41, %v14956_v34  ;;  %v5693_v48 = vpop.f32.mrf.mxu3  ;;  %v14813_v44 = vor.u32 %v18273_v30, %v14812_v38  ;;  %v299_v50 = vld.sshfl [vmem:[#allocation1 + $0x38] sm:$0xff pattern:$0x73625140]  ;;  %v14877_v34 = vor.u32 %v18289_v63, %v14876_v2  ;;  %v24137_v41 = vpack.c.bf16 %v298_v54, %v298_v54  ;;  %v15100_v56 = vld [vmem:[%s28272_s6 + $0x440] sm:$0xf] }
 0x306   :  { %10185 = vmatmul.bf16.vlgmr.msrb.gmra.mxu0 %v23944_v15  ;;  %10224 = vmatmul.bf16.vlgmr.msrb.gmra.mxu3 %v23960_v21  ;;  %v18395_v48 = vld [vmem:[%s28272_s6 + $0x5d4] sm:$0xf0]  ;;  %v18361_v38 = vld [vmem:[%s28272_s6 + $0x4c4] sm:$0xf0]  ;;  %v15220_v63 = vld [vmem:[%s28272_s6 + $0x530] sm:$0xf] }
 0x307   :  { %10229 = vmatpush.bf16.msra.mxu0 %v14869_v1  ;;  %10198 = vmatmul.bf16.vlgmr.msrb.gmra.mxu1 %v23952_v10  ;;  %v14828_v1 = vld [vmem:[%s28272_s6 + $0x220] sm:$0xf]  ;;  %v18375_v54 = vld [vmem:[%s28272_s6 + $0x534] sm:$0xf0] }
 0x308   :  { %10242 = vmatpush.bf16.msra.mxu1 %v14933_v43  ;;  %10256 = vmatpush.bf16.msra.mxu2 %v14989_v23  ;;  %v24054_v43 = vadd.f32 %v5717_v13, %v5705_v25  ;;  %v14948_v23 = vld [vmem:[%s28272_s6 + $0x310] sm:$0xf]  ;;  %v14829_v51 = vor.u32 %v18277_v61, %v14828_v1  ;;  %v18381_v25 = vld [vmem:[%s28272_s6 + $0x564] sm:$0xf0]  ;;  %v15308_v13 = vld [vmem:[%s28272_s6 + $0x5e0] sm:$0xf] }
 0x309   :  { %10269 = vmatpush.bf16.msra.mxu3 %v15053_v9  ;;  %v15021_v9 = vor.u32 %v18325_v37, %v15020_v5  ;;  %v14949_v55 = vor.u32 %v18307_v14, %v14948_v23  ;;  %v15125_v5 = vor.u32 %v18351_v49, %v15124_v45  ;;  %v15189_v37 = vor.u32 %v18367_v0, %v15188_v42  ;;  %v15116_v1 = vld [vmem:[%s28272_s6 + $0x460] sm:$0xf]  ;;  %v18365_v23 = vld [vmem:[%s28272_s6 + $0x4e4] sm:$0xf0]  ;;  %v15156_v0 = vld [vmem:[%s28272_s6 + $0x4b0] sm:$0xf] }
 0x30b   :  { %10230 = vmatpush.bf16.msra.mxu0 %v14861_v11  ;;  %v14820_v11 = vld [vmem:[%s28272_s6 + $0x210] sm:$0xf]  ;;  %v5706_v35 = vpop.f32.mrf.mxu0 }
 0x30c   :  { %10243 = vmatpush.bf16.msra.mxu1 %v14925_v3  ;;  %10257 = vmatpush.bf16.msra.mxu2 %v14981_v57  ;;  %v18275_v3 = vld [vmem:[%s28272_s6 + $0x214] sm:$0xf0]  ;;  %v14893_v57 = vor.u32 %v18293_v24, %v14892_v39  ;;  %v24153_v39 = vpack.c.bf16 %v299_v50, %v299_v50  ;;  %v15180_v24 = vld [vmem:[%s28272_s6 + $0x4e0] sm:$0xf]  ;;  %v18345_v35 = vld [vmem:[%s28272_s6 + $0x444] sm:$0xf0] }
 0x30d   :  { %10270 = vmatpush.bf16.msra.mxu3 %v15045_v7  ;;  %v18305_v7 = vld [vmem:[%s28272_s6 + $0x304] sm:$0xf0]  ;;  %v5719_v52 = vpop.f32.mrf.mxu1  ;;  %v15101_v49 = vor.u32 %v18345_v35, %v15100_v56  ;;  %v15508_v35 = vld [vmem:[%s28272_s6 + $0x770] sm:$0xf] }
 0x30f   :  { %10231 = vmatpush.bf16.msra.mxu0 %v14853_v32  ;;  %v18321_v32 = vld [vmem:[%s28272_s6 + $0x384] sm:$0xf0] }
 0x310   :  { %10244 = vmatpush.bf16.msra.mxu1 %v14917_v33  ;;  %10258 = vmatpush.bf16.msra.mxu2 %v14973_v58  ;;  %v18383_v33 = vld [vmem:[%s28272_s6 + $0x574] sm:$0xf0]  ;;  %v14821_v58 = vor.u32 %v18275_v3, %v14820_v11  ;;  %v15300_v11 = vld [vmem:[%s28272_s6 + $0x5d0] sm:$0xf]  ;;  %v15181_v3 = vor.u32 %v18365_v23, %v15180_v24  ;;  %v18341_v24 = vld [vmem:[%s28272_s6 + $0x424] sm:$0xf0] }
 0x311   :  { %10271 = vmatpush.bf16.msra.mxu3 %v15037_v40  ;;  %v14885_v40 = vor.u32 %v18291_v26, %v14884_v8  ;;  %v15253_v16 = vor.u32 %v18383_v33, %v15252_v20  ;;  %v15108_v8 = vld [vmem:[%s28272_s6 + $0x450] sm:$0xf]  ;;  %v18363_v26 = vld [vmem:[%s28272_s6 + $0x4d4] sm:$0xf0]  ;;  %v18393_v20 = vld [vmem:[%s28272_s6 + $0x5c4] sm:$0xf0] }
 0x312   :  { %v15148_v23 = vld [vmem:[%s28272_s6 + $0x4a0] sm:$0xf] }
 0x313   :  { %10232 = vmatpush.bf16.msra.mxu0 %v14845_v31  ;;  %v14941_v31 = vor.u32 %v18305_v7, %v14940_v27  ;;  %v15301_v7 = vor.u32 %v18395_v48, %v15300_v11  ;;  %v15204_v11 = vld [vmem:[%s28272_s6 + $0x510] sm:$0xf]  ;;  %v18371_v48 = vld [vmem:[%s28272_s6 + $0x514] sm:$0xf0] }
 0x314   :  { %10245 = vmatpush.bf16.msra.mxu1 %v14909_v60  ;;  %10259 = vmatpush.bf16.msra.mxu2 %v14965_v28  ;;  %v15005_v60 = vor.u32 %v18321_v32, %v15004_v47  ;;  %v296_v28 = vld.sshfl [vmem:[#allocation1 + $0x20] sm:$0xff pattern:$0x73625140]  ;;  %v18377_v47 = vld [vmem:[%s28272_s6 + $0x544] sm:$0xf0]  ;;  %v15205_v56 = vor.u32 %v18371_v48, %v15204_v11 }
 0x315   :  { %10272 = vmatpush.bf16.msra.mxu3 %v15029_v4  ;;  %v15244_v4 = vld [vmem:[%s28272_s6 + $0x560] sm:$0xf]  ;;  %v24151_v61 = vpack.c.bf16 %v296_v28, %v296_v28  ;;  %v18359_v28 = vld [vmem:[%s28272_s6 + $0x4b4] sm:$0xf0] }
 0x316   :  { %v15245_v14 = vor.u32 %v18381_v25, %v15244_v4  ;;  %v15292_v32 = vld [vmem:[%s28272_s6 + $0x5c0] sm:$0xf] }
 0x317   :  { %10233 = vmatpush.bf16.msra.mxu0 %v14837_v59  ;;  %v18397_v59 = vld [vmem:[%s28272_s6 + $0x5e4] sm:$0xf0]  ;;  %v15212_v4 = vld [vmem:[%s28272_s6 + $0x520] sm:$0xf] }
 0x318   :  { %10246 = vmatpush.bf16.msra.mxu1 %v14901_v19  ;;  %10260 = vmatpush.bf16.msra.mxu2 %v14957_v62  ;;  %v297_v19 = vld.sshfl [vmem:[#allocation1 + $0x28] sm:$0xff pattern:$0x73625140]  ;;  %v15309_v6 = vor.u32 %v18397_v59, %v15308_v13  ;;  %v15276_v59 = vld [vmem:[%s28272_s6 + $0x5a0] sm:$0xf] }
 0x319   :  { %10273 = vmatpush.bf16.msra.mxu3 %v15021_v9  ;;  %v18349_v62 = vld [vmem:[%s28272_s6 + $0x464] sm:$0xf0]  ;;  %v15236_v9 = vld [vmem:[%s28272_s6 + $0x550] sm:$0xf]  ;;  %v24168_v46 = vpack.c.bf16 %v297_v19, %v297_v19  ;;  %v15157_v19 = vor.u32 %v18359_v28, %v15156_v0  ;;  %v18415_v0 = vld [vmem:[%s28272_s6 + $0x674] sm:$0xf0] }
 0x31a   :  { %v15237_v27 = vor.u32 %v18379_v29, %v15236_v9  ;;  %v5730_v18 = vpop.f32.mrf.mxu2  ;;  %v18373_v13 = vld [vmem:[%s28272_s6 + $0x524] sm:$0xf0]  ;;  %v15444_v28 = vld [vmem:[%s28272_s6 + $0x6f0] sm:$0xf] }
 0x31b   :  { %10234 = vmatpush.bf16.msra.mxu0 %v14829_v51  ;;  %v15117_v51 = vor.u32 %v18349_v62, %v15116_v1  ;;  %v5731_v30 = vadd.f32 %v5730_v18, %v24054_v43  ;;  %v18391_v43 = vld [vmem:[%s28272_s6 + $0x5b4] sm:$0xf0]  ;;  %v15084_v1 = vld [vmem:[%s28272_s6 + $0x420] sm:$0xf]  ;;  %v15213_v9 = vor.u32 %v18373_v13, %v15212_v4 }
 0x31c   :  { %10247 = vmatpush.bf16.msra.mxu1 %v14893_v57  ;;  %10261 = vmatpush.bf16.msra.mxu2 %v14949_v55  ;;  %v15172_v57 = vld [vmem:[%s28272_s6 + $0x4d0] sm:$0xf]  ;;  %v15228_v55 = vld [vmem:[%s28272_s6 + $0x540] sm:$0xf] }
 0x31d   :  { %10274 = vmatpush.bf16.msra.mxu3 %v15013_v53  ;;  %v15109_v53 = vor.u32 %v18347_v17, %v15108_v8  ;;  %v15173_v33 = vor.u32 %v18363_v26, %v15172_v57  ;;  %v5743_v2 = vpop.f32.mrf.mxu3  ;;  %v15229_v52 = vor.u32 %v18377_v47, %v15228_v55  ;;  %v18387_v8 = vld [vmem:[%s28272_s6 + $0x594] sm:$0xf0]  ;;  %v15076_v17 = vld [vmem:[%s28272_s6 + $0x410] sm:$0xf]  ;;  %v15085_v26 = vor.u32 %v18341_v24, %v15084_v1  ;;  %v18461_v24 = vld [vmem:[%s28272_s6 + $0x7e4] sm:$0xf0] }
 0x31e   :  { %v5744_v45 = vadd.f32 %v5743_v2, %v5731_v30  ;;  %v18339_v57 = vld [vmem:[%s28272_s6 + $0x414] sm:$0xf0]  ;;  %v15572_v30 = vld [vmem:[%s28272_s6 + $0x7f0] sm:$0xf] }
 0x31f   :  { %10235 = vmatpush.bf16.msra.mxu0 %v14821_v58  ;;  %v15164_v58 = vld [vmem:[%s28272_s6 + $0x4c0] sm:$0xf]  ;;  %v18355_v55 = vld [vmem:[%s28272_s6 + $0x494] sm:$0xf0] }
 0x320   :  { %10248 = vmatpush.bf16.msra.mxu1 %v14885_v40  ;;  %10262 = vmatpush.bf16.msra.mxu2 %v14941_v31  ;;  %v15293_v40 = vor.u32 %v18393_v20, %v15292_v32  ;;  %v15284_v31 = vld [vmem:[%s28272_s6 + $0x5b0] sm:$0xf]  ;;  %v15165_v42 = vor.u32 %v18361_v38, %v15164_v58  ;;  %v270_v47 = vld [vmem:[%s28267_s1 + $0x18] sm:$0xff]  ;;  %v15196_v32 = vld [vmem:[%s28272_s6 + $0x500] sm:$0xf] }
 0x321   :  { %10275 = vmatpush.bf16.msra.mxu3 %v15005_v60  ;;  %v15092_v60 = vld [vmem:[%s28272_s6 + $0x430] sm:$0xf]  ;;  %v15285_v50 = vor.u32 %v18391_v43, %v15284_v31  ;;  %v18369_v20 = vld [vmem:[%s28272_s6 + $0x504] sm:$0xf0]  ;;  %v18447_v58 = vld [vmem:[%s28272_s6 + $0x774] sm:$0xf0] }
 0x322   :  { %301 = vst [vmem:[#allocation1 + $0x20] ss:$4 sm:$0xff] %v270_v47  ;;  %v18463_v2 = vld [vmem:[%s28272_s6 + $0x7f4] sm:$0xf0]  ;;  %v18337_v31 = vld [vmem:[%s28272_s6 + $0x404] sm:$0xf0] }
 0x323   :  { %10236 = vmatpush.bf16.msra.mxu0 %v14813_v44  ;;  %10263 = vmatmul.bf16.vlgmr.msra.gmra.mxu2 %v24137_v41  ;;  %v15221_v44 = vor.u32 %v18375_v54, %v15220_v63  ;;  %v15077_v63 = vor.u32 %v18339_v57, %v15076_v17  ;;  %v15132_v43 = vld [vmem:[%s28272_s6 + $0x480] sm:$0xf]  ;;  %v15492_v57 = vld [vmem:[%s28272_s6 + $0x750] sm:$0xf] }
 0x324   :  { %10307 = vmatpush.bf16.msrb.mxu2 %v15253_v16  ;;  %10249 = vmatpush.bf16.msra.mxu1 %v14877_v34  ;;  %v18343_v16 = vld [vmem:[%s28272_s6 + $0x434] sm:$0xf0]  ;;  %v5769_v25 = vpop.f32.mrf.mxu1  ;;  %v302_v4 = vld.sshfl [vmem:[#allocation1] sm:$0xff pattern:$0x73625140] }
 0x325   :  { %10320 = vmatpush.bf16.msrb.mxu3 %v15317_v12  ;;  %v5756_v12 = vpop.f32.mrf.mxu0  ;;  %v24366_v11 = vpack.c.bf16 %v302_v4, %v302_v4  ;;  %v15348_v4 = vld [vmem:[%s28272_s6 + $0x630] sm:$0xf] }
 0x326   :  { %10237 = vmatmul.bf16.vlgmr.msra.gmra.mxu0 %v24151_v61  ;;  %10276 = vmatmul.bf16.vlgmr.msra.gmra.mxu3 %v24153_v39  ;;  %v5757_v34 = vadd.f32 %v5756_v12, %v5744_v45  ;;  %v18353_v45 = vld [vmem:[%s28272_s6 + $0x484] sm:$0xf0]  ;;  %v18431_v12 = vld [vmem:[%s28272_s6 + $0x6f4] sm:$0xf0] }
 0x327   :  { %10281 = vmatpush.bf16.msrb.mxu0 %v15125_v5  ;;  %10250 = vmatmul.bf16.vlgmr.msra.gmra.mxu1 %v24168_v46  ;;  %v18389_v5 = vld [vmem:[%s28272_s6 + $0x5a4] sm:$0xf0]  ;;  %v15133_v13 = vor.u32 %v18353_v45, %v15132_v43 }
 0x328   :  { %10294 = vmatpush.bf16.msrb.mxu1 %v15189_v37  ;;  %10308 = vmatpush.bf16.msrb.mxu2 %v15245_v14  ;;  %v15093_v37 = vor.u32 %v18343_v16, %v15092_v60  ;;  %v24258_v62 = vadd.f32 %v5769_v25, %v5757_v34  ;;  %v18357_v14 = vld [vmem:[%s28272_s6 + $0x4a4] sm:$0xf0]  ;;  %v15277_v29 = vor.u32 %v18389_v5, %v15276_v59  ;;  %v305_v34 = vld.sshfl [vmem:[#allocation1 + $0x18] sm:$0xff pattern:$0x73625140] }
 0x329   :  { %10321 = vmatpush.bf16.msrb.mxu3 %v15309_v6  ;;  %v5732_v6 = vpop.f32.mrf.mxu2  ;;  %v15197_v60 = vor.u32 %v18369_v20, %v15196_v32  ;;  %v15500_v59 = vld [vmem:[%s28272_s6 + $0x760] sm:$0xf]  ;;  %v18445_v5 = vld [vmem:[%s28272_s6 + $0x764] sm:$0xf0]  ;;  %v15364_v32 = vld [vmem:[%s28272_s6 + $0x650] sm:$0xf] }
 0x32a   :  { %v24358_v6 = vpack.c.bf16 %v305_v34, %v305_v34  ;;  %v15501_v48 = vor.u32 %v18445_v5, %v15500_v59  ;;  %v18411_v20 = vld [vmem:[%s28272_s6 + $0x654] sm:$0xf0]  ;;  %v15412_v59 = vld [vmem:[%s28272_s6 + $0x6b0] sm:$0xf] }
 0x32b   :  { %10282 = vmatpush.bf16.msrb.mxu0 %v15117_v51  ;;  %v15268_v51 = vld [vmem:[%s28272_s6 + $0x590] sm:$0xf]  ;;  %v18407_v34 = vld [vmem:[%s28272_s6 + $0x634] sm:$0xf0] }
 0x32c   :  { %10295 = vmatpush.bf16.msrb.mxu1 %v15181_v3  ;;  %10309 = vmatpush.bf16.msrb.mxu2 %v15237_v27  ;;  %v5745_v3 = vpop.f32.mrf.mxu3  ;;  %v15149_v27 = vor.u32 %v18357_v14, %v15148_v23  ;;  %v15269_v18 = vor.u32 %v18387_v8, %v15268_v51  ;;  %v303_v23 = vld.sshfl [vmem:[#allocation1 + $0x8] sm:$0xff pattern:$0x73625140]  ;;  %v15445_v14 = vor.u32 %v18431_v12, %v15444_v28  ;;  %v15436_v51 = vld [vmem:[%s28272_s6 + $0x6e0] sm:$0xf] }
 0x32d   :  { %10322 = vmatpush.bf16.msrb.mxu3 %v15301_v7  ;;  %v15140_v7 = vld [vmem:[%s28272_s6 + $0x490] sm:$0xf]  ;;  %v5758_v38 = vpop.f32.mrf.mxu0  ;;  %v18429_v3 = vld [vmem:[%s28272_s6 + $0x6e4] sm:$0xf0]  ;;  %v24374_v17 = vpack.c.bf16 %v303_v23, %v303_v23  ;;  %v18423_v5 = vld [vmem:[%s28272_s6 + $0x6b4] sm:$0xf0] }
 0x32e   :  { %v15141_v54 = vor.u32 %v18355_v55, %v15140_v7  ;;  %v15556_v7 = vld [vmem:[%s28272_s6 + $0x7d0] sm:$0xf]  ;;  %v18459_v55 = vld [vmem:[%s28272_s6 + $0x7d4] sm:$0xf0]  ;;  %v15437_v47 = vor.u32 %v18429_v3, %v15436_v51  ;;  %v15365_v38 = vor.u32 %v18411_v20, %v15364_v32  ;;  %v15468_v23 = vld [vmem:[%s28272_s6 + $0x720] sm:$0xf]  ;;  %v15413_v3 = vor.u32 %v18423_v5, %v15412_v59 }
 0x32f   :  { %10283 = vmatpush.bf16.msrb.mxu0 %v15109_v53  ;;  %v15260_v53 = vld [vmem:[%s28272_s6 + $0x580] sm:$0xf]  ;;  %v15540_v12 = vld [vmem:[%s28272_s6 + $0x7b0] sm:$0xf]  ;;  %v18435_v32 = vld [vmem:[%s28272_s6 + $0x714] sm:$0xf0] }
 0x330   :  { %10296 = vmatpush.bf16.msrb.mxu1 %v15173_v33  ;;  %10310 = vmatpush.bf16.msrb.mxu2 %v15229_v52  ;;  %v18385_v33 = vld [vmem:[%s28272_s6 + $0x584] sm:$0xf0]  ;;  %v15068_v52 = vld [vmem:[%s28272_s6 + $0x400] sm:$0xf]  ;;  %v15636_v59 = vld [vmem:[%s28272_s6 + $0x870] sm:$0xf] }
 0x331   :  { %10323 = vmatpush.bf16.msrb.mxu3 %v15293_v40  ;;  %v5771_v40 = vpop.f32.mrf.mxu1  ;;  %v15261_v16 = vor.u32 %v18385_v33, %v15260_v53  ;;  %v15069_v25 = vor.u32 %v18337_v31, %v15068_v52  ;;  %v15428_v33 = vld [vmem:[%s28272_s6 + $0x6d0] sm:$0xf]  ;;  %v18479_v5 = vld [vmem:[%s28272_s6 + $0x874] sm:$0xf0] }
 0x333   :  { %10284 = vmatpush.bf16.msrb.mxu0 %v15101_v49  ;;  %v304_v49 = vld.sshfl [vmem:[#allocation1 + $0x10] sm:$0xff pattern:$0x73625140] }
 0x334   :  { %10297 = vmatpush.bf16.msrb.mxu1 %v15165_v42  ;;  %10311 = vmatpush.bf16.msrb.mxu2 %v15221_v44  ;;  %v15380_v42 = vld [vmem:[%s28272_s6 + $0x670] sm:$0xf]  ;;  %v15509_v44 = vor.u32 %v18447_v58, %v15508_v35  ;;  %v15484_v35 = vld [vmem:[%s28272_s6 + $0x740] sm:$0xf]  ;;  %v18441_v58 = vld [vmem:[%s28272_s6 + $0x744] sm:$0xf0] }
 0x335   :  { %10324 = vmatpush.bf16.msrb.mxu3 %v15285_v50  ;;  %v15573_v50 = vor.u32 %v18463_v2, %v15572_v30  ;;  %v15381_v1 = vor.u32 %v18415_v0, %v15380_v42  ;;  %v15548_v30 = vld [vmem:[%s28272_s6 + $0x7c0] sm:$0xf]  ;;  %v18457_v2 = vld [vmem:[%s28272_s6 + $0x7c4] sm:$0xf0]  ;;  %v15485_v45 = vor.u32 %v18441_v58, %v15484_v35  ;;  %v18403_v58 = vld [vmem:[%s28272_s6 + $0x614] sm:$0xf0] }
 0x336   :  { %v18425_v42 = vld [vmem:[%s28272_s6 + $0x6c4] sm:$0xf0] }
 0x337   :  { %10285 = vmatpush.bf16.msrb.mxu0 %v15093_v37  ;;  %v15564_v37 = vld [vmem:[%s28272_s6 + $0x7e0] sm:$0xf] }
 0x338   :  { %10298 = vmatpush.bf16.msrb.mxu1 %v15157_v19  ;;  %10312 = vmatpush.bf16.msrb.mxu2 %v15213_v9  ;;  %v24353_v19 = vpack.c.bf16 %v304_v49, %v304_v49  ;;  %v15372_v9 = vld [vmem:[%s28272_s6 + $0x660] sm:$0xf]  ;;  %v15565_v8 = vor.u32 %v18461_v24, %v15564_v37 }
 0x339   :  { %10325 = vmatpush.bf16.msrb.mxu3 %v15277_v29  ;;  %v18413_v29 = vld [vmem:[%s28272_s6 + $0x664] sm:$0xf0]  ;;  %v15420_v49 = vld [vmem:[%s28272_s6 + $0x6c0] sm:$0xf] }
 0x33a   :  { %v5782_v52 = vpop.f32.mrf.mxu2 }
 0x33b   :  { %10286 = vmatpush.bf16.msrb.mxu0 %v15085_v26  ;;  %v18443_v26 = vld [vmem:[%s28272_s6 + $0x754] sm:$0xf0]  ;;  %v5783_v31 = vadd.f32 %v5782_v52, %v24258_v62 }
 0x33c   :  { %10299 = vmatpush.bf16.msrb.mxu1 %v15149_v27  ;;  %10313 = vmatpush.bf16.msrb.mxu2 %v15205_v56  ;;  %v15373_v27 = vor.u32 %v18413_v29, %v15372_v9  ;;  %v15493_v53 = vor.u32 %v18443_v26, %v15492_v57  ;;  %v18427_v56 = vld [vmem:[%s28272_s6 + $0x6d4] sm:$0xf0]  ;;  %v15349_v9 = vor.u32 %v18407_v34, %v15348_v4  ;;  %v15532_v29 = vld [vmem:[%s28272_s6 + $0x7a0] sm:$0xf]  ;;  %v18405_v57 = vld [vmem:[%s28272_s6 + $0x624] sm:$0xf0] }
 0x33d   :  { %10326 = vmatpush.bf16.msrb.mxu3 %v15269_v18  ;;  %v15557_v18 = vor.u32 %v18459_v55, %v15556_v7  ;;  %v15429_v40 = vor.u32 %v18427_v56, %v15428_v33  ;;  %v5795_v43 = vpop.f32.mrf.mxu3  ;;  %v18439_v62 = vld [vmem:[%s28272_s6 + $0x734] sm:$0xf0]  ;;  %v15404_v26 = vld [vmem:[%s28272_s6 + $0x6a0] sm:$0xf]  ;;  %v18421_v55 = vld [vmem:[%s28272_s6 + $0x6a4] sm:$0xf0] }
 0x33e   :  { %v5796_v0 = vadd.f32 %v5795_v43, %v5783_v31  ;;  %v15524_v33 = vld [vmem:[%s28272_s6 + $0x790] sm:$0xf]  ;;  %v18451_v56 = vld [vmem:[%s28272_s6 + $0x794] sm:$0xf0]  ;;  %v15516_v31 = vld [vmem:[%s28272_s6 + $0x780] sm:$0xf] }
 0x33f   :  { %10287 = vmatpush.bf16.msrb.mxu0 %v15077_v63  ;;  %v15356_v63 = vld [vmem:[%s28272_s6 + $0x640] sm:$0xf]  ;;  %v18419_v52 = vld [vmem:[%s28272_s6 + $0x694] sm:$0xf0]  ;;  %v18449_v43 = vld [vmem:[%s28272_s6 + $0x784] sm:$0xf0] }
 0x340   :  { %10300 = vmatpush.bf16.msrb.mxu1 %v15141_v54  ;;  %10314 = vmatpush.bf16.msrb.mxu2 %v15197_v60  ;;  %v18409_v54 = vld [vmem:[%s28272_s6 + $0x644] sm:$0xf0]  ;;  %v15549_v60 = vor.u32 %v18457_v2, %v15548_v30  ;;  %v271_v30 = vld [vmem:[%s28267_s1 + $0x20] sm:$0xff]  ;;  %v15405_v2 = vor.u32 %v18421_v55, %v15404_v26  ;;  %v15637_v55 = vor.u32 %v18479_v5, %v15636_v59 }
 0x341   :  { %10327 = vmatpush.bf16.msrb.mxu3 %v15261_v16  ;;  %v15476_v16 = vld [vmem:[%s28272_s6 + $0x730] sm:$0xf]  ;;  %v15357_v28 = vor.u32 %v18409_v54, %v15356_v63  ;;  %v18433_v63 = vld [vmem:[%s28272_s6 + $0x704] sm:$0xf0]  ;;  %310 = vst [vmem:[#allocation1] ss:$4 sm:$0xff] %v271_v30 }
 0x342   :  { %v18417_v34 = vld [vmem:[%s28272_s6 + $0x684] sm:$0xf0]  ;;  %v15748_v30 = vld [vmem:[%s28272_s6 + $0x950] sm:$0xf]  ;;  %v15676_v5 = vld [vmem:[%s28272_s6 + $0x8c0] sm:$0xf] }
 0x343   :  { %10288 = vmatpush.bf16.msrb.mxu0 %v15069_v25  ;;  %10315 = vmatmul.bf16.vlgmr.msrb.gmra.mxu2 %v24353_v19  ;;  %v5808_v25 = vpop.f32.mrf.mxu0  ;;  %v18509_v26 = vld [vmem:[%s28272_s6 + $0x964] sm:$0xf0] }
 0x344   :  { %10359 = vmatpush.bf16.msra.mxu2 %v15509_v44  ;;  %10301 = vmatpush.bf16.msrb.mxu1 %v15133_v13  ;;  %v18455_v44 = vld [vmem:[%s28272_s6 + $0x7b4] sm:$0xf0]  ;;  %v15477_v13 = vor.u32 %v18439_v62, %v15476_v16  ;;  %v5809_v37 = vadd.f32 %v5808_v25, %v5796_v0  ;;  %v15828_v16 = vld [vmem:[%s28272_s6 + $0x9f0] sm:$0xf]  ;;  %v18473_v59 = vld [vmem:[%s28272_s6 + $0x844] sm:$0xf0] }
 0x345   :  { %10372 = vmatpush.bf16.msra.mxu3 %v15573_v50  ;;  %v15421_v50 = vor.u32 %v18425_v42, %v15420_v49  ;;  %v15541_v24 = vor.u32 %v18455_v44, %v15540_v12  ;;  %v5797_v20 = vpop.f32.mrf.mxu3  ;;  %v15525_v42 = vor.u32 %v18451_v56, %v15524_v33  ;;  %v18527_v62 = vld [vmem:[%s28272_s6 + $0x9f4] sm:$0xf0]  ;;  %v15324_v12 = vld [vmem:[%s28272_s6 + $0x600] sm:$0xf]  ;;  %v18401_v44 = vld [vmem:[%s28272_s6 + $0x604] sm:$0xf0] }
 0x346   :  { %10328 = vmatmul.bf16.vlgmr.msrb.gmra.mxu3 %v24358_v6  ;;  %10289 = vmatmul.bf16.vlgmr.msrb.gmra.mxu0 %v24366_v11  ;;  %v308_v25 = vld.sshfl [vmem:[#allocation1 + $0x30] sm:$0xff pattern:$0x73625140]  ;;  %v15628_v20 = vld [vmem:[%s28272_s6 + $0x860] sm:$0xf] }
 0x347   :  { %10333 = vmatpush.bf16.msra.mxu0 %v15381_v1  ;;  %10302 = vmatmul.bf16.vlgmr.msrb.gmra.mxu1 %v24374_v17  ;;  %v5821_v1 = vpop.f32.mrf.mxu1  ;;  %v18477_v56 = vld [vmem:[%s28272_s6 + $0x864] sm:$0xf0] }
 0x348   :  { %10346 = vmatpush.bf16.msra.mxu1 %v15445_v14  ;;  %10360 = vmatpush.bf16.msra.mxu2 %v15501_v48  ;;  %v18437_v14 = vld [vmem:[%s28272_s6 + $0x724] sm:$0xf0]  ;;  %v24465_v51 = vadd.f32 %v5821_v1, %v5809_v37  ;;  %v15700_v37 = vld [vmem:[%s28272_s6 + $0x8f0] sm:$0xf]  ;;  %v15517_v1 = vor.u32 %v18449_v43, %v15516_v31 }
 0x349   :  { %10373 = vmatpush.bf16.msra.mxu3 %v15565_v8  ;;  %v18453_v48 = vld [vmem:[%s28272_s6 + $0x7a4] sm:$0xf0]  ;;  %v15340_v8 = vld [vmem:[%s28272_s6 + $0x620] sm:$0xf]  ;;  %v15469_v7 = vor.u32 %v18437_v14, %v15468_v23  ;;  %v18495_v23 = vld [vmem:[%s28272_s6 + $0x8f4] sm:$0xf0] }
 0x34a   :  { %v15341_v35 = vor.u32 %v18405_v57, %v15340_v8  ;;  %v306_v14 = vld.sshfl [vmem:[#allocation1 + $0x20] sm:$0xff pattern:$0x73625140]  ;;  %v24557_v57 = vpack.c.bf16 %v308_v25, %v308_v25  ;;  %v15620_v43 = vld [vmem:[%s28272_s6 + $0x850] sm:$0xf] }
 0x34b   :  { %10334 = vmatpush.bf16.msra.mxu0 %v15373_v27  ;;  %v5784_v27 = vpop.f32.mrf.mxu2  ;;  %v5810_v49 = vpop.f32.mrf.mxu0 }
 0x34c   :  { %10347 = vmatpush.bf16.msra.mxu1 %v15437_v47  ;;  %10361 = vmatpush.bf16.msra.mxu2 %v15493_v53  ;;  %v15460_v47 = vld [vmem:[%s28272_s6 + $0x710] sm:$0xf]  ;;  %v15533_v53 = vor.u32 %v18453_v48, %v15532_v29  ;;  %v15325_v29 = vor.u32 %v18401_v44, %v15324_v12  ;;  %v309_v48 = vld.sshfl [vmem:[#allocation1 + $0x38] sm:$0xff pattern:$0x73625140] }
 0x34d   :  { %10374 = vmatpush.bf16.msra.mxu3 %v15557_v18  ;;  %v15332_v18 = vld [vmem:[%s28272_s6 + $0x610] sm:$0xf]  ;;  %v15461_v54 = vor.u32 %v18435_v32, %v15460_v47  ;;  %v15820_v27 = vld [vmem:[%s28272_s6 + $0x9e0] sm:$0xf]  ;;  %v15701_v47 = vor.u32 %v18495_v23, %v15700_v37  ;;  %v24573_v33 = vpack.c.bf16 %v309_v48, %v309_v48  ;;  %v18521_v12 = vld [vmem:[%s28272_s6 + $0x9c4] sm:$0xf0] }
 0x34e   :  { %v307_v32 = vld.sshfl [vmem:[#allocation1 + $0x28] sm:$0xff pattern:$0x73625140]  ;;  %v15684_v49 = vld [vmem:[%s28272_s6 + $0x8d0] sm:$0xf] }
 0x34f   :  { %10335 = vmatpush.bf16.msra.mxu0 %v15365_v38  ;;  %v15396_v38 = vld [vmem:[%s28272_s6 + $0x690] sm:$0xf]  ;;  %v5823_v0 = vpop.f32.mrf.mxu1  ;;  %v18489_v37 = vld [vmem:[%s28272_s6 + $0x8c4] sm:$0xf0] }
 0x350   :  { %10348 = vmatpush.bf16.msra.mxu1 %v15429_v40  ;;  %10362 = vmatpush.bf16.msra.mxu2 %v15485_v45  ;;  %v15452_v40 = vld [vmem:[%s28272_s6 + $0x700] sm:$0xf]  ;;  %v15764_v45 = vld [vmem:[%s28272_s6 + $0x970] sm:$0xf]  ;;  %v15397_v4 = vor.u32 %v18419_v52, %v15396_v38  ;;  %v18507_v52 = vld [vmem:[%s28272_s6 + $0x954] sm:$0xf0] }
 0x351   :  { %10375 = vmatpush.bf16.msra.mxu3 %v15549_v60  ;;  %v18511_v60 = vld [vmem:[%s28272_s6 + $0x974] sm:$0xf0]  ;;  %v18505_v0 = vld [vmem:[%s28272_s6 + $0x944] sm:$0xf0] }
 0x353   :  { %10336 = vmatpush.bf16.msra.mxu0 %v15357_v28  ;;  %v15333_v28 = vor.u32 %v18403_v58, %v15332_v18  ;;  %v15692_v18 = vld [vmem:[%s28272_s6 + $0x8e0] sm:$0xf] }
 0x354   :  { %10349 = vmatpush.bf16.msra.mxu1 %v15421_v50  ;;  %10363 = vmatpush.bf16.msra.mxu2 %v15477_v13  ;;  %v15388_v50 = vld [vmem:[%s28272_s6 + $0x680] sm:$0xf]  ;;  %v15453_v13 = vor.u32 %v18433_v63, %v15452_v40  ;;  %v15812_v40 = vld [vmem:[%s28272_s6 + $0x9d0] sm:$0xf]  ;;  %v18523_v63 = vld [vmem:[%s28272_s6 + $0x9d4] sm:$0xf0] }
 0x355   :  { %10376 = vmatpush.bf16.msra.mxu3 %v15541_v24  ;;  %v15765_v24 = vor.u32 %v18511_v60, %v15764_v45  ;;  %v15389_v8 = vor.u32 %v18417_v34, %v15388_v50  ;;  %v18475_v45 = vld [vmem:[%s28272_s6 + $0x854] sm:$0xf0]  ;;  %v15749_v60 = vor.u32 %v18507_v52, %v15748_v30  ;;  %v15612_v34 = vld [vmem:[%s28272_s6 + $0x840] sm:$0xf] }
 0x356   :  { %v15621_v50 = vor.u32 %v18475_v45, %v15620_v43  ;;  %v15613_v48 = vor.u32 %v18473_v59, %v15612_v34  ;;  %v18469_v43 = vld [vmem:[%s28272_s6 + $0x824] sm:$0xf0]  ;;  %v15660_v45 = vld [vmem:[%s28272_s6 + $0x8a0] sm:$0xf]  ;;  %v15652_v34 = vld [vmem:[%s28272_s6 + $0x890] sm:$0xf] }
 0x357   :  { %10337 = vmatpush.bf16.msra.mxu0 %v15349_v9  ;;  %v15829_v9 = vor.u32 %v18527_v62, %v15828_v16  ;;  %v15813_v16 = vor.u32 %v18523_v63, %v15812_v40  ;;  %v15740_v62 = vld [vmem:[%s28272_s6 + $0x940] sm:$0xf] }
 0x358   :  { %10350 = vmatpush.bf16.msra.mxu1 %v15413_v3  ;;  %10364 = vmatpush.bf16.msra.mxu2 %v15469_v7  ;;  %v15756_v3 = vld [vmem:[%s28272_s6 + $0x960] sm:$0xf]  ;;  %v18525_v7 = vld [vmem:[%s28272_s6 + $0x9e4] sm:$0xf0] }
 0x359   :  { %10377 = vmatpush.bf16.msra.mxu3 %v15533_v53  ;;  %v24571_v53 = vpack.c.bf16 %v306_v14, %v306_v14  ;;  %v15757_v58 = vor.u32 %v18509_v26, %v15756_v3  ;;  %v15821_v38 = vor.u32 %v18525_v7, %v15820_v27  ;;  %v18503_v14 = vld [vmem:[%s28272_s6 + $0x934] sm:$0xf0]  ;;  %v15677_v3 = vor.u32 %v18489_v37, %v15676_v5  ;;  %v15668_v7 = vld [vmem:[%s28272_s6 + $0x8b0] sm:$0xf]  ;;  %v15708_v59 = vld [vmem:[%s28272_s6 + $0x900] sm:$0xf] }
 0x35a   :  { %v5834_v44 = vpop.f32.mrf.mxu2  ;;  %v18471_v27 = vld [vmem:[%s28272_s6 + $0x834] sm:$0xf0]  ;;  %v18497_v5 = vld [vmem:[%s28272_s6 + $0x904] sm:$0xf0]  ;;  %v15772_v37 = vld [vmem:[%s28272_s6 + $0x980] sm:$0xf] }
 0x35b   :  { %10338 = vmatpush.bf16.msra.mxu0 %v15341_v35  ;;  %v18493_v35 = vld [vmem:[%s28272_s6 + $0x8e4] sm:$0xf0]  ;;  %v5835_v25 = vadd.f32 %v5834_v44, %v24465_v51  ;;  %v15732_v51 = vld [vmem:[%s28272_s6 + $0x930] sm:$0xf]  ;;  %v18467_v44 = vld [vmem:[%s28272_s6 + $0x814] sm:$0xf0] }
 0x35c   :  { %10351 = vmatpush.bf16.msra.mxu1 %v15405_v2  ;;  %10365 = vmatpush.bf16.msra.mxu2 %v15461_v54  ;;  %v24588_v2 = vpack.c.bf16 %v307_v32, %v307_v32  ;;  %v15629_v54 = vor.u32 %v18477_v56, %v15628_v20  ;;  %v15693_v31 = vor.u32 %v18493_v35, %v15692_v18  ;;  %v15724_v18 = vld [vmem:[%s28272_s6 + $0x920] sm:$0xf]  ;;  %v18501_v35 = vld [vmem:[%s28272_s6 + $0x924] sm:$0xf0] }
 0x35d   :  { %10378 = vmatpush.bf16.msra.mxu3 %v15525_v42  ;;  %v18491_v42 = vld [vmem:[%s28272_s6 + $0x8d4] sm:$0xf0]  ;;  %v15733_v20 = vor.u32 %v18503_v14, %v15732_v51  ;;  %v16020_v14 = vld [vmem:[%s28272_s6 + $0xb70] sm:$0xf] }
 0x35f   :  { %10339 = vmatpush.bf16.msra.mxu0 %v15333_v28  ;;  %v15804_v28 = vld [vmem:[%s28272_s6 + $0x9c0] sm:$0xf] }
 0x360   :  { %10352 = vmatpush.bf16.msra.mxu1 %v15397_v4  ;;  %10366 = vmatpush.bf16.msra.mxu2 %v15453_v13  ;;  %v15685_v4 = vor.u32 %v18491_v42, %v15684_v49  ;;  %v5847_v13 = vpop.f32.mrf.mxu3  ;;  %v18485_v49 = vld [vmem:[%s28272_s6 + $0x8a4] sm:$0xf0]  ;;  %v15725_v42 = vor.u32 %v18501_v35, %v15724_v18  ;;  %v15709_v35 = vor.u32 %v18497_v5, %v15708_v59  ;;  %v15948_v59 = vld [vmem:[%s28272_s6 + $0xae0] sm:$0xf] }
 0x361   :  { %10379 = vmatpush.bf16.msra.mxu3 %v15517_v1  ;;  %v15741_v1 = vor.u32 %v18505_v0, %v15740_v62  ;;  %v5848_v23 = vadd.f32 %v5847_v13, %v5835_v25  ;;  %v18499_v62 = vld [vmem:[%s28272_s6 + $0x914] sm:$0xf0]  ;;  %v15780_v0 = vld [vmem:[%s28272_s6 + $0x990] sm:$0xf]  ;;  %v272_v13 = vld [vmem:[%s28267_s1 + $0x28] sm:$0xff] }
 0x362   :  { %v5836_v52 = vpop.f32.mrf.mxu2  ;;  %v18483_v25 = vld [vmem:[%s28272_s6 + $0x894] sm:$0xf0]  ;;  %311 = vst [vmem:[#allocation1 + $0x20] ss:$4 sm:$0xff] %v272_v13  ;;  %v18557_v5 = vld [vmem:[%s28272_s6 + $0xae4] sm:$0xf0] }
 0x363   :  { %10340 = vmatpush.bf16.msra.mxu0 %v15325_v29  ;;  %10367 = vmatmul.bf16.vlgmr.msra.gmra.mxu2 %v24557_v57  ;;  %v18519_v29 = vld [vmem:[%s28272_s6 + $0x9b4] sm:$0xf0]  ;;  %v5860_v26 = vpop.f32.mrf.mxu0  ;;  %v15956_v52 = vld [vmem:[%s28272_s6 + $0xaf0] sm:$0xf] }
 0x364   :  { %10411 = vmatpush.bf16.msrb.mxu2 %v15765_v24  ;;  %10353 = vmatpush.bf16.msra.mxu1 %v15389_v8  ;;  %v15805_v24 = vor.u32 %v18521_v12, %v15804_v28  ;;  %v15604_v8 = vld [vmem:[%s28272_s6 + $0x830] sm:$0xf]  ;;  %v5873_v32 = vpop.f32.mrf.mxu1  ;;  %v18515_v28 = vld [vmem:[%s28272_s6 + $0x994] sm:$0xf0] }
 0x365   :  { %10424 = vmatpush.bf16.msrb.mxu3 %v15829_v9  ;;  %v15796_v9 = vld [vmem:[%s28272_s6 + $0x9b0] sm:$0xf]  ;;  %v15605_v40 = vor.u32 %v18471_v27, %v15604_v8  ;;  %v15580_v8 = vld [vmem:[%s28272_s6 + $0x800] sm:$0xf]  ;;  %v15653_v27 = vor.u32 %v18483_v25, %v15652_v34  ;;  %v18541_v34 = vld [vmem:[%s28272_s6 + $0xa64] sm:$0xf0] }
 0x366   :  { %10341 = vmatmul.bf16.vlgmr.msra.gmra.mxu0 %v24571_v53  ;;  %10380 = vmatmul.bf16.vlgmr.msra.gmra.mxu3 %v24573_v33  ;;  %v15797_v56 = vor.u32 %v18519_v29, %v15796_v9  ;;  %v15588_v12 = vld [vmem:[%s28272_s6 + $0x810] sm:$0xf]  ;;  %v18575_v9 = vld [vmem:[%s28272_s6 + $0xb74] sm:$0xf0] }
 0x367   :  { %10385 = vmatpush.bf16.msrb.mxu0 %v15637_v55  ;;  %10354 = vmatmul.bf16.vlgmr.msra.gmra.mxu1 %v24588_v2  ;;  %v18487_v55 = vld [vmem:[%s28272_s6 + $0x8b4] sm:$0xf0] }
 0x368   :  { %10398 = vmatpush.bf16.msrb.mxu1 %v15701_v47  ;;  %10412 = vmatpush.bf16.msrb.mxu2 %v15757_v58  ;;  %v5861_v47 = vadd.f32 %v5860_v26, %v5848_v23  ;;  %v15788_v58 = vld [vmem:[%s28272_s6 + $0x9a0] sm:$0xf]  ;;  %v15669_v63 = vor.u32 %v18487_v55, %v15668_v7  ;;  %v15781_v23 = vor.u32 %v18515_v28, %v15780_v0  ;;  %v18465_v7 = vld [vmem:[%s28272_s6 + $0x804] sm:$0xf0] }
 0x369   :  { %10425 = vmatpush.bf16.msrb.mxu3 %v15821_v38  ;;  %v18517_v38 = vld [vmem:[%s28272_s6 + $0x9a4] sm:$0xf0]  ;;  %v15589_v26 = vor.u32 %v18467_v44, %v15588_v12  ;;  %v15644_v55 = vld [vmem:[%s28272_s6 + $0x880] sm:$0xf] }
 0x36a   :  { %v24675_v30 = vadd.f32 %v5873_v32, %v5861_v47  ;;  %v18481_v47 = vld [vmem:[%s28272_s6 + $0x884] sm:$0xf0] }
 0x36b   :  { %10386 = vmatpush.bf16.msrb.mxu0 %v15629_v54  ;;  %v15596_v54 = vld [vmem:[%s28272_s6 + $0x820] sm:$0xf]  ;;  %v18589_v28 = vld [vmem:[%s28272_s6 + $0xbe4] sm:$0xf0] }
 0x36c   :  { %10399 = vmatpush.bf16.msrb.mxu1 %v15693_v31  ;;  %10413 = vmatpush.bf16.msrb.mxu2 %v15749_v60  ;;  %28308 = vst [vmem:[#allocation14_spill] sm:$0xff] %v24675_v30  ;;  %v5849_v31 = vpop.f32.mrf.mxu3  ;;  %v15789_v60 = vor.u32 %v18517_v38, %v15788_v58  ;;  %v5875_v29 = vpop.f32.mrf.mxu1  ;;  %v18543_v38 = vld [vmem:[%s28272_s6 + $0xa74] sm:$0xf0]  ;;  %v313_v12 = vld.sshfl [vmem:[#allocation1 + $0x8] sm:$0xff pattern:$0x73625140] }
 0x36d   :  { %10426 = vmatpush.bf16.msrb.mxu3 %v15813_v16  ;;  %v15716_v16 = vld [vmem:[%s28272_s6 + $0x910] sm:$0xf]  ;;  %v24752_v32 = vpop.f32.mrf.mxu2  ;;  %v312_v31 = vld.sshfl [vmem:[#allocation1] sm:$0xff pattern:$0x73625140] }
 0x36e   :  { %v15717_v51 = vor.u32 %v18499_v62, %v15716_v16  ;;  %v16076_v16 = vld [vmem:[%s28272_s6 + $0xbe0] sm:$0xf]  ;;  %v24790_v25 = vpack.c.bf16 %v312_v31, %v312_v31  ;;  %v18587_v29 = vld [vmem:[%s28272_s6 + $0xbd4] sm:$0xf0] }
 0x36f   :  { %10387 = vmatpush.bf16.msrb.mxu0 %v15621_v50  ;;  %v15597_v50 = vor.u32 %v18469_v43, %v15596_v54  ;;  %v315_v43 = vld.sshfl [vmem:[#allocation1 + $0x18] sm:$0xff pattern:$0x73625140]  ;;  %v15932_v31 = vld [vmem:[%s28272_s6 + $0xac0] sm:$0xf] }
 0x370   :  { %10400 = vmatpush.bf16.msrb.mxu1 %v15685_v4  ;;  %10414 = vmatpush.bf16.msrb.mxu2 %v15741_v1  ;;  %v15661_v4 = vor.u32 %v18485_v49, %v15660_v45  ;;  %v18513_v1 = vld [vmem:[%s28272_s6 + $0x984] sm:$0xf0]  ;;  %v15581_v45 = vor.u32 %v18465_v7, %v15580_v8  ;;  %v15645_v49 = vor.u32 %v18481_v47, %v15644_v55  ;;  %v15876_v8 = vld [vmem:[%s28272_s6 + $0xa50] sm:$0xf]  ;;  %v18555_v55 = vld [vmem:[%s28272_s6 + $0xad4] sm:$0xf0] }
 0x371   :  { %10427 = vmatpush.bf16.msrb.mxu3 %v15805_v24  ;;  %v5862_v24 = vpop.f32.mrf.mxu0  ;;  %v15773_v58 = vor.u32 %v18513_v1, %v15772_v37  ;;  %v16077_v37 = vor.u32 %v18589_v28, %v16076_v16  ;;  %v24798_v1 = vpack.c.bf16 %v313_v12, %v313_v12  ;;  %v15940_v7 = vld [vmem:[%s28272_s6 + $0xad0] sm:$0xf] }
 0x372   :  { %v16004_v24 = vld [vmem:[%s28272_s6 + $0xb50] sm:$0xf] }
 0x373   :  { %10388 = vmatpush.bf16.msrb.mxu0 %v15613_v48  ;;  %v16084_v48 = vld [vmem:[%s28272_s6 + $0xbf0] sm:$0xf] }
 0x374   :  { %10401 = vmatpush.bf16.msrb.mxu1 %v15677_v3  ;;  %10415 = vmatpush.bf16.msrb.mxu2 %v15733_v20  ;;  %v18591_v3 = vld [vmem:[%s28272_s6 + $0xbf4] sm:$0xf0]  ;;  %v314_v20 = vld.sshfl [vmem:[#allocation1 + $0x10] sm:$0xff pattern:$0x73625140]  ;;  %v24757_v18 = vpop.f32.mrf.mxu3 }
 0x375   :  { %10428 = vmatpush.bf16.msrb.mxu3 %v15797_v56  ;;  %v15892_v56 = vld [vmem:[%s28272_s6 + $0xa70] sm:$0xf]  ;;  %v16085_v54 = vor.u32 %v18591_v3, %v16084_v48  ;;  %v24777_v62 = vpack.c.bf16 %v314_v20, %v314_v20  ;;  %v15949_v3 = vor.u32 %v18557_v5, %v15948_v59  ;;  %v15996_v20 = vld [vmem:[%s28272_s6 + $0xb40] sm:$0xf] }
 0x376   :  { %v15893_v0 = vor.u32 %v18543_v38, %v15892_v56  ;;  %v18569_v56 = vld [vmem:[%s28272_s6 + $0xb44] sm:$0xf0]  ;;  %v16052_v16 = vld [vmem:[%s28272_s6 + $0xbb0] sm:$0xf] }
 0x377   :  { %10389 = vmatpush.bf16.msrb.mxu0 %v15605_v40  ;;  %v18559_v40 = vld [vmem:[%s28272_s6 + $0xaf4] sm:$0xf0]  ;;  %v18585_v38 = vld [vmem:[%s28272_s6 + $0xbc4] sm:$0xf0]  ;;  %v15924_v5 = vld [vmem:[%s28272_s6 + $0xab0] sm:$0xf] }
 0x378   :  { %10402 = vmatpush.bf16.msrb.mxu1 %v15669_v63  ;;  %10416 = vmatpush.bf16.msrb.mxu2 %v15725_v42  ;;  %v16021_v63 = vor.u32 %v18575_v9, %v16020_v14  ;;  %v16012_v42 = vld [vmem:[%s28272_s6 + $0xb60] sm:$0xf]  ;;  %v15957_v44 = vor.u32 %v18559_v40, %v15956_v52  ;;  %v16068_v9 = vld [vmem:[%s28272_s6 + $0xbd0] sm:$0xf]  ;;  %v15941_v52 = vor.u32 %v18555_v55, %v15940_v7  ;;  %v18549_v55 = vld [vmem:[%s28272_s6 + $0xaa4] sm:$0xf0] }
 0x379   :  { %10429 = vmatpush.bf16.msrb.mxu3 %v15789_v60  ;;  %v18573_v60 = vld [vmem:[%s28272_s6 + $0xb64] sm:$0xf0]  ;;  %v16069_v47 = vor.u32 %v18587_v29, %v16068_v9  ;;  %v15868_v40 = vld [vmem:[%s28272_s6 + $0xa40] sm:$0xf] }
 0x37a   :  { %v16013_v13 = vor.u32 %v18573_v60, %v16012_v42  ;;  %v18567_v42 = vld [vmem:[%s28272_s6 + $0xb34] sm:$0xf0]  ;;  %v16044_v9 = vld [vmem:[%s28272_s6 + $0xba0] sm:$0xf]  ;;  %v18581_v29 = vld [vmem:[%s28272_s6 + $0xba4] sm:$0xf0] }
 0x37b   :  { %10390 = vmatpush.bf16.msrb.mxu0 %v15597_v50  ;;  %v24782_v50 = vpack.c.bf16 %v315_v43, %v315_v43  ;;  %v18553_v43 = vld [vmem:[%s28272_s6 + $0xac4] sm:$0xf0] }
 0x37c   :  { %10403 = vmatpush.bf16.msrb.mxu1 %v15661_v4  ;;  %10417 = vmatpush.bf16.msrb.mxu2 %v15717_v51  ;;  %v15884_v4 = vld [vmem:[%s28272_s6 + $0xa60] sm:$0xf]  ;;  %v18571_v51 = vld [vmem:[%s28272_s6 + $0xb54] sm:$0xf0]  ;;  %v6655_v48 = vpop.f32.mrf.mxu3  ;;  %v15933_v28 = vor.u32 %v18553_v43, %v15932_v31  ;;  %v273_v31 = vld [vmem:[%s28267_s1 + $0x30] sm:$0xff] }
 0x37d   :  { %10430 = vmatpush.bf16.msrb.mxu3 %v15781_v23  ;;  %v6642_v23 = vpop.f32.mrf.mxu2  ;;  %v15885_v14 = vor.u32 %v18541_v34, %v15884_v4  ;;  %v18535_v4 = vld [vmem:[%s28272_s6 + $0xa34] sm:$0xf0]  ;;  %320 = vst [vmem:[#allocation1] ss:$4 sm:$0xff] %v273_v31  ;;  %v18653_v31 = vld [vmem:[%s28272_s6 + $0xde4] sm:$0xf0] }
 0x37f   :  { %10391 = vmatpush.bf16.msrb.mxu0 %v15589_v26  ;;  %v18539_v26 = vld [vmem:[%s28272_s6 + $0xa54] sm:$0xf0] }
 0x380   :  { %10404 = vmatpush.bf16.msrb.mxu1 %v15653_v27  ;;  %10418 = vmatpush.bf16.msrb.mxu2 %v15709_v35  ;;  %v16005_v27 = vor.u32 %v18571_v51, %v16004_v24  ;;  %v15877_v35 = vor.u32 %v18539_v26, %v15876_v8  ;;  %v15980_v51 = vld [vmem:[%s28272_s6 + $0xb20] sm:$0xf]  ;;  %v18533_v8 = vld [vmem:[%s28272_s6 + $0xa24] sm:$0xf0] }
 0x381   :  { %10431 = vmatpush.bf16.msrb.mxu3 %v15773_v58  ;;  %v16060_v58 = vld [vmem:[%s28272_s6 + $0xbc0] sm:$0xf] }
 0x382   :  { %v15916_v26 = vld [vmem:[%s28272_s6 + $0xaa0] sm:$0xf] }
 0x383   :  { %10392 = vmatpush.bf16.msrb.mxu0 %v15581_v45  ;;  %10419 = vmatmul.bf16.vlgmr.msrb.gmra.mxu2 %v24777_v62  ;;  %v16061_v45 = vor.u32 %v18585_v38, %v16060_v58  ;;  %v10186_v12 = vpop.f32.mrf.mxu0  ;;  %v16036_v58 = vld [vmem:[%s28272_s6 + $0xb90] sm:$0xf]  ;;  %v18579_v38 = vld [vmem:[%s28272_s6 + $0xb94] sm:$0xf0] }
 0x384   :  { %10463 = vmatpush.bf16.msra.mxu2 %v16021_v63  ;;  %10405 = vmatpush.bf16.msrb.mxu1 %v15645_v49  ;;  %v18537_v63 = vld [vmem:[%s28272_s6 + $0xa44] sm:$0xf0]  ;;  %v15988_v49 = vld [vmem:[%s28272_s6 + $0xb30] sm:$0xf]  ;;  %v10187_v34 = vadd.f32 %v10186_v12, %v24752_v32  ;;  %v10199_v59 = vpop.f32.mrf.mxu1  ;;  %v16028_v12 = vld [vmem:[%s28272_s6 + $0xb80] sm:$0xf] }
 0x385   :  { %10476 = vmatpush.bf16.msra.mxu3 %v16085_v54  ;;  %v15997_v54 = vor.u32 %v18569_v56, %v15996_v20  ;;  %v15869_v60 = vor.u32 %v18537_v63, %v15868_v40  ;;  %v18565_v32 = vld [vmem:[%s28272_s6 + $0xb24] sm:$0xf0]  ;;  %v18563_v20 = vld [vmem:[%s28272_s6 + $0xb14] sm:$0xf0] }
 0x386   :  { %10432 = vmatmul.bf16.vlgmr.msrb.gmra.mxu3 %v24782_v50  ;;  %10393 = vmatmul.bf16.vlgmr.msrb.gmra.mxu0 %v24790_v25  ;;  %v10200_v23 = vadd.f32 %v10199_v59, %v10187_v34  ;;  %v15981_v7 = vor.u32 %v18565_v32, %v15980_v51  ;;  %v18531_v63 = vld [vmem:[%s28272_s6 + $0xa14] sm:$0xf0]  ;;  %v15836_v51 = vld [vmem:[%s28272_s6 + $0xa00] sm:$0xf]  ;;  %v18529_v32 = vld [vmem:[%s28272_s6 + $0xa04] sm:$0xf0] }
 0x387   :  { %10437 = vmatpush.bf16.msra.mxu0 %v15893_v0  ;;  %10406 = vmatmul.bf16.vlgmr.msrb.gmra.mxu1 %v24798_v1  ;;  %v18583_v0 = vld [vmem:[%s28272_s6 + $0xbb4] sm:$0xf0] }
 0x388   :  { %10450 = vmatpush.bf16.msra.mxu1 %v15957_v44  ;;  %10464 = vmatpush.bf16.msra.mxu2 %v16013_v13  ;;  %v15860_v44 = vld [vmem:[%s28272_s6 + $0xa30] sm:$0xf]  ;;  %v15989_v13 = vor.u32 %v18567_v42, %v15988_v49  ;;  %v16053_v24 = vor.u32 %v18583_v0, %v16052_v16  ;;  %v18547_v49 = vld [vmem:[%s28272_s6 + $0xa94] sm:$0xf0]  ;;  %v15964_v42 = vld [vmem:[%s28272_s6 + $0xb00] sm:$0xf] }
 0x389   :  { %10477 = vmatpush.bf16.msra.mxu3 %v16077_v37  ;;  %v18551_v37 = vld [vmem:[%s28272_s6 + $0xab4] sm:$0xf0]  ;;  %v10225_v43 = vpop.f32.mrf.mxu3 }
 0x38a   :  { %v15925_v48 = vor.u32 %v18551_v37, %v15924_v5  ;;  %v18639_v59 = vld [vmem:[%s28272_s6 + $0xd74] sm:$0xf0]  ;;  %v16340_v5 = vld [vmem:[%s28272_s6 + $0xdf0] sm:$0xf] }
 0x38b   :  { %10438 = vmatpush.bf16.msra.mxu0 %v15885_v14  ;;  %v15861_v14 = vor.u32 %v18535_v4, %v15860_v44  ;;  %v10188_v16 = vpop.f32.mrf.mxu0  ;;  %v18577_v44 = vld [vmem:[%s28272_s6 + $0xb84] sm:$0xf0]  ;;  %v16276_v4 = vld [vmem:[%s28272_s6 + $0xd70] sm:$0xf]  ;;  %v18655_v37 = vld [vmem:[%s28272_s6 + $0xdf4] sm:$0xf0] }
 0x38c   :  { %10451 = vmatpush.bf16.msra.mxu1 %v15949_v3  ;;  %10465 = vmatpush.bf16.msra.mxu2 %v16005_v27  ;;  %v15852_v3 = vld [vmem:[%s28272_s6 + $0xa20] sm:$0xf]  ;;  %v10212_v27 = vpop.f32.mrf.mxu2  ;;  %v10201_v34 = vpop.f32.mrf.mxu1 }
 0x38d   :  { %10478 = vmatpush.bf16.msra.mxu3 %v16069_v47  ;;  %v15972_v47 = vld [vmem:[%s28272_s6 + $0xb10] sm:$0xf]  ;;  %v10213_v56 = vadd.f32 %v10212_v27, %v10200_v23  ;;  %v15853_v40 = vor.u32 %v18533_v8, %v15852_v3  ;;  %v15900_v23 = vld [vmem:[%s28272_s6 + $0xa80] sm:$0xf]  ;;  %v18607_v8 = vld [vmem:[%s28272_s6 + $0xc74] sm:$0xf0] }
 0x38e   :  { %v16148_v3 = vld [vmem:[%s28272_s6 + $0xc70] sm:$0xf] }
 0x38f   :  { %10439 = vmatpush.bf16.msra.mxu0 %v15877_v35  ;;  %v16045_v35 = vor.u32 %v18581_v29, %v16044_v9  ;;  %v24934_v0 = vadd.f32 %v10225_v43, %v10213_v56  ;;  %v18545_v9 = vld [vmem:[%s28272_s6 + $0xa84] sm:$0xf0]  ;;  %v318_v29 = vld.sshfl [vmem:[#allocation1 + $0x30] sm:$0xff pattern:$0x73625140]  ;;  %v16341_v56 = vor.u32 %v18655_v37, %v16340_v5 }
 0x390   :  { %10452 = vmatpush.bf16.msra.mxu1 %v15941_v52  ;;  %10466 = vmatpush.bf16.msra.mxu2 %v15997_v54  ;;  %v15844_v52 = vld [vmem:[%s28272_s6 + $0xa10] sm:$0xf]  ;;  %v18635_v37 = vld [vmem:[%s28272_s6 + $0xd54] sm:$0xf0] }
 0x391   :  { %10479 = vmatpush.bf16.msra.mxu3 %v16061_v45  ;;  %v15908_v54 = vld [vmem:[%s28272_s6 + $0xa90] sm:$0xf]  ;;  %v15917_v45 = vor.u32 %v18549_v55, %v15916_v26  ;;  %v16277_v55 = vor.u32 %v18639_v59, %v16276_v4  ;;  %v10227_v43 = vpop.f32.mrf.mxu3  ;;  %v18621_v4 = vld [vmem:[%s28272_s6 + $0xce4] sm:$0xf0] }
 0x392   :  { %v16212_v26 = vld [vmem:[%s28272_s6 + $0xcf0] sm:$0xf] }
 0x393   :  { %10440 = vmatpush.bf16.msra.mxu0 %v15869_v60  ;;  %v18561_v60 = vld [vmem:[%s28272_s6 + $0xb04] sm:$0xf0]  ;;  %v16260_v59 = vld [vmem:[%s28272_s6 + $0xd50] sm:$0xf] }
 0x394   :  { %10453 = vmatpush.bf16.msra.mxu1 %v15933_v28  ;;  %10467 = vmatpush.bf16.msra.mxu2 %v15989_v13  ;;  %v15973_v28 = vor.u32 %v18563_v20, %v15972_v47  ;;  %v16037_v13 = vor.u32 %v18579_v38, %v16036_v58  ;;  %v10214_v27 = vpop.f32.mrf.mxu2  ;;  %v18623_v47 = vld [vmem:[%s28272_s6 + $0xcf4] sm:$0xf0]  ;;  %v316_v20 = vld.sshfl [vmem:[#allocation1 + $0x20] sm:$0xff pattern:$0x73625140] }
 0x395   :  { %10480 = vmatpush.bf16.msra.mxu3 %v16053_v24  ;;  %v15845_v24 = vor.u32 %v18531_v63, %v15844_v52  ;;  %v319_v58 = vld.sshfl [vmem:[#allocation1 + $0x38] sm:$0xff pattern:$0x73625140]  ;;  %v16268_v38 = vld [vmem:[%s28272_s6 + $0xd60] sm:$0xf]  ;;  %v15901_v52 = vor.u32 %v18545_v9, %v15900_v23  ;;  %v24995_v16 = vpack.c.bf16 %v316_v20, %v316_v20 }
 0x396   :  { %v18637_v63 = vld [vmem:[%s28272_s6 + $0xd64] sm:$0xf0]  ;;  %v18603_v9 = vld [vmem:[%s28272_s6 + $0xc54] sm:$0xf0]  ;;  %v16308_v43 = vld [vmem:[%s28272_s6 + $0xdb0] sm:$0xf] }
 0x397   :  { %10441 = vmatpush.bf16.msra.mxu0 %v15861_v14  ;;  %v15909_v14 = vor.u32 %v18547_v49, %v15908_v54  ;;  %v16332_v54 = vld [vmem:[%s28272_s6 + $0xde0] sm:$0xf]  ;;  %v16213_v49 = vor.u32 %v18623_v47, %v16212_v26  ;;  %v16269_v34 = vor.u32 %v18637_v63, %v16268_v38  ;;  %v18633_v27 = vld [vmem:[%s28272_s6 + $0xd44] sm:$0xf0] }
 0x398   :  { %10454 = vmatpush.bf16.msra.mxu1 %v15925_v48  ;;  %10468 = vmatpush.bf16.msra.mxu2 %v15981_v7  ;;  %v15965_v48 = vor.u32 %v18561_v60, %v15964_v42  ;;  %v16029_v7 = vor.u32 %v18577_v44, %v16028_v12  ;;  %v317_v42 = vld.sshfl [vmem:[#allocation1 + $0x28] sm:$0xff pattern:$0x73625140]  ;;  %v16140_v60 = vld [vmem:[%s28272_s6 + $0xc60] sm:$0xf] }
 0x399   :  { %10481 = vmatpush.bf16.msra.mxu3 %v16045_v35  ;;  %v15837_v35 = vor.u32 %v18529_v32, %v15836_v51  ;;  %v18605_v12 = vld [vmem:[%s28272_s6 + $0xc64] sm:$0xf0]  ;;  %v16204_v44 = vld [vmem:[%s28272_s6 + $0xce0] sm:$0xf]  ;;  %v25012_v5 = vpack.c.bf16 %v317_v42, %v317_v42  ;;  %v18651_v51 = vld [vmem:[%s28272_s6 + $0xdd4] sm:$0xf0] }
 0x39a   :  { %v16141_v32 = vor.u32 %v18605_v12, %v16140_v60  ;;  %v16205_v23 = vor.u32 %v18621_v4, %v16204_v44  ;;  %v16252_v26 = vld [vmem:[%s28272_s6 + $0xd40] sm:$0xf]  ;;  %v18617_v38 = vld [vmem:[%s28272_s6 + $0xcc4] sm:$0xf0]  ;;  %v16116_v12 = vld [vmem:[%s28272_s6 + $0xc30] sm:$0xf] }
 0x39b   :  { %10442 = vmatpush.bf16.msra.mxu0 %v15853_v40  ;;  %v24981_v40 = vpack.c.bf16 %v318_v29, %v318_v29  ;;  %v16196_v29 = vld [vmem:[%s28272_s6 + $0xcd0] sm:$0xf]  ;;  %v18599_v4 = vld [vmem:[%s28272_s6 + $0xc34] sm:$0xf0] }
 0x39c   :  { %10455 = vmatpush.bf16.msra.mxu1 %v15917_v45  ;;  %10469 = vmatpush.bf16.msra.mxu2 %v15973_v28  ;;  %v16149_v45 = vor.u32 %v18607_v8, %v16148_v3  ;;  %v24997_v28 = vpack.c.bf16 %v319_v58, %v319_v58  ;;  %v16261_v3 = vor.u32 %v18635_v37, %v16260_v59  ;;  %v16188_v58 = vld [vmem:[%s28272_s6 + $0xcc0] sm:$0xf] }
 0x39d   :  { %10482 = vmatpush.bf16.msra.mxu3 %v16037_v13  ;;  %v16333_v13 = vor.u32 %v18653_v31, %v16332_v54  ;;  %v16244_v54 = vld [vmem:[%s28272_s6 + $0xd30] sm:$0xf]  ;;  %v18631_v31 = vld [vmem:[%s28272_s6 + $0xd34] sm:$0xf0]  ;;  %v16189_v60 = vor.u32 %v18617_v38, %v16188_v58 }
 0x39e   :  { %v16245_v37 = vor.u32 %v18631_v31, %v16244_v54  ;;  %v16292_v58 = vld [vmem:[%s28272_s6 + $0xd90] sm:$0xf]  ;;  %v18595_v54 = vld [vmem:[%s28272_s6 + $0xc14] sm:$0xf0] }
 0x39f   :  { %10443 = vmatpush.bf16.msra.mxu0 %v15845_v24  ;;  %v16324_v24 = vld [vmem:[%s28272_s6 + $0xdd0] sm:$0xf] }
 0x3a0   :  { %10456 = vmatpush.bf16.msra.mxu1 %v15909_v14  ;;  %10470 = vmatpush.bf16.msra.mxu2 %v15965_v48  ;;  %v16132_v14 = vld [vmem:[%s28272_s6 + $0xc50] sm:$0xf]  ;;  %v18619_v48 = vld [vmem:[%s28272_s6 + $0xcd4] sm:$0xf0]  ;;  %v16325_v8 = vor.u32 %v18651_v51, %v16324_v24 }
 0x3a1   :  { %10483 = vmatpush.bf16.msra.mxu3 %v16029_v7  ;;  %v16316_v7 = vld [vmem:[%s28272_s6 + $0xdc0] sm:$0xf]  ;;  %v16133_v47 = vor.u32 %v18603_v9, %v16132_v14  ;;  %v16197_v20 = vor.u32 %v18619_v48, %v16196_v29  ;;  %v18645_v14 = vld [vmem:[%s28272_s6 + $0xda4] sm:$0xf0]  ;;  %v16117_v29 = vor.u32 %v18599_v4, %v16116_v12 }
 0x3a2   :  { %v16220_v12 = vld [vmem:[%s28272_s6 + $0xd00] sm:$0xf] }
 0x3a3   :  { %10444 = vmatpush.bf16.msra.mxu0 %v15837_v35  ;;  %10471 = vmatmul.bf16.vlgmr.msra.gmra.mxu2 %v24981_v40  ;;  %v18601_v35 = vld [vmem:[%s28272_s6 + $0xc44] sm:$0xf0]  ;;  %v16284_v4 = vld [vmem:[%s28272_s6 + $0xd80] sm:$0xf] }
 0x3a4   :  { %10515 = vmatpush.bf16.msrb.mxu2 %v16277_v55  ;;  %10457 = vmatpush.bf16.msra.mxu1 %v15901_v52  ;;  %v18649_v55 = vld [vmem:[%s28272_s6 + $0xdc4] sm:$0xf0]  ;;  %v16253_v52 = vor.u32 %v18633_v27, %v16252_v26  ;;  %v10251_v59 = vpop.f32.mrf.mxu1  ;;  %v16172_v27 = vld [vmem:[%s28272_s6 + $0xca0] sm:$0xf] }
 0x3a5   :  { %10528 = vmatpush.bf16.msrb.mxu3 %v16341_v56  ;;  %v16124_v56 = vld [vmem:[%s28272_s6 + $0xc40] sm:$0xf]  ;;  %v16317_v63 = vor.u32 %v18649_v55, %v16316_v7  ;;  %v18597_v26 = vld [vmem:[%s28272_s6 + $0xc24] sm:$0xf0] }
 0x3a6   :  { %10445 = vmatmul.bf16.vlgmr.msra.gmra.mxu0 %v24995_v16  ;;  %10484 = vmatmul.bf16.vlgmr.msra.gmra.mxu3 %v24997_v28  ;;  %v16125_v42 = vor.u32 %v18601_v35, %v16124_v56  ;;  %v10264_v9 = vpop.f32.mrf.mxu2  ;;  %v18613_v7 = vld [vmem:[%s28272_s6 + $0xca4] sm:$0xf0]  ;;  %v16228_v56 = vld [vmem:[%s28272_s6 + $0xd10] sm:$0xf]  ;;  %v18627_v35 = vld [vmem:[%s28272_s6 + $0xd14] sm:$0xf0] }
 0x3a7   :  { %10489 = vmatpush.bf16.msrb.mxu0 %v16149_v45  ;;  %10458 = vmatmul.bf16.vlgmr.msra.gmra.mxu1 %v25012_v5  ;;  %v18647_v45 = vld [vmem:[%s28272_s6 + $0xdb4] sm:$0xf0] }
 0x3a8   :  { %10502 = vmatpush.bf16.msrb.mxu1 %v16213_v49  ;;  %10516 = vmatpush.bf16.msrb.mxu2 %v16269_v34  ;;  %v10238_v49 = vpop.f32.mrf.mxu0  ;;  %v16180_v34 = vld [vmem:[%s28272_s6 + $0xcb0] sm:$0xf]  ;;  %v16309_v24 = vor.u32 %v18647_v45, %v16308_v43  ;;  %v16173_v43 = vor.u32 %v18613_v7, %v16172_v27 }
 0x3a9   :  { %10529 = vmatpush.bf16.msrb.mxu3 %v16333_v13  ;;  %v10239_v44 = vadd.f32 %v10238_v49, %v24934_v0  ;;  %v18615_v13 = vld [vmem:[%s28272_s6 + $0xcb4] sm:$0xf0]  ;;  %v16236_v0 = vld [vmem:[%s28272_s6 + $0xd20] sm:$0xf]  ;;  %v10277_v55 = vpop.f32.mrf.mxu3  ;;  %v16164_v45 = vld [vmem:[%s28272_s6 + $0xc90] sm:$0xf] }
 0x3aa   :  { %v16181_v48 = vor.u32 %v18615_v13, %v16180_v34  ;;  %v18611_v49 = vld [vmem:[%s28272_s6 + $0xc94] sm:$0xf0]  ;;  %v18641_v34 = vld [vmem:[%s28272_s6 + $0xd84] sm:$0xf0]  ;;  %v16229_v13 = vor.u32 %v18627_v35, %v16228_v56  ;;  %v16404_v27 = vld [vmem:[%s28272_s6 + $0xe70] sm:$0xf] }
 0x3ab   :  { %10490 = vmatpush.bf16.msrb.mxu0 %v16141_v32  ;;  %v10252_v51 = vadd.f32 %v10251_v59, %v10239_v44  ;;  %v18629_v32 = vld [vmem:[%s28272_s6 + $0xd24] sm:$0xf0]  ;;  %v18687_v56 = vld [vmem:[%s28272_s6 + $0xef4] sm:$0xf0] }
 0x3ac   :  { %10503 = vmatpush.bf16.msrb.mxu1 %v16205_v23  ;;  %10517 = vmatpush.bf16.msrb.mxu2 %v16261_v3  ;;  %v16300_v23 = vld [vmem:[%s28272_s6 + $0xda0] sm:$0xf]  ;;  %v18625_v44 = vld [vmem:[%s28272_s6 + $0xd04] sm:$0xf0] }
 0x3ad   :  { %10530 = vmatpush.bf16.msrb.mxu3 %v16325_v8  ;;  %v16108_v3 = vld [vmem:[%s28272_s6 + $0xc20] sm:$0xf]  ;;  %v10265_v8 = vadd.f32 %v10264_v9, %v10252_v51  ;;  %v16596_v51 = vld [vmem:[%s28272_s6 + $0xff0] sm:$0xf]  ;;  %v16165_v9 = vor.u32 %v18611_v49, %v16164_v45  ;;  %v16221_v7 = vor.u32 %v18625_v44, %v16220_v12  ;;  %v18701_v49 = vld [vmem:[%s28272_s6 + $0xf64] sm:$0xf0] }
 0x3ae   :  { %v16109_v31 = vor.u32 %v18597_v26, %v16108_v3  ;;  %v18609_v3 = vld [vmem:[%s28272_s6 + $0xc84] sm:$0xf0]  ;;  %v324_v26 = vld.sshfl [vmem:[#allocation1 + $0x10] sm:$0xff pattern:$0x73625140] }
 0x3af   :  { %10491 = vmatpush.bf16.msrb.mxu0 %v16133_v47  ;;  %v16237_v47 = vor.u32 %v18629_v32, %v16236_v0  ;;  %v25120_v38 = vadd.f32 %v10277_v55, %v10265_v8  ;;  %v10253_v0 = vpop.f32.mrf.mxu1  ;;  %v18719_v32 = vld [vmem:[%s28272_s6 + $0xff4] sm:$0xf0]  ;;  %v10266_v8 = vpop.f32.mrf.mxu2  ;;  %v16285_v55 = vor.u32 %v18641_v34, %v16284_v4  ;;  %v16524_v45 = vld [vmem:[%s28272_s6 + $0xf60] sm:$0xf]  ;;  %v18717_v44 = vld [vmem:[%s28272_s6 + $0xfe4] sm:$0xf0] }
 0x3b0   :  { %10504 = vmatpush.bf16.msrb.mxu1 %v16197_v20  ;;  %10518 = vmatpush.bf16.msrb.mxu2 %v16253_v52  ;;  %v16301_v20 = vor.u32 %v18645_v14, %v16300_v23  ;;  %v18643_v52 = vld [vmem:[%s28272_s6 + $0xd94] sm:$0xf0]  ;;  %v16092_v23 = vld [vmem:[%s28272_s6 + $0xc00] sm:$0xf]  ;;  %v16525_v0 = vor.u32 %v18701_v49, %v16524_v45  ;;  %v18665_v45 = vld [vmem:[%s28272_s6 + $0xe44] sm:$0xf0] }
 0x3b1   :  { %10531 = vmatpush.bf16.msrb.mxu3 %v16317_v63  ;;  %v16100_v63 = vld [vmem:[%s28272_s6 + $0xc10] sm:$0xf]  ;;  %v16293_v59 = vor.u32 %v18643_v52, %v16292_v58  ;;  %v10279_v35 = vpop.f32.mrf.mxu3  ;;  %v16597_v52 = vor.u32 %v18719_v32, %v16596_v51  ;;  %v323_v4 = vld.sshfl [vmem:[#allocation1 + $0x8] sm:$0xff pattern:$0x73625140] }
 0x3b2   :  { %v16101_v14 = vor.u32 %v18595_v54, %v16100_v63  ;;  %v322_v63 = vld.sshfl [vmem:[#allocation1] sm:$0xff pattern:$0x73625140]  ;;  %v325_v54 = vld.sshfl [vmem:[#allocation1 + $0x18] sm:$0xff pattern:$0x73625140] }
 0x3b3   :  { %10492 = vmatpush.bf16.msrb.mxu0 %v16125_v42  ;;  %v10240_v42 = vpop.f32.mrf.mxu0  ;;  %v16460_v51 = vld [vmem:[%s28272_s6 + $0xee0] sm:$0xf]  ;;  %v18685_v32 = vld [vmem:[%s28272_s6 + $0xee4] sm:$0xf0]  ;;  %v18715_v8 = vld [vmem:[%s28272_s6 + $0xfd4] sm:$0xf0] }
 0x3b4   :  { %10505 = vmatpush.bf16.msrb.mxu1 %v16189_v60  ;;  %10519 = vmatpush.bf16.msrb.mxu2 %v16245_v37  ;;  %v274_v60 = vld [vmem:[%s28267_s1 + $0x38] sm:$0xff]  ;;  %v16532_v37 = vld [vmem:[%s28272_s6 + $0xf70] sm:$0xf]  ;;  %v16588_v42 = vld [vmem:[%s28272_s6 + $0xfe0] sm:$0xf] }
 0x3b5   :  { %10532 = vmatpush.bf16.msrb.mxu3 %v16309_v24  ;;  %v18703_v24 = vld [vmem:[%s28272_s6 + $0xf74] sm:$0xf0]  ;;  %321 = vst [vmem:[#allocation1 + $0x20] ss:$4 sm:$0xff] %v274_v60  ;;  %v25197_v60 = vpack.c.bf16 %v324_v26, %v324_v26  ;;  %v16461_v26 = vor.u32 %v18685_v32, %v16460_v51  ;;  %v16508_v35 = vld [vmem:[%s28272_s6 + $0xf40] sm:$0xf] }
 0x3b6   :  { %v16533_v58 = vor.u32 %v18703_v24, %v16532_v37  ;;  %v18669_v37 = vld [vmem:[%s28272_s6 + $0xe64] sm:$0xf0]  ;;  %v25210_v24 = vpack.c.bf16 %v322_v63, %v322_v63  ;;  %v16572_v63 = vld [vmem:[%s28272_s6 + $0xfc0] sm:$0xf] }
 0x3b7   :  { %10493 = vmatpush.bf16.msrb.mxu0 %v16117_v29  ;;  %v18593_v29 = vld [vmem:[%s28272_s6 + $0xc04] sm:$0xf0] }
 0x3b8   :  { %10506 = vmatpush.bf16.msrb.mxu1 %v16181_v48  ;;  %10520 = vmatpush.bf16.msrb.mxu2 %v16237_v47  ;;  %v16156_v48 = vld [vmem:[%s28272_s6 + $0xc80] sm:$0xf]  ;;  %v18671_v47 = vld [vmem:[%s28272_s6 + $0xe74] sm:$0xf0] }
 0x3b9   :  { %10533 = vmatpush.bf16.msrb.mxu3 %v16301_v20  ;;  %v16468_v20 = vld [vmem:[%s28272_s6 + $0xef0] sm:$0xf]  ;;  %v16405_v12 = vor.u32 %v18671_v47, %v16404_v27 }
 0x3ba   :  { %v16469_v34 = vor.u32 %v18687_v56, %v16468_v20  ;;  %v16388_v27 = vld [vmem:[%s28272_s6 + $0xe50] sm:$0xf]  ;;  %v18683_v20 = vld [vmem:[%s28272_s6 + $0xed4] sm:$0xf0] }
 0x3bb   :  { %10494 = vmatpush.bf16.msrb.mxu0 %v16109_v31  ;;  %v16093_v31 = vor.u32 %v18593_v29, %v16092_v23  ;;  %v16589_v23 = vor.u32 %v18717_v44, %v16588_v42  ;;  %v18699_v29 = vld [vmem:[%s28272_s6 + $0xf54] sm:$0xf0]  ;;  %v16452_v47 = vld [vmem:[%s28272_s6 + $0xed0] sm:$0xf]  ;;  %v16444_v42 = vld [vmem:[%s28272_s6 + $0xec0] sm:$0xf] }
 0x3bc   :  { %10507 = vmatpush.bf16.msrb.mxu1 %v16173_v43  ;;  %10521 = vmatpush.bf16.msrb.mxu2 %v16229_v13  ;;  %v16157_v43 = vor.u32 %v18609_v3, %v16156_v48  ;;  %v25202_v13 = vpack.c.bf16 %v325_v54, %v325_v54  ;;  %v16580_v3 = vld [vmem:[%s28272_s6 + $0xfd0] sm:$0xf]  ;;  %v18713_v54 = vld [vmem:[%s28272_s6 + $0xfc4] sm:$0xf0] }
 0x3bd   :  { %10534 = vmatpush.bf16.msrb.mxu3 %v16293_v59  ;;  %v16396_v59 = vld [vmem:[%s28272_s6 + $0xe60] sm:$0xf]  ;;  %v16581_v56 = vor.u32 %v18715_v8, %v16580_v3  ;;  %v16573_v44 = vor.u32 %v18713_v54, %v16572_v63  ;;  %v16436_v8 = vld [vmem:[%s28272_s6 + $0xeb0] sm:$0xf]  ;;  %v18661_v63 = vld [vmem:[%s28272_s6 + $0xe24] sm:$0xf0] }
 0x3be   :  { %v16397_v48 = vor.u32 %v18669_v37, %v16396_v59  ;;  %v16564_v37 = vld [vmem:[%s28272_s6 + $0xfb0] sm:$0xf]  ;;  %v16428_v54 = vld [vmem:[%s28272_s6 + $0xea0] sm:$0xf] }
 0x3bf   :  { %10495 = vmatpush.bf16.msrb.mxu0 %v16101_v14  ;;  %v25218_v14 = vpack.c.bf16 %v323_v4, %v323_v4  ;;  %v16500_v4 = vld [vmem:[%s28272_s6 + $0xf30] sm:$0xf] }
 0x3c0   :  { %10508 = vmatpush.bf16.msrb.mxu1 %v16165_v9  ;;  %10522 = vmatpush.bf16.msrb.mxu2 %v16221_v7  ;;  %v16516_v9 = vld [vmem:[%s28272_s6 + $0xf50] sm:$0xf]  ;;  %v18667_v7 = vld [vmem:[%s28272_s6 + $0xe54] sm:$0xf0] }
 0x3c1   :  { %10535 = vmatpush.bf16.msrb.mxu3 %v16285_v55  ;;  %v16517_v55 = vor.u32 %v18699_v29, %v16516_v9  ;;  %v18663_v9 = vld [vmem:[%s28272_s6 + $0xe34] sm:$0xf0] }
 0x3c3   :  { %10496 = vmatpush.bf16.msrb.mxu0 %v16093_v31  ;;  %10523 = vmatmul.bf16.vlgmr.msrb.gmra.mxu2 %v25197_v60  ;;  %v16453_v31 = vor.u32 %v18683_v20, %v16452_v47  ;;  %v10290_v51 = vpop.f32.mrf.mxu0  ;;  %v16556_v20 = vld [vmem:[%s28272_s6 + $0xfa0] sm:$0xf] }
 0x3c4   :  { %10567 = vmatpush.bf16.msra.mxu2 %v16533_v58  ;;  %10509 = vmatpush.bf16.msrb.mxu1 %v16157_v43  ;;  %v18697_v58 = vld [vmem:[%s28272_s6 + $0xf44] sm:$0xf0]  ;;  %v16380_v43 = vld [vmem:[%s28272_s6 + $0xe40] sm:$0xf]  ;;  %v10291_v29 = vadd.f32 %v10290_v51, %v25120_v38  ;;  %v18659_v51 = vld [vmem:[%s28272_s6 + $0xe14] sm:$0xf0] }
 0x3c5   :  { %10580 = vmatpush.bf16.msra.mxu3 %v16597_v52  ;;  %v16389_v52 = vor.u32 %v18667_v7, %v16388_v27  ;;  %v16509_v49 = vor.u32 %v18697_v58, %v16508_v35  ;;  %v16381_v59 = vor.u32 %v18665_v45, %v16380_v43  ;;  %v16492_v7 = vld [vmem:[%s28272_s6 + $0xf20] sm:$0xf]  ;;  %v18693_v38 = vld [vmem:[%s28272_s6 + $0xf24] sm:$0xf0] }
 0x3c6   :  { %10536 = vmatmul.bf16.vlgmr.msrb.gmra.mxu3 %v25202_v13  ;;  %10497 = vmatmul.bf16.vlgmr.msrb.gmra.mxu0 %v25210_v24  ;;  %v10316_v35 = vpop.f32.mrf.mxu2  ;;  %v16493_v45 = vor.u32 %v18693_v38, %v16492_v7  ;;  %v18705_v7 = vld [vmem:[%s28272_s6 + $0xf84] sm:$0xf0]  ;;  %v16788_v38 = vld [vmem:[%s28272_s6 + $0x1170] sm:$0xf] }
 0x3c7   :  { %10541 = vmatpush.bf16.msra.mxu0 %v16405_v12  ;;  %10510 = vmatmul.bf16.vlgmr.msrb.gmra.mxu1 %v25218_v14  ;;  %v18681_v12 = vld [vmem:[%s28272_s6 + $0xec4] sm:$0xf0] }
 0x3c8   :  { %10554 = vmatpush.bf16.msra.mxu1 %v16469_v34  ;;  %10568 = vmatpush.bf16.msra.mxu2 %v16525_v0  ;;  %v18695_v34 = vld [vmem:[%s28272_s6 + $0xf34] sm:$0xf0]  ;;  %v16445_v32 = vor.u32 %v18681_v12, %v16444_v42  ;;  %v16484_v42 = vld [vmem:[%s28272_s6 + $0xf10] sm:$0xf] }
 0x3c9   :  { %10581 = vmatpush.bf16.msra.mxu3 %v16589_v23  ;;  %v18711_v0 = vld [vmem:[%s28272_s6 + $0xfb4] sm:$0xf0]  ;;  %v16372_v23 = vld [vmem:[%s28272_s6 + $0xe30] sm:$0xf]  ;;  %v16501_v3 = vor.u32 %v18695_v34, %v16500_v4  ;;  %v10329_v43 = vpop.f32.mrf.mxu3 }
 0x3ca   :  { %v16565_v27 = vor.u32 %v18711_v0, %v16564_v37  ;;  %v16373_v47 = vor.u32 %v18663_v9, %v16372_v23  ;;  %v18691_v12 = vld [vmem:[%s28272_s6 + $0xf14] sm:$0xf0]  ;;  %v16548_v4 = vld [vmem:[%s28272_s6 + $0xf90] sm:$0xf]  ;;  %v275_v23 = vld [vmem:[%s28267_s1 + $0x40] sm:$0xff] }
 0x3cb   :  { %10542 = vmatpush.bf16.msra.mxu0 %v16397_v48  ;;  %v10303_v48 = vpop.f32.mrf.mxu1  ;;  %v18707_v34 = vld [vmem:[%s28272_s6 + $0xf94] sm:$0xf0]  ;;  %330 = vst [vmem:[#allocation1] ss:$4 sm:$0xff] %v275_v23 }
 0x3cc   :  { %10555 = vmatpush.bf16.msra.mxu1 %v16461_v26  ;;  %10569 = vmatpush.bf16.msra.mxu2 %v16517_v55  ;;  %v18679_v26 = vld [vmem:[%s28272_s6 + $0xeb4] sm:$0xf0]  ;;  %v10304_v55 = vadd.f32 %v10303_v48, %v10291_v29  ;;  %v16476_v48 = vld [vmem:[%s28272_s6 + $0xf00] sm:$0xf] }
 0x3cd   :  { %10582 = vmatpush.bf16.msra.mxu3 %v16581_v56  ;;  %v18709_v56 = vld [vmem:[%s28272_s6 + $0xfa4] sm:$0xf0]  ;;  %v16437_v58 = vor.u32 %v18679_v26, %v16436_v8  ;;  %v18675_v29 = vld [vmem:[%s28272_s6 + $0xe94] sm:$0xf0]  ;;  %v10292_v8 = vpop.f32.mrf.mxu0  ;;  %v16485_v26 = vor.u32 %v18691_v12, %v16484_v42  ;;  %v16660_v12 = vld [vmem:[%s28272_s6 + $0x1070] sm:$0xf] }
 0x3cf   :  { %10543 = vmatpush.bf16.msra.mxu0 %v16389_v52  ;;  %v16364_v52 = vld [vmem:[%s28272_s6 + $0xe20] sm:$0xf] }
 0x3d0   :  { %10556 = vmatpush.bf16.msra.mxu1 %v16453_v31  ;;  %10570 = vmatpush.bf16.msra.mxu2 %v16509_v49  ;;  %v10317_v31 = vadd.f32 %v10316_v35, %v10304_v55  ;;  %v18677_v49 = vld [vmem:[%s28272_s6 + $0xea4] sm:$0xf0]  ;;  %v16365_v0 = vor.u32 %v18661_v63, %v16364_v52  ;;  %v18783_v35 = vld [vmem:[%s28272_s6 + $0x11f4] sm:$0xf0]  ;;  %v16348_v52 = vld [vmem:[%s28272_s6 + $0xe00] sm:$0xf] }
 0x3d1   :  { %10583 = vmatpush.bf16.msra.mxu3 %v16573_v44  ;;  %v16557_v44 = vor.u32 %v18709_v56, %v16556_v20  ;;  %v16429_v9 = vor.u32 %v18677_v49, %v16428_v54  ;;  %v18767_v20 = vld [vmem:[%s28272_s6 + $0x1174] sm:$0xf0]  ;;  %v16852_v56 = vld [vmem:[%s28272_s6 + $0x11f0] sm:$0xf]  ;;  %v18657_v63 = vld [vmem:[%s28272_s6 + $0xe04] sm:$0xf0]  ;;  %v10318_v49 = vpop.f32.mrf.mxu2 }
 0x3d2   :  { %v25336_v37 = vadd.f32 %v10329_v43, %v10317_v31  ;;  %v16412_v54 = vld [vmem:[%s28272_s6 + $0xe80] sm:$0xf]  ;;  %v18673_v43 = vld [vmem:[%s28272_s6 + $0xe84] sm:$0xf0]  ;;  %v16853_v23 = vor.u32 %v18783_v35, %v16852_v56  ;;  %v18763_v49 = vld [vmem:[%s28272_s6 + $0x1154] sm:$0xf0] }
 0x3d3   :  { %10544 = vmatpush.bf16.msra.mxu0 %v16381_v59  ;;  %v16356_v59 = vld [vmem:[%s28272_s6 + $0xe10] sm:$0xf]  ;;  %v10305_v55 = vpop.f32.mrf.mxu1 }
 0x3d4   :  { %10557 = vmatpush.bf16.msra.mxu1 %v16445_v32  ;;  %10571 = vmatpush.bf16.msra.mxu2 %v16501_v3  ;;  %v16420_v32 = vld [vmem:[%s28272_s6 + $0xe90] sm:$0xf]  ;;  %v18689_v3 = vld [vmem:[%s28272_s6 + $0xf04] sm:$0xf0] }
 0x3d5   :  { %10584 = vmatpush.bf16.msra.mxu3 %v16565_v27  ;;  %v16540_v27 = vld [vmem:[%s28272_s6 + $0xf80] sm:$0xf]  ;;  %v16421_v31 = vor.u32 %v18675_v29, %v16420_v32  ;;  %v16477_v42 = vor.u32 %v18689_v3, %v16476_v48  ;;  %v329_v29 = vld.sshfl [vmem:[#allocation1 + $0x38] sm:$0xff pattern:$0x73625140]  ;;  %v16413_v3 = vor.u32 %v18673_v43, %v16412_v54 }
 0x3d6   :  { %v326_v32 = vld.sshfl [vmem:[#allocation1 + $0x20] sm:$0xff pattern:$0x73625140]  ;;  %v25417_v35 = vpack.c.bf16 %v329_v29, %v329_v29  ;;  %v16772_v43 = vld [vmem:[%s28272_s6 + $0x1150] sm:$0xf] }
 0x3d7   :  { %10545 = vmatpush.bf16.msra.mxu0 %v16373_v47  ;;  %v16549_v47 = vor.u32 %v18707_v34, %v16548_v4  ;;  %v16724_v4 = vld [vmem:[%s28272_s6 + $0x10f0] sm:$0xf]  ;;  %v10331_v34 = vpop.f32.mrf.mxu3  ;;  %v16780_v48 = vld [vmem:[%s28272_s6 + $0x1160] sm:$0xf]  ;;  %v25415_v56 = vpack.c.bf16 %v326_v32, %v326_v32  ;;  %v16773_v32 = vor.u32 %v18763_v49, %v16772_v43  ;;  %v18761_v29 = vld [vmem:[%s28272_s6 + $0x1144] sm:$0xf0] }
 0x3d8   :  { %10558 = vmatpush.bf16.msra.mxu1 %v16437_v58  ;;  %10572 = vmatpush.bf16.msra.mxu2 %v16493_v45  ;;  %v16357_v58 = vor.u32 %v18659_v51, %v16356_v59  ;;  %v328_v45 = vld.sshfl [vmem:[#allocation1 + $0x30] sm:$0xff pattern:$0x73625140]  ;;  %v16541_v59 = vor.u32 %v18705_v7, %v16540_v27  ;;  %v18751_v51 = vld [vmem:[%s28272_s6 + $0x10f4] sm:$0xf0] }
 0x3d9   :  { %10585 = vmatpush.bf16.msra.mxu3 %v16557_v44  ;;  %v18735_v44 = vld [vmem:[%s28272_s6 + $0x1074] sm:$0xf0]  ;;  %v25401_v8 = vpack.c.bf16 %v328_v45, %v328_v45  ;;  %v16844_v27 = vld [vmem:[%s28272_s6 + $0x11e0] sm:$0xf]  ;;  %v18781_v7 = vld [vmem:[%s28272_s6 + $0x11e4] sm:$0xf0]  ;;  %v16725_v55 = vor.u32 %v18751_v51, %v16724_v4 }
 0x3da   :  { %v16644_v34 = vld [vmem:[%s28272_s6 + $0x1050] sm:$0xf]  ;;  %v18747_v51 = vld [vmem:[%s28272_s6 + $0x10d4] sm:$0xf0] }
 0x3db   :  { %10546 = vmatpush.bf16.msra.mxu0 %v16365_v0  ;;  %v16789_v0 = vor.u32 %v18767_v20, %v16788_v38  ;;  %v16661_v38 = vor.u32 %v18735_v44, %v16660_v12  ;;  %v16652_v20 = vld [vmem:[%s28272_s6 + $0x1060] sm:$0xf]  ;;  %v18779_v12 = vld [vmem:[%s28272_s6 + $0x11d4] sm:$0xf0] }
 0x3dc   :  { %10559 = vmatpush.bf16.msra.mxu1 %v16429_v9  ;;  %10573 = vmatpush.bf16.msra.mxu2 %v16485_v26  ;;  %v16349_v9 = vor.u32 %v18657_v63, %v16348_v52  ;;  %v18765_v26 = vld [vmem:[%s28272_s6 + $0x1164] sm:$0xf0]  ;;  %v16716_v52 = vld [vmem:[%s28272_s6 + $0x10e0] sm:$0xf] }
 0x3dd   :  { %10586 = vmatpush.bf16.msra.mxu3 %v16549_v47  ;;  %v327_v47 = vld.sshfl [vmem:[#allocation1 + $0x28] sm:$0xff pattern:$0x73625140]  ;;  %v16781_v54 = vor.u32 %v18765_v26, %v16780_v48  ;;  %v16828_v48 = vld [vmem:[%s28272_s6 + $0x11c0] sm:$0xf] }
 0x3de   :  { %v18749_v63 = vld [vmem:[%s28272_s6 + $0x10e4] sm:$0xf0]  ;;  %v25432_v45 = vpack.c.bf16 %v327_v47, %v327_v47 }
 0x3df   :  { %10547 = vmatpush.bf16.msra.mxu0 %v16357_v58  ;;  %v18733_v58 = vld [vmem:[%s28272_s6 + $0x1064] sm:$0xf0]  ;;  %v16717_v4 = vor.u32 %v18749_v63, %v16716_v52  ;;  %v16756_v52 = vld [vmem:[%s28272_s6 + $0x1130] sm:$0xf]  ;;  %v18759_v63 = vld [vmem:[%s28272_s6 + $0x1134] sm:$0xf0] }
 0x3e0   :  { %10560 = vmatpush.bf16.msra.mxu1 %v16421_v31  ;;  %10574 = vmatpush.bf16.msra.mxu2 %v16477_v42  ;;  %v16845_v31 = vor.u32 %v18781_v7, %v16844_v27  ;;  %v16836_v42 = vld [vmem:[%s28272_s6 + $0x11d0] sm:$0xf]  ;;  %v16653_v44 = vor.u32 %v18733_v58, %v16652_v20  ;;  %v16636_v7 = vld [vmem:[%s28272_s6 + $0x1040] sm:$0xf]  ;;  %v18745_v47 = vld [vmem:[%s28272_s6 + $0x10c4] sm:$0xf0] }
 0x3e1   :  { %10587 = vmatpush.bf16.msra.mxu3 %v16541_v59  ;;  %v18731_v59 = vld [vmem:[%s28272_s6 + $0x1054] sm:$0xf0] }
 0x3e2   :  { %v16645_v26 = vor.u32 %v18731_v59, %v16644_v34  ;;  %v16692_v34 = vld [vmem:[%s28272_s6 + $0x10b0] sm:$0xf]  ;;  %v18743_v59 = vld [vmem:[%s28272_s6 + $0x10b4] sm:$0xf0] }
 0x3e3   :  { %10548 = vmatpush.bf16.msra.mxu0 %v16349_v9  ;;  %10575 = vmatmul.bf16.vlgmr.msra.gmra.mxu2 %v25401_v8  ;;  %v16764_v9 = vld [vmem:[%s28272_s6 + $0x1140] sm:$0xf]  ;;  %v10342_v43 = vpop.f32.mrf.mxu0 }
 0x3e4   :  { %10619 = vmatpush.bf16.msrb.mxu2 %v16789_v0  ;;  %10561 = vmatpush.bf16.msra.mxu1 %v16413_v3  ;;  %v16708_v0 = vld [vmem:[%s28272_s6 + $0x10d0] sm:$0xf]  ;;  %v18777_v3 = vld [vmem:[%s28272_s6 + $0x11c4] sm:$0xf0]  ;;  %v16765_v20 = vor.u32 %v18761_v29, %v16764_v9  ;;  %v16812_v29 = vld [vmem:[%s28272_s6 + $0x11a0] sm:$0xf] }
 0x3e5   :  { %10632 = vmatpush.bf16.msrb.mxu3 %v16853_v23  ;;  %v16837_v23 = vor.u32 %v18779_v12, %v16836_v42  ;;  %v16709_v27 = vor.u32 %v18747_v51, %v16708_v0  ;;  %v16829_v58 = vor.u32 %v18777_v3, %v16828_v48  ;;  %v16628_v12 = vld [vmem:[%s28272_s6 + $0x1030] sm:$0xf]  ;;  %v10355_v0 = vpop.f32.mrf.mxu1  ;;  %v16757_v51 = vor.u32 %v18759_v63, %v16756_v52  ;;  %v18757_v9 = vld [vmem:[%s28272_s6 + $0x1124] sm:$0xf0] }
 0x3e6   :  { %10549 = vmatmul.bf16.vlgmr.msra.gmra.mxu0 %v25415_v56  ;;  %10588 = vmatmul.bf16.vlgmr.msra.gmra.mxu3 %v25417_v35  ;;  %v18773_v48 = vld [vmem:[%s28272_s6 + $0x11a4] sm:$0xf0]  ;;  %v10368_v3 = vpop.f32.mrf.mxu2 }
 0x3e7   :  { %10593 = vmatpush.bf16.msrb.mxu0 %v16661_v38  ;;  %10562 = vmatmul.bf16.vlgmr.msra.gmra.mxu1 %v25432_v45  ;;  %v18729_v38 = vld [vmem:[%s28272_s6 + $0x1044] sm:$0xf0]  ;;  %v16813_v63 = vor.u32 %v18773_v48, %v16812_v29 }
 0x3e8   :  { %10606 = vmatpush.bf16.msrb.mxu1 %v16725_v55  ;;  %10620 = vmatpush.bf16.msrb.mxu2 %v16781_v54  ;;  %v16700_v55 = vld [vmem:[%s28272_s6 + $0x10c0] sm:$0xf]  ;;  %v16820_v54 = vld [vmem:[%s28272_s6 + $0x11b0] sm:$0xf]  ;;  %v16637_v49 = vor.u32 %v18729_v38, %v16636_v7  ;;  %v18769_v29 = vld [vmem:[%s28272_s6 + $0x1184] sm:$0xf0] }
 0x3e9   :  { %10633 = vmatpush.bf16.msrb.mxu3 %v16845_v31  ;;  %v18775_v31 = vld [vmem:[%s28272_s6 + $0x11b4] sm:$0xf0]  ;;  %v16701_v42 = vor.u32 %v18745_v47, %v16700_v55  ;;  %v16620_v7 = vld [vmem:[%s28272_s6 + $0x1020] sm:$0xf]  ;;  %v18725_v55 = vld [vmem:[%s28272_s6 + $0x1024] sm:$0xf0] }
 0x3ea   :  { %v16684_v47 = vld [vmem:[%s28272_s6 + $0x10a0] sm:$0xf] }
 0x3eb   :  { %10594 = vmatpush.bf16.msrb.mxu0 %v16653_v44  ;;  %v10343_v44 = vadd.f32 %v10342_v43, %v25336_v37  ;;  %v16748_v37 = vld [vmem:[%s28272_s6 + $0x1120] sm:$0xf]  ;;  %v16804_v43 = vld [vmem:[%s28272_s6 + $0x1190] sm:$0xf] }
 0x3ec   :  { %10607 = vmatpush.bf16.msrb.mxu1 %v16717_v4  ;;  %10621 = vmatpush.bf16.msrb.mxu2 %v16773_v32  ;;  %v18727_v4 = vld [vmem:[%s28272_s6 + $0x1034] sm:$0xf0]  ;;  %v16821_v32 = vor.u32 %v18775_v31, %v16820_v54  ;;  %v16749_v52 = vor.u32 %v18757_v9, %v16748_v37  ;;  %v16740_v54 = vld [vmem:[%s28272_s6 + $0x1110] sm:$0xf]  ;;  %v16732_v37 = vld [vmem:[%s28272_s6 + $0x1100] sm:$0xf] }
 0x3ed   :  { %10634 = vmatpush.bf16.msrb.mxu3 %v16837_v23  ;;  %v10356_v23 = vadd.f32 %v10355_v0, %v10343_v44  ;;  %v18755_v31 = vld [vmem:[%s28272_s6 + $0x1114] sm:$0xf0]  ;;  %v16796_v9 = vld [vmem:[%s28272_s6 + $0x1180] sm:$0xf] }
 0x3ee   :  { %v18723_v44 = vld [vmem:[%s28272_s6 + $0x1014] sm:$0xf0]  ;;  %v16741_v48 = vor.u32 %v18755_v31, %v16740_v54  ;;  %v18737_v54 = vld [vmem:[%s28272_s6 + $0x1084] sm:$0xf0]  ;;  %v10370_v31 = vpop.f32.mrf.mxu2 }
 0x3ef   :  { %10595 = vmatpush.bf16.msrb.mxu0 %v16645_v26  ;;  %v16629_v26 = vor.u32 %v18727_v4, %v16628_v12  ;;  %v10369_v38 = vadd.f32 %v10368_v3, %v10356_v23  ;;  %v16612_v12 = vld [vmem:[%s28272_s6 + $0x1010] sm:$0xf]  ;;  %v16621_v4 = vor.u32 %v18725_v55, %v16620_v7  ;;  %v18739_v0 = vld [vmem:[%s28272_s6 + $0x1094] sm:$0xf0]  ;;  %v18753_v23 = vld [vmem:[%s28272_s6 + $0x1104] sm:$0xf0]  ;;  %v10357_v7 = vpop.f32.mrf.mxu1 }
 0x3f0   :  { %10608 = vmatpush.bf16.msrb.mxu1 %v16709_v27  ;;  %10622 = vmatpush.bf16.msrb.mxu2 %v16765_v20  ;;  %v16693_v27 = vor.u32 %v18743_v59, %v16692_v34  ;;  %v18741_v20 = vld [vmem:[%s28272_s6 + $0x10a4] sm:$0xf0]  ;;  %v16676_v59 = vld [vmem:[%s28272_s6 + $0x1090] sm:$0xf]  ;;  %v18847_v55 = vld [vmem:[%s28272_s6 + $0x13f4] sm:$0xf0] }
 0x3f1   :  { %10635 = vmatpush.bf16.msrb.mxu3 %v16829_v58  ;;  %v10381_v58 = vpop.f32.mrf.mxu3  ;;  %v16685_v34 = vor.u32 %v18741_v20, %v16684_v47  ;;  %v16604_v47 = vld [vmem:[%s28272_s6 + $0x1000] sm:$0xf]  ;;  %v16613_v20 = vor.u32 %v18723_v44, %v16612_v12  ;;  %v16733_v12 = vor.u32 %v18753_v23, %v16732_v37  ;;  %v16797_v44 = vor.u32 %v18769_v29, %v16796_v9  ;;  %v18829_v29 = vld [vmem:[%s28272_s6 + $0x1364] sm:$0xf0] }
 0x3f2   :  { %v332_v7 = vld.sshfl [vmem:[#allocation1] sm:$0xff pattern:$0x73625140] }
 0x3f3   :  { %10596 = vmatpush.bf16.msrb.mxu0 %v16637_v49  ;;  %v25540_v49 = vadd.f32 %v10381_v58, %v10369_v38  ;;  %v17108_v38 = vld [vmem:[%s28272_s6 + $0x13f0] sm:$0xf]  ;;  %v16677_v58 = vor.u32 %v18739_v0, %v16676_v59  ;;  %v18815_v59 = vld [vmem:[%s28272_s6 + $0x12f4] sm:$0xf0]  ;;  %v17036_v9 = vld [vmem:[%s28272_s6 + $0x1360] sm:$0xf] }
 0x3f4   :  { %10609 = vmatpush.bf16.msrb.mxu1 %v16701_v42  ;;  %10623 = vmatpush.bf16.msrb.mxu2 %v16757_v51  ;;  %v18771_v42 = vld [vmem:[%s28272_s6 + $0x1194] sm:$0xf0]  ;;  %v10344_v51 = vpop.f32.mrf.mxu0  ;;  %v16972_v31 = vld [vmem:[%s28272_s6 + $0x12e0] sm:$0xf] }
 0x3f5   :  { %10636 = vmatpush.bf16.msrb.mxu3 %v16821_v32  ;;  %v276_v32 = vld [vmem:[%s28267_s1 + $0x48] sm:$0xff]  ;;  %v16805_v3 = vor.u32 %v18771_v42, %v16804_v43  ;;  %v334_v43 = vld.sshfl [vmem:[#allocation1 + $0x10] sm:$0xff pattern:$0x73625140] }
 0x3f6   :  { %331 = vst [vmem:[#allocation1 + $0x20] ss:$4 sm:$0xff] %v276_v32  ;;  %v16916_v42 = vld [vmem:[%s28272_s6 + $0x1270] sm:$0xf]  ;;  %v17109_v32 = vor.u32 %v18847_v55, %v17108_v38  ;;  %v18845_v38 = vld [vmem:[%s28272_s6 + $0x13e4] sm:$0xf0] }
 0x3f7   :  { %10597 = vmatpush.bf16.msrb.mxu0 %v16629_v26  ;;  %v17044_v26 = vld [vmem:[%s28272_s6 + $0x1370] sm:$0xf]  ;;  %v333_v55 = vld.sshfl [vmem:[#allocation1 + $0x8] sm:$0xff pattern:$0x73625140] }
 0x3f8   :  { %10610 = vmatpush.bf16.msrb.mxu1 %v16693_v27  ;;  %10624 = vmatpush.bf16.msrb.mxu2 %v16749_v52  ;;  %v18831_v27 = vld [vmem:[%s28272_s6 + $0x1374] sm:$0xf0]  ;;  %v18721_v52 = vld [vmem:[%s28272_s6 + $0x1004] sm:$0xf0] }
 0x3f9   :  { %10637 = vmatpush.bf16.msrb.mxu3 %v16813_v63  ;;  %v16668_v63 = vld [vmem:[%s28272_s6 + $0x1080] sm:$0xf]  ;;  %v10383_v0 = vpop.f32.mrf.mxu3  ;;  %v17045_v51 = vor.u32 %v18831_v27, %v17044_v26  ;;  %v16605_v37 = vor.u32 %v18721_v52, %v16604_v47  ;;  %v25617_v26 = vpack.c.bf16 %v334_v43, %v334_v43  ;;  %v18797_v52 = vld [vmem:[%s28272_s6 + $0x1264] sm:$0xf0] }
 0x3fa   :  { %v16669_v23 = vor.u32 %v18737_v54, %v16668_v63  ;;  %v25630_v63 = vpack.c.bf16 %v332_v7, %v332_v7  ;;  %v17037_v54 = vor.u32 %v18829_v29, %v17036_v9  ;;  %v18813_v43 = vld [vmem:[%s28272_s6 + $0x12e4] sm:$0xf0]  ;;  %v18843_v0 = vld [vmem:[%s28272_s6 + $0x13d4] sm:$0xf0]  ;;  %v17020_v29 = vld [vmem:[%s28272_s6 + $0x1340] sm:$0xf] }
 0x3fb   :  { %10598 = vmatpush.bf16.msrb.mxu0 %v16621_v4  ;;  %v18799_v4 = vld [vmem:[%s28272_s6 + $0x1274] sm:$0xf0] }
 0x3fc   :  { %10611 = vmatpush.bf16.msrb.mxu1 %v16685_v34  ;;  %10625 = vmatpush.bf16.msrb.mxu2 %v16741_v48  ;;  %v16980_v34 = vld [vmem:[%s28272_s6 + $0x12f0] sm:$0xf]  ;;  %v335_v48 = vld.sshfl [vmem:[#allocation1 + $0x18] sm:$0xff pattern:$0x73625140]  ;;  %v16917_v27 = vor.u32 %v18799_v4, %v16916_v42  ;;  %28310 = vst [vmem:[#allocation16_spill] sm:$0xff] %v25630_v63 }
 0x3fd   :  { %10638 = vmatpush.bf16.msrb.mxu3 %v16805_v3  ;;  %v17100_v3 = vld [vmem:[%s28272_s6 + $0x13e0] sm:$0xf]  ;;  %v16981_v47 = vor.u32 %v18815_v59, %v16980_v34  ;;  %v18827_v4 = vld [vmem:[%s28272_s6 + $0x1354] sm:$0xf0]  ;;  %v17092_v59 = vld [vmem:[%s28272_s6 + $0x13d0] sm:$0xf] }
 0x3fe   :  { %v17101_v42 = vor.u32 %v18845_v38, %v17100_v3  ;;  %v18795_v7 = vld [vmem:[%s28272_s6 + $0x1254] sm:$0xf0]  ;;  %v17093_v9 = vor.u32 %v18843_v0, %v17092_v59  ;;  %v18825_v3 = vld [vmem:[%s28272_s6 + $0x1344] sm:$0xf0]  ;;  %v17084_v38 = vld [vmem:[%s28272_s6 + $0x13c0] sm:$0xf] }
 0x3ff   :  { %10599 = vmatpush.bf16.msrb.mxu0 %v16613_v20  ;;  %v25622_v20 = vpack.c.bf16 %v335_v48, %v335_v48  ;;  %v17076_v59 = vld [vmem:[%s28272_s6 + $0x13b0] sm:$0xf]  ;;  %v18839_v0 = vld [vmem:[%s28272_s6 + $0x13b4] sm:$0xf0] }
 0x400   :  { %10612 = vmatpush.bf16.msrb.mxu1 %v16677_v58  ;;  %10626 = vmatpush.bf16.msrb.mxu2 %v16733_v12  ;;  %v16908_v58 = vld [vmem:[%s28272_s6 + $0x1260] sm:$0xf]  ;;  %v25638_v12 = vpack.c.bf16 %v333_v55, %v333_v55  ;;  %v18841_v55 = vld [vmem:[%s28272_s6 + $0x13c4] sm:$0xf0] }
 0x401   :  { %10639 = vmatpush.bf16.msrb.mxu3 %v16797_v44  ;;  %28309 = vst [vmem:[#allocation15_spill] sm:$0xff] %v25622_v20  ;;  %v17028_v44 = vld [vmem:[%s28272_s6 + $0x1350] sm:$0xf]  ;;  %v16909_v34 = vor.u32 %v18797_v52, %v16908_v58  ;;  %v16892_v58 = vld [vmem:[%s28272_s6 + $0x1240] sm:$0xf] }
 0x402   :  { %28311 = vst [vmem:[#allocation17_spill] sm:$0xff] %v25638_v12  ;;  %v17029_v48 = vor.u32 %v18827_v4, %v17028_v44  ;;  %v18793_v52 = vld [vmem:[%s28272_s6 + $0x1244] sm:$0xf0]  ;;  %v17012_v44 = vld [vmem:[%s28272_s6 + $0x1330] sm:$0xf] }
 0x403   :  { %10600 = vmatpush.bf16.msrb.mxu0 %v16605_v37  ;;  %10627 = vmatmul.bf16.vlgmr.msrb.gmra.mxu2 %v25617_v26  ;;  %v16964_v37 = vld [vmem:[%s28272_s6 + $0x12d0] sm:$0xf]  ;;  %v18823_v4 = vld [vmem:[%s28272_s6 + $0x1334] sm:$0xf0] }
 0x404   :  { %10671 = vmatpush.bf16.msra.mxu2 %v17045_v51  ;;  %10613 = vmatpush.bf16.msrb.mxu1 %v16669_v23  ;;  %v16973_v51 = vor.u32 %v18813_v43, %v16972_v31  ;;  %v18811_v23 = vld [vmem:[%s28272_s6 + $0x12d4] sm:$0xf0]  ;;  %v16956_v31 = vld [vmem:[%s28272_s6 + $0x12c0] sm:$0xf]  ;;  %v18809_v43 = vld [vmem:[%s28272_s6 + $0x12c4] sm:$0xf0] }
 0x405   :  { %10684 = vmatpush.bf16.msra.mxu3 %v17109_v32  ;;  %v16900_v32 = vld [vmem:[%s28272_s6 + $0x1250] sm:$0xf]  ;;  %v339_v36 = vld.sshfl [vmem:[#allocation1 + $0x38] sm:$0xff pattern:$0x73625140] }
 0x406   :  { %10640 = vmatmul.bf16.vlgmr.msrb.gmra.mxu3 %v25622_v20  ;;  %10601 = vmatmul.bf16.vlgmr.msrb.gmra.mxu0 %v25630_v63 }
 0x407   :  { %10645 = vmatpush.bf16.msra.mxu0 %v16917_v27  ;;  %10614 = vmatmul.bf16.vlgmr.msrb.gmra.mxu1 %v25638_v12  ;;  %v16901_v27 = vor.u32 %v18795_v7, %v16900_v32  ;;  %v16957_v32 = vor.u32 %v18809_v43, %v16956_v31  ;;  %v16884_v7 = vld [vmem:[%s28272_s6 + $0x1230] sm:$0xf]  ;;  %v16876_v43 = vld [vmem:[%s28272_s6 + $0x1220] sm:$0xf] }
 0x408   :  { %10658 = vmatpush.bf16.msra.mxu1 %v16981_v47  ;;  %10672 = vmatpush.bf16.msra.mxu2 %v17037_v54  ;;  %v16965_v47 = vor.u32 %v18811_v23, %v16964_v37  ;;  %v17021_v54 = vor.u32 %v18825_v3, %v17020_v29  ;;  %v10407_v23 = vpop.f32.mrf.mxu1  ;;  %v16948_v29 = vld [vmem:[%s28272_s6 + $0x12b0] sm:$0xf]  ;;  %v18807_v3 = vld [vmem:[%s28272_s6 + $0x12b4] sm:$0xf0]  ;;  %v17292_v12 = vld [vmem:[%s28272_s6 + $0x1560] sm:$0xf] }
 0x409   :  { %10685 = vmatpush.bf16.msra.mxu3 %v17101_v42  ;;  %v17085_v42 = vor.u32 %v18841_v55, %v17084_v38  ;;  %v17004_v38 = vld [vmem:[%s28272_s6 + $0x1320] sm:$0xf]  ;;  %v16949_v31 = vor.u32 %v18807_v3, %v16948_v29  ;;  %v18787_v3 = vld [vmem:[%s28272_s6 + $0x1214] sm:$0xf0] }
 0x40b   :  { %10646 = vmatpush.bf16.msra.mxu0 %v16909_v34  ;;  %v16893_v34 = vor.u32 %v18793_v52, %v16892_v58  ;;  %v17068_v58 = vld [vmem:[%s28272_s6 + $0x13a0] sm:$0xf]  ;;  %v18837_v52 = vld [vmem:[%s28272_s6 + $0x13a4] sm:$0xf0] }
 0x40c   :  { %10659 = vmatpush.bf16.msra.mxu1 %v16973_v51  ;;  %10673 = vmatpush.bf16.msra.mxu2 %v17029_v48  ;;  %v10394_v51 = vpop.f32.mrf.mxu0  ;;  %v18791_v48 = vld [vmem:[%s28272_s6 + $0x1234] sm:$0xf0] }
 0x40d   :  { %10686 = vmatpush.bf16.msra.mxu3 %v17093_v9  ;;  %v10395_v37 = vadd.f32 %v10394_v51, %v25540_v49  ;;  %v17013_v9 = vor.u32 %v18823_v4, %v17012_v44  ;;  %v18821_v49 = vld [vmem:[%s28272_s6 + $0x1324] sm:$0xf0]  ;;  %v16940_v44 = vld [vmem:[%s28272_s6 + $0x12a0] sm:$0xf]  ;;  %v16996_v51 = vld [vmem:[%s28272_s6 + $0x1310] sm:$0xf] }
 0x40f   :  { %10647 = vmatpush.bf16.msra.mxu0 %v16901_v27  ;;  %v17077_v27 = vor.u32 %v18839_v0, %v17076_v59  ;;  %v10408_v55 = vadd.f32 %v10407_v23, %v10395_v37  ;;  %v17005_v59 = vor.u32 %v18821_v49, %v17004_v38  ;;  %v18805_v0 = vld [vmem:[%s28272_s6 + $0x12a4] sm:$0xf0]  ;;  %v18835_v37 = vld [vmem:[%s28272_s6 + $0x1394] sm:$0xf0]  ;;  %v16868_v23 = vld [vmem:[%s28272_s6 + $0x1210] sm:$0xf] }
 0x410   :  { %10660 = vmatpush.bf16.msra.mxu1 %v16965_v47  ;;  %10674 = vmatpush.bf16.msra.mxu2 %v17021_v54  ;;  %v16885_v47 = vor.u32 %v18791_v48, %v16884_v7  ;;  %v10420_v54 = vpop.f32.mrf.mxu2  ;;  %v17069_v7 = vor.u32 %v18837_v52, %v17068_v58  ;;  %v17060_v48 = vld [vmem:[%s28272_s6 + $0x1390] sm:$0xf]  ;;  %v16941_v49 = vor.u32 %v18805_v0, %v16940_v44  ;;  %v18817_v58 = vld [vmem:[%s28272_s6 + $0x1304] sm:$0xf0]  ;;  %v10409_v44 = vpop.f32.mrf.mxu1  ;;  %v18911_v0 = vld [vmem:[%s28272_s6 + $0x15f4] sm:$0xf0] }
 0x411   :  { %10687 = vmatpush.bf16.msra.mxu3 %v17085_v42  ;;  %v18789_v42 = vld [vmem:[%s28272_s6 + $0x1224] sm:$0xf0]  ;;  %v10421_v4 = vadd.f32 %v10420_v54, %v10408_v55  ;;  %v277_v38 = vld [vmem:[%s28267_s1 + $0x50] sm:$0xff]  ;;  %v18803_v55 = vld [vmem:[%s28272_s6 + $0x1294] sm:$0xf0] }
 0x412   :  { %v16877_v29 = vor.u32 %v18789_v42, %v16876_v43  ;;  %v18833_v43 = vld [vmem:[%s28272_s6 + $0x1384] sm:$0xf0]  ;;  %v17300_v42 = vld [vmem:[%s28272_s6 + $0x1570] sm:$0xf]  ;;  %340 = vst [vmem:[#allocation1] ss:$4 sm:$0xff] %v277_v38 }
 0x413   :  { %10648 = vmatpush.bf16.msra.mxu0 %v16893_v34  ;;  %v10433_v34 = vpop.f32.mrf.mxu3  ;;  %v18801_v38 = vld [vmem:[%s28272_s6 + $0x1284] sm:$0xf0]  ;;  %v18863_v44 = vld [vmem:[%s28272_s6 + $0x1474] sm:$0xf0] }
 0x414   :  { %10661 = vmatpush.bf16.msra.mxu1 %v16957_v32  ;;  %10675 = vmatpush.bf16.msra.mxu2 %v17013_v9  ;;  %v18819_v32 = vld [vmem:[%s28272_s6 + $0x1314] sm:$0xf0]  ;;  %v25756_v9 = vadd.f32 %v10433_v34, %v10421_v4  ;;  %v10396_v52 = vpop.f32.mrf.mxu0  ;;  %v17061_v4 = vor.u32 %v18835_v37, %v17060_v48  ;;  %v16924_v48 = vld [vmem:[%s28272_s6 + $0x1280] sm:$0xf] }
 0x415   :  { %10688 = vmatpush.bf16.msra.mxu3 %v17077_v27  ;;  %v16932_v27 = vld [vmem:[%s28272_s6 + $0x1290] sm:$0xf]  ;;  %v16997_v54 = vor.u32 %v18819_v32, %v16996_v51  ;;  %v18895_v34 = vld [vmem:[%s28272_s6 + $0x1574] sm:$0xf0]  ;;  %v16869_v51 = vor.u32 %v18787_v3, %v16868_v23  ;;  %v16860_v32 = vld [vmem:[%s28272_s6 + $0x1200] sm:$0xf]  ;;  %v16925_v20 = vor.u32 %v18801_v38, %v16924_v48 }
 0x416   :  { %v16933_v37 = vor.u32 %v18803_v55, %v16932_v27  ;;  %v17172_v52 = vld [vmem:[%s28272_s6 + $0x1470] sm:$0xf]  ;;  %v17301_v30 = vor.u32 %v18895_v34, %v17300_v42  ;;  %v18909_v42 = vld [vmem:[%s28272_s6 + $0x15e4] sm:$0xf0]  ;;  %v17228_v48 = vld [vmem:[%s28272_s6 + $0x14e0] sm:$0xf] }
 0x417   :  { %10649 = vmatpush.bf16.msra.mxu0 %v16885_v47  ;;  %v16988_v47 = vld [vmem:[%s28272_s6 + $0x1300] sm:$0xf]  ;;  %v17236_v27 = vld [vmem:[%s28272_s6 + $0x14f0] sm:$0xf] }
 0x418   :  { %10662 = vmatpush.bf16.msra.mxu1 %v16949_v31  ;;  %10676 = vmatpush.bf16.msra.mxu2 %v17005_v59  ;;  %v17052_v31 = vld [vmem:[%s28272_s6 + $0x1380] sm:$0xf]  ;;  %v17364_v59 = vld [vmem:[%s28272_s6 + $0x15f0] sm:$0xf]  ;;  %v10422_v23 = vpop.f32.mrf.mxu2  ;;  %v16989_v3 = vor.u32 %v18817_v58, %v16988_v47  ;;  %v18879_v47 = vld [vmem:[%s28272_s6 + $0x14f4] sm:$0xf0] }
 0x419   :  { %10689 = vmatpush.bf16.msra.mxu3 %v17069_v7  ;;  %v18785_v7 = vld [vmem:[%s28272_s6 + $0x1204] sm:$0xf0]  ;;  %v17053_v55 = vor.u32 %v18833_v43, %v17052_v31  ;;  %v336_v58 = vld.sshfl [vmem:[#allocation1 + $0x20] sm:$0xff pattern:$0x73625140]  ;;  %v17237_v34 = vor.u32 %v18879_v47, %v17236_v27 }
 0x41a   :  { %v16861_v23 = vor.u32 %v18785_v7, %v16860_v32  ;;  %v18893_v31 = vld [vmem:[%s28272_s6 + $0x1564] sm:$0xf0]  ;;  %v17356_v43 = vld [vmem:[%s28272_s6 + $0x15e0] sm:$0xf]  ;;  %v25837_v32 = vpack.c.bf16 %v339_v36, %v339_v36  ;;  %v17284_v36 = vld [vmem:[%s28272_s6 + $0x1550] sm:$0xf] }
 0x41b   :  { %10650 = vmatpush.bf16.msra.mxu0 %v16877_v29  ;;  %v338_v29 = vld.sshfl [vmem:[#allocation1 + $0x30] sm:$0xff pattern:$0x73625140]  ;;  %v18861_v7 = vld [vmem:[%s28272_s6 + $0x1464] sm:$0xf0]  ;;  %v17293_v38 = vor.u32 %v18893_v31, %v17292_v12 }
 0x41c   :  { %10663 = vmatpush.bf16.msra.mxu1 %v16941_v49  ;;  %10677 = vmatpush.bf16.msra.mxu2 %v16997_v54  ;;  %v10435_v49 = vpop.f32.mrf.mxu3  ;;  %v17365_v54 = vor.u32 %v18911_v0, %v17364_v59  ;;  %v25821_v63 = vpack.c.bf16 %v338_v29, %v338_v29  ;;  %v337_v59 = vld.sshfl [vmem:[#allocation1 + $0x28] sm:$0xff pattern:$0x73625140]  ;;  %v17164_v0 = vld [vmem:[%s28272_s6 + $0x1460] sm:$0xf] }
 0x41d   :  { %10690 = vmatpush.bf16.msra.mxu3 %v17061_v4  ;;  %v17173_v4 = vor.u32 %v18863_v44, %v17172_v52  ;;  %v25852_v29 = vpack.c.bf16 %v337_v59, %v337_v59  ;;  %v17348_v52 = vld [vmem:[%s28272_s6 + $0x15d0] sm:$0xf]  ;;  %v18907_v12 = vld [vmem:[%s28272_s6 + $0x15d4] sm:$0xf0]  ;;  %v17165_v44 = vor.u32 %v18861_v7, %v17164_v0  ;;  %v18889_v31 = vld [vmem:[%s28272_s6 + $0x1544] sm:$0xf0] }
 0x41e   :  { %v17156_v27 = vld [vmem:[%s28272_s6 + $0x1450] sm:$0xf]  ;;  %v18859_v49 = vld [vmem:[%s28272_s6 + $0x1454] sm:$0xf0]  ;;  %v17148_v59 = vld [vmem:[%s28272_s6 + $0x1440] sm:$0xf] }
 0x41f   :  { %10651 = vmatpush.bf16.msra.mxu0 %v16869_v51  ;;  %v25835_v51 = vpack.c.bf16 %v336_v58, %v336_v58  ;;  %28313 = vst [vmem:[#allocation12_spill] sm:$0xff] %v25852_v29  ;;  %v18875_v47 = vld [vmem:[%s28272_s6 + $0x14d4] sm:$0xf0]  ;;  %v18857_v0 = vld [vmem:[%s28272_s6 + $0x1444] sm:$0xf0] }
 0x420   :  { %10664 = vmatpush.bf16.msra.mxu1 %v16933_v37  ;;  %10678 = vmatpush.bf16.msra.mxu2 %v16989_v3  ;;  %v18877_v37 = vld [vmem:[%s28272_s6 + $0x14e4] sm:$0xf0]  ;;  %v18891_v3 = vld [vmem:[%s28272_s6 + $0x1554] sm:$0xf0]  ;;  %v17212_v7 = vld [vmem:[%s28272_s6 + $0x14c0] sm:$0xf] }
 0x421   :  { %10691 = vmatpush.bf16.msra.mxu3 %v17053_v55  ;;  %28312 = vst [vmem:[#allocation18_spill] sm:$0xff] %v25835_v51  ;;  %v17220_v55 = vld [vmem:[%s28272_s6 + $0x14d0] sm:$0xf]  ;;  %v17285_v58 = vor.u32 %v18891_v3, %v17284_v36  ;;  %v18887_v36 = vld [vmem:[%s28272_s6 + $0x1534] sm:$0xf0] }
 0x422   :  { %v17332_v3 = vld [vmem:[%s28272_s6 + $0x15b0] sm:$0xf] }
 0x423   :  { %10652 = vmatpush.bf16.msra.mxu0 %v16861_v23  ;;  %10679 = vmatmul.bf16.vlgmr.msra.gmra.mxu2 %v25821_v63  ;;  %v17276_v23 = vld [vmem:[%s28272_s6 + $0x1540] sm:$0xf] }
 0x424   :  { %10723 = vmatpush.bf16.msrb.mxu2 %v17301_v30  ;;  %v17357_v30 = vor.u32 %v18909_v42, %v17356_v43  ;;  %10665 = vmatpush.bf16.msra.mxu1 %v16925_v20  ;;  %v17229_v20 = vor.u32 %v18877_v37, %v17228_v48  ;;  %v17340_v43 = vld [vmem:[%s28272_s6 + $0x15c0] sm:$0xf]  ;;  %v18905_v42 = vld [vmem:[%s28272_s6 + $0x15c4] sm:$0xf0]  ;;  %v17277_v37 = vor.u32 %v18889_v31, %v17276_v23 }
 0x425   :  { %10736 = vmatpush.bf16.msrb.mxu3 %v17365_v54  ;;  %v17349_v54 = vor.u32 %v18907_v12, %v17348_v52  ;;  %v18873_v48 = vld [vmem:[%s28272_s6 + $0x14c4] sm:$0xf0]  ;;  %v18903_v52 = vld [vmem:[%s28272_s6 + $0x15b4] sm:$0xf0]  ;;  %v10446_v12 = vpop.f32.mrf.mxu0 }
 0x426   :  { %10653 = vmatmul.bf16.vlgmr.msra.gmra.mxu0 %v25835_v51  ;;  %10692 = vmatmul.bf16.vlgmr.msra.gmra.mxu3 %v25837_v32  ;;  %v17333_v31 = vor.u32 %v18903_v52, %v17332_v3  ;;  %v341_v51 = vld.sshfl [vmem:[#allocation1] sm:$0xff pattern:$0x73625140] }
 0x427   :  { %10697 = vmatpush.bf16.msrb.mxu0 %v17173_v4  ;;  %10666 = vmatmul.bf16.vlgmr.msra.gmra.mxu1 %v25852_v29  ;;  %v17157_v4 = vor.u32 %v18859_v49, %v17156_v27  ;;  %v17140_v27 = vld [vmem:[%s28272_s6 + $0x1430] sm:$0xf]  ;;  %v10447_v49 = vadd.f32 %v10446_v12, %v25756_v9  ;;  %v17260_v9 = vld [vmem:[%s28272_s6 + $0x1520] sm:$0xf] }
 0x428   :  { %10710 = vmatpush.bf16.msrb.mxu1 %v17237_v34  ;;  %10724 = vmatpush.bf16.msrb.mxu2 %v17293_v38  ;;  %v17221_v34 = vor.u32 %v18875_v47, %v17220_v55  ;;  %v17341_v38 = vor.u32 %v18905_v42, %v17340_v43  ;;  %v18855_v55 = vld [vmem:[%s28272_s6 + $0x1434] sm:$0xf0]  ;;  %v17204_v47 = vld [vmem:[%s28272_s6 + $0x14b0] sm:$0xf]  ;;  %v18885_v42 = vld [vmem:[%s28272_s6 + $0x1524] sm:$0xf0] }
 0x429   :  { %10737 = vmatpush.bf16.msrb.mxu3 %v17357_v30  ;;  %v17268_v30 = vld [vmem:[%s28272_s6 + $0x1530] sm:$0xf]  ;;  %v10485_v3 = vpop.f32.mrf.mxu3  ;;  %v17261_v52 = vor.u32 %v18885_v42, %v17260_v9  ;;  %v18867_v9 = vld [vmem:[%s28272_s6 + $0x1494] sm:$0xf0]  ;;  %v17244_v42 = vld [vmem:[%s28272_s6 + $0x1500] sm:$0xf] }
 0x42a   :  { %v17269_v23 = vor.u32 %v18887_v36, %v17268_v30  ;;  %v17196_v30 = vld [vmem:[%s28272_s6 + $0x14a0] sm:$0xf]  ;;  %v18869_v36 = vld [vmem:[%s28272_s6 + $0x14a4] sm:$0xf0] }
 0x42b   :  { %10698 = vmatpush.bf16.msrb.mxu0 %v17165_v44  ;;  %v17149_v44 = vor.u32 %v18857_v0, %v17148_v59  ;;  %v10472_v59 = vpop.f32.mrf.mxu2  ;;  %v17141_v0 = vor.u32 %v18855_v55, %v17140_v27  ;;  %v18899_v55 = vld [vmem:[%s28272_s6 + $0x1594] sm:$0xf0] }
 0x42c   :  { %10711 = vmatpush.bf16.msrb.mxu1 %v17229_v20  ;;  %10725 = vmatpush.bf16.msrb.mxu2 %v17285_v58  ;;  %v17213_v20 = vor.u32 %v18873_v48, %v17212_v7  ;;  %v18871_v58 = vld [vmem:[%s28272_s6 + $0x14b4] sm:$0xf0]  ;;  %v17132_v48 = vld [vmem:[%s28272_s6 + $0x1420] sm:$0xf] }
 0x42d   :  { %10738 = vmatpush.bf16.msrb.mxu3 %v17349_v54  ;;  %v10459_v54 = vpop.f32.mrf.mxu1  ;;  %v17205_v7 = vor.u32 %v18871_v58, %v17204_v47  ;;  %v17124_v47 = vld [vmem:[%s28272_s6 + $0x1410] sm:$0xf] }
 0x42e   :  { %v10460_v43 = vadd.f32 %v10459_v54, %v10447_v49  ;;  %v17316_v49 = vld [vmem:[%s28272_s6 + $0x1590] sm:$0xf]  ;;  %v17197_v54 = vor.u32 %v18869_v36, %v17196_v30  ;;  %v18270_v30 = vld [vmem:[%s28272_s6 + $0x1f4] sm:$0xf]  ;;  %v14806_v36 = vld [vmem:[%s28272_s6 + $0x1f8] sm:$0xf0] }
 0x42f   :  { %10699 = vmatpush.bf16.msrb.mxu0 %v17157_v4  ;;  %v17324_v4 = vld [vmem:[%s28272_s6 + $0x15a0] sm:$0xf]  ;;  %v14809_v29 = vor.u32 %v18270_v30, %v14806_v36  ;;  %v14798_v30 = vld [vmem:[%s28272_s6 + $0x1e8] sm:$0xf0] }
 0x430   :  { %10712 = vmatpush.bf16.msrb.mxu1 %v17221_v34  ;;  %10726 = vmatpush.bf16.msrb.mxu2 %v17277_v37  ;;  %v18901_v34 = vld [vmem:[%s28272_s6 + $0x15a4] sm:$0xf0]  ;;  %v10473_v37 = vadd.f32 %v10472_v59, %v10460_v43  ;;  %v10448_v43 = vpop.f32.mrf.mxu0 }
 0x431   :  { %10739 = vmatpush.bf16.msrb.mxu3 %v17341_v38  ;;  %v18853_v38 = vld [vmem:[%s28272_s6 + $0x1424] sm:$0xf0]  ;;  %v17325_v12 = vor.u32 %v18901_v34, %v17324_v4  ;;  %v17308_v34 = vld [vmem:[%s28272_s6 + $0x1580] sm:$0xf] }
 0x432   :  { %v25957_v27 = vadd.f32 %v10485_v3, %v10473_v37  ;;  %v17133_v58 = vor.u32 %v18853_v38, %v17132_v48  ;;  %v18881_v4 = vld [vmem:[%s28272_s6 + $0x1504] sm:$0xf0]  ;;  %v18254_v48 = vld [vmem:[%s28272_s6 + $0x174] sm:$0xf]  ;;  %v14742_v37 = vld [vmem:[%s28272_s6 + $0x178] sm:$0xf0] }
 0x433   :  { %10700 = vmatpush.bf16.msrb.mxu0 %v17149_v44  ;;  %v17252_v44 = vld [vmem:[%s28272_s6 + $0x1510] sm:$0xf]  ;;  %v17116_v3 = vld [vmem:[%s28272_s6 + $0x1400] sm:$0xf] }
 0x434   :  { %10713 = vmatpush.bf16.msrb.mxu1 %v17213_v20  ;;  %10727 = vmatpush.bf16.msrb.mxu2 %v17269_v23  ;;  %v18883_v20 = vld [vmem:[%s28272_s6 + $0x1514] sm:$0xf0]  ;;  %v343_v43 = vld.sshfl [vmem:[#allocation1 + $0x10] sm:$0xff pattern:$0x73625140] }
 0x435   :  { %10740 = vmatpush.bf16.msrb.mxu3 %v17333_v31  ;;  %v18851_v23 = vld [vmem:[%s28272_s6 + $0x1414] sm:$0xf0]  ;;  %v17188_v31 = vld [vmem:[%s28272_s6 + $0x1490] sm:$0xf]  ;;  %v17253_v59 = vor.u32 %v18883_v20, %v17252_v44  ;;  %v10461_v38 = vpop.f32.mrf.mxu1  ;;  %v18849_v44 = vld [vmem:[%s28272_s6 + $0x1404] sm:$0xf0] }
 0x436   :  { %v17180_v20 = vld [vmem:[%s28272_s6 + $0x1480] sm:$0xf]  ;;  %v10487_v38 = vpop.f32.mrf.mxu3  ;;  %v342_v36 = vld.sshfl [vmem:[#allocation1 + $0x8] sm:$0xff pattern:$0x73625140] }
 0x437   :  { %10701 = vmatpush.bf16.msrb.mxu0 %v17141_v0  ;;  %v17317_v0 = vor.u32 %v18899_v55, %v17316_v49  ;;  %v18865_v49 = vld [vmem:[%s28272_s6 + $0x1484] sm:$0xf0]  ;;  %v10474_v55 = vpop.f32.mrf.mxu2 }
 0x438   :  { %10714 = vmatpush.bf16.msrb.mxu1 %v17205_v7  ;;  %10728 = vmatpush.bf16.msrb.mxu2 %v17261_v52  ;;  %v18897_v7 = vld [vmem:[%s28272_s6 + $0x1584] sm:$0xf0]  ;;  %v17125_v52 = vor.u32 %v18851_v23, %v17124_v47  ;;  %v17245_v47 = vor.u32 %v18881_v4, %v17244_v42  ;;  %v14614_v23 = vld [vmem:[%s28272_s6 + $0x78] sm:$0xf0]  ;;  %v14745_v55 = vor.u32 %v18254_v48, %v14742_v37 }
 0x439   :  { %10741 = vmatpush.bf16.msrb.mxu3 %v17325_v12  ;;  %v17189_v12 = vor.u32 %v18867_v9, %v17188_v31  ;;  %v18238_v31 = vld [vmem:[%s28272_s6 + $0xf4] sm:$0xf]  ;;  %v14678_v9 = vld [vmem:[%s28272_s6 + $0xf8] sm:$0xf0]  ;;  %v17117_v42 = vor.u32 %v18849_v44, %v17116_v3  ;;  %v17181_v4 = vor.u32 %v18865_v49, %v17180_v20  ;;  %v26034_v48 = vpack.c.bf16 %v343_v43, %v343_v43  ;;  %v14606_v44 = vld [vmem:[%s28272_s6 + $0x68] sm:$0xf0] }
 0x43a   :  { %v14681_v3 = vor.u32 %v18238_v31, %v14678_v9  ;;  %v26047_v20 = vpack.c.bf16 %v341_v51, %v341_v51  ;;  %v18236_v43 = vld [vmem:[%s28272_s6 + $0xe4] sm:$0xf]  ;;  %v14726_v51 = vld [vmem:[%s28272_s6 + $0x158] sm:$0xf0]  ;;  %v18266_v31 = vld [vmem:[%s28272_s6 + $0x1d4] sm:$0xf] }
 0x43b   :  { %10702 = vmatpush.bf16.msrb.mxu0 %v17133_v58  ;;  %v18222_v58 = vld [vmem:[%s28272_s6 + $0x74] sm:$0xf]  ;;  %v14790_v9 = vld [vmem:[%s28272_s6 + $0x1d8] sm:$0xf0] }
 0x43c   :  { %10715 = vmatpush.bf16.msrb.mxu1 %v17197_v54  ;;  %10729 = vmatpush.bf16.msrb.mxu2 %v17253_v59  ;;  %v17309_v54 = vor.u32 %v18897_v7, %v17308_v34  ;;  %v344_v59 = vld.sshfl [vmem:[#allocation1 + $0x18] sm:$0xff pattern:$0x73625140]  ;;  %v18252_v34 = vld [vmem:[%s28272_s6 + $0x164] sm:$0xf]  ;;  %v14617_v37 = vor.u32 %v18222_v58, %v14614_v23 }
 0x43d   :  { %10742 = vmatpush.bf16.msrb.mxu3 %v17317_v0  ;;  %v14734_v0 = vld [vmem:[%s28272_s6 + $0x168] sm:$0xf0]  ;;  %v18268_v7 = vld [vmem:[%s28272_s6 + $0x1e4] sm:$0xf] }
 0x43e   :  { %v14737_v49 = vor.u32 %v18252_v34, %v14734_v0  ;;  %v14670_v58 = vld [vmem:[%s28272_s6 + $0xe8] sm:$0xf0]  ;;  %v14662_v34 = vld [vmem:[%s28272_s6 + $0xd8] sm:$0xf0]  ;;  %v14793_v0 = vor.u32 %v18266_v31, %v14790_v9  ;;  %v18262_v9 = vld [vmem:[%s28272_s6 + $0x1b4] sm:$0xf] }
 0x43f   :  { %10703 = vmatpush.bf16.msrb.mxu0 %v17125_v52  ;;  %v26039_v52 = vpack.c.bf16 %v344_v59, %v344_v59  ;;  %v14673_v38 = vor.u32 %v18236_v43, %v14670_v58  ;;  %v14598_v59 = vld [vmem:[%s28272_s6 + $0x58] sm:$0xf0]  ;;  %v18232_v58 = vld [vmem:[%s28272_s6 + $0xc4] sm:$0xf] }
 0x440   :  { %10716 = vmatpush.bf16.msrb.mxu1 %v17189_v12  ;;  %10730 = vmatpush.bf16.msrb.mxu2 %v17245_v47  ;;  %v18220_v12 = vld [vmem:[%s28272_s6 + $0x64] sm:$0xf]  ;;  %v14801_v47 = vor.u32 %v18268_v7, %v14798_v30 }
 0x441   :  { %10743 = vmatpush.bf16.msrb.mxu3 %v17309_v54  ;;  %v26055_v54 = vpack.c.bf16 %v342_v36, %v342_v36  ;;  %v14609_v23 = vor.u32 %v18220_v12, %v14606_v44  ;;  %v18248_v7 = vld [vmem:[%s28272_s6 + $0x144] sm:$0xf] }
 0x442   :  { %v18264_v36 = vld [vmem:[%s28272_s6 + $0x1c4] sm:$0xf] }
 0x443   :  { %10704 = vmatpush.bf16.msrb.mxu0 %v17117_v42  ;;  %10731 = vmatmul.bf16.vlgmr.msrb.gmra.mxu2 %v26034_v48  ;;  %v18216_v44 = vld [vmem:[%s28272_s6 + $0x44] sm:$0xf] }
 0x444   :  { %10775 = vmatpush.bf16.msra.mxu2 %v14745_v55  ;;  %10717 = vmatpush.bf16.msrb.mxu1 %v17181_v4  ;;  %v18218_v55 = vld [vmem:[%s28272_s6 + $0x54] sm:$0xf] }
 0x445   :  { %10788 = vmatpush.bf16.msra.mxu3 %v14809_v29  ;;  %v18250_v29 = vld [vmem:[%s28272_s6 + $0x154] sm:$0xf]  ;;  %v14601_v30 = vor.u32 %v18218_v55, %v14598_v59  ;;  %v10498_v55 = vpop.f32.mrf.mxu0 }
 0x446   :  { %10744 = vmatmul.bf16.vlgmr.msrb.gmra.mxu3 %v26039_v52  ;;  %10705 = vmatmul.bf16.vlgmr.msrb.gmra.mxu0 %v26047_v20  ;;  %v14729_v42 = vor.u32 %v18250_v29, %v14726_v51  ;;  %v18234_v4 = vld [vmem:[%s28272_s6 + $0xd4] sm:$0xf] }
 0x447   :  { %10749 = vmatpush.bf16.msra.mxu0 %v14617_v37  ;;  %10718 = vmatmul.bf16.vlgmr.msrb.gmra.mxu1 %v26055_v54  ;;  %v14718_v37 = vld [vmem:[%s28272_s6 + $0x148] sm:$0xf0]  ;;  %v14665_v12 = vor.u32 %v18234_v4, %v14662_v34  ;;  %v18246_v51 = vld [vmem:[%s28272_s6 + $0x134] sm:$0xf]  ;;  %v14582_v4 = vld [vmem:[%s28272_s6 + $0x38] sm:$0xf0]  ;;  %v10499_v34 = vadd.f32 %v10498_v55, %v25957_v27 }
 0x448   :  { %10762 = vmatpush.bf16.msra.mxu1 %v14681_v3  ;;  %10776 = vmatpush.bf16.msra.mxu2 %v14737_v49  ;;  %v14782_v3 = vld [vmem:[%s28272_s6 + $0x1c8] sm:$0xf0]  ;;  %v14721_v43 = vor.u32 %v18248_v7, %v14718_v37  ;;  %v18230_v37 = vld [vmem:[%s28272_s6 + $0xb4] sm:$0xf] }
 0x449   :  { %10789 = vmatpush.bf16.msra.mxu3 %v14801_v47  ;;  %v14590_v49 = vld [vmem:[%s28272_s6 + $0x48] sm:$0xf0]  ;;  %v14785_v29 = vor.u32 %v18264_v36, %v14782_v3  ;;  %v18244_v3 = vld [vmem:[%s28272_s6 + $0x124] sm:$0xf] }
 0x44a   :  { %v14654_v47 = vld [vmem:[%s28272_s6 + $0xc8] sm:$0xf0]  ;;  %v14593_v31 = vor.u32 %v18216_v44, %v14590_v49  ;;  %v18260_v49 = vld [vmem:[%s28272_s6 + $0x1a4] sm:$0xf] }
 0x44b   :  { %10750 = vmatpush.bf16.msra.mxu0 %v14609_v23  ;;  %v14710_v23 = vld [vmem:[%s28272_s6 + $0x138] sm:$0xf0]  ;;  %v14657_v59 = vor.u32 %v18232_v58, %v14654_v47  ;;  %v14702_v27 = vld [vmem:[%s28272_s6 + $0x128] sm:$0xf0]  ;;  %v10524_v58 = vpop.f32.mrf.mxu2 }
 0x44c   :  { %10763 = vmatpush.bf16.msra.mxu1 %v14673_v38  ;;  %10777 = vmatpush.bf16.msra.mxu2 %v14729_v42  ;;  %v14774_v38 = vld [vmem:[%s28272_s6 + $0x1b8] sm:$0xf0]  ;;  %v18214_v42 = vld [vmem:[%s28272_s6 + $0x34] sm:$0xf]  ;;  %v14713_v7 = vor.u32 %v18246_v51, %v14710_v23  ;;  %v14574_v51 = vld [vmem:[%s28272_s6 + $0x28] sm:$0xf0] }
 0x44d   :  { %10790 = vmatpush.bf16.msra.mxu3 %v14793_v0  ;;  %v10511_v0 = vpop.f32.mrf.mxu1  ;;  %v14777_v36 = vor.u32 %v18262_v9, %v14774_v38  ;;  %v14585_v44 = vor.u32 %v18214_v42, %v14582_v4  ;;  %v14705_v9 = vor.u32 %v18244_v3, %v14702_v27  ;;  %v18228_v38 = vld [vmem:[%s28272_s6 + $0xa4] sm:$0xf]  ;;  %v14638_v55 = vld [vmem:[%s28272_s6 + $0xa8] sm:$0xf0]  ;;  %v18242_v42 = vld [vmem:[%s28272_s6 + $0x114] sm:$0xf]  ;;  %v10500_v27 = vpop.f32.mrf.mxu0 }
 0x44e   :  { %v14694_v4 = vld [vmem:[%s28272_s6 + $0x118] sm:$0xf0] }
 0x44f   :  { %10751 = vmatpush.bf16.msra.mxu0 %v14601_v30  ;;  %v14646_v30 = vld [vmem:[%s28272_s6 + $0xb8] sm:$0xf0] }
 0x450   :  { %10764 = vmatpush.bf16.msra.mxu1 %v14665_v12  ;;  %10778 = vmatpush.bf16.msra.mxu2 %v14721_v43  ;;  %v10512_v12 = vadd.f32 %v10511_v0, %v10499_v34  ;;  %v14766_v43 = vld [vmem:[%s28272_s6 + $0x1a8] sm:$0xf0]  ;;  %v14649_v47 = vor.u32 %v18230_v37, %v14646_v30  ;;  %v14758_v37 = vld [vmem:[%s28272_s6 + $0x198] sm:$0xf0]  ;;  %v14641_v30 = vor.u32 %v18228_v38, %v14638_v55  ;;  %v18334_v55 = vld [vmem:[%s28272_s6 + $0x3f4] sm:$0xf] }
 0x451   :  { %10791 = vmatpush.bf16.msra.mxu3 %v14785_v29  ;;  %v18212_v29 = vld [vmem:[%s28272_s6 + $0x24] sm:$0xf]  ;;  %v14566_v3 = vld [vmem:[%s28272_s6 + $0x18] sm:$0xf0] }
 0x452   :  { %v10525_v23 = vadd.f32 %v10524_v58, %v10512_v12  ;;  %v14577_v0 = vor.u32 %v18212_v29, %v14574_v51  ;;  %v14697_v12 = vor.u32 %v18242_v42, %v14694_v4  ;;  %v14686_v29 = vld [vmem:[%s28272_s6 + $0x108] sm:$0xf0]  ;;  %v18256_v51 = vld [vmem:[%s28272_s6 + $0x184] sm:$0xf]  ;;  %v14998_v38 = vld [vmem:[%s28272_s6 + $0x378] sm:$0xf0] }
 0x453   :  { %10752 = vmatpush.bf16.msra.mxu0 %v14593_v31  ;;  %v10537_v31 = vpop.f32.mrf.mxu3  ;;  %v15062_v42 = vld [vmem:[%s28272_s6 + $0x3f8] sm:$0xf0]  ;;  %v18208_v4 = vld [vmem:[%s28272_s6 + $0x4] sm:$0xf] }
 0x454   :  { %10765 = vmatpush.bf16.msra.mxu1 %v14657_v59  ;;  %10779 = vmatpush.bf16.msra.mxu2 %v14713_v7  ;;  %v14769_v59 = vor.u32 %v18260_v49, %v14766_v43  ;;  %v26164_v34 = vadd.f32 %v10537_v31, %v10525_v23  ;;  %v18258_v7 = vld [vmem:[%s28272_s6 + $0x194] sm:$0xf]  ;;  %v14630_v49 = vld [vmem:[%s28272_s6 + $0x98] sm:$0xf0]  ;;  %v18240_v43 = vld [vmem:[%s28272_s6 + $0x104] sm:$0xf] }
 0x455   :  { %10792 = vmatpush.bf16.msra.mxu3 %v14777_v36  ;;  %v18210_v36 = vld [vmem:[%s28272_s6 + $0x14] sm:$0xf]  ;;  %v10513_v58 = vpop.f32.mrf.mxu1  ;;  %v14750_v23 = vld [vmem:[%s28272_s6 + $0x188] sm:$0xf0] }
 0x456   :  { %v14569_v31 = vor.u32 %v18210_v36, %v14566_v3  ;;  %v14622_v36 = vld [vmem:[%s28272_s6 + $0x88] sm:$0xf0]  ;;  %v18286_v3 = vld [vmem:[%s28272_s6 + $0x274] sm:$0xf]  ;;  %v14934_v58 = vld [vmem:[%s28272_s6 + $0x2f8] sm:$0xf0] }
 0x457   :  { %10753 = vmatpush.bf16.msra.mxu0 %v14585_v44  ;;  %v18226_v44 = vld [vmem:[%s28272_s6 + $0x94] sm:$0xf] }
 0x458   :  { %10766 = vmatpush.bf16.msra.mxu1 %v14649_v47  ;;  %10780 = vmatpush.bf16.msra.mxu2 %v14705_v9  ;;  %v14761_v47 = vor.u32 %v18258_v7, %v14758_v37  ;;  %v18318_v9 = vld [vmem:[%s28272_s6 + $0x374] sm:$0xf]  ;;  %v10526_v7 = vpop.f32.mrf.mxu2  ;;  %v14689_v37 = vor.u32 %v18240_v43, %v14686_v29  ;;  %v15065_v29 = vor.u32 %v18334_v55, %v15062_v42  ;;  %v14862_v42 = vld [vmem:[%s28272_s6 + $0x268] sm:$0xf0] }
 0x459   :  { %10793 = vmatpush.bf16.msra.mxu3 %v14769_v59  ;;  %v14633_v59 = vor.u32 %v18226_v44, %v14630_v49  ;;  %v14753_v44 = vor.u32 %v18256_v51, %v14750_v23  ;;  %v15001_v49 = vor.u32 %v18318_v9, %v14998_v38  ;;  %v18302_v43 = vld [vmem:[%s28272_s6 + $0x2f4] sm:$0xf]  ;;  %v14990_v23 = vld [vmem:[%s28272_s6 + $0x368] sm:$0xf0]  ;;  %v18332_v9 = vld [vmem:[%s28272_s6 + $0x3e4] sm:$0xf] }
 0x45a   :  { %v14937_v55 = vor.u32 %v18302_v43, %v14934_v58  ;;  %v14854_v43 = vld [vmem:[%s28272_s6 + $0x258] sm:$0xf0]  ;;  %v18298_v58 = vld [vmem:[%s28272_s6 + $0x2d4] sm:$0xf] }
 0x45b   :  { %10754 = vmatpush.bf16.msra.mxu0 %v14577_v0  ;;  %v14558_v0 = vld [vmem:[%s28272_s6 + $0x8] sm:$0xf0]  ;;  %v10539_v27 = vpop.f32.mrf.mxu3 }
 0x45c   :  { %10767 = vmatpush.bf16.msra.mxu1 %v14641_v30  ;;  %10781 = vmatpush.bf16.msra.mxu2 %v14697_v12  ;;  %v18224_v30 = vld [vmem:[%s28272_s6 + $0x84] sm:$0xf]  ;;  %v14870_v12 = vld [vmem:[%s28272_s6 + $0x278] sm:$0xf0]  ;;  %v14561_v7 = vor.u32 %v18208_v4, %v14558_v0  ;;  %v14926_v0 = vld [vmem:[%s28272_s6 + $0x2e8] sm:$0xf0] }
 0x45d   :  { %10794 = vmatpush.bf16.msra.mxu3 %v14761_v47  ;;  %v18316_v47 = vld [vmem:[%s28272_s6 + $0x364] sm:$0xf]  ;;  %v14625_v51 = vor.u32 %v18224_v30, %v14622_v36  ;;  %v14873_v38 = vor.u32 %v18286_v3, %v14870_v12  ;;  %v18314_v36 = vld [vmem:[%s28272_s6 + $0x354] sm:$0xf]  ;;  %v14982_v3 = vld [vmem:[%s28272_s6 + $0x358] sm:$0xf0] }
 0x45e   :  { %v18300_v4 = vld [vmem:[%s28272_s6 + $0x2e4] sm:$0xf]  ;;  %v18330_v27 = vld [vmem:[%s28272_s6 + $0x3d4] sm:$0xf] }
 0x45f   :  { %10755 = vmatpush.bf16.msra.mxu0 %v14569_v31  ;;  %v15054_v31 = vld [vmem:[%s28272_s6 + $0x3e8] sm:$0xf0]  ;;  %v14929_v12 = vor.u32 %v18300_v4, %v14926_v0  ;;  %v18310_v0 = vld [vmem:[%s28272_s6 + $0x334] sm:$0xf] }
 0x460   :  { %10768 = vmatpush.bf16.msra.mxu1 %v14633_v59  ;;  %10782 = vmatpush.bf16.msra.mxu2 %v14689_v37  ;;  %v18284_v59 = vld [vmem:[%s28272_s6 + $0x264] sm:$0xf]  ;;  %v14993_v37 = vor.u32 %v18316_v47, %v14990_v23  ;;  %v15057_v30 = vor.u32 %v18332_v9, %v15054_v31  ;;  %v15038_v23 = vld [vmem:[%s28272_s6 + $0x3c8] sm:$0xf0] }
 0x461   :  { %10795 = vmatpush.bf16.msra.mxu3 %v14753_v44  ;;  %v15046_v44 = vld [vmem:[%s28272_s6 + $0x3d8] sm:$0xf0] }
 0x462   :  { %v15049_v47 = vor.u32 %v18330_v27, %v15046_v44 }
 0x463   :  { %10756 = vmatpush.bf16.msra.mxu0 %v14561_v7  ;;  %10783 = vmatmul.bf16.vlgmr.msra.gmra.mxu2 %v23936_v22  ;;  %v18282_v22 = vld [vmem:[%s28272_s6 + $0x254] sm:$0xf]  ;;  %v14985_v7 = vor.u32 %v18314_v36, %v14982_v3  ;;  %v15030_v36 = vld [vmem:[%s28272_s6 + $0x3b8] sm:$0xf0]  ;;  %v10550_v3 = vpop.f32.mrf.mxu0 }
 0x464   :  { %10827 = vmatpush.bf16.msrb.mxu2 %v15001_v49  ;;  %10769 = vmatpush.bf16.msra.mxu1 %v14625_v51  ;;  %v14865_v49 = vor.u32 %v18284_v59, %v14862_v42  ;;  %v18328_v51 = vld [vmem:[%s28272_s6 + $0x3c4] sm:$0xf]  ;;  %v14857_v9 = vor.u32 %v18282_v22, %v14854_v43  ;;  %v14910_v59 = vld [vmem:[%s28272_s6 + $0x2c8] sm:$0xf0]  ;;  %v14838_v22 = vld [vmem:[%s28272_s6 + $0x238] sm:$0xf0] }
 0x465   :  { %10840 = vmatpush.bf16.msrb.mxu3 %v15065_v29  ;;  %v14918_v29 = vld [vmem:[%s28272_s6 + $0x2d8] sm:$0xf0]  ;;  %v15041_v4 = vor.u32 %v18328_v51, %v15038_v23  ;;  %v18294_v43 = vld [vmem:[%s28272_s6 + $0x2b4] sm:$0xf]  ;;  %v18324_v51 = vld [vmem:[%s28272_s6 + $0x3a4] sm:$0xf] }
 0x466   :  { %10757 = vmatmul.bf16.vlgmr.msra.gmra.mxu0 %v23944_v15  ;;  %10796 = vmatmul.bf16.vlgmr.msra.gmra.mxu3 %v23960_v21  ;;  %v18312_v15 = vld [vmem:[%s28272_s6 + $0x344] sm:$0xf]  ;;  %v14974_v21 = vld [vmem:[%s28272_s6 + $0x348] sm:$0xf0]  ;;  %v14921_v31 = vor.u32 %v18298_v58, %v14918_v29  ;;  %v14902_v58 = vld [vmem:[%s28272_s6 + $0x2b8] sm:$0xf0]  ;;  %v10563_v29 = vpop.f32.mrf.mxu1 }
 0x467   :  { %10801 = vmatpush.bf16.msrb.mxu0 %v14873_v38  ;;  %10770 = vmatmul.bf16.vlgmr.msra.gmra.mxu1 %v23952_v10  ;;  %v18280_v10 = vld [vmem:[%s28272_s6 + $0x244] sm:$0xf]  ;;  %v14846_v38 = vld [vmem:[%s28272_s6 + $0x248] sm:$0xf0]  ;;  %v14977_v42 = vor.u32 %v18312_v15, %v14974_v21 }
 0x468   :  { %10814 = vmatpush.bf16.msrb.mxu1 %v14937_v55  ;;  %10828 = vmatpush.bf16.msrb.mxu2 %v14993_v37  ;;  %v18296_v55 = vld [vmem:[%s28272_s6 + $0x2c4] sm:$0xf]  ;;  %v14966_v37 = vld [vmem:[%s28272_s6 + $0x338] sm:$0xf0]  ;;  %v14849_v27 = vor.u32 %v18280_v10, %v14846_v38  ;;  %v14958_v21 = vld [vmem:[%s28272_s6 + $0x328] sm:$0xf0]  ;;  %v14905_v10 = vor.u32 %v18294_v43, %v14902_v58 }
 0x469   :  { %10841 = vmatpush.bf16.msrb.mxu3 %v15057_v30  ;;  %v18326_v30 = vld [vmem:[%s28272_s6 + $0x3b4] sm:$0xf]  ;;  %v14913_v44 = vor.u32 %v18296_v55, %v14910_v59  ;;  %v15022_v23 = vld [vmem:[%s28272_s6 + $0x3a8] sm:$0xf0]  ;;  %v18276_v38 = vld [vmem:[%s28272_s6 + $0x224] sm:$0xf] }
 0x46a   :  { %v14830_v59 = vld [vmem:[%s28272_s6 + $0x228] sm:$0xf0]  ;;  %v18274_v43 = vld [vmem:[%s28272_s6 + $0x214] sm:$0xf] }
 0x46b   :  { %10802 = vmatpush.bf16.msrb.mxu0 %v14865_v49  ;;  %v18278_v49 = vld [vmem:[%s28272_s6 + $0x234] sm:$0xf]  ;;  %v10552_v58 = vpop.f32.mrf.mxu0 }
 0x46c   :  { %10815 = vmatpush.bf16.msrb.mxu1 %v14929_v12  ;;  %10829 = vmatpush.bf16.msrb.mxu2 %v14985_v7  ;;  %v10551_v12 = vadd.f32 %v10550_v3, %v26164_v34  ;;  %v14969_v7 = vor.u32 %v18310_v0, %v14966_v37  ;;  %v18308_v34 = vld [vmem:[%s28272_s6 + $0x324] sm:$0xf]  ;;  %v10589_v0 = vpop.f32.mrf.mxu3 }
 0x46d   :  { %10842 = vmatpush.bf16.msrb.mxu3 %v15049_v47  ;;  %v15033_v47 = vor.u32 %v18326_v30, %v15030_v36  ;;  %v14961_v37 = vor.u32 %v18308_v34, %v14958_v21  ;;  %v15025_v30 = vor.u32 %v18324_v51, %v15022_v23  ;;  %v18306_v36 = vld [vmem:[%s28272_s6 + $0x314] sm:$0xf]  ;;  %v18304_v21 = vld [vmem:[%s28272_s6 + $0x304] sm:$0xf]  ;;  %v14942_v51 = vld [vmem:[%s28272_s6 + $0x308] sm:$0xf0] }
 0x46e   :  { %v10564_v15 = vadd.f32 %v10563_v29, %v10551_v12  ;;  %v14833_v12 = vor.u32 %v18276_v38, %v14830_v59  ;;  %v14822_v29 = vld [vmem:[%s28272_s6 + $0x218] sm:$0xf0]  ;;  %v18320_v23 = vld [vmem:[%s28272_s6 + $0x384] sm:$0xf] }
 0x46f   :  { %10803 = vmatpush.bf16.msrb.mxu0 %v14857_v9  ;;  %v10576_v9 = vpop.f32.mrf.mxu2  ;;  %v15254_v38 = vld [vmem:[%s28272_s6 + $0x578] sm:$0xf0] }
 0x470   :  { %10816 = vmatpush.bf16.msrb.mxu1 %v14921_v31  ;;  %10830 = vmatpush.bf16.msrb.mxu2 %v14977_v42  ;;  %v14841_v31 = vor.u32 %v18278_v49, %v14838_v22  ;;  %v10577_v55 = vadd.f32 %v10576_v9, %v10564_v15  ;;  %v18292_v42 = vld [vmem:[%s28272_s6 + $0x2a4] sm:$0xf]  ;;  %v15014_v49 = vld [vmem:[%s28272_s6 + $0x398] sm:$0xf0]  ;;  %v10565_v9 = vpop.f32.mrf.mxu1 }
 0x471   :  { %10843 = vmatpush.bf16.msrb.mxu3 %v15041_v4  ;;  %v14894_v4 = vld [vmem:[%s28272_s6 + $0x2a8] sm:$0xf0]  ;;  %v18396_v9 = vld [vmem:[%s28272_s6 + $0x5e4] sm:$0xf] }
 0x472   :  { %v26360_v3 = vadd.f32 %v10589_v0, %v10577_v55  ;;  %v14897_v22 = vor.u32 %v18292_v42, %v14894_v4  ;;  %v14825_v55 = vor.u32 %v18274_v43, %v14822_v29  ;;  %v18398_v42 = vld [vmem:[%s28272_s6 + $0x5f4] sm:$0xf]  ;;  %v15318_v4 = vld [vmem:[%s28272_s6 + $0x5f8] sm:$0xf0]  ;;  %v18272_v0 = vld [vmem:[%s28272_s6 + $0x204] sm:$0xf] }
 0x473   :  { %10804 = vmatpush.bf16.msrb.mxu0 %v14849_v27  ;;  %v14950_v27 = vld [vmem:[%s28272_s6 + $0x318] sm:$0xf0]  ;;  %v15321_v29 = vor.u32 %v18398_v42, %v15318_v4  ;;  %v18364_v42 = vld [vmem:[%s28272_s6 + $0x4e4] sm:$0xf]  ;;  %v15182_v4 = vld [vmem:[%s28272_s6 + $0x4e8] sm:$0xf0] }
 0x474   :  { %10817 = vmatpush.bf16.msrb.mxu1 %v14913_v44  ;;  %10831 = vmatpush.bf16.msrb.mxu2 %v14969_v7  ;;  %v18322_v44 = vld [vmem:[%s28272_s6 + $0x394] sm:$0xf]  ;;  %v14953_v34 = vor.u32 %v18306_v36, %v14950_v27  ;;  %v18288_v36 = vld [vmem:[%s28272_s6 + $0x284] sm:$0xf]  ;;  %v14878_v27 = vld [vmem:[%s28272_s6 + $0x288] sm:$0xf0]  ;;  %v10591_v43 = vpop.f32.mrf.mxu3 }
 0x475   :  { %10844 = vmatpush.bf16.msrb.mxu3 %v15033_v47  ;;  %v18290_v7 = vld [vmem:[%s28272_s6 + $0x294] sm:$0xf]  ;;  %v14886_v47 = vld [vmem:[%s28272_s6 + $0x298] sm:$0xf0]  ;;  %v15017_v15 = vor.u32 %v18322_v44, %v15014_v49  ;;  %v14945_v44 = vor.u32 %v18304_v21, %v14942_v51  ;;  %v18380_v21 = vld [vmem:[%s28272_s6 + $0x564] sm:$0xf] }
 0x476   :  { %v14889_v59 = vor.u32 %v18290_v7, %v14886_v47  ;;  %v18366_v7 = vld [vmem:[%s28272_s6 + $0x4f4] sm:$0xf]  ;;  %v15190_v47 = vld [vmem:[%s28272_s6 + $0x4f8] sm:$0xf0]  ;;  %v15246_v51 = vld [vmem:[%s28272_s6 + $0x568] sm:$0xf0] }
 0x477   :  { %10805 = vmatpush.bf16.msrb.mxu0 %v14841_v31  ;;  %v15006_v31 = vld [vmem:[%s28272_s6 + $0x388] sm:$0xf0]  ;;  %v18362_v43 = vld [vmem:[%s28272_s6 + $0x4d4] sm:$0xf] }
 0x478   :  { %10818 = vmatpush.bf16.msrb.mxu1 %v14905_v10  ;;  %10832 = vmatpush.bf16.msrb.mxu2 %v14961_v37  ;;  %v18382_v10 = vld [vmem:[%s28272_s6 + $0x574] sm:$0xf]  ;;  %v10578_v37 = vpop.f32.mrf.mxu2  ;;  %v15009_v49 = vor.u32 %v18320_v23, %v15006_v31  ;;  %v15310_v31 = vld [vmem:[%s28272_s6 + $0x5e8] sm:$0xf0] }
 0x479   :  { %10845 = vmatpush.bf16.msrb.mxu3 %v15025_v30  ;;  %v14814_v30 = vld [vmem:[%s28272_s6 + $0x208] sm:$0xf0]  ;;  %v15257_v58 = vor.u32 %v18382_v10, %v15254_v38  ;;  %v15193_v10 = vor.u32 %v18366_v7, %v15190_v47  ;;  %v18348_v38 = vld [vmem:[%s28272_s6 + $0x464] sm:$0xf]  ;;  %v18378_v37 = vld [vmem:[%s28272_s6 + $0x554] sm:$0xf] }
 0x47a   :  { %v18392_v47 = vld [vmem:[%s28272_s6 + $0x5c4] sm:$0xf] }
 0x47b   :  { %10806 = vmatpush.bf16.msrb.mxu0 %v14833_v12  ;;  %v18350_v12 = vld [vmem:[%s28272_s6 + $0x474] sm:$0xf] }
 0x47c   :  { %10819 = vmatpush.bf16.msrb.mxu1 %v14897_v22  ;;  %10833 = vmatpush.bf16.msrb.mxu2 %v14953_v34  ;;  %v15126_v22 = vld [vmem:[%s28272_s6 + $0x478] sm:$0xf0]  ;;  %v14817_v34 = vor.u32 %v18272_v0, %v14814_v30  ;;  %v15313_v0 = vor.u32 %v18396_v9, %v15310_v31  ;;  %v15166_v9 = vld [vmem:[%s28272_s6 + $0x4c8] sm:$0xf0] }
 0x47d   :  { %10846 = vmatpush.bf16.msrb.mxu3 %v15017_v15  ;;  %v14881_v15 = vor.u32 %v18288_v36, %v14878_v27  ;;  %v15129_v23 = vor.u32 %v18350_v12, %v15126_v22  ;;  %v15238_v30 = vld [vmem:[%s28272_s6 + $0x558] sm:$0xf0]  ;;  %v18394_v27 = vld [vmem:[%s28272_s6 + $0x5d4] sm:$0xf] }
 0x47e   :  { %v18346_v12 = vld [vmem:[%s28272_s6 + $0x454] sm:$0xf]  ;;  %v15241_v22 = vor.u32 %v18378_v37, %v15238_v30  ;;  %v15094_v30 = vld [vmem:[%s28272_s6 + $0x438] sm:$0xf0] }
 0x47f   :  { %10807 = vmatpush.bf16.msrb.mxu0 %v14825_v55  ;;  %v15118_v55 = vld [vmem:[%s28272_s6 + $0x468] sm:$0xf0]  ;;  %v18342_v37 = vld [vmem:[%s28272_s6 + $0x434] sm:$0xf] }
 0x480   :  { %10820 = vmatpush.bf16.msrb.mxu1 %v14889_v59  ;;  %10834 = vmatpush.bf16.msrb.mxu2 %v14945_v44  ;;  %v15249_v59 = vor.u32 %v18380_v21, %v15246_v51  ;;  %v15121_v36 = vor.u32 %v18348_v38, %v15118_v55  ;;  %v15302_v44 = vld [vmem:[%s28272_s6 + $0x5d8] sm:$0xf0]  ;;  %v15102_v21 = vld [vmem:[%s28272_s6 + $0x448] sm:$0xf0] }
 0x481   :  { %10847 = vmatpush.bf16.msrb.mxu3 %v15009_v49  ;;  %v15185_v49 = vor.u32 %v18364_v42, %v15182_v4  ;;  %v15222_v38 = vld [vmem:[%s28272_s6 + $0x538] sm:$0xf0] }
 0x482   :  { %v15286_v42 = vld [vmem:[%s28272_s6 + $0x5b8] sm:$0xf0] }
 0x483   :  { %10808 = vmatpush.bf16.msrb.mxu0 %v14817_v34  ;;  %10835 = vmatmul.bf16.vlgmr.msrb.gmra.mxu2 %v24137_v41  ;;  %v15110_v41 = vld [vmem:[%s28272_s6 + $0x458] sm:$0xf0]  ;;  %v15294_v34 = vld [vmem:[%s28272_s6 + $0x5c8] sm:$0xf0]  ;;  %v10602_v4 = vpop.f32.mrf.mxu0 }
 0x484   :  { %10879 = vmatpush.bf16.msra.mxu2 %v15257_v58  ;;  %10821 = vmatpush.bf16.msrb.mxu1 %v14881_v15  ;;  %v15305_v58 = vor.u32 %v18394_v27, %v15302_v44  ;;  %v15113_v7 = vor.u32 %v18346_v12, %v15110_v41  ;;  %v18344_v15 = vld [vmem:[%s28272_s6 + $0x444] sm:$0xf]  ;;  %v15297_v31 = vor.u32 %v18392_v47, %v15294_v34  ;;  %v10615_v27 = vpop.f32.mrf.mxu1  ;;  %v15158_v12 = vld [vmem:[%s28272_s6 + $0x4b8] sm:$0xf0]  ;;  %v15086_v34 = vld [vmem:[%s28272_s6 + $0x428] sm:$0xf0] }
 0x485   :  { %10892 = vmatpush.bf16.msra.mxu3 %v15321_v29  ;;  %v18376_v29 = vld [vmem:[%s28272_s6 + $0x544] sm:$0xf]  ;;  %v15105_v55 = vor.u32 %v18344_v15, %v15102_v21 }
 0x486   :  { %10848 = vmatmul.bf16.vlgmr.msrb.gmra.mxu3 %v24153_v39  ;;  %10809 = vmatmul.bf16.vlgmr.msrb.gmra.mxu0 %v24151_v61  ;;  %v15174_v39 = vld [vmem:[%s28272_s6 + $0x4d8] sm:$0xf0]  ;;  %v15230_v61 = vld [vmem:[%s28272_s6 + $0x548] sm:$0xf0]  ;;  %v18340_v47 = vld [vmem:[%s28272_s6 + $0x424] sm:$0xf] }
 0x487   :  { %10853 = vmatpush.bf16.msra.mxu0 %v15129_v23  ;;  %10822 = vmatmul.bf16.vlgmr.msrb.gmra.mxu1 %v24168_v46  ;;  %v15177_v46 = vor.u32 %v18362_v43, %v15174_v39  ;;  %v15233_v51 = vor.u32 %v18376_v29, %v15230_v61  ;;  %v18360_v23 = vld [vmem:[%s28272_s6 + $0x4c4] sm:$0xf]  ;;  %v15097_v39 = vor.u32 %v18342_v37, %v15094_v30  ;;  %v15278_v29 = vld [vmem:[%s28272_s6 + $0x5a8] sm:$0xf0]  ;;  %v10628_v61 = vpop.f32.mrf.mxu2  ;;  %v15078_v37 = vld [vmem:[%s28272_s6 + $0x418] sm:$0xf0] }
 0x488   :  { %10866 = vmatpush.bf16.msra.mxu1 %v15193_v10  ;;  %10880 = vmatpush.bf16.msra.mxu2 %v15249_v59  ;;  %v18374_v10 = vld [vmem:[%s28272_s6 + $0x534] sm:$0xf] }
 0x489   :  { %10893 = vmatpush.bf16.msra.mxu3 %v15313_v0  ;;  %v18390_v59 = vld [vmem:[%s28272_s6 + $0x5b4] sm:$0xf]  ;;  %v15169_v0 = vor.u32 %v18360_v23, %v15166_v9  ;;  %v15225_v44 = vor.u32 %v18374_v10, %v15222_v38  ;;  %v10641_v15 = vpop.f32.mrf.mxu3  ;;  %v15150_v23 = vld [vmem:[%s28272_s6 + $0x4a8] sm:$0xf0]  ;;  %v15206_v10 = vld [vmem:[%s28272_s6 + $0x518] sm:$0xf0] }
 0x48a   :  { %v15289_v41 = vor.u32 %v18390_v59, %v15286_v42  ;;  %v18386_v59 = vld [vmem:[%s28272_s6 + $0x594] sm:$0xf]  ;;  %v15270_v42 = vld [vmem:[%s28272_s6 + $0x598] sm:$0xf0] }
 0x48b   :  { %10854 = vmatpush.bf16.msra.mxu0 %v15121_v36  ;;  %v10603_v36 = vadd.f32 %v10602_v4, %v26360_v3  ;;  %v15214_v3 = vld [vmem:[%s28272_s6 + $0x528] sm:$0xf0]  ;;  %v10604_v30 = vpop.f32.mrf.mxu0 }
 0x48c   :  { %10867 = vmatpush.bf16.msra.mxu1 %v15185_v49  ;;  %10881 = vmatpush.bf16.msra.mxu2 %v15241_v22  ;;  %v18358_v49 = vld [vmem:[%s28272_s6 + $0x4b4] sm:$0xf]  ;;  %v18372_v22 = vld [vmem:[%s28272_s6 + $0x524] sm:$0xf] }
 0x48d   :  { %10894 = vmatpush.bf16.msra.mxu3 %v15305_v58  ;;  %v10616_v43 = vadd.f32 %v10615_v27, %v10603_v36  ;;  %v18388_v58 = vld [vmem:[%s28272_s6 + $0x5a4] sm:$0xf]  ;;  %v15217_v21 = vor.u32 %v18372_v22, %v15214_v3  ;;  %v18354_v27 = vld [vmem:[%s28272_s6 + $0x494] sm:$0xf]  ;;  %v15198_v22 = vld [vmem:[%s28272_s6 + $0x508] sm:$0xf0] }
 0x48e   :  { %v15281_v9 = vor.u32 %v18388_v58, %v15278_v29  ;;  %v18384_v3 = vld [vmem:[%s28272_s6 + $0x584] sm:$0xf]  ;;  %v18446_v58 = vld [vmem:[%s28272_s6 + $0x774] sm:$0xf]  ;;  %v15510_v29 = vld [vmem:[%s28272_s6 + $0x778] sm:$0xf0] }
 0x48f   :  { %10855 = vmatpush.bf16.msra.mxu0 %v15113_v7  ;;  %v15161_v7 = vor.u32 %v18358_v49, %v15158_v12  ;;  %v18368_v49 = vld [vmem:[%s28272_s6 + $0x504] sm:$0xf]  ;;  %v10617_v12 = vpop.f32.mrf.mxu1 }
 0x490   :  { %10868 = vmatpush.bf16.msra.mxu1 %v15177_v46  ;;  %10882 = vmatpush.bf16.msra.mxu2 %v15233_v51  ;;  %v10629_v46 = vadd.f32 %v10628_v61, %v10616_v43  ;;  %v18356_v51 = vld [vmem:[%s28272_s6 + $0x4a4] sm:$0xf]  ;;  %v15262_v43 = vld [vmem:[%s28272_s6 + $0x588] sm:$0xf0]  ;;  %v18462_v61 = vld [vmem:[%s28272_s6 + $0x7f4] sm:$0xf] }
 0x491   :  { %10895 = vmatpush.bf16.msra.mxu3 %v15297_v31  ;;  %v18370_v31 = vld [vmem:[%s28272_s6 + $0x514] sm:$0xf]  ;;  %v15153_v4 = vor.u32 %v18356_v51, %v15150_v23  ;;  %v18352_v51 = vld [vmem:[%s28272_s6 + $0x484] sm:$0xf]  ;;  %v15134_v23 = vld [vmem:[%s28272_s6 + $0x488] sm:$0xf0] }
 0x492   :  { %v26562_v38 = vadd.f32 %v10641_v15, %v10629_v46  ;;  %v15209_v36 = vor.u32 %v18370_v31, %v15206_v10  ;;  %v15070_v46 = vld [vmem:[%s28272_s6 + $0x408] sm:$0xf0]  ;;  %v10630_v15 = vpop.f32.mrf.mxu2  ;;  %v10643_v31 = vpop.f32.mrf.mxu3  ;;  %v15265_v10 = vor.u32 %v18384_v3, %v15262_v43  ;;  %v18444_v30 = vld [vmem:[%s28272_s6 + $0x764] sm:$0xf] }
 0x493   :  { %10856 = vmatpush.bf16.msra.mxu0 %v15105_v55  ;;  %v15089_v55 = vor.u32 %v18340_v47, %v15086_v34  ;;  %v15574_v47 = vld [vmem:[%s28272_s6 + $0x7f8] sm:$0xf0]  ;;  %v18336_v34 = vld [vmem:[%s28272_s6 + $0x404] sm:$0xf]  ;;  %v15374_v3 = vld [vmem:[%s28272_s6 + $0x668] sm:$0xf0] }
 0x494   :  { %10869 = vmatpush.bf16.msra.mxu1 %v15169_v0  ;;  %10883 = vmatpush.bf16.msra.mxu2 %v15225_v44  ;;  %v18338_v0 = vld [vmem:[%s28272_s6 + $0x414] sm:$0xf]  ;;  %v15142_v44 = vld [vmem:[%s28272_s6 + $0x498] sm:$0xf0]  ;;  %v18428_v43 = vld [vmem:[%s28272_s6 + $0x6e4] sm:$0xf] }
 0x495   :  { %10896 = vmatpush.bf16.msra.mxu3 %v15289_v41  ;;  %v15273_v41 = vor.u32 %v18386_v59, %v15270_v42  ;;  %v15382_v59 = vld [vmem:[%s28272_s6 + $0x678] sm:$0xf0]  ;;  %v18430_v42 = vld [vmem:[%s28272_s6 + $0x6f4] sm:$0xf] }
 0x497   :  { %10857 = vmatpush.bf16.msra.mxu0 %v15097_v39  ;;  %v15081_v39 = vor.u32 %v18338_v0, %v15078_v37  ;;  %v15577_v0 = vor.u32 %v18462_v61, %v15574_v47  ;;  %v15073_v37 = vor.u32 %v18336_v34, %v15070_v46  ;;  %v18442_v61 = vld [vmem:[%s28272_s6 + $0x754] sm:$0xf]  ;;  %v15558_v34 = vld [vmem:[%s28272_s6 + $0x7d8] sm:$0xf0] }
 0x498   :  { %10870 = vmatpush.bf16.msra.mxu1 %v15161_v7  ;;  %10884 = vmatpush.bf16.msra.mxu2 %v15217_v21  ;;  %v15145_v7 = vor.u32 %v18354_v27, %v15142_v44  ;;  %v15201_v21 = vor.u32 %v18368_v49, %v15198_v22  ;;  %v15502_v27 = vld [vmem:[%s28272_s6 + $0x768] sm:$0xf0]  ;;  %v18460_v44 = vld [vmem:[%s28272_s6 + $0x7e4] sm:$0xf]  ;;  %v18458_v47 = vld [vmem:[%s28272_s6 + $0x7d4] sm:$0xf] }
 0x499   :  { %10897 = vmatpush.bf16.msra.mxu3 %v15281_v9  ;;  %v18414_v9 = vld [vmem:[%s28272_s6 + $0x674] sm:$0xf]  ;;  %v15566_v49 = vld [vmem:[%s28272_s6 + $0x7e8] sm:$0xf0]  ;;  %v18412_v22 = vld [vmem:[%s28272_s6 + $0x664] sm:$0xf]  ;;  %v15561_v31 = vor.u32 %v18458_v47, %v15558_v34 }
 0x49a   :  { %v15385_v12 = vor.u32 %v18414_v9, %v15382_v59  ;;  %v15377_v46 = vor.u32 %v18412_v22, %v15374_v3 }
 0x49b   :  { %10858 = vmatpush.bf16.msra.mxu0 %v15089_v55  ;;  %v15513_v55 = vor.u32 %v18446_v58, %v15510_v29  ;;  %v15505_v58 = vor.u32 %v18444_v30, %v15502_v27  ;;  %v15569_v29 = vor.u32 %v18460_v44, %v15566_v49  ;;  %v18438_v27 = vld [vmem:[%s28272_s6 + $0x734] sm:$0xf]  ;;  %v15478_v44 = vld [vmem:[%s28272_s6 + $0x738] sm:$0xf0] }
 0x49c   :  { %10871 = vmatpush.bf16.msra.mxu1 %v15153_v4  ;;  %10885 = vmatpush.bf16.msra.mxu2 %v15209_v36  ;;  %v15446_v4 = vld [vmem:[%s28272_s6 + $0x6f8] sm:$0xf0]  ;;  %v15137_v36 = vor.u32 %v18352_v51, %v15134_v23  ;;  %v18426_v51 = vld [vmem:[%s28272_s6 + $0x6d4] sm:$0xf]  ;;  %v15481_v47 = vor.u32 %v18438_v27, %v15478_v44 }
 0x49d   :  { %10898 = vmatpush.bf16.msra.mxu3 %v15273_v41  ;;  %v15449_v41 = vor.u32 %v18430_v42, %v15446_v4  ;;  %v15430_v23 = vld [vmem:[%s28272_s6 + $0x6d8] sm:$0xf0]  ;;  %v15358_v4 = vld [vmem:[%s28272_s6 + $0x648] sm:$0xf0]  ;;  %v18454_v49 = vld [vmem:[%s28272_s6 + $0x7b4] sm:$0xf] }
 0x49e   :  { %v15433_v42 = vor.u32 %v18426_v51, %v15430_v23 }
 0x49f   :  { %10859 = vmatpush.bf16.msra.mxu0 %v15081_v39  ;;  %v15438_v39 = vld [vmem:[%s28272_s6 + $0x6e8] sm:$0xf0] }
 0x4a0   :  { %10872 = vmatpush.bf16.msra.mxu1 %v15145_v7  ;;  %10886 = vmatpush.bf16.msra.mxu2 %v15201_v21  ;;  %v15494_v7 = vld [vmem:[%s28272_s6 + $0x758] sm:$0xf0]  ;;  %v15441_v15 = vor.u32 %v18428_v43, %v15438_v39  ;;  %v18406_v43 = vld [vmem:[%s28272_s6 + $0x634] sm:$0xf] }
 0x4a1   :  { %10899 = vmatpush.bf16.msra.mxu3 %v15265_v10  ;;  %v15366_v21 = vld [vmem:[%s28272_s6 + $0x658] sm:$0xf0]  ;;  %v15497_v9 = vor.u32 %v18442_v61, %v15494_v7  ;;  %v18456_v10 = vld [vmem:[%s28272_s6 + $0x7c4] sm:$0xf] }
 0x4a2   :  { %v15414_v61 = vld [vmem:[%s28272_s6 + $0x6b8] sm:$0xf0] }
 0x4a3   :  { %10860 = vmatpush.bf16.msra.mxu0 %v15073_v37  ;;  %10887 = vmatmul.bf16.vlgmr.msra.gmra.mxu2 %v24353_v19  ;;  %v18410_v19 = vld [vmem:[%s28272_s6 + $0x654] sm:$0xf]  ;;  %v15422_v37 = vld [vmem:[%s28272_s6 + $0x6c8] sm:$0xf0] }
 0x4a4   :  { %10931 = vmatpush.bf16.msrb.mxu2 %v15513_v55  ;;  %10873 = vmatpush.bf16.msra.mxu1 %v15137_v36  ;;  %v15550_v55 = vld [vmem:[%s28272_s6 + $0x7c8] sm:$0xf0]  ;;  %v15369_v59 = vor.u32 %v18410_v19, %v15366_v21  ;;  %v10667_v7 = vpop.f32.mrf.mxu1  ;;  %v18452_v19 = vld [vmem:[%s28272_s6 + $0x7a4] sm:$0xf] }
 0x4a5   :  { %10944 = vmatpush.bf16.msrb.mxu3 %v15577_v0  ;;  %v18424_v0 = vld [vmem:[%s28272_s6 + $0x6c4] sm:$0xf]  ;;  %v15553_v36 = vor.u32 %v18456_v10, %v15550_v55  ;;  %v15534_v21 = vld [vmem:[%s28272_s6 + $0x7a8] sm:$0xf0] }
 0x4a6   :  { %10861 = vmatmul.bf16.vlgmr.msra.gmra.mxu0 %v24366_v11  ;;  %10900 = vmatmul.bf16.vlgmr.msra.gmra.mxu3 %v24358_v6  ;;  %v18440_v6 = vld [vmem:[%s28272_s6 + $0x744] sm:$0xf]  ;;  %v15486_v11 = vld [vmem:[%s28272_s6 + $0x748] sm:$0xf0]  ;;  %v15425_v3 = vor.u32 %v18424_v0, %v15422_v37  ;;  %v10680_v51 = vpop.f32.mrf.mxu2  ;;  %v15462_v37 = vld [vmem:[%s28272_s6 + $0x718] sm:$0xf0] }
 0x4a7   :  { %10905 = vmatpush.bf16.msrb.mxu0 %v15385_v12  ;;  %10874 = vmatmul.bf16.vlgmr.msra.gmra.mxu1 %v24374_v17  ;;  %v18408_v17 = vld [vmem:[%s28272_s6 + $0x644] sm:$0xf]  ;;  %v15489_v30 = vor.u32 %v18440_v6, %v15486_v11  ;;  %v15542_v12 = vld [vmem:[%s28272_s6 + $0x7b8] sm:$0xf0]  ;;  %v15342_v11 = vld [vmem:[%s28272_s6 + $0x628] sm:$0xf0] }
 0x4a8   :  { %10918 = vmatpush.bf16.msrb.mxu1 %v15449_v41  ;;  %10932 = vmatpush.bf16.msrb.mxu2 %v15505_v58  ;;  %v10654_v41 = vpop.f32.mrf.mxu0  ;;  %v15361_v22 = vor.u32 %v18408_v17, %v15358_v4  ;;  %v15350_v58 = vld [vmem:[%s28272_s6 + $0x638] sm:$0xf0]  ;;  %v15545_v34 = vor.u32 %v18454_v49, %v15542_v12  ;;  %v18420_v10 = vld [vmem:[%s28272_s6 + $0x6a4] sm:$0xf]  ;;  %v15406_v55 = vld [vmem:[%s28272_s6 + $0x6a8] sm:$0xf0]  ;;  %v15537_v17 = vor.u32 %v18452_v19, %v15534_v21 }
 0x4a9   :  { %10945 = vmatpush.bf16.msrb.mxu3 %v15569_v29  ;;  %v10655_v39 = vadd.f32 %v10654_v41, %v26562_v38  ;;  %v18422_v29 = vld [vmem:[%s28272_s6 + $0x6b4] sm:$0xf]  ;;  %v18436_v38 = vld [vmem:[%s28272_s6 + $0x724] sm:$0xf]  ;;  %v15353_v23 = vor.u32 %v18406_v43, %v15350_v58  ;;  %v15409_v44 = vor.u32 %v18420_v10, %v15406_v55  ;;  %v15334_v41 = vld [vmem:[%s28272_s6 + $0x618] sm:$0xf0] }
 0x4aa   :  { %v18434_v4 = vld [vmem:[%s28272_s6 + $0x714] sm:$0xf]  ;;  %v18432_v58 = vld [vmem:[%s28272_s6 + $0x704] sm:$0xf]  ;;  %v15830_v21 = vld [vmem:[%s28272_s6 + $0x9f8] sm:$0xf0] }
 0x4ab   :  { %10906 = vmatpush.bf16.msrb.mxu0 %v15377_v46  ;;  %v10668_v46 = vadd.f32 %v10667_v7, %v10655_v39  ;;  %v18402_v49 = vld [vmem:[%s28272_s6 + $0x614] sm:$0xf]  ;;  %v15465_v43 = vor.u32 %v18434_v4, %v15462_v37 }
 0x4ac   :  { %10919 = vmatpush.bf16.msrb.mxu1 %v15441_v15  ;;  %10933 = vmatpush.bf16.msrb.mxu2 %v15497_v9  ;;  %v15470_v15 = vld [vmem:[%s28272_s6 + $0x728] sm:$0xf0]  ;;  %v15417_v9 = vor.u32 %v18422_v29, %v15414_v61  ;;  %v18448_v61 = vld [vmem:[%s28272_s6 + $0x784] sm:$0xf]  ;;  %v10669_v7 = vpop.f32.mrf.mxu1  ;;  %v18526_v19 = vld [vmem:[%s28272_s6 + $0x9f4] sm:$0xf] }
 0x4ad   :  { %10946 = vmatpush.bf16.msrb.mxu3 %v15561_v31  ;;  %v18404_v31 = vld [vmem:[%s28272_s6 + $0x624] sm:$0xf]  ;;  %v10681_v6 = vadd.f32 %v10680_v51, %v10668_v46  ;;  %v15454_v29 = vld [vmem:[%s28272_s6 + $0x708] sm:$0xf0]  ;;  %v15337_v46 = vor.u32 %v18402_v49, %v15334_v41  ;;  %v18478_v55 = vld [vmem:[%s28272_s6 + $0x874] sm:$0xf]  ;;  %v15833_v4 = vor.u32 %v18526_v19, %v15830_v21 }
 0x4ae   :  { %v15345_v27 = vor.u32 %v18404_v31, %v15342_v11  ;;  %v18400_v51 = vld [vmem:[%s28272_s6 + $0x604] sm:$0xf]  ;;  %v15457_v11 = vor.u32 %v18432_v58, %v15454_v29  ;;  %v18494_v37 = vld [vmem:[%s28272_s6 + $0x8f4] sm:$0xf]  ;;  %v15758_v49 = vld [vmem:[%s28272_s6 + $0x968] sm:$0xf0] }
 0x4af   :  { %10907 = vmatpush.bf16.msrb.mxu0 %v15369_v59  ;;  %v10693_v59 = vpop.f32.mrf.mxu3  ;;  %v18416_v31 = vld [vmem:[%s28272_s6 + $0x684] sm:$0xf]  ;;  %v18474_v21 = vld [vmem:[%s28272_s6 + $0x854] sm:$0xf] }
 0x4b0   :  { %10920 = vmatpush.bf16.msrb.mxu1 %v15433_v42  ;;  %10934 = vmatpush.bf16.msrb.mxu2 %v15489_v30  ;;  %v15473_v42 = vor.u32 %v18436_v38, %v15470_v15  ;;  %v26758_v0 = vadd.f32 %v10693_v59, %v10681_v6  ;;  %v18450_v30 = vld [vmem:[%s28272_s6 + $0x794] sm:$0xf]  ;;  %v10656_v12 = vpop.f32.mrf.mxu0  ;;  %v15766_v38 = vld [vmem:[%s28272_s6 + $0x978] sm:$0xf0]  ;;  %v15390_v6 = vld [vmem:[%s28272_s6 + $0x688] sm:$0xf0] }
 0x4b1   :  { %10947 = vmatpush.bf16.msrb.mxu3 %v15553_v36  ;;  %v15526_v36 = vld [vmem:[%s28272_s6 + $0x798] sm:$0xf0]  ;;  %v18524_v41 = vld [vmem:[%s28272_s6 + $0x9e4] sm:$0xf] }
 0x4b2   :  { %v15529_v39 = vor.u32 %v18450_v30, %v15526_v36  ;;  %v15638_v59 = vld [vmem:[%s28272_s6 + $0x878] sm:$0xf0]  ;;  %v18492_v29 = vld [vmem:[%s28272_s6 + $0x8e4] sm:$0xf] }
 0x4b3   :  { %10908 = vmatpush.bf16.msrb.mxu0 %v15361_v22  ;;  %v18418_v22 = vld [vmem:[%s28272_s6 + $0x694] sm:$0xf]  ;;  %v15702_v30 = vld [vmem:[%s28272_s6 + $0x8f8] sm:$0xf0]  ;;  %v15641_v12 = vor.u32 %v18478_v55, %v15638_v59  ;;  %v18472_v55 = vld [vmem:[%s28272_s6 + $0x844] sm:$0xf] }
 0x4b4   :  { %10921 = vmatpush.bf16.msrb.mxu1 %v15425_v3  ;;  %10935 = vmatpush.bf16.msrb.mxu2 %v15481_v47  ;;  %v15398_v3 = vld [vmem:[%s28272_s6 + $0x698] sm:$0xf0]  ;;  %v15518_v47 = vld [vmem:[%s28272_s6 + $0x788] sm:$0xf0] }
 0x4b5   :  { %10948 = vmatpush.bf16.msrb.mxu3 %v15545_v34  ;;  %v18510_v34 = vld [vmem:[%s28272_s6 + $0x974] sm:$0xf]  ;;  %v15401_v15 = vor.u32 %v18418_v22, %v15398_v3  ;;  %v15521_v10 = vor.u32 %v18448_v61, %v15518_v47  ;;  %v15822_v22 = vld [vmem:[%s28272_s6 + $0x9e8] sm:$0xf0]  ;;  %v15705_v3 = vor.u32 %v18494_v37, %v15702_v30 }
 0x4b6   :  { %v15694_v61 = vld [vmem:[%s28272_s6 + $0x8e8] sm:$0xf0]  ;;  %v15825_v7 = vor.u32 %v18524_v41, %v15822_v22  ;;  %v18506_v47 = vld [vmem:[%s28272_s6 + $0x954] sm:$0xf] }
 0x4b7   :  { %10909 = vmatpush.bf16.msrb.mxu0 %v15353_v23  ;;  %v10682_v23 = vpop.f32.mrf.mxu2  ;;  %v15697_v19 = vor.u32 %v18492_v29, %v15694_v61  ;;  %v15614_v59 = vld [vmem:[%s28272_s6 + $0x848] sm:$0xf0]  ;;  %v18502_v30 = vld [vmem:[%s28272_s6 + $0x934] sm:$0xf]  ;;  %v15670_v61 = vld [vmem:[%s28272_s6 + $0x8b8] sm:$0xf0] }
 0x4b8   :  { %10922 = vmatpush.bf16.msrb.mxu1 %v15417_v9  ;;  %10936 = vmatpush.bf16.msrb.mxu2 %v15473_v42  ;;  %v15326_v9 = vld [vmem:[%s28272_s6 + $0x608] sm:$0xf0]  ;;  %v10695_v42 = vpop.f32.mrf.mxu3  ;;  %v18490_v23 = vld [vmem:[%s28272_s6 + $0x8d4] sm:$0xf] }
 0x4b9   :  { %10949 = vmatpush.bf16.msrb.mxu3 %v15537_v17  ;;  %v15769_v17 = vor.u32 %v18510_v34, %v15766_v38  ;;  %v15329_v36 = vor.u32 %v18400_v51, %v15326_v9  ;;  %v15750_v34 = vld [vmem:[%s28272_s6 + $0x958] sm:$0xf0]  ;;  %v18470_v22 = vld [vmem:[%s28272_s6 + $0x834] sm:$0xf] }
 0x4ba   :  { %v15753_v51 = vor.u32 %v18506_v47, %v15750_v34  ;;  %v18486_v29 = vld [vmem:[%s28272_s6 + $0x8b4] sm:$0xf]  ;;  %v18500_v47 = vld [vmem:[%s28272_s6 + $0x924] sm:$0xf] }
 0x4bb   :  { %10910 = vmatpush.bf16.msrb.mxu0 %v15345_v27  ;;  %v15393_v27 = vor.u32 %v18416_v31, %v15390_v6  ;;  %v18504_v31 = vld [vmem:[%s28272_s6 + $0x944] sm:$0xf] }
 0x4bc   :  { %10923 = vmatpush.bf16.msrb.mxu1 %v15409_v44  ;;  %10937 = vmatpush.bf16.msrb.mxu2 %v15465_v43  ;;  %v18508_v44 = vld [vmem:[%s28272_s6 + $0x964] sm:$0xf] }
 0x4bd   :  { %10950 = vmatpush.bf16.msrb.mxu3 %v15529_v39  ;;  %v18476_v43 = vld [vmem:[%s28272_s6 + $0x864] sm:$0xf]  ;;  %v15630_v39 = vld [vmem:[%s28272_s6 + $0x868] sm:$0xf0]  ;;  %v15761_v58 = vor.u32 %v18508_v44, %v15758_v49  ;;  %v18518_v44 = vld [vmem:[%s28272_s6 + $0x9b4] sm:$0xf] }
 0x4be   :  { %v15633_v38 = vor.u32 %v18476_v43, %v15630_v39  ;;  %v15798_v49 = vld [vmem:[%s28272_s6 + $0x9b8] sm:$0xf0] }
 0x4bf   :  { %10911 = vmatpush.bf16.msrb.mxu0 %v15337_v46  ;;  %v18522_v46 = vld [vmem:[%s28272_s6 + $0x9d4] sm:$0xf] }
 0x4c0   :  { %10924 = vmatpush.bf16.msrb.mxu1 %v15401_v15  ;;  %10938 = vmatpush.bf16.msrb.mxu2 %v15457_v11  ;;  %v15814_v15 = vld [vmem:[%s28272_s6 + $0x9d8] sm:$0xf0]  ;;  %v18520_v11 = vld [vmem:[%s28272_s6 + $0x9c4] sm:$0xf] }
 0x4c1   :  { %10951 = vmatpush.bf16.msrb.mxu3 %v15521_v10  ;;  %v15817_v9 = vor.u32 %v18522_v46, %v15814_v15  ;;  %v15806_v10 = vld [vmem:[%s28272_s6 + $0x9c8] sm:$0xf0]  ;;  %v18516_v46 = vld [vmem:[%s28272_s6 + $0x9a4] sm:$0xf] }
 0x4c2   :  { %v15809_v37 = vor.u32 %v18520_v11, %v15806_v10  ;;  %v15790_v15 = vld [vmem:[%s28272_s6 + $0x9a8] sm:$0xf0]  ;;  %v18498_v11 = vld [vmem:[%s28272_s6 + $0x914] sm:$0xf]  ;;  %v15718_v10 = vld [vmem:[%s28272_s6 + $0x918] sm:$0xf0] }
 0x4c3   :  { %10912 = vmatpush.bf16.msrb.mxu0 %v15329_v36  ;;  %10939 = vmatmul.bf16.vlgmr.msrb.gmra.mxu2 %v24557_v57  ;;  %v15622_v57 = vld [vmem:[%s28272_s6 + $0x858] sm:$0xf0] }
 0x4c4   :  { %10983 = vmatpush.bf16.msra.mxu2 %v15769_v17  ;;  %10925 = vmatpush.bf16.msrb.mxu1 %v15393_v27  ;;  %v15625_v6 = vor.u32 %v18474_v21, %v15622_v57  ;;  %v18488_v17 = vld [vmem:[%s28272_s6 + $0x8c4] sm:$0xf]  ;;  %v15734_v36 = vld [vmem:[%s28272_s6 + $0x938] sm:$0xf0]  ;;  %v15617_v27 = vor.u32 %v18472_v55, %v15614_v59  ;;  %v10719_v39 = vpop.f32.mrf.mxu1  ;;  %v15673_v21 = vor.u32 %v18486_v29, %v15670_v61  ;;  %v18514_v59 = vld [vmem:[%s28272_s6 + $0x994] sm:$0xf] }
 0x4c5   :  { %10996 = vmatpush.bf16.msra.mxu3 %v15833_v4  ;;  %v15678_v4 = vld [vmem:[%s28272_s6 + $0x8c8] sm:$0xf0]  ;;  %v18468_v57 = vld [vmem:[%s28272_s6 + $0x824] sm:$0xf]  ;;  %v16022_v29 = vld [vmem:[%s28272_s6 + $0xb78] sm:$0xf0] }
 0x4c6   :  { %10952 = vmatmul.bf16.vlgmr.msrb.gmra.mxu3 %v24573_v33  ;;  %10913 = vmatmul.bf16.vlgmr.msrb.gmra.mxu0 %v24571_v53  ;;  %v15686_v33 = vld [vmem:[%s28272_s6 + $0x8d8] sm:$0xf0]  ;;  %v15742_v53 = vld [vmem:[%s28272_s6 + $0x948] sm:$0xf0]  ;;  %v15681_v41 = vor.u32 %v18488_v17, %v15678_v4  ;;  %v18466_v4 = vld [vmem:[%s28272_s6 + $0x814] sm:$0xf] }
 0x4c7   :  { %10957 = vmatpush.bf16.msra.mxu0 %v15641_v12  ;;  %10926 = vmatmul.bf16.vlgmr.msrb.gmra.mxu1 %v24588_v2  ;;  %v15689_v2 = vor.u32 %v18490_v23, %v15686_v33  ;;  %v15745_v42 = vor.u32 %v18504_v31, %v15742_v53  ;;  %v10706_v12 = vpop.f32.mrf.mxu0  ;;  %v18484_v31 = vld [vmem:[%s28272_s6 + $0x8a4] sm:$0xf]  ;;  %v15662_v53 = vld [vmem:[%s28272_s6 + $0x8a8] sm:$0xf0]  ;;  %v18590_v61 = vld [vmem:[%s28272_s6 + $0xbf4] sm:$0xf] }
 0x4c8   :  { %10970 = vmatpush.bf16.msra.mxu1 %v15705_v3  ;;  %10984 = vmatpush.bf16.msra.mxu2 %v15761_v58  ;;  %v15606_v3 = vld [vmem:[%s28272_s6 + $0x838] sm:$0xf0]  ;;  %v10707_v43 = vadd.f32 %v10706_v12, %v26758_v0  ;;  %v15737_v58 = vor.u32 %v18502_v30, %v15734_v36  ;;  %v15726_v0 = vld [vmem:[%s28272_s6 + $0x928] sm:$0xf0]  ;;  %v15665_v17 = vor.u32 %v18484_v31, %v15662_v53 }
 0x4c9   :  { %10997 = vmatpush.bf16.msra.mxu3 %v15825_v7  ;;  %v15801_v7 = vor.u32 %v18518_v44, %v15798_v49  ;;  %v10745_v33 = vpop.f32.mrf.mxu3  ;;  %v15721_v36 = vor.u32 %v18498_v11, %v15718_v10  ;;  %v15654_v44 = vld [vmem:[%s28272_s6 + $0x898] sm:$0xf0]  ;;  %v18496_v49 = vld [vmem:[%s28272_s6 + $0x904] sm:$0xf] }
 0x4ca   :  { %v10720_v34 = vadd.f32 %v10719_v39, %v10707_v43  ;;  %v15774_v43 = vld [vmem:[%s28272_s6 + $0x988] sm:$0xf0]  ;;  %v15958_v31 = vld [vmem:[%s28272_s6 + $0xaf8] sm:$0xf0]  ;;  %v18572_v11 = vld [vmem:[%s28272_s6 + $0xb64] sm:$0xf] }
 0x4cb   :  { %10958 = vmatpush.bf16.msra.mxu0 %v15633_v38  ;;  %v15609_v38 = vor.u32 %v18470_v22, %v15606_v3  ;;  %v15710_v22 = vld [vmem:[%s28272_s6 + $0x908] sm:$0xf0]  ;;  %v18512_v3 = vld [vmem:[%s28272_s6 + $0x984] sm:$0xf] }
 0x4cc   :  { %10971 = vmatpush.bf16.msra.mxu1 %v15697_v19  ;;  %10985 = vmatpush.bf16.msra.mxu2 %v15753_v51  ;;  %v10732_v19 = vpop.f32.mrf.mxu2  ;;  %v15598_v51 = vld [vmem:[%s28272_s6 + $0x828] sm:$0xf0]  ;;  %v10721_v12 = vpop.f32.mrf.mxu1 }
 0x4cd   :  { %10998 = vmatpush.bf16.msra.mxu3 %v15817_v9  ;;  %v10733_v23 = vadd.f32 %v10732_v19, %v10720_v34  ;;  %v15729_v9 = vor.u32 %v18500_v47, %v15726_v0  ;;  %v15601_v55 = vor.u32 %v18468_v57, %v15598_v51  ;;  %v16086_v47 = vld [vmem:[%s28272_s6 + $0xbf8] sm:$0xf0]  ;;  %v18464_v0 = vld [vmem:[%s28272_s6 + $0x804] sm:$0xf]  ;;  %v15582_v34 = vld [vmem:[%s28272_s6 + $0x808] sm:$0xf0]  ;;  %v15777_v51 = vor.u32 %v18512_v3, %v15774_v43 }
 0x4ce   :  { %v15646_v19 = vld [vmem:[%s28272_s6 + $0x888] sm:$0xf0]  ;;  %v16089_v53 = vor.u32 %v18590_v61, %v16086_v47  ;;  %v18570_v12 = vld [vmem:[%s28272_s6 + $0xb54] sm:$0xf]  ;;  %v16070_v3 = vld [vmem:[%s28272_s6 + $0xbd8] sm:$0xf0] }
 0x4cf   :  { %10959 = vmatpush.bf16.msra.mxu0 %v15625_v6  ;;  %v15793_v6 = vor.u32 %v18516_v46, %v15790_v15  ;;  %v10708_v30 = vpop.f32.mrf.mxu0  ;;  %v15713_v46 = vor.u32 %v18496_v49, %v15710_v22  ;;  %v18480_v15 = vld [vmem:[%s28272_s6 + $0x884] sm:$0xf]  ;;  %v18586_v22 = vld [vmem:[%s28272_s6 + $0xbd4] sm:$0xf]  ;;  %v15942_v61 = vld [vmem:[%s28272_s6 + $0xad8] sm:$0xf0] }
 0x4d0   :  { %10972 = vmatpush.bf16.msra.mxu1 %v15689_v2  ;;  %10986 = vmatpush.bf16.msra.mxu2 %v15745_v42  ;;  %v26960_v2 = vadd.f32 %v10745_v33, %v10733_v23  ;;  %v15782_v42 = vld [vmem:[%s28272_s6 + $0x998] sm:$0xf0]  ;;  %v15649_v10 = vor.u32 %v18480_v15, %v15646_v19  ;;  %v15886_v30 = vld [vmem:[%s28272_s6 + $0xa68] sm:$0xf0]  ;;  %v16073_v47 = vor.u32 %v18586_v22, %v16070_v3  ;;  %v18552_v19 = vld [vmem:[%s28272_s6 + $0xac4] sm:$0xf] }
 0x4d1   :  { %10999 = vmatpush.bf16.msra.mxu3 %v15809_v37  ;;  %v15590_v37 = vld [vmem:[%s28272_s6 + $0x818] sm:$0xf0]  ;;  %v10747_v57 = vpop.f32.mrf.mxu3  ;;  %v15870_v15 = vld [vmem:[%s28272_s6 + $0xa48] sm:$0xf0]  ;;  %v18532_v3 = vld [vmem:[%s28272_s6 + $0xa24] sm:$0xf] }
 0x4d2   :  { %v15593_v39 = vor.u32 %v18466_v4, %v15590_v37  ;;  %v15894_v33 = vld [vmem:[%s28272_s6 + $0xa78] sm:$0xf0]  ;;  %v18540_v37 = vld [vmem:[%s28272_s6 + $0xa64] sm:$0xf] }
 0x4d3   :  { %10960 = vmatpush.bf16.msra.mxu0 %v15617_v27  ;;  %v18482_v27 = vld [vmem:[%s28272_s6 + $0x894] sm:$0xf]  ;;  %v15889_v43 = vor.u32 %v18540_v37, %v15886_v30 }
 0x4d4   :  { %10973 = vmatpush.bf16.msra.mxu1 %v15681_v41  ;;  %10987 = vmatpush.bf16.msra.mxu2 %v15737_v58  ;;  %v15785_v41 = vor.u32 %v18514_v59, %v15782_v42  ;;  %v18574_v58 = vld [vmem:[%s28272_s6 + $0xb74] sm:$0xf]  ;;  %v18588_v59 = vld [vmem:[%s28272_s6 + $0xbe4] sm:$0xf]  ;;  %v16078_v42 = vld [vmem:[%s28272_s6 + $0xbe8] sm:$0xf0] }
 0x4d5   :  { %11000 = vmatpush.bf16.msra.mxu3 %v15801_v7  ;;  %v15657_v7 = vor.u32 %v18482_v27, %v15654_v44  ;;  %v16025_v23 = vor.u32 %v18574_v58, %v16022_v29  ;;  %v15950_v27 = vld [vmem:[%s28272_s6 + $0xae8] sm:$0xf0]  ;;  %v16081_v49 = vor.u32 %v18588_v59, %v16078_v42  ;;  %v15878_v58 = vld [vmem:[%s28272_s6 + $0xa58] sm:$0xf0]  ;;  %v18554_v29 = vld [vmem:[%s28272_s6 + $0xad4] sm:$0xf] }
 0x4d6   :  { %v15862_v59 = vld [vmem:[%s28272_s6 + $0xa38] sm:$0xf0]  ;;  %v18550_v42 = vld [vmem:[%s28272_s6 + $0xab4] sm:$0xf] }
 0x4d7   :  { %10961 = vmatpush.bf16.msra.mxu0 %v15609_v38  ;;  %v10734_v38 = vpop.f32.mrf.mxu2 }
 0x4d8   :  { %10974 = vmatpush.bf16.msra.mxu1 %v15673_v21  ;;  %10988 = vmatpush.bf16.msra.mxu2 %v15729_v9  ;;  %v18542_v21 = vld [vmem:[%s28272_s6 + $0xa74] sm:$0xf] }
 0x4d9   :  { %11001 = vmatpush.bf16.msra.mxu3 %v15793_v6  ;;  %v18558_v9 = vld [vmem:[%s28272_s6 + $0xaf4] sm:$0xf]  ;;  %v15585_v6 = vor.u32 %v18464_v0, %v15582_v34  ;;  %v18584_v0 = vld [vmem:[%s28272_s6 + $0xbc4] sm:$0xf]  ;;  %v16062_v34 = vld [vmem:[%s28272_s6 + $0xbc8] sm:$0xf0] }
 0x4da   :  { %v15961_v4 = vor.u32 %v18558_v9, %v15958_v31  ;;  %v18582_v9 = vld [vmem:[%s28272_s6 + $0xbb4] sm:$0xf]  ;;  %v16054_v31 = vld [vmem:[%s28272_s6 + $0xbb8] sm:$0xf0] }
 0x4db   :  { %10962 = vmatpush.bf16.msra.mxu0 %v15601_v55  ;;  %v16014_v55 = vld [vmem:[%s28272_s6 + $0xb68] sm:$0xf0]  ;;  %v16057_v30 = vor.u32 %v18582_v9, %v16054_v31  ;;  %v18576_v31 = vld [vmem:[%s28272_s6 + $0xb84] sm:$0xf] }
 0x4dc   :  { %10975 = vmatpush.bf16.msra.mxu1 %v15665_v17  ;;  %10989 = vmatpush.bf16.msra.mxu2 %v15721_v36  ;;  %v15897_v17 = vor.u32 %v18542_v21, %v15894_v33  ;;  %v18556_v36 = vld [vmem:[%s28272_s6 + $0xae4] sm:$0xf]  ;;  %v16017_v44 = vor.u32 %v18572_v11, %v16014_v55  ;;  %v15934_v21 = vld [vmem:[%s28272_s6 + $0xac8] sm:$0xf0]  ;;  %v15990_v33 = vld [vmem:[%s28272_s6 + $0xb38] sm:$0xf0] }
 0x4dd   :  { %11002 = vmatpush.bf16.msra.mxu3 %v15785_v41  ;;  %v16006_v41 = vld [vmem:[%s28272_s6 + $0xb58] sm:$0xf0]  ;;  %v15937_v11 = vor.u32 %v18552_v19, %v15934_v21  ;;  %v18546_v21 = vld [vmem:[%s28272_s6 + $0xa94] sm:$0xf]  ;;  %v15966_v9 = vld [vmem:[%s28272_s6 + $0xb08] sm:$0xf0] }
 0x4de   :  { %v15846_v19 = vld [vmem:[%s28272_s6 + $0xa18] sm:$0xf0] }
 0x4df   :  { %10963 = vmatpush.bf16.msra.mxu0 %v15593_v39  ;;  %v15953_v39 = vor.u32 %v18556_v36, %v15950_v27  ;;  %v15982_v27 = vld [vmem:[%s28272_s6 + $0xb28] sm:$0xf0] }
 0x4e0   :  { %10976 = vmatpush.bf16.msra.mxu1 %v15657_v7  ;;  %10990 = vmatpush.bf16.msra.mxu2 %v15713_v46  ;;  %v16009_v7 = vor.u32 %v18570_v12, %v16006_v41  ;;  %v15945_v46 = vor.u32 %v18554_v29, %v15942_v61 }
 0x4e1   :  { %11003 = vmatpush.bf16.msra.mxu3 %v15777_v51  ;;  %v16065_v51 = vor.u32 %v18584_v0, %v16062_v34  ;;  %v18578_v0 = vld [vmem:[%s28272_s6 + $0xb94] sm:$0xf]  ;;  %v16038_v34 = vld [vmem:[%s28272_s6 + $0xb98] sm:$0xf0] }
 0x4e3   :  { %10964 = vmatpush.bf16.msra.mxu0 %v15585_v6  ;;  %10991 = vmatmul.bf16.vlgmr.msra.gmra.mxu2 %v24777_v62  ;;  %v18538_v62 = vld [vmem:[%s28272_s6 + $0xa54] sm:$0xf] }
 0x4e4   :  { %11035 = vmatpush.bf16.msrb.mxu2 %v16025_v23  ;;  %10977 = vmatpush.bf16.msra.mxu1 %v15649_v10  ;;  %v15881_v38 = vor.u32 %v18538_v62, %v15878_v58  ;;  %v18566_v23 = vld [vmem:[%s28272_s6 + $0xb34] sm:$0xf]  ;;  %v18548_v62 = vld [vmem:[%s28272_s6 + $0xaa4] sm:$0xf]  ;;  %v15918_v58 = vld [vmem:[%s28272_s6 + $0xaa8] sm:$0xf0] }
 0x4e5   :  { %11048 = vmatpush.bf16.msrb.mxu3 %v16089_v53  ;;  %v10758_v53 = vpop.f32.mrf.mxu0  ;;  %v18534_v10 = vld [vmem:[%s28272_s6 + $0xa34] sm:$0xf]  ;;  %v15993_v37 = vor.u32 %v18566_v23, %v15990_v33  ;;  %v16041_v23 = vor.u32 %v18578_v0, %v16038_v34  ;;  %v18560_v33 = vld [vmem:[%s28272_s6 + $0xb04] sm:$0xf] }
 0x4e6   :  { %10965 = vmatmul.bf16.vlgmr.msra.gmra.mxu0 %v24790_v25  ;;  %11004 = vmatmul.bf16.vlgmr.msra.gmra.mxu3 %v24782_v50  ;;  %v18568_v50 = vld [vmem:[%s28272_s6 + $0xb44] sm:$0xf]  ;;  %v15998_v25 = vld [vmem:[%s28272_s6 + $0xb48] sm:$0xf0]  ;;  %v10759_v55 = vadd.f32 %v10758_v53, %v24757_v18  ;;  %v10784_v12 = vpop.f32.mrf.mxu2  ;;  %v15865_v41 = vor.u32 %v18534_v10, %v15862_v59  ;;  %v16278_v10 = vld [vmem:[%s28272_s6 + $0xd78] sm:$0xf0] }
 0x4e7   :  { %11009 = vmatpush.bf16.msrb.mxu0 %v15897_v17  ;;  %10978 = vmatmul.bf16.vlgmr.msra.gmra.mxu1 %v24798_v1  ;;  %v18536_v1 = vld [vmem:[%s28272_s6 + $0xa44] sm:$0xf]  ;;  %v16001_v57 = vor.u32 %v18568_v50, %v15998_v25  ;;  %v15926_v17 = vld [vmem:[%s28272_s6 + $0xab8] sm:$0xf0] }
 0x4e8   :  { %11022 = vmatpush.bf16.msrb.mxu1 %v15961_v4  ;;  %11036 = vmatpush.bf16.msrb.mxu2 %v16017_v44  ;;  %v15873_v6 = vor.u32 %v18536_v1, %v15870_v15  ;;  %v10771_v4 = vpop.f32.mrf.mxu1  ;;  %v18564_v18 = vld [vmem:[%s28272_s6 + $0xb24] sm:$0xf]  ;;  %v15929_v22 = vor.u32 %v18550_v42, %v15926_v17  ;;  %v15974_v25 = vld [vmem:[%s28272_s6 + $0xb18] sm:$0xf0]  ;;  %v18530_v1 = vld [vmem:[%s28272_s6 + $0xa14] sm:$0xf] }
 0x4e9   :  { %11049 = vmatpush.bf16.msrb.mxu3 %v16081_v49  ;;  %v10772_v36 = vadd.f32 %v10771_v4, %v10759_v55  ;;  %v18580_v44 = vld [vmem:[%s28272_s6 + $0xba4] sm:$0xf]  ;;  %v16046_v49 = vld [vmem:[%s28272_s6 + $0xba8] sm:$0xf0]  ;;  %v10797_v29 = vpop.f32.mrf.mxu3  ;;  %v15985_v61 = vor.u32 %v18564_v18, %v15982_v27  ;;  %v15849_v55 = vor.u32 %v18530_v1, %v15846_v19  ;;  %v18654_v42 = vld [vmem:[%s28272_s6 + $0xdf4] sm:$0xf]  ;;  %v15969_v27 = vor.u32 %v18560_v33, %v15966_v9 }
 0x4ea   :  { %v16342_v17 = vld [vmem:[%s28272_s6 + $0xdf8] sm:$0xf0]  ;;  %v18528_v4 = vld [vmem:[%s28272_s6 + $0xa04] sm:$0xf] }
 0x4eb   :  { %11010 = vmatpush.bf16.msrb.mxu0 %v15889_v43  ;;  %v10785_v43 = vadd.f32 %v10784_v12, %v10772_v36  ;;  %v18544_v18 = vld [vmem:[%s28272_s6 + $0xa84] sm:$0xf]  ;;  %v15902_v36 = vld [vmem:[%s28272_s6 + $0xa88] sm:$0xf0]  ;;  %v16150_v12 = vld [vmem:[%s28272_s6 + $0xc78] sm:$0xf0] }
 0x4ec   :  { %11023 = vmatpush.bf16.msrb.mxu1 %v15953_v39  ;;  %11037 = vmatpush.bf16.msrb.mxu2 %v16009_v7  ;;  %v15854_v39 = vld [vmem:[%s28272_s6 + $0xa28] sm:$0xf0]  ;;  %v16049_v7 = vor.u32 %v18580_v44, %v16046_v49  ;;  %v18606_v49 = vld [vmem:[%s28272_s6 + $0xc74] sm:$0xf]  ;;  %v18604_v34 = vld [vmem:[%s28272_s6 + $0xc64] sm:$0xf] }
 0x4ed   :  { %11050 = vmatpush.bf16.msrb.mxu3 %v16073_v47  ;;  %v18562_v47 = vld [vmem:[%s28272_s6 + $0xb14] sm:$0xf]  ;;  %v27156_v50 = vadd.f32 %v10797_v29, %v10785_v43  ;;  %v10760_v15 = vpop.f32.mrf.mxu0  ;;  %v18636_v29 = vld [vmem:[%s28272_s6 + $0xd64] sm:$0xf]  ;;  %v16326_v33 = vld [vmem:[%s28272_s6 + $0xdd8] sm:$0xf0] }
 0x4ee   :  { %v18622_v43 = vld [vmem:[%s28272_s6 + $0xcf4] sm:$0xf]  ;;  %v18620_v1 = vld [vmem:[%s28272_s6 + $0xce4] sm:$0xf]  ;;  %v16206_v15 = vld [vmem:[%s28272_s6 + $0xce8] sm:$0xf0] }
 0x4ef   :  { %11011 = vmatpush.bf16.msrb.mxu0 %v15881_v38  ;;  %v15857_v38 = vor.u32 %v18532_v3, %v15854_v39  ;;  %v16345_v3 = vor.u32 %v18654_v42, %v16342_v17  ;;  %v16214_v39 = vld [vmem:[%s28272_s6 + $0xcf8] sm:$0xf0]  ;;  %v16209_v9 = vor.u32 %v18620_v1, %v16206_v15  ;;  %v16318_v42 = vld [vmem:[%s28272_s6 + $0xdc8] sm:$0xf0]  ;;  %v18600_v17 = vld [vmem:[%s28272_s6 + $0xc44] sm:$0xf] }
 0x4f0   :  { %11024 = vmatpush.bf16.msrb.mxu1 %v15945_v46  ;;  %11038 = vmatpush.bf16.msrb.mxu2 %v16001_v57  ;;  %v15921_v46 = vor.u32 %v18548_v62, %v15918_v58  ;;  %v15910_v57 = vld [vmem:[%s28272_s6 + $0xa98] sm:$0xf0]  ;;  %v10773_v53 = vpop.f32.mrf.mxu1  ;;  %v15905_v58 = vor.u32 %v18544_v18, %v15902_v36  ;;  %v16217_v0 = vor.u32 %v18622_v43, %v16214_v39  ;;  %v16190_v18 = vld [vmem:[%s28272_s6 + $0xcc8] sm:$0xf0]  ;;  %v18598_v43 = vld [vmem:[%s28272_s6 + $0xc34] sm:$0xf] }
 0x4f1   :  { %11051 = vmatpush.bf16.msrb.mxu3 %v16065_v51  ;;  %v15977_v51 = vor.u32 %v18562_v47, %v15974_v25  ;;  %v15913_v59 = vor.u32 %v18546_v21, %v15910_v57  ;;  %v18652_v47 = vld [vmem:[%s28272_s6 + $0xde4] sm:$0xf]  ;;  %v16334_v25 = vld [vmem:[%s28272_s6 + $0xde8] sm:$0xf0]  ;;  %v18634_v21 = vld [vmem:[%s28272_s6 + $0xd54] sm:$0xf] }
 0x4f2   :  { %v16337_v19 = vor.u32 %v18652_v47, %v16334_v25  ;;  %v16262_v57 = vld [vmem:[%s28272_s6 + $0xd58] sm:$0xf0]  ;;  %v18628_v25 = vld [vmem:[%s28272_s6 + $0xd24] sm:$0xf] }
 0x4f3   :  { %11012 = vmatpush.bf16.msrb.mxu0 %v15873_v6  ;;  %v16030_v6 = vld [vmem:[%s28272_s6 + $0xb88] sm:$0xf0]  ;;  %v16265_v53 = vor.u32 %v18634_v21, %v16262_v57  ;;  %v16118_v39 = vld [vmem:[%s28272_s6 + $0xc38] sm:$0xf0] }
 0x4f4   :  { %11025 = vmatpush.bf16.msrb.mxu1 %v15937_v11  ;;  %11039 = vmatpush.bf16.msrb.mxu2 %v15993_v37  ;;  %v18638_v11 = vld [vmem:[%s28272_s6 + $0xd74] sm:$0xf]  ;;  %v10786_v37 = vpop.f32.mrf.mxu2  ;;  %v16033_v44 = vor.u32 %v18576_v31, %v16030_v6  ;;  %v16110_v21 = vld [vmem:[%s28272_s6 + $0xc28] sm:$0xf0] }
 0x4f5   :  { %11052 = vmatpush.bf16.msrb.mxu3 %v16057_v30  ;;  %v15838_v30 = vld [vmem:[%s28272_s6 + $0xa08] sm:$0xf0]  ;;  %v18602_v31 = vld [vmem:[%s28272_s6 + $0xc54] sm:$0xf] }
 0x4f6   :  { %v15841_v62 = vor.u32 %v18528_v4, %v15838_v30  ;;  %v18618_v6 = vld [vmem:[%s28272_s6 + $0xcd4] sm:$0xf]  ;;  %v16126_v4 = vld [vmem:[%s28272_s6 + $0xc48] sm:$0xf0]  ;;  %v18616_v30 = vld [vmem:[%s28272_s6 + $0xcc4] sm:$0xf] }
 0x4f7   :  { %11013 = vmatpush.bf16.msrb.mxu0 %v15865_v41  ;;  %v10799_v41 = vpop.f32.mrf.mxu3 }
 0x4f8   :  { %11026 = vmatpush.bf16.msrb.mxu1 %v15929_v22  ;;  %11040 = vmatpush.bf16.msrb.mxu2 %v15985_v61  ;;  %v16281_v22 = vor.u32 %v18638_v11, %v16278_v10  ;;  %v16270_v61 = vld [vmem:[%s28272_s6 + $0xd68] sm:$0xf0]  ;;  %v18632_v10 = vld [vmem:[%s28272_s6 + $0xd44] sm:$0xf]  ;;  %v16310_v41 = vld [vmem:[%s28272_s6 + $0xdb8] sm:$0xf0] }
 0x4f9   :  { %11053 = vmatpush.bf16.msrb.mxu3 %v16049_v7  ;;  %v16153_v7 = vor.u32 %v18606_v49, %v16150_v12  ;;  %v16129_v49 = vor.u32 %v18600_v17, %v16126_v4  ;;  %v18646_v12 = vld [vmem:[%s28272_s6 + $0xdb4] sm:$0xf]  ;;  %v16166_v4 = vld [vmem:[%s28272_s6 + $0xc98] sm:$0xf0] }
 0x4fa   :  { %v16313_v47 = vor.u32 %v18646_v12, %v16310_v41  ;;  %v18610_v17 = vld [vmem:[%s28272_s6 + $0xc94] sm:$0xf]  ;;  %v16534_v41 = vld [vmem:[%s28272_s6 + $0xf78] sm:$0xf0] }
 0x4fb   :  { %11014 = vmatpush.bf16.msrb.mxu0 %v15857_v38  ;;  %v16142_v38 = vld [vmem:[%s28272_s6 + $0xc68] sm:$0xf0]  ;;  %v18702_v12 = vld [vmem:[%s28272_s6 + $0xf74] sm:$0xf] }
 0x4fc   :  { %11027 = vmatpush.bf16.msrb.mxu1 %v15921_v46  ;;  %11041 = vmatpush.bf16.msrb.mxu2 %v15977_v51  ;;  %v16273_v46 = vor.u32 %v18636_v29, %v16270_v61  ;;  %v16145_v51 = vor.u32 %v18604_v34, %v16142_v38  ;;  %v18614_v61 = vld [vmem:[%s28272_s6 + $0xcb4] sm:$0xf]  ;;  %v16121_v34 = vor.u32 %v18598_v43, %v16118_v39  ;;  %v18644_v38 = vld [vmem:[%s28272_s6 + $0xda4] sm:$0xf]  ;;  %v16598_v43 = vld [vmem:[%s28272_s6 + $0xff8] sm:$0xf0] }
 0x4fd   :  { %11054 = vmatpush.bf16.msrb.mxu3 %v16041_v23  ;;  %v18650_v23 = vld [vmem:[%s28272_s6 + $0xdd4] sm:$0xf]  ;;  %v18592_v39 = vld [vmem:[%s28272_s6 + $0xc04] sm:$0xf] }
 0x4fe   :  { %v16329_v11 = vor.u32 %v18650_v23, %v16326_v33  ;;  %v18612_v33 = vld [vmem:[%s28272_s6 + $0xca4] sm:$0xf] }
 0x4ff   :  { %11015 = vmatpush.bf16.msrb.mxu0 %v15849_v55 }
 0x500   :  { %11028 = vmatpush.bf16.msrb.mxu1 %v15913_v59  ;;  %11042 = vmatpush.bf16.msrb.mxu2 %v15969_v27  ;;  %v18648_v59 = vld [vmem:[%s28272_s6 + $0xdc4] sm:$0xf]  ;;  %v18630_v27 = vld [vmem:[%s28272_s6 + $0xd34] sm:$0xf] }
 0x501   :  { %11055 = vmatpush.bf16.msrb.mxu3 %v16033_v44  ;;  %v16321_v36 = vor.u32 %v18648_v59, %v16318_v42  ;;  %v16246_v44 = vld [vmem:[%s28272_s6 + $0xd38] sm:$0xf0] }
 0x502   :  { %v16249_v29 = vor.u32 %v18630_v27, %v16246_v44  ;;  %v16102_v59 = vld [vmem:[%s28272_s6 + $0xc18] sm:$0xf0]  ;;  %v18640_v27 = vld [vmem:[%s28272_s6 + $0xd84] sm:$0xf]  ;;  %v16286_v44 = vld [vmem:[%s28272_s6 + $0xd88] sm:$0xf0] }
 0x503   :  { %11016 = vmatpush.bf16.msrb.mxu0 %v15841_v62  ;;  %11043 = vmatmul.bf16.vlgmr.msrb.gmra.mxu2 %v24981_v40  ;;  %v16134_v40 = vld [vmem:[%s28272_s6 + $0xc58] sm:$0xf0] }
 0x504   :  { %11087 = vmatpush.bf16.msra.mxu2 %v16281_v22  ;;  %11029 = vmatpush.bf16.msrb.mxu1 %v15905_v58  ;;  %v16137_v55 = vor.u32 %v18602_v31, %v16134_v40  ;;  %v10810_v22 = vpop.f32.mrf.mxu0  ;;  %v10823_v58 = vpop.f32.mrf.mxu1  ;;  %v18626_v40 = vld [vmem:[%s28272_s6 + $0xd14] sm:$0xf] }
 0x505   :  { %11100 = vmatpush.bf16.msra.mxu3 %v16345_v3  ;;  %v16193_v3 = vor.u32 %v18616_v30, %v16190_v18  ;;  %v10811_v62 = vadd.f32 %v10810_v22, %v27156_v50  ;;  %v16238_v50 = vld [vmem:[%s28272_s6 + $0xd28] sm:$0xf0]  ;;  %v18718_v22 = vld [vmem:[%s28272_s6 + $0xff4] sm:$0xf] }
 0x506   :  { %11056 = vmatmul.bf16.vlgmr.msrb.gmra.mxu3 %v24997_v28  ;;  %11017 = vmatmul.bf16.vlgmr.msrb.gmra.mxu0 %v24995_v16  ;;  %v16198_v28 = vld [vmem:[%s28272_s6 + $0xcd8] sm:$0xf0]  ;;  %v16254_v16 = vld [vmem:[%s28272_s6 + $0xd48] sm:$0xf0]  ;;  %v10836_v1 = vpop.f32.mrf.mxu2  ;;  %v16241_v23 = vor.u32 %v18628_v25, %v16238_v50  ;;  %v16289_v50 = vor.u32 %v18640_v27, %v16286_v44  ;;  %v18712_v27 = vld [vmem:[%s28272_s6 + $0xfc4] sm:$0xf] }
 0x507   :  { %11061 = vmatpush.bf16.msra.mxu0 %v16153_v7  ;;  %11030 = vmatmul.bf16.vlgmr.msrb.gmra.mxu1 %v25012_v5  ;;  %v16201_v5 = vor.u32 %v18618_v6, %v16198_v28  ;;  %v16257_v37 = vor.u32 %v18632_v10, %v16254_v16  ;;  %v16182_v7 = vld [vmem:[%s28272_s6 + $0xcb8] sm:$0xf0]  ;;  %v16574_v44 = vld [vmem:[%s28272_s6 + $0xfc8] sm:$0xf0] }
 0x508   :  { %11074 = vmatpush.bf16.msra.mxu1 %v16217_v0  ;;  %11088 = vmatpush.bf16.msra.mxu2 %v16273_v46  ;;  %v10824_v0 = vadd.f32 %v10823_v58, %v10811_v62  ;;  %v16302_v46 = vld [vmem:[%s28272_s6 + $0xda8] sm:$0xf0]  ;;  %v16185_v15 = vor.u32 %v18614_v61, %v16182_v7  ;;  %v16294_v10 = vld [vmem:[%s28272_s6 + $0xd98] sm:$0xf0]  ;;  %v18608_v61 = vld [vmem:[%s28272_s6 + $0xc84] sm:$0xf] }
 0x509   :  { %11101 = vmatpush.bf16.msra.mxu3 %v16337_v19  ;;  %v18596_v19 = vld [vmem:[%s28272_s6 + $0xc24] sm:$0xf]  ;;  %v16305_v31 = vor.u32 %v18644_v38, %v16302_v46  ;;  %v16094_v62 = vld [vmem:[%s28272_s6 + $0xc08] sm:$0xf0]  ;;  %v18686_v38 = vld [vmem:[%s28272_s6 + $0xef4] sm:$0xf] }
 0x50a   :  { %v10837_v57 = vadd.f32 %v10836_v1, %v10824_v0  ;;  %v16113_v28 = vor.u32 %v18596_v19, %v16110_v21  ;;  %v16158_v7 = vld [vmem:[%s28272_s6 + $0xc88] sm:$0xf0]  ;;  %v16537_v0 = vor.u32 %v18702_v12, %v16534_v41  ;;  %v16470_v46 = vld [vmem:[%s28272_s6 + $0xef8] sm:$0xf0]  ;;  %v16601_v1 = vor.u32 %v18718_v22, %v16598_v43  ;;  %v18700_v19 = vld [vmem:[%s28272_s6 + $0xf64] sm:$0xf] }
 0x50b   :  { %11062 = vmatpush.bf16.msra.mxu0 %v16145_v51  ;;  %v10849_v51 = vpop.f32.mrf.mxu3  ;;  %v16161_v21 = vor.u32 %v18608_v61, %v16158_v7  ;;  %v16382_v41 = vld [vmem:[%s28272_s6 + $0xe48] sm:$0xf0]  ;;  %v18680_v22 = vld [vmem:[%s28272_s6 + $0xec4] sm:$0xf]  ;;  %v16566_v61 = vld [vmem:[%s28272_s6 + $0xfb8] sm:$0xf0] }
 0x50c   :  { %11075 = vmatpush.bf16.msra.mxu1 %v16209_v9  ;;  %11089 = vmatpush.bf16.msra.mxu2 %v16265_v53  ;;  %v16174_v9 = vld [vmem:[%s28272_s6 + $0xca8] sm:$0xf0]  ;;  %v16230_v53 = vld [vmem:[%s28272_s6 + $0xd18] sm:$0xf0]  ;;  %v27358_v6 = vadd.f32 %v10849_v51, %v10837_v57  ;;  %v10812_v42 = vpop.f32.mrf.mxu0  ;;  %v10825_v30 = vpop.f32.mrf.mxu1  ;;  %v18716_v51 = vld [vmem:[%s28272_s6 + $0xfe4] sm:$0xf] }
 0x50d   :  { %11102 = vmatpush.bf16.msra.mxu3 %v16329_v11  ;;  %v18642_v11 = vld [vmem:[%s28272_s6 + $0xd94] sm:$0xf]  ;;  %v16177_v16 = vor.u32 %v18612_v33, %v16174_v9  ;;  %v16526_v57 = vld [vmem:[%s28272_s6 + $0xf68] sm:$0xf0]  ;;  %v16473_v9 = vor.u32 %v18686_v38, %v16470_v46  ;;  %v16582_v42 = vld [vmem:[%s28272_s6 + $0xfd8] sm:$0xf0] }
 0x50e   :  { %v16297_v18 = vor.u32 %v18642_v11, %v16294_v10  ;;  %v10838_v58 = vpop.f32.mrf.mxu2  ;;  %v16529_v11 = vor.u32 %v18700_v19, %v16526_v57  ;;  %v16454_v30 = vld [vmem:[%s28272_s6 + $0xed8] sm:$0xf0]  ;;  %v18678_v38 = vld [vmem:[%s28272_s6 + $0xeb4] sm:$0xf]  ;;  %v16494_v57 = vld [vmem:[%s28272_s6 + $0xf28] sm:$0xf0] }
 0x50f   :  { %11063 = vmatpush.bf16.msra.mxu0 %v16137_v55  ;;  %v18594_v55 = vld [vmem:[%s28272_s6 + $0xc14] sm:$0xf]  ;;  %v16502_v58 = vld [vmem:[%s28272_s6 + $0xf38] sm:$0xf0] }
 0x510   :  { %11076 = vmatpush.bf16.msra.mxu1 %v16201_v5  ;;  %11090 = vmatpush.bf16.msra.mxu2 %v16257_v37  ;;  %v16233_v5 = vor.u32 %v18626_v40, %v16230_v53  ;;  %v18624_v37 = vld [vmem:[%s28272_s6 + $0xd04] sm:$0xf]  ;;  %v16398_v40 = vld [vmem:[%s28272_s6 + $0xe68] sm:$0xf0]  ;;  %v16438_v46 = vld [vmem:[%s28272_s6 + $0xeb8] sm:$0xf0] }
 0x511   :  { %11103 = vmatpush.bf16.msra.mxu3 %v16321_v36  ;;  %v16222_v36 = vld [vmem:[%s28272_s6 + $0xd08] sm:$0xf0]  ;;  %v18684_v53 = vld [vmem:[%s28272_s6 + $0xee4] sm:$0xf] }
 0x513   :  { %11064 = vmatpush.bf16.msra.mxu0 %v16129_v49  ;;  %v16105_v49 = vor.u32 %v18594_v55, %v16102_v59  ;;  %v10851_v25 = vpop.f32.mrf.mxu3  ;;  %v16518_v55 = vld [vmem:[%s28272_s6 + $0xf58] sm:$0xf0]  ;;  %v18714_v59 = vld [vmem:[%s28272_s6 + $0xfd4] sm:$0xf] }
 0x514   :  { %11077 = vmatpush.bf16.msra.mxu1 %v16193_v3  ;;  %11091 = vmatpush.bf16.msra.mxu2 %v16249_v29  ;;  %v16169_v3 = vor.u32 %v18610_v17, %v16166_v4  ;;  %v16225_v29 = vor.u32 %v18624_v37, %v16222_v36  ;;  %v16390_v4 = vld [vmem:[%s28272_s6 + $0xe58] sm:$0xf0]  ;;  %v18682_v37 = vld [vmem:[%s28272_s6 + $0xed4] sm:$0xf]  ;;  %v16585_v36 = vor.u32 %v18714_v59, %v16582_v42 }
 0x515   :  { %11104 = vmatpush.bf16.msra.mxu3 %v16313_v47  ;;  %v18670_v47 = vld [vmem:[%s28272_s6 + $0xe74] sm:$0xf]  ;;  %v16457_v12 = vor.u32 %v18682_v37, %v16454_v30 }
 0x516   :  { %v18690_v42 = vld [vmem:[%s28272_s6 + $0xf14] sm:$0xf] }
 0x517   :  { %11065 = vmatpush.bf16.msra.mxu0 %v16121_v34  ;;  %v16406_v34 = vld [vmem:[%s28272_s6 + $0xe78] sm:$0xf0] }
 0x518   :  { %11078 = vmatpush.bf16.msra.mxu1 %v16185_v15  ;;  %11092 = vmatpush.bf16.msra.mxu2 %v16241_v23  ;;  %v16097_v15 = vor.u32 %v18592_v39, %v16094_v62  ;;  %v16590_v23 = vld [vmem:[%s28272_s6 + $0xfe8] sm:$0xf0]  ;;  %v16409_v33 = vor.u32 %v18670_v47, %v16406_v34  ;;  %v16577_v39 = vor.u32 %v18712_v27, %v16574_v44  ;;  %v18694_v62 = vld [vmem:[%s28272_s6 + $0xf34] sm:$0xf]  ;;  %v16374_v34 = vld [vmem:[%s28272_s6 + $0xe38] sm:$0xf0] }
 0x519   :  { %11105 = vmatpush.bf16.msra.mxu3 %v16305_v31  ;;  %v18668_v31 = vld [vmem:[%s28272_s6 + $0xe64] sm:$0xf]  ;;  %v16593_v10 = vor.u32 %v18716_v51, %v16590_v23  ;;  %v16558_v23 = vld [vmem:[%s28272_s6 + $0xfa8] sm:$0xf0]  ;;  %v16422_v27 = vld [vmem:[%s28272_s6 + $0xe98] sm:$0xf0] }
 0x51a   :  { %v18708_v51 = vld [vmem:[%s28272_s6 + $0xfa4] sm:$0xf] }
 0x51b   :  { %11066 = vmatpush.bf16.msra.mxu0 %v16113_v28  ;;  %v16462_v28 = vld [vmem:[%s28272_s6 + $0xee8] sm:$0xf0]  ;;  %v16561_v59 = vor.u32 %v18708_v51, %v16558_v23 }
 0x51c   :  { %11079 = vmatpush.bf16.msra.mxu1 %v16177_v16  ;;  %11093 = vmatpush.bf16.msra.mxu2 %v16233_v5  ;;  %v18698_v16 = vld [vmem:[%s28272_s6 + $0xf54] sm:$0xf]  ;;  %v16401_v5 = vor.u32 %v18668_v31, %v16398_v40  ;;  %v16465_v17 = vor.u32 %v18684_v53, %v16462_v28  ;;  %v16441_v31 = vor.u32 %v18678_v38, %v16438_v46  ;;  %v18660_v40 = vld [vmem:[%s28272_s6 + $0xe24] sm:$0xf]  ;;  %v16366_v28 = vld [vmem:[%s28272_s6 + $0xe28] sm:$0xf0] }
 0x51d   :  { %11106 = vmatpush.bf16.msra.mxu3 %v16297_v18  ;;  %v16521_v18 = vor.u32 %v18698_v16, %v16518_v55  ;;  %v16369_v37 = vor.u32 %v18660_v40, %v16366_v28  ;;  %v18734_v46 = vld [vmem:[%s28272_s6 + $0x1074] sm:$0xf]  ;;  %v18780_v40 = vld [vmem:[%s28272_s6 + $0x11e4] sm:$0xf] }
 0x51f   :  { %11067 = vmatpush.bf16.msra.mxu0 %v16105_v49 }
 0x520   :  { %11080 = vmatpush.bf16.msra.mxu1 %v16169_v3  ;;  %11094 = vmatpush.bf16.msra.mxu2 %v16225_v29  ;;  %v16446_v3 = vld [vmem:[%s28272_s6 + $0xec8] sm:$0xf0]  ;;  %v18710_v29 = vld [vmem:[%s28272_s6 + $0xfb4] sm:$0xf] }
 0x521   :  { %11107 = vmatpush.bf16.msra.mxu3 %v16289_v50  ;;  %v16449_v25 = vor.u32 %v18680_v22, %v16446_v3  ;;  %v18662_v50 = vld [vmem:[%s28272_s6 + $0xe34] sm:$0xf]  ;;  %v16569_v19 = vor.u32 %v18710_v29, %v16566_v61  ;;  %v16542_v3 = vld [vmem:[%s28272_s6 + $0xf88] sm:$0xf0]  ;;  %v16854_v61 = vld [vmem:[%s28272_s6 + $0x11f8] sm:$0xf0] }
 0x522   :  { %v18782_v29 = vld [vmem:[%s28272_s6 + $0x11f4] sm:$0xf] }
 0x523   :  { %11068 = vmatpush.bf16.msra.mxu0 %v16097_v15  ;;  %11095 = vmatmul.bf16.vlgmr.msra.gmra.mxu2 %v25197_v60  ;;  %v18666_v60 = vld [vmem:[%s28272_s6 + $0xe54] sm:$0xf]  ;;  %v10862_v7 = vpop.f32.mrf.mxu0  ;;  %v16505_v15 = vor.u32 %v18694_v62, %v16502_v58 }
 0x524   :  { %11139 = vmatpush.bf16.msrb.mxu2 %v16537_v0  ;;  %11081 = vmatpush.bf16.msra.mxu1 %v16161_v21  ;;  %v16393_v49 = vor.u32 %v18666_v60, %v16390_v4  ;;  %v10863_v0 = vadd.f32 %v10862_v7, %v27358_v6  ;;  %v18692_v6 = vld [vmem:[%s28272_s6 + $0xf24] sm:$0xf]  ;;  %v18706_v60 = vld [vmem:[%s28272_s6 + $0xf94] sm:$0xf]  ;;  %v16550_v4 = vld [vmem:[%s28272_s6 + $0xf98] sm:$0xf0] }
 0x525   :  { %11152 = vmatpush.bf16.msrb.mxu3 %v16601_v1  ;;  %v10875_v1 = vpop.f32.mrf.mxu1  ;;  %v16497_v55 = vor.u32 %v18692_v6, %v16494_v57  ;;  %v18656_v7 = vld [vmem:[%s28272_s6 + $0xe04] sm:$0xf]  ;;  %v16857_v6 = vor.u32 %v18782_v29, %v16854_v61  ;;  %v16726_v57 = vld [vmem:[%s28272_s6 + $0x10f8] sm:$0xf0] }
 0x526   :  { %11069 = vmatmul.bf16.vlgmr.msra.gmra.mxu0 %v25210_v24  ;;  %11108 = vmatmul.bf16.vlgmr.msra.gmra.mxu3 %v25202_v13  ;;  %v18696_v13 = vld [vmem:[%s28272_s6 + $0xf44] sm:$0xf]  ;;  %v16510_v24 = vld [vmem:[%s28272_s6 + $0xf48] sm:$0xf0]  ;;  %v10876_v21 = vadd.f32 %v10875_v1, %v10863_v0  ;;  %v16662_v1 = vld [vmem:[%s28272_s6 + $0x1078] sm:$0xf0] }
 0x527   :  { %11113 = vmatpush.bf16.msrb.mxu0 %v16409_v33  ;;  %11082 = vmatmul.bf16.vlgmr.msra.gmra.mxu1 %v25218_v14  ;;  %v18664_v14 = vld [vmem:[%s28272_s6 + $0xe44] sm:$0xf]  ;;  %v16513_v43 = vor.u32 %v18696_v13, %v16510_v24  ;;  %v10888_v33 = vpop.f32.mrf.mxu2  ;;  %v16358_v13 = vld [vmem:[%s28272_s6 + $0xe18] sm:$0xf0]  ;;  %v18674_v24 = vld [vmem:[%s28272_s6 + $0xe94] sm:$0xf] }
 0x528   :  { %11126 = vmatpush.bf16.msrb.mxu1 %v16473_v9  ;;  %11140 = vmatpush.bf16.msrb.mxu2 %v16529_v11  ;;  %v16385_v47 = vor.u32 %v18664_v14, %v16382_v41  ;;  %v16377_v9 = vor.u32 %v18662_v50, %v16374_v34  ;;  %v10889_v53 = vadd.f32 %v10888_v33, %v10876_v21  ;;  %v18676_v11 = vld [vmem:[%s28272_s6 + $0xea4] sm:$0xf]  ;;  %v16478_v14 = vld [vmem:[%s28272_s6 + $0xf08] sm:$0xf0]  ;;  %v18750_v21 = vld [vmem:[%s28272_s6 + $0x10f4] sm:$0xf] }
 0x529   :  { %11153 = vmatpush.bf16.msrb.mxu3 %v16593_v10  ;;  %v16430_v10 = vld [vmem:[%s28272_s6 + $0xea8] sm:$0xf0]  ;;  %v10901_v16 = vpop.f32.mrf.mxu3  ;;  %v18704_v41 = vld [vmem:[%s28272_s6 + $0xf84] sm:$0xf]  ;;  %v16425_v58 = vor.u32 %v18674_v24, %v16422_v27  ;;  %v16729_v28 = vor.u32 %v18750_v21, %v16726_v57  ;;  %v18746_v24 = vld [vmem:[%s28272_s6 + $0x10d4] sm:$0xf] }
 0x52a   :  { %v16433_v30 = vor.u32 %v18676_v11, %v16430_v10  ;;  %v18672_v50 = vld [vmem:[%s28272_s6 + $0xe84] sm:$0xf]  ;;  %v16414_v0 = vld [vmem:[%s28272_s6 + $0xe88] sm:$0xf0]  ;;  %v16545_v38 = vor.u32 %v18704_v41, %v16542_v3  ;;  %v16758_v29 = vld [vmem:[%s28272_s6 + $0x1138] sm:$0xf0] }
 0x52b   :  { %11114 = vmatpush.bf16.msrb.mxu0 %v16401_v5  ;;  %v27554_v5 = vadd.f32 %v10901_v16, %v10889_v53  ;;  %v16417_v23 = vor.u32 %v18672_v50, %v16414_v0  ;;  %v18764_v33 = vld [vmem:[%s28272_s6 + $0x1164] sm:$0xf]  ;;  %v16846_v53 = vld [vmem:[%s28272_s6 + $0x11e8] sm:$0xf0]  ;;  %v18726_v0 = vld [vmem:[%s28272_s6 + $0x1034] sm:$0xf] }
 0x52c   :  { %11127 = vmatpush.bf16.msrb.mxu1 %v16465_v17  ;;  %11141 = vmatpush.bf16.msrb.mxu2 %v16521_v18  ;;  %v16486_v17 = vld [vmem:[%s28272_s6 + $0xf18] sm:$0xf0]  ;;  %v18658_v18 = vld [vmem:[%s28272_s6 + $0xe14] sm:$0xf]  ;;  %v18732_v11 = vld [vmem:[%s28272_s6 + $0x1064] sm:$0xf] }
 0x52d   :  { %11154 = vmatpush.bf16.msrb.mxu3 %v16585_v36  ;;  %v10864_v36 = vpop.f32.mrf.mxu0  ;;  %v16489_v44 = vor.u32 %v18690_v42, %v16486_v17  ;;  %v10877_v22 = vpop.f32.mrf.mxu1  ;;  %v16361_v62 = vor.u32 %v18658_v18, %v16358_v13  ;;  %v16654_v10 = vld [vmem:[%s28272_s6 + $0x1068] sm:$0xf0]  ;;  %v16849_v42 = vor.u32 %v18780_v40, %v16846_v53  ;;  %v18762_v17 = vld [vmem:[%s28272_s6 + $0x1154] sm:$0xf]  ;;  %v18728_v41 = vld [vmem:[%s28272_s6 + $0x1044] sm:$0xf] }
 0x52e   :  { %v18730_v36 = vld [vmem:[%s28272_s6 + $0x1054] sm:$0xf]  ;;  %v16638_v22 = vld [vmem:[%s28272_s6 + $0x1048] sm:$0xf0]  ;;  %v18756_v21 = vld [vmem:[%s28272_s6 + $0x1124] sm:$0xf] }
 0x52f   :  { %11115 = vmatpush.bf16.msrb.mxu0 %v16393_v49  ;;  %v16553_v49 = vor.u32 %v18706_v60, %v16550_v4  ;;  %v16774_v60 = vld [vmem:[%s28272_s6 + $0x1158] sm:$0xf0]  ;;  %v16657_v4 = vor.u32 %v18732_v11, %v16654_v10  ;;  %v16641_v61 = vor.u32 %v18728_v41, %v16638_v22  ;;  %v18724_v40 = vld [vmem:[%s28272_s6 + $0x1024] sm:$0xf]  ;;  %v16622_v53 = vld [vmem:[%s28272_s6 + $0x1028] sm:$0xf0] }
 0x530   :  { %11128 = vmatpush.bf16.msrb.mxu1 %v16457_v12  ;;  %11142 = vmatpush.bf16.msrb.mxu2 %v16513_v43  ;;  %v18688_v12 = vld [vmem:[%s28272_s6 + $0xf04] sm:$0xf]  ;;  %v18766_v43 = vld [vmem:[%s28272_s6 + $0x1174] sm:$0xf]  ;;  %v16777_v13 = vor.u32 %v18762_v17, %v16774_v60  ;;  %v16742_v17 = vld [vmem:[%s28272_s6 + $0x1118] sm:$0xf0] }
 0x531   :  { %11155 = vmatpush.bf16.msrb.mxu3 %v16577_v39  ;;  %v16790_v39 = vld [vmem:[%s28272_s6 + $0x1178] sm:$0xf0]  ;;  %v16481_v34 = vor.u32 %v18688_v12, %v16478_v14  ;;  %v18776_v12 = vld [vmem:[%s28272_s6 + $0x11c4] sm:$0xf]  ;;  %v16830_v14 = vld [vmem:[%s28272_s6 + $0x11c8] sm:$0xf0] }
 0x532   :  { %v18830_v22 = vld [vmem:[%s28272_s6 + $0x1374] sm:$0xf] }
 0x533   :  { %11116 = vmatpush.bf16.msrb.mxu0 %v16385_v47  ;;  %v10890_v47 = vpop.f32.mrf.mxu2 }
 0x534   :  { %11129 = vmatpush.bf16.msrb.mxu1 %v16449_v25  ;;  %11143 = vmatpush.bf16.msrb.mxu2 %v16505_v15  ;;  %v16350_v25 = vld [vmem:[%s28272_s6 + $0xe08] sm:$0xf0]  ;;  %v10903_v15 = vpop.f32.mrf.mxu3  ;;  %v16822_v47 = vld [vmem:[%s28272_s6 + $0x11b8] sm:$0xf0] }
 0x535   :  { %11156 = vmatpush.bf16.msrb.mxu3 %v16569_v19  ;;  %v16793_v19 = vor.u32 %v18766_v43, %v16790_v39  ;;  %v16353_v51 = vor.u32 %v18656_v7, %v16350_v25  ;;  %v18744_v43 = vld [vmem:[%s28272_s6 + $0x10c4] sm:$0xf]  ;;  %v16702_v39 = vld [vmem:[%s28272_s6 + $0x10c8] sm:$0xf0]  ;;  %v18774_v7 = vld [vmem:[%s28272_s6 + $0x11b4] sm:$0xf] }
 0x536   :  { %v16705_v50 = vor.u32 %v18744_v43, %v16702_v39  ;;  %v18742_v15 = vld [vmem:[%s28272_s6 + $0x10b4] sm:$0xf] }
 0x537   :  { %11117 = vmatpush.bf16.msrb.mxu0 %v16377_v9  ;;  %v16782_v9 = vld [vmem:[%s28272_s6 + $0x1168] sm:$0xf0]  ;;  %v18846_v43 = vld [vmem:[%s28272_s6 + $0x13f4] sm:$0xf] }
 0x538   :  { %11130 = vmatpush.bf16.msrb.mxu1 %v16441_v31  ;;  %11144 = vmatpush.bf16.msrb.mxu2 %v16497_v55  ;;  %v16665_v31 = vor.u32 %v18734_v46, %v16662_v1  ;;  %v16785_v16 = vor.u32 %v18764_v33, %v16782_v9  ;;  %v18748_v55 = vld [vmem:[%s28272_s6 + $0x10e4] sm:$0xf]  ;;  %v16814_v33 = vld [vmem:[%s28272_s6 + $0x11a8] sm:$0xf0] }
 0x539   :  { %11157 = vmatpush.bf16.msrb.mxu3 %v16561_v59  ;;  %v16718_v59 = vld [vmem:[%s28272_s6 + $0x10e8] sm:$0xf0] }
 0x53a   :  { %v16721_v18 = vor.u32 %v18748_v55, %v16718_v59  ;;  %v16686_v55 = vld [vmem:[%s28272_s6 + $0x10a8] sm:$0xf0] }
 0x53b   :  { %11118 = vmatpush.bf16.msrb.mxu0 %v16369_v37  ;;  %v18778_v37 = vld [vmem:[%s28272_s6 + $0x11d4] sm:$0xf] }
 0x53c   :  { %11131 = vmatpush.bf16.msrb.mxu1 %v16433_v30  ;;  %11145 = vmatpush.bf16.msrb.mxu2 %v16489_v44  ;;  %v16838_v30 = vld [vmem:[%s28272_s6 + $0x11d8] sm:$0xf0]  ;;  %v18760_v44 = vld [vmem:[%s28272_s6 + $0x1144] sm:$0xf] }
 0x53d   :  { %11158 = vmatpush.bf16.msrb.mxu3 %v16553_v49  ;;  %v16841_v27 = vor.u32 %v18778_v37, %v16838_v30  ;;  %v18770_v37 = vld [vmem:[%s28272_s6 + $0x1194] sm:$0xf]  ;;  %v16806_v30 = vld [vmem:[%s28272_s6 + $0x1198] sm:$0xf0] }
 0x53f   :  { %11119 = vmatpush.bf16.msrb.mxu0 %v16361_v62  ;;  %v16833_v62 = vor.u32 %v18776_v12, %v16830_v14  ;;  %v16734_v12 = vld [vmem:[%s28272_s6 + $0x1108] sm:$0xf0]  ;;  %v18768_v14 = vld [vmem:[%s28272_s6 + $0x1184] sm:$0xf] }
 0x540   :  { %11132 = vmatpush.bf16.msrb.mxu1 %v16425_v58  ;;  %11146 = vmatpush.bf16.msrb.mxu2 %v16481_v34  ;;  %v18758_v58 = vld [vmem:[%s28272_s6 + $0x1134] sm:$0xf]  ;;  %v16630_v34 = vld [vmem:[%s28272_s6 + $0x1038] sm:$0xf0] }
 0x541   :  { %11159 = vmatpush.bf16.msrb.mxu3 %v16545_v38  ;;  %v16761_v1 = vor.u32 %v18758_v58, %v16758_v29  ;;  %v18720_v58 = vld [vmem:[%s28272_s6 + $0x1004] sm:$0xf]  ;;  %v16606_v29 = vld [vmem:[%s28272_s6 + $0x1008] sm:$0xf0] }
 0x543   :  { %11120 = vmatpush.bf16.msrb.mxu0 %v16353_v51  ;;  %11147 = vmatmul.bf16.vlgmr.msrb.gmra.mxu2 %v25401_v8  ;;  %v16646_v8 = vld [vmem:[%s28272_s6 + $0x1058] sm:$0xf0]  ;;  %v10914_v25 = vpop.f32.mrf.mxu0  ;;  %v16633_v51 = vor.u32 %v18726_v0, %v16630_v34 }
 0x544   :  { %11191 = vmatpush.bf16.msra.mxu2 %v16793_v19  ;;  %11133 = vmatpush.bf16.msrb.mxu1 %v16417_v23  ;;  %v16649_v49 = vor.u32 %v18730_v36, %v16646_v8  ;;  %v10915_v38 = vadd.f32 %v10914_v25, %v27554_v5  ;;  %v10927_v46 = vpop.f32.mrf.mxu1  ;;  %v16694_v19 = vld [vmem:[%s28272_s6 + $0x10b8] sm:$0xf0]  ;;  %v16750_v5 = vld [vmem:[%s28272_s6 + $0x1128] sm:$0xf0]  ;;  %v18772_v23 = vld [vmem:[%s28272_s6 + $0x11a4] sm:$0xf] }
 0x545   :  { %11204 = vmatpush.bf16.msra.mxu3 %v16857_v6  ;;  %v16825_v6 = vor.u32 %v18774_v7, %v16822_v47  ;;  %v16753_v10 = vor.u32 %v18756_v21, %v16750_v5  ;;  %v16817_v59 = vor.u32 %v18772_v23, %v16814_v33  ;;  %v18722_v36 = vld [vmem:[%s28272_s6 + $0x1014] sm:$0xf]  ;;  %v16614_v8 = vld [vmem:[%s28272_s6 + $0x1018] sm:$0xf0]  ;;  %v18736_v47 = vld [vmem:[%s28272_s6 + $0x1084] sm:$0xf] }
 0x546   :  { %11160 = vmatmul.bf16.vlgmr.msrb.gmra.mxu3 %v25417_v35  ;;  %11121 = vmatmul.bf16.vlgmr.msrb.gmra.mxu0 %v25415_v56  ;;  %v16710_v35 = vld [vmem:[%s28272_s6 + $0x10d8] sm:$0xf0]  ;;  %v16766_v56 = vld [vmem:[%s28272_s6 + $0x1148] sm:$0xf0]  ;;  %v10928_v57 = vadd.f32 %v10927_v46, %v10915_v38  ;;  %v10940_v9 = vpop.f32.mrf.mxu2  ;;  %v16617_v41 = vor.u32 %v18722_v36, %v16614_v8  ;;  %v18828_v21 = vld [vmem:[%s28272_s6 + $0x1364] sm:$0xf] }
 0x547   :  { %11165 = vmatpush.bf16.msra.mxu0 %v16665_v31  ;;  %11134 = vmatmul.bf16.vlgmr.msrb.gmra.mxu1 %v25432_v45  ;;  %v16713_v45 = vor.u32 %v18746_v24, %v16710_v35  ;;  %v16769_v3 = vor.u32 %v18760_v44, %v16766_v56  ;;  %v16697_v31 = vor.u32 %v18742_v15, %v16694_v19  ;;  %v18738_v35 = vld [vmem:[%s28272_s6 + $0x1094] sm:$0xf]  ;;  %v18752_v44 = vld [vmem:[%s28272_s6 + $0x1104] sm:$0xf]  ;;  %v16670_v25 = vld [vmem:[%s28272_s6 + $0x1088] sm:$0xf0] }
 0x548   :  { %11178 = vmatpush.bf16.msra.mxu1 %v16729_v28  ;;  %11192 = vmatpush.bf16.msra.mxu2 %v16785_v16  ;;  %v10941_v28 = vadd.f32 %v10940_v9, %v10928_v57  ;;  %v18740_v16 = vld [vmem:[%s28272_s6 + $0x10a4] sm:$0xf]  ;;  %v16737_v7 = vor.u32 %v18752_v44, %v16734_v12  ;;  %v16918_v46 = vld [vmem:[%s28272_s6 + $0x1278] sm:$0xf0]  ;;  %v16673_v5 = vor.u32 %v18736_v47, %v16670_v25  ;;  %v17038_v57 = vld [vmem:[%s28272_s6 + $0x1368] sm:$0xf0] }
 0x549   :  { %11205 = vmatpush.bf16.msra.mxu3 %v16849_v42  ;;  %v10953_v11 = vpop.f32.mrf.mxu3  ;;  %v18754_v42 = vld [vmem:[%s28272_s6 + $0x1114] sm:$0xf]  ;;  %v16982_v15 = vld [vmem:[%s28272_s6 + $0x12f8] sm:$0xf0]  ;;  %v17102_v23 = vld [vmem:[%s28272_s6 + $0x13e8] sm:$0xf0] }
 0x54a   :  { %v27756_v60 = vadd.f32 %v10953_v11, %v10941_v28  ;;  %v16745_v24 = vor.u32 %v18754_v42, %v16742_v17  ;;  %v16974_v28 = vld [vmem:[%s28272_s6 + $0x12e8] sm:$0xf0]  ;;  %v17041_v11 = vor.u32 %v18828_v21, %v17038_v57  ;;  %v17094_v42 = vld [vmem:[%s28272_s6 + $0x13d8] sm:$0xf0]  ;;  %v18810_v36 = vld [vmem:[%s28272_s6 + $0x12d4] sm:$0xf] }
 0x54b   :  { %11166 = vmatpush.bf16.msra.mxu0 %v16657_v4  ;;  %v16625_v4 = vor.u32 %v18724_v40, %v16622_v53  ;;  %v16910_v40 = vld [vmem:[%s28272_s6 + $0x1268] sm:$0xf0]  ;;  %v18812_v53 = vld [vmem:[%s28272_s6 + $0x12e4] sm:$0xf]  ;;  %v16966_v8 = vld [vmem:[%s28272_s6 + $0x12d8] sm:$0xf0] }
 0x54c   :  { %11179 = vmatpush.bf16.msra.mxu1 %v16721_v18  ;;  %11193 = vmatpush.bf16.msra.mxu2 %v16777_v13  ;;  %v16689_v18 = vor.u32 %v18740_v16, %v16686_v55  ;;  %v10916_v13 = vpop.f32.mrf.mxu0  ;;  %v10929_v56 = vpop.f32.mrf.mxu1  ;;  %v18826_v16 = vld [vmem:[%s28272_s6 + $0x1354] sm:$0xf]  ;;  %v17030_v55 = vld [vmem:[%s28272_s6 + $0x1358] sm:$0xf0]  ;;  %v17022_v44 = vld [vmem:[%s28272_s6 + $0x1348] sm:$0xf0] }
 0x54d   :  { %11206 = vmatpush.bf16.msra.mxu3 %v16841_v27  ;;  %v16678_v27 = vld [vmem:[%s28272_s6 + $0x1098] sm:$0xf0]  ;;  %v17033_v13 = vor.u32 %v18826_v16, %v17030_v55  ;;  %v18840_v56 = vld [vmem:[%s28272_s6 + $0x13c4] sm:$0xf]  ;;  %v17006_v21 = vld [vmem:[%s28272_s6 + $0x1328] sm:$0xf0] }
 0x54e   :  { %v16681_v39 = vor.u32 %v18738_v35, %v16678_v27  ;;  %v18824_v35 = vld [vmem:[%s28272_s6 + $0x1344] sm:$0xf]  ;;  %v17070_v57 = vld [vmem:[%s28272_s6 + $0x13a8] sm:$0xf0]  ;;  %v18818_v55 = vld [vmem:[%s28272_s6 + $0x1314] sm:$0xf] }
 0x54f   :  { %11167 = vmatpush.bf16.msra.mxu0 %v16649_v49  ;;  %v16809_v49 = vor.u32 %v18770_v37, %v16806_v30  ;;  %v28314_v37 = vld [vmem:[#allocation16_spill] sm:$0xff]  ;;  %v28315_v30 = vld [vmem:[#allocation15_spill] sm:$0xff]  ;;  %v28316_v27 = vld [vmem:[#allocation17_spill] sm:$0xff] }
 0x550   :  { %11180 = vmatpush.bf16.msra.mxu1 %v16713_v45  ;;  %11194 = vmatpush.bf16.msra.mxu2 %v16769_v3  ;;  %v16798_v45 = vld [vmem:[%s28272_s6 + $0x1188] sm:$0xf0]  ;;  %v17046_v3 = vld [vmem:[%s28272_s6 + $0x1378] sm:$0xf0] }
 0x551   :  { %11207 = vmatpush.bf16.msra.mxu3 %v16833_v62  ;;  %v17110_v62 = vld [vmem:[%s28272_s6 + $0x13f8] sm:$0xf0]  ;;  %v10955_v0 = vpop.f32.mrf.mxu3  ;;  %v16801_v34 = vor.u32 %v18768_v14, %v16798_v45  ;;  %v17049_v38 = vor.u32 %v18830_v22, %v17046_v3  ;;  %v16969_v14 = vor.u32 %v18810_v36, %v16966_v8  ;;  %v18792_v45 = vld [vmem:[%s28272_s6 + $0x1244] sm:$0xf]  ;;  %v16958_v3 = vld [vmem:[%s28272_s6 + $0x12c8] sm:$0xf0] }
 0x552   :  { %v17113_v19 = vor.u32 %v18846_v43, %v17110_v62  ;;  %v18808_v22 = vld [vmem:[%s28272_s6 + $0x12c4] sm:$0xf]  ;;  %v17025_v43 = vor.u32 %v18824_v35, %v17022_v44  ;;  %v18822_v62 = vld [vmem:[%s28272_s6 + $0x1334] sm:$0xf]  ;;  %v16870_v36 = vld [vmem:[%s28272_s6 + $0x1218] sm:$0xf0] }
 0x553   :  { %11168 = vmatpush.bf16.msra.mxu0 %v16641_v61  ;;  %v10942_v61 = vpop.f32.mrf.mxu2  ;;  %v16961_v25 = vor.u32 %v18808_v22, %v16958_v3  ;;  %v18802_v8 = vld [vmem:[%s28272_s6 + $0x1294] sm:$0xf]  ;;  %v16990_v44 = vld [vmem:[%s28272_s6 + $0x1308] sm:$0xf0] }
 0x554   :  { %11181 = vmatpush.bf16.msra.mxu1 %v16705_v50  ;;  %11195 = vmatpush.bf16.msra.mxu2 %v16761_v1  ;;  %v18798_v50 = vld [vmem:[%s28272_s6 + $0x1274] sm:$0xf]  ;;  %v17078_v61 = vld [vmem:[%s28272_s6 + $0x13b8] sm:$0xf0] }
 0x555   :  { %11208 = vmatpush.bf16.msra.mxu3 %v16825_v6  ;;  %v18814_v1 = vld [vmem:[%s28272_s6 + $0x12f4] sm:$0xf]  ;;  %v16609_v6 = vor.u32 %v18720_v58, %v16606_v29  ;;  %v16921_v33 = vor.u32 %v18798_v50, %v16918_v46  ;;  %v17014_v58 = vld [vmem:[%s28272_s6 + $0x1338] sm:$0xf0] }
 0x556   :  { %v16985_v9 = vor.u32 %v18814_v1, %v16982_v15  ;;  %v18838_v29 = vld [vmem:[%s28272_s6 + $0x13b4] sm:$0xf]  ;;  %v16950_v46 = vld [vmem:[%s28272_s6 + $0x12b8] sm:$0xf0]  ;;  %v17017_v15 = vor.u32 %v18822_v62, %v17014_v58  ;;  %v16862_v58 = vld [vmem:[%s28272_s6 + $0x1208] sm:$0xf0] }
 0x557   :  { %11169 = vmatpush.bf16.msra.mxu0 %v16633_v51  ;;  %v18844_v51 = vld [vmem:[%s28272_s6 + $0x13e4] sm:$0xf]  ;;  %v18790_v50 = vld [vmem:[%s28272_s6 + $0x1234] sm:$0xf] }
 0x558   :  { %11182 = vmatpush.bf16.msra.mxu1 %v16697_v31  ;;  %11196 = vmatpush.bf16.msra.mxu2 %v16753_v10  ;;  %v18796_v31 = vld [vmem:[%s28272_s6 + $0x1264] sm:$0xf]  ;;  %v17105_v10 = vor.u32 %v18844_v51, %v17102_v23  ;;  %v18910_v3 = vld [vmem:[%s28272_s6 + $0x15f4] sm:$0xf] }
 0x559   :  { %11209 = vmatpush.bf16.msra.mxu3 %v16817_v59  ;;  %v18842_v59 = vld [vmem:[%s28272_s6 + $0x13d4] sm:$0xf]  ;;  %v16913_v17 = vor.u32 %v18796_v31, %v16910_v40  ;;  %v16878_v40 = vld [vmem:[%s28272_s6 + $0x1228] sm:$0xf0] }
 0x55b   :  { %11170 = vmatpush.bf16.msra.mxu0 %v16625_v4  ;;  %v16977_v4 = vor.u32 %v18812_v53, %v16974_v28  ;;  %v18804_v53 = vld [vmem:[%s28272_s6 + $0x12a4] sm:$0xf]  ;;  %v16942_v28 = vld [vmem:[%s28272_s6 + $0x12a8] sm:$0xf0] }
 0x55c   :  { %11183 = vmatpush.bf16.msra.mxu1 %v16689_v18  ;;  %11197 = vmatpush.bf16.msra.mxu2 %v16745_v24  ;;  %v16902_v18 = vld [vmem:[%s28272_s6 + $0x1258] sm:$0xf0]  ;;  %v17097_v24 = vor.u32 %v18842_v59, %v17094_v42 }
 0x55d   :  { %11210 = vmatpush.bf16.msra.mxu3 %v16809_v49  ;;  %v17086_v49 = vld [vmem:[%s28272_s6 + $0x13c8] sm:$0xf0]  ;;  %v16998_v42 = vld [vmem:[%s28272_s6 + $0x1318] sm:$0xf0] }
 0x55f   :  { %11171 = vmatpush.bf16.msra.mxu0 %v16617_v41  ;;  %v16894_v41 = vld [vmem:[%s28272_s6 + $0x1248] sm:$0xf0] }
 0x560   :  { %11184 = vmatpush.bf16.msra.mxu1 %v16681_v39  ;;  %11198 = vmatpush.bf16.msra.mxu2 %v16737_v7  ;;  %v17089_v39 = vor.u32 %v18840_v56, %v17086_v49  ;;  %v16897_v47 = vor.u32 %v18792_v45, %v16894_v41  ;;  %v18832_v56 = vld [vmem:[%s28272_s6 + $0x1384] sm:$0xf]  ;;  %v17302_v45 = vld [vmem:[%s28272_s6 + $0x1578] sm:$0xf0] }
 0x561   :  { %11211 = vmatpush.bf16.msra.mxu3 %v16801_v34  ;;  %v16886_v34 = vld [vmem:[%s28272_s6 + $0x1238] sm:$0xf0] }
 0x562   :  { %v16889_v23 = vor.u32 %v18790_v50, %v16886_v34  ;;  %v17174_v50 = vld [vmem:[%s28272_s6 + $0x1478] sm:$0xf0] }
 0x563   :  { %11172 = vmatpush.bf16.msra.mxu0 %v16609_v6  ;;  %11199 = vmatmul.bf16.vlgmr.msra.gmra.mxu2 %v25617_v26  ;;  %v18794_v26 = vld [vmem:[%s28272_s6 + $0x1254] sm:$0xf]  ;;  %v10966_v7 = vpop.f32.mrf.mxu0 }
 0x564   :  { %11243 = vmatpush.bf16.msrb.mxu2 %v17049_v38  ;;  %11185 = vmatpush.bf16.msra.mxu1 %v16673_v5  ;;  %v16905_v12 = vor.u32 %v18794_v26, %v16902_v18  ;;  %v10967_v0 = vadd.f32 %v10966_v7, %v27756_v60  ;;  %v18806_v38 = vld [vmem:[%s28272_s6 + $0x12b4] sm:$0xf]  ;;  %v10979_v1 = vpop.f32.mrf.mxu1  ;;  %v18820_v60 = vld [vmem:[%s28272_s6 + $0x1324] sm:$0xf] }
 0x565   :  { %11256 = vmatpush.bf16.msrb.mxu3 %v17113_v19  ;;  %v17081_v19 = vor.u32 %v18838_v29, %v17078_v61  ;;  %v18836_v5 = vld [vmem:[%s28272_s6 + $0x13a4] sm:$0xf]  ;;  %v16926_v61 = vld [vmem:[%s28272_s6 + $0x1288] sm:$0xf0] }
 0x566   :  { %11173 = vmatmul.bf16.vlgmr.msra.gmra.mxu0 %v28314_v37  ;;  %11212 = vmatmul.bf16.vlgmr.msra.gmra.mxu3 %v28315_v30  ;;  %v10980_v6 = vadd.f32 %v10979_v1, %v10967_v0  ;;  %v10992_v51 = vpop.f32.mrf.mxu2  ;;  %v17073_v16 = vor.u32 %v18836_v5, %v17070_v57  ;;  %v16945_v37 = vor.u32 %v18804_v53, %v16942_v28  ;;  %v18786_v30 = vld [vmem:[%s28272_s6 + $0x1214] sm:$0xf]  ;;  %v18800_v29 = vld [vmem:[%s28272_s6 + $0x1284] sm:$0xf]  ;;  %v17238_v1 = vld [vmem:[%s28272_s6 + $0x14f8] sm:$0xf0] }
 0x567   :  { %11217 = vmatpush.bf16.msrb.mxu0 %v16921_v33  ;;  %11186 = vmatmul.bf16.vlgmr.msra.gmra.mxu1 %v28316_v27  ;;  %v16953_v33 = vor.u32 %v18806_v38, %v16950_v46  ;;  %v18816_v27 = vld [vmem:[%s28272_s6 + $0x1304] sm:$0xf]  ;;  %v16873_v41 = vor.u32 %v18786_v30, %v16870_v36  ;;  %v18878_v46 = vld [vmem:[%s28272_s6 + $0x14f4] sm:$0xf]  ;;  %v17358_v57 = vld [vmem:[%s28272_s6 + $0x15e8] sm:$0xf0] }
 0x568   :  { %11230 = vmatpush.bf16.msrb.mxu1 %v16985_v9  ;;  %11244 = vmatpush.bf16.msrb.mxu2 %v17041_v11  ;;  %v18788_v9 = vld [vmem:[%s28272_s6 + $0x1224] sm:$0xf]  ;;  %v10993_v31 = vadd.f32 %v10992_v51, %v10980_v6  ;;  %v16993_v7 = vor.u32 %v18816_v27, %v16990_v44  ;;  %v17294_v6 = vld [vmem:[%s28272_s6 + $0x1568] sm:$0xf0]  ;;  %v17241_v51 = vor.u32 %v18878_v46, %v17238_v1  ;;  %v18890_v28 = vld [vmem:[%s28272_s6 + $0x1554] sm:$0xf] }
 0x569   :  { %11257 = vmatpush.bf16.msrb.mxu3 %v17105_v10  ;;  %v11005_v11 = vpop.f32.mrf.mxu3  ;;  %v17009_v10 = vor.u32 %v18820_v60, %v17006_v21  ;;  %v16881_v26 = vor.u32 %v18788_v9, %v16878_v40  ;;  %v18892_v60 = vld [vmem:[%s28272_s6 + $0x1564] sm:$0xf]  ;;  %v17230_v40 = vld [vmem:[%s28272_s6 + $0x14e8] sm:$0xf0]  ;;  %v28318_v30 = vld [vmem:[#allocation12_spill] sm:$0xff] }
 0x56a   :  { %v27952_v59 = vadd.f32 %v11005_v11, %v10993_v31  ;;  %v18908_v5 = vld [vmem:[%s28272_s6 + $0x15e4] sm:$0xf]  ;;  %v17297_v9 = vor.u32 %v18892_v60, %v17294_v6  ;;  %v17286_v11 = vld [vmem:[%s28272_s6 + $0x1558] sm:$0xf0] }
 0x56b   :  { %11218 = vmatpush.bf16.msrb.mxu0 %v16913_v17  ;;  %v18834_v17 = vld [vmem:[%s28272_s6 + $0x1394] sm:$0xf]  ;;  %v10968_v18 = vpop.f32.mrf.mxu0  ;;  %v18876_v31 = vld [vmem:[%s28272_s6 + $0x14e4] sm:$0xf]  ;;  %v17361_v53 = vor.u32 %v18908_v5, %v17358_v57  ;;  %v17134_v5 = vld [vmem:[%s28272_s6 + $0x1428] sm:$0xf0] }
 0x56c   :  { %11231 = vmatpush.bf16.msrb.mxu1 %v16977_v4  ;;  %11245 = vmatpush.bf16.msrb.mxu2 %v17033_v13  ;;  %v17062_v4 = vld [vmem:[%s28272_s6 + $0x1398] sm:$0xf0]  ;;  %v10981_v49 = vpop.f32.mrf.mxu1  ;;  %v18888_v36 = vld [vmem:[%s28272_s6 + $0x1544] sm:$0xf] }
 0x56d   :  { %11258 = vmatpush.bf16.msrb.mxu3 %v17097_v24  ;;  %v16934_v13 = vld [vmem:[%s28272_s6 + $0x1298] sm:$0xf0]  ;;  %v17001_v24 = vor.u32 %v18818_v55, %v16998_v42  ;;  %v17065_v35 = vor.u32 %v18834_v17, %v17062_v4  ;;  %v17233_v42 = vor.u32 %v18876_v31, %v17230_v40  ;;  %v18858_v17 = vld [vmem:[%s28272_s6 + $0x1454] sm:$0xf]  ;;  %v28317_v4 = vld [vmem:[#allocation18_spill] sm:$0xff] }
 0x56e   :  { %v16937_v22 = vor.u32 %v18802_v8, %v16934_v13  ;;  %v10994_v62 = vpop.f32.mrf.mxu2  ;;  %v17350_v55 = vld [vmem:[%s28272_s6 + $0x15d8] sm:$0xf0]  ;;  %v17278_v8 = vld [vmem:[%s28272_s6 + $0x1548] sm:$0xf0]  ;;  %v18856_v44 = vld [vmem:[%s28272_s6 + $0x1444] sm:$0xf] }
 0x56f   :  { %11219 = vmatpush.bf16.msrb.mxu0 %v16905_v12  ;;  %v17054_v12 = vld [vmem:[%s28272_s6 + $0x1388] sm:$0xf0]  ;;  %v17281_v49 = vor.u32 %v18888_v36, %v17278_v8  ;;  %v18882_v40 = vld [vmem:[%s28272_s6 + $0x1514] sm:$0xf] }
 0x570   :  { %11232 = vmatpush.bf16.msrb.mxu1 %v16969_v14  ;;  %11246 = vmatpush.bf16.msrb.mxu2 %v17025_v43  ;;  %v18894_v14 = vld [vmem:[%s28272_s6 + $0x1574] sm:$0xf]  ;;  %v17366_v43 = vld [vmem:[%s28272_s6 + $0x15f8] sm:$0xf0]  ;;  %v17246_v36 = vld [vmem:[%s28272_s6 + $0x1508] sm:$0xf0] }
 0x571   :  { %11259 = vmatpush.bf16.msrb.mxu3 %v17089_v39  ;;  %v18784_v39 = vld [vmem:[%s28272_s6 + $0x1204] sm:$0xf]  ;;  %v11007_v0 = vpop.f32.mrf.mxu3  ;;  %v17305_v34 = vor.u32 %v18894_v14, %v17302_v45  ;;  %v17369_v38 = vor.u32 %v18910_v3, %v17366_v43  ;;  %v17214_v14 = vld [vmem:[%s28272_s6 + $0x14c8] sm:$0xf0]  ;;  %v18902_v43 = vld [vmem:[%s28272_s6 + $0x15b4] sm:$0xf] }
 0x572   :  { %v17206_v0 = vld [vmem:[%s28272_s6 + $0x14b8] sm:$0xf0] }
 0x573   :  { %11220 = vmatpush.bf16.msrb.mxu0 %v16897_v47  ;;  %v17057_v47 = vor.u32 %v18832_v56, %v17054_v12  ;;  %v17150_v56 = vld [vmem:[%s28272_s6 + $0x1448] sm:$0xf0]  ;;  %v18872_v12 = vld [vmem:[%s28272_s6 + $0x14c4] sm:$0xf] }
 0x574   :  { %11233 = vmatpush.bf16.msrb.mxu1 %v16961_v25  ;;  %11247 = vmatpush.bf16.msrb.mxu2 %v17017_v15  ;;  %v18862_v25 = vld [vmem:[%s28272_s6 + $0x1474] sm:$0xf]  ;;  %v16865_v15 = vor.u32 %v18784_v39, %v16862_v58  ;;  %v17153_v3 = vor.u32 %v18856_v44, %v17150_v56  ;;  %v17334_v39 = vld [vmem:[%s28272_s6 + $0x15b8] sm:$0xf0]  ;;  %v17217_v58 = vor.u32 %v18872_v12, %v17214_v14  ;;  %v17118_v44 = vld [vmem:[%s28272_s6 + $0x1408] sm:$0xf0] }
 0x575   :  { %11260 = vmatpush.bf16.msrb.mxu3 %v17081_v19  ;;  %v16929_v19 = vor.u32 %v18800_v29, %v16926_v61  ;;  %v17177_v21 = vor.u32 %v18862_v25, %v17174_v50  ;;  %v18854_v29 = vld [vmem:[%s28272_s6 + $0x1434] sm:$0xf]  ;;  %v17142_v61 = vld [vmem:[%s28272_s6 + $0x1438] sm:$0xf0]  ;;  %v18864_v12 = vld [vmem:[%s28272_s6 + $0x1484] sm:$0xf] }
 0x576   :  { %v18870_v50 = vld [vmem:[%s28272_s6 + $0x14b4] sm:$0xf]  ;;  %v17145_v1 = vor.u32 %v18854_v29, %v17142_v61  ;;  %v17182_v14 = vld [vmem:[%s28272_s6 + $0x1488] sm:$0xf0] }
 0x577   :  { %11221 = vmatpush.bf16.msrb.mxu0 %v16889_v23  ;;  %v18860_v23 = vld [vmem:[%s28272_s6 + $0x1464] sm:$0xf]  ;;  %v17209_v6 = vor.u32 %v18870_v50, %v17206_v0  ;;  %v18932_v29 = vld [vmem:[%s28275_s9 + $0x70] sm:$0xff]  ;;  %v18921_v0 = vld [vmem:[%s28275_s9 + $0x18] sm:$0xff] }
 0x578   :  { %11234 = vmatpush.bf16.msrb.mxu1 %v16953_v33  ;;  %11248 = vmatpush.bf16.msrb.mxu2 %v17009_v10  ;;  %v17166_v33 = vld [vmem:[%s28272_s6 + $0x1468] sm:$0xf0] }
 0x579   :  { %11261 = vmatpush.bf16.msrb.mxu3 %v17073_v16  ;;  %v17169_v10 = vor.u32 %v18860_v23, %v17166_v33  ;;  %v18906_v16 = vld [vmem:[%s28272_s6 + $0x15d4] sm:$0xf]  ;;  %v18868_v33 = vld [vmem:[%s28272_s6 + $0x14a4] sm:$0xf]  ;;  %v18940_v61 = vld [vmem:[#allocation6 + $0x30] sm:$0xff] }
 0x57a   :  { %v17353_v18 = vor.u32 %v18906_v16, %v17350_v55  ;;  %v17318_v16 = vld [vmem:[%s28272_s6 + $0x1598] sm:$0xf0] }
 0x57b   :  { %11222 = vmatpush.bf16.msrb.mxu0 %v16881_v26  ;;  %v17289_v26 = vor.u32 %v18890_v28, %v17286_v11 }
 0x57c   :  { %11235 = vmatpush.bf16.msrb.mxu1 %v16945_v37  ;;  %11249 = vmatpush.bf16.msrb.mxu2 %v17001_v24  ;;  %v18874_v37 = vld [vmem:[%s28272_s6 + $0x14d4] sm:$0xf]  ;;  %v18904_v24 = vld [vmem:[%s28272_s6 + $0x15c4] sm:$0xf] }
 0x57d   :  { %11262 = vmatpush.bf16.msrb.mxu3 %v17065_v35  ;;  %v17342_v35 = vld [vmem:[%s28272_s6 + $0x15c8] sm:$0xf0] }
 0x57e   :  { %v17345_v45 = vor.u32 %v18904_v24, %v17342_v35  ;;  %v17310_v24 = vld [vmem:[%s28272_s6 + $0x1588] sm:$0xf0] }
 0x57f   :  { %11223 = vmatpush.bf16.msrb.mxu0 %v16873_v41  ;;  %v18886_v41 = vld [vmem:[%s28272_s6 + $0x1534] sm:$0xf] }
 0x580   :  { %11236 = vmatpush.bf16.msrb.mxu1 %v16937_v22  ;;  %11250 = vmatpush.bf16.msrb.mxu2 %v16993_v7  ;;  %v17270_v22 = vld [vmem:[%s28272_s6 + $0x1538] sm:$0xf0] }
 0x581   :  { %11263 = vmatpush.bf16.msrb.mxu3 %v17057_v47  ;;  %v17273_v25 = vor.u32 %v18886_v41, %v17270_v22  ;;  %v18925_v22 = vld [vmem:[%s28275_s9 + $0x38] sm:$0xff] }
 0x583   :  { %11224 = vmatpush.bf16.msrb.mxu0 %v16865_v15  ;;  %11251 = vmatmul.bf16.vlgmr.msrb.gmra.mxu2 %v25821_v63  ;;  %v17158_v63 = vld [vmem:[%s28272_s6 + $0x1458] sm:$0xf0]  ;;  %v11018_v62 = vpop.f32.mrf.mxu0  ;;  %v18900_v15 = vld [vmem:[%s28272_s6 + $0x15a4] sm:$0xf] }
 0x584   :  { %11295 = vmatpush.bf16.msra.mxu2 %v17305_v34  ;;  %11237 = vmatpush.bf16.msrb.mxu1 %v16929_v19  ;;  %v17161_v13 = vor.u32 %v18858_v17, %v17158_v63  ;;  %v11019_v7 = vadd.f32 %v11018_v62, %v27952_v59  ;;  %v11031_v47 = vpop.f32.mrf.mxu1  ;;  %v17337_v34 = vor.u32 %v18902_v43, %v17334_v39  ;;  %v17262_v59 = vld [vmem:[%s28272_s6 + $0x1528] sm:$0xf0]  ;;  %v17126_v17 = vld [vmem:[%s28272_s6 + $0x1418] sm:$0xf0]  ;;  %v18941_v62 = vld [vmem:[#allocation6 + $0x38] sm:$0xff] }
 0x585   :  { %11308 = vmatpush.bf16.msra.mxu3 %v17369_v38  ;;  %v18884_v38 = vld [vmem:[%s28272_s6 + $0x1524] sm:$0xf]  ;;  %v17326_v19 = vld [vmem:[%s28272_s6 + $0x15a8] sm:$0xf0]  ;;  %v17185_v39 = vor.u32 %v18864_v12, %v17182_v14 }
 0x586   :  { %11264 = vmatmul.bf16.vlgmr.msrb.gmra.mxu3 %v25837_v32  ;;  %11225 = vmatmul.bf16.vlgmr.msrb.gmra.mxu0 %v28317_v4  ;;  %v17222_v32 = vld [vmem:[%s28272_s6 + $0x14d8] sm:$0xf0]  ;;  %v11032_v46 = vadd.f32 %v11031_v47, %v11019_v7  ;;  %v11044_v60 = vpop.f32.mrf.mxu2  ;;  %v17265_v23 = vor.u32 %v18884_v38, %v17262_v59  ;;  %v17329_v31 = vor.u32 %v18900_v15, %v17326_v19  ;;  %v18923_v7 = vld [vmem:[%s28275_s9 + $0x28] sm:$0xff]  ;;  %v5877_v59 = vld [vmem:[%s28271_s5] sm:$0x3] }
 0x587   :  { %11269 = vmatpush.bf16.msra.mxu0 %v17177_v21  ;;  %11238 = vmatmul.bf16.vlgmr.msrb.gmra.mxu1 %v28318_v30  ;;  %v17225_v27 = vor.u32 %v18874_v37, %v17222_v32  ;;  %v18852_v21 = vld [vmem:[%s28272_s6 + $0x1424] sm:$0xf]  ;;  %v17190_v37 = vld [vmem:[%s28272_s6 + $0x1498] sm:$0xf0]  ;;  %v18931_v47 = vld [vmem:[%s28275_s9 + $0x68] sm:$0xff] }
 0x588   :  { %11282 = vmatpush.bf16.msra.mxu1 %v17241_v51  ;;  %11296 = vmatpush.bf16.msra.mxu2 %v17297_v9  ;;  %v11045_v57 = vadd.f32 %v11044_v60, %v11032_v46  ;;  %v17198_v9 = vld [vmem:[%s28272_s6 + $0x14a8] sm:$0xf0]  ;;  %v17137_v11 = vor.u32 %v18852_v21, %v17134_v5  ;;  %v18929_v38 = vld [vmem:[%s28275_s9 + $0x58] sm:$0xff]  ;;  %v18920_v60 = vld [vmem:[%s28275_s9 + $0x10] sm:$0xff] }
 0x589   :  { %11309 = vmatpush.bf16.msra.mxu3 %v17361_v53  ;;  %v11057_v51 = vpop.f32.mrf.mxu3  ;;  %v17254_v53 = vld [vmem:[%s28272_s6 + $0x1518] sm:$0xf0]  ;;  %v17201_v55 = vor.u32 %v18868_v33, %v17198_v9  ;;  %v18937_v15 = vld [vmem:[#allocation6 + $0x18] sm:$0xff]  ;;  %v18936_v33 = vld [vmem:[#allocation6 + $0x10] sm:$0xff] }
 0x58a   :  { %v28154_v28 = vadd.f32 %v11057_v51, %v11045_v57  ;;  %v17257_v4 = vor.u32 %v18882_v40, %v17254_v53  ;;  %v28239_v21 = vld [vmem:[#allocation4] sm:$0x3]  ;;  %v18928_v57 = vld [vmem:[%s28275_s9 + $0x50] sm:$0xff]  ;;  %v5880_v51 = vperm.slane %v5877_v59, 1  ;;  %v18919_v40 = vld [vmem:[%s28275_s9 + $0x8] sm:$0xff] }
 0x58b   :  { %11270 = vmatpush.bf16.msra.mxu0 %v17169_v10  ;;  %v18898_v10 = vld [vmem:[%s28272_s6 + $0x1594] sm:$0xf]  ;;  %v11020_v63 = vpop.f32.mrf.mxu0 }
 0x58c   :  { %11283 = vmatpush.bf16.msra.mxu1 %v17233_v42  ;;  %11297 = vmatpush.bf16.msra.mxu2 %v17289_v26  ;;  %v18850_v42 = vld [vmem:[%s28272_s6 + $0x1414] sm:$0xf]  ;;  %v11033_v32 = vpop.f32.mrf.mxu1  ;;  %v17321_v30 = vor.u32 %v18898_v10, %v17318_v16  ;;  %v28320_v16 = vld [vmem:[#allocation14_spill] sm:$0xff] }
 0x58d   :  { %11310 = vmatpush.bf16.msra.mxu3 %v17353_v18  ;;  %v18866_v26 = vld [vmem:[%s28272_s6 + $0x1494] sm:$0xf]  ;;  %v18880_v18 = vld [vmem:[%s28272_s6 + $0x1504] sm:$0xf]  ;;  %v17129_v8 = vor.u32 %v18850_v42, %v17126_v17 }
 0x58e   :  { %v17193_v35 = vor.u32 %v18866_v26, %v17190_v37  ;;  %v11046_v56 = vpop.f32.mrf.mxu2  ;;  %v28319_v53 = vld [vmem:[#allocation19_spill] sm:$0xff]  ;;  %v18935_v42 = vld [vmem:[#allocation6 + $0x8] sm:$0xff] }
 0x58f   :  { %11271 = vmatpush.bf16.msra.mxu0 %v17161_v13  ;;  %v18896_v13 = vld [vmem:[%s28272_s6 + $0x1584] sm:$0xf] }
 0x590   :  { %11284 = vmatpush.bf16.msra.mxu1 %v17225_v27  ;;  %11298 = vmatpush.bf16.msra.mxu2 %v17281_v49  ;;  %v18848_v27 = vld [vmem:[%s28272_s6 + $0x1404] sm:$0xf]  ;;  %v17249_v49 = vor.u32 %v18880_v18, %v17246_v36  ;;  %v17313_v41 = vor.u32 %v18896_v13, %v17310_v24  ;;  %v18934_v18 = vld [vmem:[#allocation6] sm:$0xff] }
 0x591   :  { %11311 = vmatpush.bf16.msra.mxu3 %v17345_v45  ;;  %v11059_v45 = vpop.f32.mrf.mxu3  ;;  %v17121_v43 = vor.u32 %v18848_v27, %v17118_v44  ;;  %v18926_v37 = vld [vmem:[%s28275_s9 + $0x40] sm:$0xff] }
 0x593   :  { %11272 = vmatpush.bf16.msra.mxu0 %v17153_v3  ;;  %v18933_v3 = vld [vmem:[%s28275_s9 + $0x78] sm:$0xff] }
 0x594   :  { %11285 = vmatpush.bf16.msra.mxu1 %v17217_v58  ;;  %11299 = vmatpush.bf16.msra.mxu2 %v17273_v25  ;;  %v18924_v58 = vld [vmem:[%s28275_s9 + $0x30] sm:$0xff] }
 0x595   :  { %11312 = vmatpush.bf16.msra.mxu3 %v17337_v34 }
 0x597   :  { %11273 = vmatpush.bf16.msra.mxu0 %v17145_v1 }
 0x598   :  { %11286 = vmatpush.bf16.msra.mxu1 %v17209_v6  ;;  %11300 = vmatpush.bf16.msra.mxu2 %v17265_v23  ;;  %v5879_v6 = vperm.slane %v5877_v59, 0 }
 0x599   :  { %11313 = vmatpush.bf16.msra.mxu3 %v17329_v31  ;;  %v11323_v31 = vperm.slane %v28239_v21, 0 }
 0x59b   :  { %11274 = vmatpush.bf16.msra.mxu0 %v17137_v11  ;;  %v18927_v11 = vld [vmem:[%s28275_s9 + $0x48] sm:$0xff]  ;;  %v11327_v63 = vadd.f32 %v11323_v31, %v26960_v2 }
 0x59c   :  { %11287 = vmatpush.bf16.msra.mxu1 %v17201_v55  ;;  %11301 = vmatpush.bf16.msra.mxu2 %v17257_v4  ;;  %v5884_v55 = vadd.f32 %v5880_v51, %v28320_v16  ;;  %v18918_v4 = vld [vmem:[%s28275_s9] sm:$0xff] }
 0x59d   :  { %11314 = vmatpush.bf16.msra.mxu3 %v17321_v30  ;;  %v11329_v36 = vmax.f32 %v11327_v63, 0.0 }
 0x59e   :  { %v5886_v30 = vmax.f32 %v5884_v55, 0.0 }
 0x59f   :  { %11275 = vmatpush.bf16.msra.mxu0 %v17129_v8  ;;  %v11365_v13 = vpack.c.bf16 %v11329_v36, %v11329_v36 }
 0x5a0   :  { %11288 = vmatpush.bf16.msra.mxu1 %v17193_v35  ;;  %11302 = vmatpush.bf16.msra.mxu2 %v17249_v49  ;;  %v11332_v2 = vpack.c.bf16 %v5886_v30, %v5886_v30 }
 0x5a1   :  { %11315 = vmatpush.bf16.msra.mxu3 %v17313_v41 }
 0x5a3   :  { %11276 = vmatpush.bf16.msra.mxu0 %v17121_v43  ;;  %11303 = vmatmul.bf16.vlgmr.msra.gmra.mxu2 %v26034_v48  ;;  %v18939_v48 = vld [vmem:[#allocation6 + $0x28] sm:$0xff]  ;;  %v11070_v25 = vpop.f32.mrf.mxu0 }
 0x5a4   :  { %11617 = vmatpush.bf16.msrb.mxu2 %v18925_v22  ;;  %11289 = vmatpush.bf16.msra.mxu1 %v17185_v39  ;;  %v11071_v50 = vadd.f32 %v11070_v25, %v28154_v28  ;;  %v11083_v34 = vpop.f32.mrf.mxu1  ;;  %v5883_v28 = vadd.f32 %v5879_v6, %v28319_v53  ;;  %v18946_v25 = vld [vmem:[#allocation6 + $0x60] sm:$0xff] }
 0x5a5   :  { %11630 = vmatpush.bf16.msrb.mxu3 %v18933_v3 }
 0x5a6   :  { %11316 = vmatmul.bf16.vlgmr.msra.gmra.mxu3 %v26039_v52  ;;  %11277 = vmatmul.bf16.vlgmr.msra.gmra.mxu0 %v26047_v20  ;;  %v18922_v52 = vld [vmem:[%s28275_s9 + $0x20] sm:$0xff]  ;;  %v11084_v46 = vadd.f32 %v11083_v34, %v11071_v50  ;;  %v11096_v1 = vpop.f32.mrf.mxu2  ;;  %v5885_v26 = vmax.f32 %v5883_v28, 0.0 }
 0x5a7   :  { %11495 = vmatpush.bf16.msrb.mxu0 %v18941_v62  ;;  %11290 = vmatmul.bf16.vlgmr.msra.gmra.mxu1 %v26055_v54  ;;  %v18930_v20 = vld [vmem:[%s28275_s9 + $0x60] sm:$0xff] }
 0x5a8   :  { %11618 = vmatpush.bf16.msrb.mxu2 %v18924_v58  ;;  %v18938_v54 = vld [vmem:[#allocation6 + $0x20] sm:$0xff]  ;;  %v11097_v19 = vadd.f32 %v11096_v1, %v11084_v46  ;;  %v11331_v8 = vpack.c.bf16 %v5885_v26, %v5885_v26  ;;  %v18943_v46 = vld [vmem:[#allocation6 + $0x48] sm:$0xff] }
 0x5a9   :  { %11631 = vmatpush.bf16.msrb.mxu3 %v18932_v29  ;;  %v11109_v5 = vpop.f32.mrf.mxu3  ;;  %v18949_v29 = vld [vmem:[#allocation6 + $0x78] sm:$0xff] }
 0x5aa   :  { %v11110_v23 = vadd.f32 %v11109_v5, %v11097_v19  ;;  %11508 = vmatpush.bf16.msrb.mxu1 %v18949_v29 }
 0x5ab   :  { %11496 = vmatpush.bf16.msrb.mxu0 %v18940_v61  ;;  %v11072_v9 = vpop.f32.mrf.mxu0 }
 0x5ac   :  { %11619 = vmatpush.bf16.msrb.mxu2 %v18923_v7  ;;  %v11085_v10 = vpop.f32.mrf.mxu1 }
 0x5ad   :  { %11632 = vmatpush.bf16.msrb.mxu3 %v18931_v47  ;;  %v18948_v47 = vld [vmem:[#allocation6 + $0x70] sm:$0xff] }
 0x5ae   :  { %v11098_v17 = vpop.f32.mrf.mxu2  ;;  %11509 = vmatpush.bf16.msrb.mxu1 %v18948_v47 }
 0x5af   :  { %11497 = vmatpush.bf16.msrb.mxu0 %v18939_v48  ;;  %v11324_v17 = vperm.slane %v28239_v21, 1 }
 0x5b0   :  { %11620 = vmatpush.bf16.msrb.mxu2 %v18922_v52  ;;  %v18947_v52 = vld [vmem:[#allocation6 + $0x68] sm:$0xff] }
 0x5b1   :  { %11633 = vmatpush.bf16.msrb.mxu3 %v18930_v20  ;;  %v11111_v32 = vpop.f32.mrf.mxu3 }
 0x5b2   :  { %11510 = vmatpush.bf16.msrb.mxu1 %v18947_v52 }
 0x5b3   :  { %11498 = vmatpush.bf16.msrb.mxu0 %v18938_v54  ;;  %v18945_v54 = vld [vmem:[#allocation6 + $0x58] sm:$0xff] }
 0x5b4   :  { %11621 = vmatpush.bf16.msrb.mxu2 %v18921_v0  ;;  %v18944_v0 = vld [vmem:[#allocation6 + $0x50] sm:$0xff] }
 0x5b5   :  { %11634 = vmatpush.bf16.msrb.mxu3 %v18929_v38 }
 0x5b6   :  { %11511 = vmatpush.bf16.msrb.mxu1 %v18946_v25 }
 0x5b7   :  { %11499 = vmatpush.bf16.msrb.mxu0 %v18937_v15 }
 0x5b8   :  { %11622 = vmatpush.bf16.msrb.mxu2 %v18920_v60  ;;  %v18942_v60 = vld [vmem:[#allocation6 + $0x40] sm:$0xff] }
 0x5b9   :  { %11635 = vmatpush.bf16.msrb.mxu3 %v18928_v57 }
 0x5ba   :  { %11512 = vmatpush.bf16.msrb.mxu1 %v18945_v54 }
 0x5bb   :  { %11500 = vmatpush.bf16.msrb.mxu0 %v18936_v33 }
 0x5bc   :  { %11623 = vmatpush.bf16.msrb.mxu2 %v18919_v40 }
 0x5bd   :  { %11636 = vmatpush.bf16.msrb.mxu3 %v18927_v11 }
 0x5be   :  { %11513 = vmatpush.bf16.msrb.mxu1 %v18944_v0 }
 0x5bf   :  { %11501 = vmatpush.bf16.msrb.mxu0 %v18935_v42 }
 0x5c0   :  { %11624 = vmatpush.bf16.msrb.mxu2 %v18918_v4 }
 0x5c1   :  { %11637 = vmatpush.bf16.msrb.mxu3 %v18926_v37 }
 0x5c2   :  { %11514 = vmatpush.bf16.msrb.mxu1 %v18943_v46 }
 0x5c3   :  { %11502 = vmatpush.bf16.msrb.mxu0 %v18934_v18  ;;  %11625 = vmatmul.bf16.vlgmr.msrb.gmra.mxu2 %v11331_v8  ;;  %v11122_v24 = vpop.f32.mrf.mxu0 }
 0x5c4   :  { %11638 = vmatmul.bf16.vlgmr.msrb.gmra.mxu3 %v11332_v2  ;;  %v11123_v35 = vadd.f32 %v11122_v24, %v11110_v23  ;;  %v11135_v27 = vpop.f32.mrf.mxu1 }
 0x5c6   :  { %11503 = vmatmul.bf16.vlgmr.msrb.gmra.mxu0 %v11365_v13  ;;  %v11136_v44 = vadd.f32 %v11135_v27, %v11123_v35  ;;  %v11148_v56 = vpop.f32.mrf.mxu2  ;;  %11515 = vmatpush.bf16.msrb.mxu1 %v18942_v60 }
 0x5c8   :  { %v11149_v49 = vadd.f32 %v11148_v56, %v11136_v44  ;;  %v11648_v44 = vlaneseq }
 0x5c9   :  { %v11161_v12 = vpop.f32.mrf.mxu3 }
 0x5ca   :  { %v11162_v14 = vadd.f32 %v11161_v12, %v11149_v49  ;;  %v11649_v12 = vand.u32 127, %v11648_v44 }
 0x5cb   :  { %v11124_v45 = vpop.f32.mrf.mxu0 }
 0x5cc   :  { %v11137_v41 = vpop.f32.mrf.mxu1  ;;  %vm11650_vm3 = vcmp.lt.s32.totalorder %v11649_v12, 3 }
 0x5ce   :  { %v11150_v22 = vpop.f32.mrf.mxu2 }
 0x5d1   :  { %v11163_v3 = vpop.f32.mrf.mxu3 }
 0x5e3   :  { %v11174_v43 = vpop.f32.mrf.mxu0 }
 0x5e4   :  { %v11187_v39 = vpop.f32.mrf.mxu1  ;;  %v11175_v38 = vadd.f32 %v11174_v43, %v11162_v14  ;;  %v18959_v14 = vld [vmem:[#allocation7] ss:$0 sm:$0xff] }
 0x5e6   :  { %v11200_v62 = vpop.f32.mrf.mxu2  ;;  %v11188_v15 = vadd.f32 %v11187_v39, %v11175_v38 }
 0x5e8   :  { %v11201_v5 = vadd.f32 %v11200_v62, %v11188_v15 }
 0x5e9   :  { %v11213_v58 = vpop.f32.mrf.mxu3 }
 0x5ea   :  { %v11214_v23 = vadd.f32 %v11213_v58, %v11201_v5 }
 0x5eb   :  { %v11176_v61 = vpop.f32.mrf.mxu0 }
 0x5ec   :  { %v11189_v7 = vpop.f32.mrf.mxu1 }
 0x5ee   :  { %v11202_v48 = vpop.f32.mrf.mxu2 }
 0x5f1   :  { %v11215_v20 = vpop.f32.mrf.mxu3 }
 0x603   :  { %v11226_v50 = vpop.f32.mrf.mxu0 }
 0x604   :  { %v11239_v34 = vpop.f32.mrf.mxu1  ;;  %v11227_v33 = vadd.f32 %v11226_v50, %v11214_v23 }
 0x606   :  { %v11252_v59 = vpop.f32.mrf.mxu2  ;;  %v11240_v9 = vadd.f32 %v11239_v34, %v11227_v33 }
 0x608   :  { %v11253_v31 = vadd.f32 %v11252_v59, %v11240_v9 }
 0x609   :  { %v11265_v1 = vpop.f32.mrf.mxu3 }
 0x60a   :  { %v11266_v40 = vadd.f32 %v11265_v1, %v11253_v31 }
 0x60b   :  { %v11228_v19 = vpop.f32.mrf.mxu0 }
 0x60c   :  { %v11241_v6 = vpop.f32.mrf.mxu1 }
 0x60e   :  { %v11254_v57 = vpop.f32.mrf.mxu2 }
 0x611   :  { %v11267_v51 = vpop.f32.mrf.mxu3 }
 0x623   :  { %v11278_v53 = vpop.f32.mrf.mxu0 }
 0x624   :  { %v11279_v28 = vadd.f32 %v11278_v53, %v11266_v40  ;;  %v11291_v11 = vpop.f32.mrf.mxu1 }
 0x626   :  { %v11292_v10 = vadd.f32 %v11291_v11, %v11279_v28  ;;  %v11304_v16 = vpop.f32.mrf.mxu2 }
 0x628   :  { %v11305_v55 = vadd.f32 %v11304_v16, %v11292_v10 }
 0x629   :  { %v11317_v42 = vpop.f32.mrf.mxu3 }
 0x62a   :  { %v11318_v63 = vadd.f32 %v11317_v42, %v11305_v55 }
 0x62b   :  { %v11280_v4 = vpop.f32.mrf.mxu0 }
 0x62c   :  { %v11328_v26 = vadd.f32 %v11324_v17, %v11318_v63  ;;  %v11293_v37 = vpop.f32.mrf.mxu1 }
 0x62e   :  { %v11330_v32 = vmax.f32 %v11328_v26, 0.0  ;;  %v11306_v30 = vpop.f32.mrf.mxu2 }
 0x630   :  { %v11366_v18 = vpack.c.bf16 %v11330_v32, %v11330_v32 }
 0x631   :  { %v11319_v36 = vpop.f32.mrf.mxu3 }
 0x632   :  { %11516 = vmatmul.bf16.vlgmr.msrb.gmra.mxu1 %v11366_v18 }
 0x643   :  { %v11504_v8 = vpop.f32.mrf.mxu0 }
 0x646   :  { %v11626_v2 = vpop.f32.mrf.mxu2 }
 0x647   :  { %v11639_v13 = vpop.f32.mrf.mxu3 }
 0x64b   :  { %v11506_v24 = vpop.f32.mrf.mxu0 }
 0x64e   :  { %v11628_v35 = vpop.f32.mrf.mxu2 }
 0x64f   :  { %v11641_v27 = vpop.f32.mrf.mxu3 }
 0x6af   :  { %v11517_v56 = vpop.f32.mrf.mxu1 }
 0x6b0   :  { %v11518_v49 = vadd.f32 %v11517_v56, %v11504_v8 }
 0x6b2   :  { %v11627_v21 = vadd.f32 %v11626_v2, %v11518_v49 }
 0x6b4   :  { %v11640_v45 = vadd.f32 %v11639_v13, %v11627_v21 }
 0x6b6   :  { %v11647_v41 = vadd.f32 %v18959_v14, %v11640_v45 }
 0x6b7   :  { %v11519_v22 = vpop.f32.mrf.mxu1 }
 0x6b8   :  { %v11651_v3 = vsel %vm11650_vm3, %v11647_v41, -inf }
 0x6b9   :  { %v11653_v43 = vsel %vm11652_vm4, %v11651_v3, -inf }
 0x6ba   :  { %11654 = vmax.xlane.f32.xlu0 %v11653_v43 }
 0x72d   :  { %v11655_v39 = vpop.xlane.xlu0 %11654 }
 0x72e   :  { %v11656_v62 = vsub.f32 %v11651_v3, %v11655_v39 }
 0x730   :  { %v11657_v58 = vmul.f32 1.442695, %v11656_v62 }
 0x732   :  { %18960 = vpow2.f32 %v11657_v58 }
 0x738   :  { %v18961_v29 = vpop.eup %18960 }
 0x739   :  { %v11659_v61 = vsel %vm11652_vm4, %v18961_v29, 0.0 }
 0x73a   :  { %11660 = vadd.xlane.f32.xlu0 %v11659_v61 }
 0x7ad   :  { %v11661_v7 = vpop.xlane.xlu0 %11660 }
 0x7ae   :  { %18962 = vrcp.f32 %v11661_v7  ;;  %v11673_v20 = vand.u32 2147483648, %v11661_v7  ;;  %v11671_v54 = vand.u32 2147483647, %v11661_v7  ;;  %vm11667_vm6 = vweird.f32 %v11661_v7 }
 0x7b0   :  { %v11674_v0 = vor.u32 1.1754944e-38, %v11673_v20  ;;  %vm11672_vm8 = vcmp.eq.f32.partialorder %v11671_v54, 8.507059e+37 }
 0x7b4   :  { %v18963_v47 = vpop.eup %18962 }
 0x7b5   :  { %v11663_v48 = vmul.f32 %v18963_v47, %v11661_v7  ;;  %vm11668_vm5 = vweird.f32 %v18963_v47 }
 0x7b6   :  { %vm11669_vm7 = vmor %vm11667_vm6, %vm11668_vm5 }
 0x7b7   :  { %v11664_v52 = vsub.f32 1.0, %v11663_v48 }
 0x7b9   :  { %v11665_v25 = vmul.f32 %v18963_v47, %v11664_v52 }
 0x7bb   :  { %v11666_v50 = vadd.f32 %v18963_v47, %v11665_v25 }
 0x7bd   :  { %v11670_v34 = vsel %vm11669_vm7, %v18963_v47, %v11666_v50 }
 0x7be   :  { %v11675_v38 = vsel %vm11672_vm8, %v11674_v0, %v11670_v34 }
 0x7bf   :  { %v11676_v59 = vmul.f32 %v18961_v29, %v11675_v38 }
 0x7c1   :  { %v11677_v46 = vsel %vm11650_vm3, %v11676_v59, %v11647_v41 }
 0x7c2   :  { %11678 = vst [vmem:[%s28278_s12] sm:$0x3] %v11677_v46 }
 0x7c3   :  { %11683 = vsyncpa [#allocation3], 1 }
 0x7c4   :  { %11684 = vsyncpa [#allocation5], 1 }
 0x7c5   :  { %11685 = vsyncpa [#allocation8], 1 }

</bundles_post_ra>
